<compile_context>
chip_gen: v5e
topology: v5e:2x2
jax: 0.10.0
libtpu: 0.0.40
codegen_flags: <defaults>
</compile_context>

<pallas_src>
import math
import numpy as np
import jax
import jax.numpy as jnp
from jax.experimental import pallas as pl
from jax.experimental.pallas import tpu as pltpu

# Hyperparameters from the PyTorch module.
D_K = D_V = 64
D_MODEL = 192
D_PAD = 256                  # d_model zero-padded to a multiple of 128 lanes
N_HEADS = 8
D_FF = 2048
N_LAYERS = 6
VOCAB_SIZE = 20              # synthetic stand-in for len(atom2num); token 0 = PAD
LN_EPS = 1e-5


# ----------------------------- Pallas kernel --------------------------------
def encoder_stack_kernel(mask_ref, x_ref,
                         wqkv_ref, wo_ref,
                         ln1g_ref, ln1b_ref, w1_ref, w2_ref,
                         ln2g_ref, ln2b_ref,
                         out_ref, attn_ref):
    """One grid step = one batch block x one encoder layer (grid = (blocks, layers))."""
    layer = pl.program_id(1)
    bb, _, seq = mask_ref.shape          # batch rows in this block, seq length
    n_rows = x_ref.shape[0]              # bb * seq

    # Activation lives in the output ref, which is VMEM-resident across the
    # (arbitrary) layer axis because its block index only depends on the batch axis.
    @pl.when(layer == 0)
    def _():
        out_ref[...] = x_ref[...]

    x = out_ref[...]                     # (N, D_PAD) f32
    xb = x.astype(jnp.bfloat16)

    # Mask distinguishing real model lanes (< D_MODEL) from zero padding.
    lane = jax.lax.broadcasted_iota(jnp.int32, (1, D_PAD), 1)
    feat_mask = (lane < D_MODEL).astype(jnp.float32)

    def layer_norm(v, g, b):
        v = v * feat_mask                # guard: padded lanes contribute exactly 0
        mu = jnp.sum(v, axis=-1, keepdims=True) * (1.0 / D_MODEL)
        d = (v - mu) * feat_mask
        var = jnp.sum(d * d, axis=-1, keepdims=True) * (1.0 / D_MODEL)
        return d * jax.lax.rsqrt(var + LN_EPS) * g + b

    # ---------------- fused QKV projection: one 1536-wide MXU matmul ----------
    # Column order of wqkv is (qkv, head, d_k); 1/sqrt(d_k) is folded into W_Q.
    qkv = jnp.dot(xb, wqkv_ref[0], preferred_element_type=jnp.float32)   # (N, 1536)
    qkv = qkv.reshape(bb, seq, 3 * N_HEADS, D_K)
    qkv = jnp.transpose(qkv, (0, 2, 1, 3))                               # (bb, 3H, S, D_K)
    q = qkv[:, :N_HEADS].reshape(bb * N_HEADS, seq, D_K).astype(jnp.bfloat16)
    k = qkv[:, N_HEADS:2 * N_HEADS].reshape(bb * N_HEADS, seq, D_K).astype(jnp.bfloat16)
    v = qkv[:, 2 * N_HEADS:].reshape(bb * N_HEADS, seq, D_K).astype(jnp.bfloat16)

    # ---------------- ScaledDotProductAttention, batched over (row, head) -----
    s = jnp.einsum('gqd,gkd->gqk', q, k,
                   preferred_element_type=jnp.float32)                   # (bb*H, S, S)
    s = s.reshape(bb, N_HEADS, seq, seq)
    pad_key = mask_ref[...].reshape(bb, 1, 1, seq)                       # 1.0 on PAD keys
    s = jnp.where(pad_key > 0.5, -1e9, s)                                # masked_fill_
    s = s - jnp.max(s, axis=-1, keepdims=True)                           # stable softmax
    e = jnp.exp(s)
    attn = e * pl.reciprocal(jnp.sum(e, axis=-1, keepdims=True), approx=True)
    attn_ref[0] = attn                                                   # one store / layer

    ctx = jnp.einsum('gqk,gkd->gqd',
                     attn.reshape(bb * N_HEADS, seq, seq).astype(jnp.bfloat16), v,
                     preferred_element_type=jnp.float32)                 # (bb*H, S, D_V)
    ctx = jnp.transpose(ctx.reshape(bb, N_HEADS, seq, D_V), (0, 2, 1, 3))
    ctx = ctx.reshape(n_rows, N_HEADS * D_V).astype(jnp.bfloat16)        # (N, 512)

    # ---------------- output projection: single 512-wide matmul ----------------
    attn_out = jnp.dot(ctx, wo_ref[0], preferred_element_type=jnp.float32)  # (N, D_PAD)
    y = layer_norm(attn_out + x, ln1g_ref[0], ln1b_ref[0])

    # ---------------- position-wise feed-forward -------------------------------
    h1 = jnp.maximum(jnp.dot(y.astype(jnp.bfloat16), w1_ref[0],
                             preferred_element_type=jnp.float32), 0.0)
    h2 = jnp.dot(h1.astype(jnp.bfloat16), w2_ref[0],
                 preferred_element_type=jnp.float32)
    out_ref[...] = layer_norm(h2 + y, ln2g_ref[0], ln2b_ref[0])


# ------------------------- wrapper / pallas_call -----------------------------
def pack_layer_params(layer_params):
    """Stack per-layer weights along a leading layer axis, fuse Q/K/V into one
    1536-wide weight (scale folded into W_Q), pad d_model 192->256, cast MXU
    weights to bf16."""
    pad_d = D_PAD - D_MODEL
    scale = 1.0 / math.sqrt(D_K)
    wqkv_s, wo_s = [], []
    g1s, b1s, w1s, w2s, g2s, b2s = [], [], [], [], [], []
    for (wq, wk, wv, wo, g1, b1, w1, w2, g2, b2) in layer_params:
        wqkv = jnp.concatenate([wq * scale, wk, wv], axis=1)      # (D_MODEL, 3*H*D_K)
        wqkv_s.append(jnp.pad(wqkv, ((0, pad_d), (0, 0))))        # (D_PAD, 1536)
        wo_s.append(jnp.pad(wo, ((0, 0), (0, pad_d))))            # (H*D_V, D_PAD)
        w1s.append(jnp.pad(w1, ((0, pad_d), (0, 0))))             # (D_PAD, D_FF)
        w2s.append(jnp.pad(w2, ((0, 0), (0, pad_d))))             # (D_FF, D_PAD)
        g1s.append(jnp.pad(g1, (0, pad_d))[None, :])
        b1s.append(jnp.pad(b1, (0, pad_d))[None, :])
        g2s.append(jnp.pad(g2, (0, pad_d))[None, :])
        b2s.append(jnp.pad(b2, (0, pad_d))[None, :])
    bf = lambda xs: jnp.stack(xs).astype(jnp.bfloat16)
    f32 = lambda xs: jnp.stack(xs).astype(jnp.float32)
    return (bf(wqkv_s), bf(wo_s),
            f32(g1s), f32(b1s), bf(w1s), bf(w2s), f32(g2s), f32(b2s))


def encoder_forward_pallas(enc_inputs, emb, pos_table, packed, *, batch_block=None):
    B, S = enc_inputs.shape
    bb = B if batch_block is None else batch_block
    assert B % bb == 0 and (bb * S) % 8 == 0
    nb = B // bb
    N = bb * S

    # Host-side glue: embedding gather + positional encoding (no clean Pallas gather here).
    x = emb[enc_inputs] + pos_table[:S, :]                        # (B, S, 192) f32
    # TODO(synk): nn.Dropout(p=0.1) is identity in eval mode; omitted here.
    x = jnp.pad(x, ((0, 0), (0, 0), (0, D_PAD - D_MODEL)))
    x2 = x.reshape(B * S, D_PAD).astype(jnp.float32)
    # PAD-key indicator (1.0 on padded tokens) replaces the dense (B, S, S) mask.
    key_pad = (enc_inputs == 0).astype(jnp.float32)[:, None, :]   # (B, 1, S)

    wqkv, wo, g1, b1, w1, w2, g2, b2 = packed

    out2, attn = pl.pallas_call(
        encoder_stack_kernel,
        out_shape=(jax.ShapeDtypeStruct((B * S, D_PAD), jnp.float32),
                   jax.ShapeDtypeStruct((N_LAYERS, B, N_HEADS, S, S), jnp.float32)),
        grid=(nb, N_LAYERS),
        in_specs=[
            pl.BlockSpec((bb, 1, S), lambda i, l: (i, 0, 0)),                 # pad-key mask
            pl.BlockSpec((N, D_PAD), lambda i, l: (i, 0)),                    # x rows
            pl.BlockSpec((1, D_PAD, 3 * N_HEADS * D_K), lambda i, l: (l, 0, 0)),  # wqkv
            pl.BlockSpec((1, N_HEADS * D_V, D_PAD), lambda i, l: (l, 0, 0)),      # wo
            pl.BlockSpec((1, 1, D_PAD), lambda i, l: (l, 0, 0)),              # ln1 gamma
            pl.BlockSpec((1, 1, D_PAD), lambda i, l: (l, 0, 0)),              # ln1 beta
            pl.BlockSpec((1, D_PAD, D_FF), lambda i, l: (l, 0, 0)),           # w1
            pl.BlockSpec((1, D_FF, D_PAD), lambda i, l: (l, 0, 0)),           # w2
            pl.BlockSpec((1, 1, D_PAD), lambda i, l: (l, 0, 0)),              # ln2 gamma
            pl.BlockSpec((1, 1, D_PAD), lambda i, l: (l, 0, 0)),              # ln2 beta
        ],
        out_specs=(
            pl.BlockSpec((N, D_PAD), lambda i, l: (i, 0)),                    # resident over layers
            pl.BlockSpec((1, bb, N_HEADS, S, S), lambda i, l: (l, i, 0, 0, 0)),
        ),
        compiler_params=pltpu.CompilerParams(
            dimension_semantics=("parallel", "arbitrary"),
            vmem_limit_bytes=32 * 1024 * 1024),
    )(key_pad, x2, wqkv, wo, g1, b1, w1, w2, g2, b2)

    out = out2.reshape(B, S, D_PAD)[:, :, :D_MODEL]
    attns = [attn[l] for l in range(N_LAYERS)]
    return out, attns


# ------------------------------ glue / reference -----------------------------
def positional_table(max_len, d_model):
    pos_table = np.array(
        [[pos / np.power(10000, 2 * i / d_model) for i in range(d_model)]
         if pos != 0 else np.zeros(d_model) for pos in range(max_len)])
    pos_table[1:, 0::2] = np.sin(pos_table[1:, 0::2])
    pos_table[1:, 1::2] = np.cos(pos_table[1:, 1::2])
    return jnp.asarray(pos_table, dtype=jnp.float32)


def _layer_norm_ref(x, gamma, beta):
    mu = jnp.mean(x, axis=-1, keepdims=True)
    var = jnp.mean((x - mu) ** 2, axis=-1, keepdims=True)
    return (x - mu) * jax.lax.rsqrt(var + LN_EPS) * gamma + beta


def ref_encoder(enc_inputs, emb, pos_table, layer_params):
    """Pure-JAX f32 reference mirroring the PyTorch forward (eval mode)."""
    B, S = enc_inputs.shape
    x = emb[enc_inputs] + pos_table[:S, :]
    mask = jnp.broadcast_to((enc_inputs == 0)[:, None, :], (B, S, S))
    attns = []
    for (wq, wk, wv, wo, g1, b1, w1, w2, g2, b2) in layer_params:
        q = (x @ wq).reshape(B, S, N_HEADS, D_K).transpose(0, 2, 1, 3)
        k = (x @ wk).reshape(B, S, N_HEADS, D_K).transpose(0, 2, 1, 3)
        v = (x @ wv).reshape(B, S, N_HEADS, D_V).transpose(0, 2, 1, 3)
        s = jnp.einsum('bhqd,bhkd->bhqk', q, k) / np.sqrt(D_K)
        s = jnp.where(mask[:, None, :, :], -1e9, s)
        a = jax.nn.softmax(s, axis=-1)
        ctx = jnp.einsum('bhqk,bhkd->bhqd', a, v)
        ctx = ctx.transpose(0, 2, 1, 3).reshape(B, S, N_HEADS * D_V)
        y = _layer_norm_ref(ctx @ wo + x, g1, b1)
        x = _layer_norm_ref(jnp.maximum(y @ w1, 0.0) @ w2 + y, g2, b2)
        attns.append(a)
    return x, attns


def init_params(key):
    keys = jax.random.split(key, 1 + N_LAYERS)
    emb = jax.random.normal(keys[0], (VOCAB_SIZE, D_MODEL), jnp.float32)
    layer_params = []
    for l in range(N_LAYERS):
        ks = jax.random.split(keys[1 + l], 6)
        wq = 0.05 * jax.random.normal(ks[0], (D_MODEL, N_HEADS * D_K), jnp.float32)
        wk = 0.05 * jax.random.normal(ks[1], (D_MODEL, N_HEADS * D_K), jnp.float32)
        wv = 0.05 * jax.random.normal(ks[2], (D_MODEL, N_HEADS * D_V), jnp.float32)
        wo = 0.05 * jax.random.normal(ks[3], (N_HEADS * D_V, D_MODEL), jnp.float32)
        g1 = jnp.ones((D_MODEL,), jnp.float32)
        b1 = jnp.zeros((D_MODEL,), jnp.float32)
        w1 = 0.05 * jax.random.normal(ks[4], (D_MODEL, D_FF), jnp.float32)
        w2 = 0.05 * jax.random.normal(ks[5], (D_FF, D_MODEL), jnp.float32)
        g2 = jnp.ones((D_MODEL,), jnp.float32)
        b2 = jnp.zeros((D_MODEL,), jnp.float32)
        layer_params.append((wq, wk, wv, wo, g1, b1, w1, w2, g2, b2))
    return emb, layer_params


if __name__ == "__main__":
    B, S = 2, 8
    key = jax.random.PRNGKey(0)
    k_tok, k_par = jax.random.split(key)

    tokens = jax.random.randint(k_tok, (B, S), 1, VOCAB_SIZE, dtype=jnp.int32)
    tokens = tokens.at[:, -2:].set(0)            # pad positions to exercise the mask

    emb, layer_params = init_params(k_par)
    pos_table = positional_table(64, D_MODEL)
    packed = pack_layer_params(layer_params)

    out, attns = encoder_forward_pallas(tokens, emb, pos_table, packed)
    out = jax.block_until_ready(out)
    attns = [jax.block_until_ready(a) for a in attns]

    ref_out, ref_attns = ref_encoder(tokens, emb, pos_table, layer_params)
    np.testing.assert_allclose(np.asarray(out), np.asarray(ref_out),
                               rtol=5e-2, atol=5e-2)
    for a, ra in zip(attns, ref_attns):
        np.testing.assert_allclose(np.asarray(a), np.asarray(ra),
                                   rtol=5e-2, atol=2e-2)

    print("KERNEL_OK")
</pallas_src>

<mosaic_0001>
module attributes {stable_mosaic.version = 11 : i64} {
  func.func @encoder_stack_kernel(%arg0: i32, %arg1: i32, %arg2: memref<2x1x8xf32, #tpu.memory_space<vmem>>, %arg3: memref<16x256xf32, #tpu.memory_space<vmem>>, %arg4: memref<1x256x1536xbf16, #tpu.memory_space<vmem>>, %arg5: memref<1x512x256xbf16, #tpu.memory_space<vmem>>, %arg6: memref<1x1x256xf32, #tpu.memory_space<vmem>>, %arg7: memref<1x1x256xf32, #tpu.memory_space<vmem>>, %arg8: memref<1x256x2048xbf16, #tpu.memory_space<vmem>>, %arg9: memref<1x2048x256xbf16, #tpu.memory_space<vmem>>, %arg10: memref<1x1x256xf32, #tpu.memory_space<vmem>>, %arg11: memref<1x1x256xf32, #tpu.memory_space<vmem>>, %arg12: memref<16x256xf32, #tpu.memory_space<vmem>>, %arg13: memref<1x2x8x8x8xf32, #tpu.memory_space<vmem>>) attributes {dimension_semantics = [#tpu.dimension_semantics<parallel>, #tpu.dimension_semantics<arbitrary>], iteration_bounds = array<i64: 1, 6>, scalar_prefetch = 0 : i64, scratch_operands = 0 : i64, tpu.core_type = #tpu.core_type<tc>, window_params = [{transform_indices = @transform_0, window_bounds = array<i64: 2, 1, 8>}, {transform_indices = @transform_1, window_bounds = array<i64: 16, 256>}, {transform_indices = @transform_2, window_bounds = array<i64: 1, 256, 1536>}, {transform_indices = @transform_3, window_bounds = array<i64: 1, 512, 256>}, {transform_indices = @transform_4, window_bounds = array<i64: 1, 1, 256>}, {transform_indices = @transform_5, window_bounds = array<i64: 1, 1, 256>}, {transform_indices = @transform_6, window_bounds = array<i64: 1, 256, 2048>}, {transform_indices = @transform_7, window_bounds = array<i64: 1, 2048, 256>}, {transform_indices = @transform_8, window_bounds = array<i64: 1, 1, 256>}, {transform_indices = @transform_9, window_bounds = array<i64: 1, 1, 256>}, {transform_indices = @transform_10, window_bounds = array<i64: 16, 256>}, {transform_indices = @transform_11, window_bounds = array<i64: 1, 2, 8, 8, 8>}]} {
    %c0_i32 = arith.constant 0 : i32
    %0 = arith.cmpi eq, %arg1, %c0_i32 : i32
    %1 = arith.extui %0 : i1 to i32
    %c0_i32_0 = arith.constant 0 : i32
    %2 = arith.cmpi ne, %1, %c0_i32_0 : i32
    scf.if %2 {
      %c0_56 = arith.constant 0 : index
      %c0_57 = arith.constant 0 : index
      %126 = vector.load %arg3[%c0_56, %c0_57] : memref<16x256xf32, #tpu.memory_space<vmem>>, vector<16x256xf32>
      %c0_58 = arith.constant 0 : index
      %c0_59 = arith.constant 0 : index
      %127 = vector.load %arg12[%c0_58, %c0_59] : memref<16x256xf32, #tpu.memory_space<vmem>>, vector<16x256xf32>
      tpu.vector_store %arg12[%c0_58, %c0_59], %126 {strides = array<i32>} : memref<16x256xf32, #tpu.memory_space<vmem>>, vector<16x256xf32>,
    } else {
    }
    %c0 = arith.constant 0 : index
    %c0_1 = arith.constant 0 : index
    %3 = vector.load %arg12[%c0, %c0_1] : memref<16x256xf32, #tpu.memory_space<vmem>>, vector<16x256xf32>
    %4 = arith.truncf %3 : vector<16x256xf32> to vector<16x256xbf16>
    %5 = tpu.iota {dimensions = array<i32: 1>} : vector<1x256xi32>
    %c192_i32 = arith.constant 192 : i32
    %6 = vector.broadcast %c192_i32 : i32 to vector<1x256xi32>
    %7 = arith.cmpi slt, %5, %6 : vector<1x256xi32>
    %8 = arith.extui %7 : vector<1x256xi1> to vector<1x256xi32>
    %9 = arith.sitofp %8 : vector<1x256xi32> to vector<1x256xf32>
    %c0_2 = arith.constant 0 : index
    %c0_3 = arith.constant 0 : index
    %c0_4 = arith.constant 0 : index
    %10 = vector.load %arg4[%c0_2, %c0_3, %c0_4] : memref<1x256x1536xbf16, #tpu.memory_space<vmem>>, vector<1x256x1536xbf16>
    %11 = vector.shape_cast %10 : vector<1x256x1536xbf16> to vector<256x1536xbf16>
    %cst = arith.constant dense<0.000000e+00> : vector<16x1536xf32>
    %12 = tpu.matmul %4, %11, %cst {dimension_numbers = #tpu.dot_dimension_numbers<[1], [0], [0], [1], [0, 0, 1, 1], [], []>} : vector<16x256xbf16>, vector<256x1536xbf16>, vector<16x1536xf32> -> vector<16x1536xf32>
    %13 = vector.shape_cast %12 : vector<16x1536xf32> to vector<2x8x24x64xf32>
    %14 = tpu.transpose %13, [0, 2, 1, 3] : vector<2x8x24x64xf32> -> vector<2x24x8x64xf32>
    %15 = vector.extract_strided_slice %14 {offsets = [0, 0, 0, 0], sizes = [2, 8, 8, 64], strides = [1, 1, 1, 1]} : vector<2x24x8x64xf32> to vector<2x8x8x64xf32>
    %16 = vector.shape_cast %15 : vector<2x8x8x64xf32> to vector<16x8x64xf32>
    %17 = arith.truncf %16 : vector<16x8x64xf32> to vector<16x8x64xbf16>
    %18 = vector.extract_strided_slice %14 {offsets = [0, 8, 0, 0], sizes = [2, 8, 8, 64], strides = [1, 1, 1, 1]} : vector<2x24x8x64xf32> to vector<2x8x8x64xf32>
    %19 = vector.shape_cast %18 : vector<2x8x8x64xf32> to vector<16x8x64xf32>
    %20 = arith.truncf %19 : vector<16x8x64xf32> to vector<16x8x64xbf16>
    %21 = vector.extract_strided_slice %14 {offsets = [0, 16, 0, 0], sizes = [2, 8, 8, 64], strides = [1, 1, 1, 1]} : vector<2x24x8x64xf32> to vector<2x8x8x64xf32>
    %22 = vector.shape_cast %21 : vector<2x8x8x64xf32> to vector<16x8x64xf32>
    %23 = arith.truncf %22 : vector<16x8x64xf32> to vector<16x8x64xbf16>
    "tpu.trace_start"() <{level = 10 : i32, message = "gqd,gkd->gqk"}> : () -> ()
    %cst_5 = arith.constant dense<0.000000e+00> : vector<16x8x8xf32>
    %24 = tpu.matmul %17, %20, %cst_5 {dimension_numbers = #tpu.dot_dimension_numbers<[2], [2], [1], [1], [0, 0, 0, 1, 1, 1], [0], [0]>} : vector<16x8x64xbf16>, vector<16x8x64xbf16>, vector<16x8x8xf32> -> vector<16x8x8xf32>
    "tpu.trace_stop"() : () -> ()
    %25 = vector.shape_cast %24 : vector<16x8x8xf32> to vector<2x8x8x8xf32>
    %c0_6 = arith.constant 0 : index
    %c0_7 = arith.constant 0 : index
    %c0_8 = arith.constant 0 : index
    %26 = vector.load %arg2[%c0_6, %c0_7, %c0_8] : memref<2x1x8xf32, #tpu.memory_space<vmem>>, vector<2x1x8xf32>
    %27 = vector.shape_cast %26 : vector<2x1x8xf32> to vector<2x1x1x8xf32>
    %cst_9 = arith.constant 5.000000e-01 : f32
    %28 = vector.broadcast %cst_9 : f32 to vector<2x1x1x8xf32>
    %29 = arith.cmpf ogt, %27, %28 : vector<2x1x1x8xf32>
    %cst_10 = arith.constant -1.000000e+09 : f32
    %30 = vector.shape_cast %29 : vector<2x1x1x8xi1> to vector<2x1x1x8xi1>
    %31 = vector.broadcast %30 : vector<2x1x1x8xi1> to vector<2x8x8x8xi1>
    %32 = vector.broadcast %cst_10 : f32 to vector<2x8x8x8xf32>
    %33 = arith.select %31, %32, %25 : vector<2x8x8x8xi1>, vector<2x8x8x8xf32>
    %cst_11 = arith.constant dense<0xFF800000> : vector<2x8x8xf32>
    %34 = vector.multi_reduction <maximumf>, %33, %cst_11 [3] : vector<2x8x8x8xf32> to vector<2x8x8xf32>
    %35 = vector.shape_cast %34 : vector<2x8x8xf32> to vector<2x8x8x1xf32>
    %36 = vector.broadcast %35 : vector<2x8x8x1xf32> to vector<2x8x8x8xf32>
    %37 = arith.subf %33, %36 : vector<2x8x8x8xf32>
    %38 = math.exp %37 : vector<2x8x8x8xf32>
    %cst_12 = arith.constant dense<0.000000e+00> : vector<2x8x8xf32>
    %39 = vector.multi_reduction <add>, %38, %cst_12 [3] : vector<2x8x8x8xf32> to vector<2x8x8xf32>
    %40 = vector.shape_cast %39 : vector<2x8x8xf32> to vector<2x8x8x1xf32>
    %41 = tpu.reciprocal %40 {approx = true} : vector<2x8x8x1xf32> -> vector<2x8x8x1xf32>
    %42 = vector.broadcast %41 : vector<2x8x8x1xf32> to vector<2x8x8x8xf32>
    %43 = arith.mulf %38, %42 : vector<2x8x8x8xf32>
    %c0_13 = arith.constant 0 : index
    %c0_14 = arith.constant 0 : index
    %c0_15 = arith.constant 0 : index
    %c0_16 = arith.constant 0 : index
    %c0_17 = arith.constant 0 : index
    %44 = vector.load %arg13[%c0_13, %c0_14, %c0_15, %c0_16, %c0_17] : memref<1x2x8x8x8xf32, #tpu.memory_space<vmem>>, vector<1x2x8x8x8xf32>
    %45 = vector.shape_cast %44 : vector<1x2x8x8x8xf32> to vector<2x8x8x8xf32>
    %46 = vector.shape_cast %43 : vector<2x8x8x8xf32> to vector<1x2x8x8x8xf32>
    tpu.vector_store %arg13[%c0_13, %c0_14, %c0_15, %c0_16, %c0_17], %46 {strides = array<i32>} : memref<1x2x8x8x8xf32, #tpu.memory_space<vmem>>, vector<1x2x8x8x8xf32>,
    %47 = vector.shape_cast %43 : vector<2x8x8x8xf32> to vector<16x8x8xf32>
    %48 = arith.truncf %47 : vector<16x8x8xf32> to vector<16x8x8xbf16>
    "tpu.trace_start"() <{level = 10 : i32, message = "gqk,gkd->gqd"}> : () -> ()
    %cst_18 = arith.constant dense<0.000000e+00> : vector<16x8x64xf32>
    %49 = tpu.matmul %48, %23, %cst_18 {dimension_numbers = #tpu.dot_dimension_numbers<[2], [1], [1], [2], [0, 0, 0, 1, 1, 2], [0], [0]>} : vector<16x8x8xbf16>, vector<16x8x64xbf16>, vector<16x8x64xf32> -> vector<16x8x64xf32>
    "tpu.trace_stop"() : () -> ()
    %50 = vector.shape_cast %49 : vector<16x8x64xf32> to vector<2x8x8x64xf32>
    %51 = tpu.transpose %50, [0, 2, 1, 3] : vector<2x8x8x64xf32> -> vector<2x8x8x64xf32>
    %52 = vector.shape_cast %51 : vector<2x8x8x64xf32> to vector<16x512xf32>
    %53 = arith.truncf %52 : vector<16x512xf32> to vector<16x512xbf16>
    %c0_19 = arith.constant 0 : index
    %c0_20 = arith.constant 0 : index
    %c0_21 = arith.constant 0 : index
    %54 = vector.load %arg5[%c0_19, %c0_20, %c0_21] : memref<1x512x256xbf16, #tpu.memory_space<vmem>>, vector<1x512x256xbf16>
    %55 = vector.shape_cast %54 : vector<1x512x256xbf16> to vector<512x256xbf16>
    %cst_22 = arith.constant dense<0.000000e+00> : vector<16x256xf32>
    %56 = tpu.matmul %53, %55, %cst_22 {dimension_numbers = #tpu.dot_dimension_numbers<[1], [0], [0], [1], [0, 0, 1, 1], [], []>} : vector<16x512xbf16>, vector<512x256xbf16>, vector<16x256xf32> -> vector<16x256xf32>
    %57 = arith.addf %56, %3 : vector<16x256xf32>
    %c0_23 = arith.constant 0 : index
    %c0_24 = arith.constant 0 : index
    %c0_25 = arith.constant 0 : index
    %58 = vector.load %arg6[%c0_23, %c0_24, %c0_25] : memref<1x1x256xf32, #tpu.memory_space<vmem>>, vector<1x1x256xf32>
    %59 = vector.shape_cast %58 : vector<1x1x256xf32> to vector<1x256xf32>
    %c0_26 = arith.constant 0 : index
    %c0_27 = arith.constant 0 : index
    %c0_28 = arith.constant 0 : index
    %60 = vector.load %arg7[%c0_26, %c0_27, %c0_28] : memref<1x1x256xf32, #tpu.memory_space<vmem>>, vector<1x1x256xf32>
    %61 = vector.shape_cast %60 : vector<1x1x256xf32> to vector<1x256xf32>
    %62 = vector.broadcast %9 : vector<1x256xf32> to vector<16x256xf32>
    %63 = arith.mulf %57, %62 : vector<16x256xf32>
    %cst_29 = arith.constant dense<0.000000e+00> : vector<16xf32>
    %64 = vector.multi_reduction <add>, %63, %cst_29 [1] : vector<16x256xf32> to vector<16xf32>
    %65 = vector.shape_cast %64 : vector<16xf32> to vector<16x1xf32>
    %cst_30 = arith.constant 0.00520833349 : f32
    %66 = vector.broadcast %cst_30 : f32 to vector<16x1xf32>
    %67 = arith.mulf %65, %66 : vector<16x1xf32>
    %68 = vector.broadcast %67 : vector<16x1xf32> to vector<16x256xf32>
    %69 = arith.subf %63, %68 : vector<16x256xf32>
    %70 = vector.broadcast %9 : vector<1x256xf32> to vector<16x256xf32>
    %71 = arith.mulf %69, %70 : vector<16x256xf32>
    %72 = arith.mulf %71, %71 : vector<16x256xf32>
    %cst_31 = arith.constant dense<0.000000e+00> : vector<16xf32>
    %73 = vector.multi_reduction <add>, %72, %cst_31 [1] : vector<16x256xf32> to vector<16xf32>
    %74 = vector.shape_cast %73 : vector<16xf32> to vector<16x1xf32>
    %cst_32 = arith.constant 0.00520833349 : f32
    %75 = vector.broadcast %cst_32 : f32 to vector<16x1xf32>
    %76 = arith.mulf %74, %75 : vector<16x1xf32>
    %cst_33 = arith.constant 9.99999974E-6 : f32
    %77 = vector.broadcast %cst_33 : f32 to vector<16x1xf32>
    %78 = arith.addf %76, %77 : vector<16x1xf32>
    %79 = math.rsqrt %78 : vector<16x1xf32>
    %80 = vector.broadcast %79 : vector<16x1xf32> to vector<16x256xf32>
    %81 = arith.mulf %71, %80 : vector<16x256xf32>
    %82 = vector.broadcast %59 : vector<1x256xf32> to vector<16x256xf32>
    %83 = arith.mulf %81, %82 : vector<16x256xf32>
    %84 = vector.broadcast %61 : vector<1x256xf32> to vector<16x256xf32>
    %85 = arith.addf %83, %84 : vector<16x256xf32>
    %86 = arith.truncf %85 : vector<16x256xf32> to vector<16x256xbf16>
    %c0_34 = arith.constant 0 : index
    %c0_35 = arith.constant 0 : index
    %c0_36 = arith.constant 0 : index
    %87 = vector.load %arg8[%c0_34, %c0_35, %c0_36] : memref<1x256x2048xbf16, #tpu.memory_space<vmem>>, vector<1x256x2048xbf16>
    %88 = vector.shape_cast %87 : vector<1x256x2048xbf16> to vector<256x2048xbf16>
    %cst_37 = arith.constant dense<0.000000e+00> : vector<16x2048xf32>
    %89 = tpu.matmul %86, %88, %cst_37 {dimension_numbers = #tpu.dot_dimension_numbers<[1], [0], [0], [1], [0, 0, 1, 1], [], []>} : vector<16x256xbf16>, vector<256x2048xbf16>, vector<16x2048xf32> -> vector<16x2048xf32>
    %cst_38 = arith.constant 0.000000e+00 : f32
    %90 = vector.broadcast %cst_38 : f32 to vector<16x2048xf32>
    %91 = arith.maximumf %89, %90 : vector<16x2048xf32>
    %92 = arith.truncf %91 : vector<16x2048xf32> to vector<16x2048xbf16>
    %c0_39 = arith.constant 0 : index
    %c0_40 = arith.constant 0 : index
    %c0_41 = arith.constant 0 : index
    %93 = vector.load %arg9[%c0_39, %c0_40, %c0_41] : memref<1x2048x256xbf16, #tpu.memory_space<vmem>>, vector<1x2048x256xbf16>
    %94 = vector.shape_cast %93 : vector<1x2048x256xbf16> to vector<2048x256xbf16>
    %cst_42 = arith.constant dense<0.000000e+00> : vector<16x256xf32>
    %95 = tpu.matmul %92, %94, %cst_42 {dimension_numbers = #tpu.dot_dimension_numbers<[1], [0], [0], [1], [0, 0, 1, 1], [], []>} : vector<16x2048xbf16>, vector<2048x256xbf16>, vector<16x256xf32> -> vector<16x256xf32>
    %96 = arith.addf %95, %85 : vector<16x256xf32>
    %c0_43 = arith.constant 0 : index
    %c0_44 = arith.constant 0 : index
    %c0_45 = arith.constant 0 : index
    %97 = vector.load %arg10[%c0_43, %c0_44, %c0_45] : memref<1x1x256xf32, #tpu.memory_space<vmem>>, vector<1x1x256xf32>
    %98 = vector.shape_cast %97 : vector<1x1x256xf32> to vector<1x256xf32>
    %c0_46 = arith.constant 0 : index
    %c0_47 = arith.constant 0 : index
    %c0_48 = arith.constant 0 : index
    %99 = vector.load %arg11[%c0_46, %c0_47, %c0_48] : memref<1x1x256xf32, #tpu.memory_space<vmem>>, vector<1x1x256xf32>
    %100 = vector.shape_cast %99 : vector<1x1x256xf32> to vector<1x256xf32>
    %101 = vector.broadcast %9 : vector<1x256xf32> to vector<16x256xf32>
    %102 = arith.mulf %96, %101 : vector<16x256xf32>
    %cst_49 = arith.constant dense<0.000000e+00> : vector<16xf32>
    %103 = vector.multi_reduction <add>, %102, %cst_49 [1] : vector<16x256xf32> to vector<16xf32>
    %104 = vector.shape_cast %103 : vector<16xf32> to vector<16x1xf32>
    %cst_50 = arith.constant 0.00520833349 : f32
    %105 = vector.broadcast %cst_50 : f32 to vector<16x1xf32>
    %106 = arith.mulf %104, %105 : vector<16x1xf32>
    %107 = vector.broadcast %106 : vector<16x1xf32> to vector<16x256xf32>
    %108 = arith.subf %102, %107 : vector<16x256xf32>
    %109 = vector.broadcast %9 : vector<1x256xf32> to vector<16x256xf32>
    %110 = arith.mulf %108, %109 : vector<16x256xf32>
    %111 = arith.mulf %110, %110 : vector<16x256xf32>
    %cst_51 = arith.constant dense<0.000000e+00> : vector<16xf32>
    %112 = vector.multi_reduction <add>, %111, %cst_51 [1] : vector<16x256xf32> to vector<16xf32>
    %113 = vector.shape_cast %112 : vector<16xf32> to vector<16x1xf32>
    %cst_52 = arith.constant 0.00520833349 : f32
    %114 = vector.broadcast %cst_52 : f32 to vector<16x1xf32>
    %115 = arith.mulf %113, %114 : vector<16x1xf32>
    %cst_53 = arith.constant 9.99999974E-6 : f32
    %116 = vector.broadcast %cst_53 : f32 to vector<16x1xf32>
    %117 = arith.addf %115, %116 : vector<16x1xf32>
    %118 = math.rsqrt %117 : vector<16x1xf32>
    %119 = vector.broadcast %118 : vector<16x1xf32> to vector<16x256xf32>
    %120 = arith.mulf %110, %119 : vector<16x256xf32>
    %121 = vector.broadcast %98 : vector<1x256xf32> to vector<16x256xf32>
    %122 = arith.mulf %120, %121 : vector<16x256xf32>
    %123 = vector.broadcast %100 : vector<1x256xf32> to vector<16x256xf32>
    %124 = arith.addf %122, %123 : vector<16x256xf32>
    %c0_54 = arith.constant 0 : index
    %c0_55 = arith.constant 0 : index
    %125 = vector.load %arg12[%c0_54, %c0_55] : memref<16x256xf32, #tpu.memory_space<vmem>>, vector<16x256xf32>
    tpu.vector_store %arg12[%c0_54, %c0_55], %124 {strides = array<i32>} : memref<16x256xf32, #tpu.memory_space<vmem>>, vector<16x256xf32>,
    return
  }
  func.func @transform_0(%arg0: i32, %arg1: i32) -> (i32, i32, i32) {
    %c0_i32 = arith.constant 0 : i32
    %c0_i32_0 = arith.constant 0 : i32
    %c0_i32_1 = arith.constant 0 : i32
    return %arg0, %c0_i32, %c0_i32_0 : i32, i32, i32
  }
  func.func @transform_1(%arg0: i32, %arg1: i32) -> (i32, i32) {
    %c0_i32 = arith.constant 0 : i32
    %c0_i32_0 = arith.constant 0 : i32
    return %arg0, %c0_i32 : i32, i32
  }
  func.func @transform_2(%arg0: i32, %arg1: i32) -> (i32, i32, i32) {
    %c0_i32 = arith.constant 0 : i32
    %c0_i32_0 = arith.constant 0 : i32
    %c0_i32_1 = arith.constant 0 : i32
    return %arg1, %c0_i32, %c0_i32_0 : i32, i32, i32
  }
  func.func @transform_3(%arg0: i32, %arg1: i32) -> (i32, i32, i32) {
    %c0_i32 = arith.constant 0 : i32
    %c0_i32_0 = arith.constant 0 : i32
    %c0_i32_1 = arith.constant 0 : i32
    return %arg1, %c0_i32, %c0_i32_0 : i32, i32, i32
  }
  func.func @transform_4(%arg0: i32, %arg1: i32) -> (i32, i32, i32) {
    %c0_i32 = arith.constant 0 : i32
    %c0_i32_0 = arith.constant 0 : i32
    %c0_i32_1 = arith.constant 0 : i32
    return %arg1, %c0_i32, %c0_i32_0 : i32, i32, i32
  }
  func.func @transform_5(%arg0: i32, %arg1: i32) -> (i32, i32, i32) {
    %c0_i32 = arith.constant 0 : i32
    %c0_i32_0 = arith.constant 0 : i32
    %c0_i32_1 = arith.constant 0 : i32
    return %arg1, %c0_i32, %c0_i32_0 : i32, i32, i32
  }
  func.func @transform_6(%arg0: i32, %arg1: i32) -> (i32, i32, i32) {
    %c0_i32 = arith.constant 0 : i32
    %c0_i32_0 = arith.constant 0 : i32
    %c0_i32_1 = arith.constant 0 : i32
    return %arg1, %c0_i32, %c0_i32_0 : i32, i32, i32
  }
  func.func @transform_7(%arg0: i32, %arg1: i32) -> (i32, i32, i32) {
    %c0_i32 = arith.constant 0 : i32
    %c0_i32_0 = arith.constant 0 : i32
    %c0_i32_1 = arith.constant 0 : i32
    return %arg1, %c0_i32, %c0_i32_0 : i32, i32, i32
  }
  func.func @transform_8(%arg0: i32, %arg1: i32) -> (i32, i32, i32) {
    %c0_i32 = arith.constant 0 : i32
    %c0_i32_0 = arith.constant 0 : i32
    %c0_i32_1 = arith.constant 0 : i32
    return %arg1, %c0_i32, %c0_i32_0 : i32, i32, i32
  }
  func.func @transform_9(%arg0: i32, %arg1: i32) -> (i32, i32, i32) {
    %c0_i32 = arith.constant 0 : i32
    %c0_i32_0 = arith.constant 0 : i32
    %c0_i32_1 = arith.constant 0 : i32
    return %arg1, %c0_i32, %c0_i32_0 : i32, i32, i32
  }
  func.func @transform_10(%arg0: i32, %arg1: i32) -> (i32, i32) {
    %c0_i32 = arith.constant 0 : i32
    %c0_i32_0 = arith.constant 0 : i32
    return %arg0, %c0_i32 : i32, i32
  }
  func.func @transform_11(%arg0: i32, %arg1: i32) -> (i32, i32, i32, i32, i32) {
    %c0_i32 = arith.constant 0 : i32
    %c0_i32_0 = arith.constant 0 : i32
    %c0_i32_1 = arith.constant 0 : i32
    %c0_i32_2 = arith.constant 0 : i32
    return %arg1, %arg0, %c0_i32, %c0_i32_0, %c0_i32_1 : i32, i32, i32, i32, i32
  }
}

</mosaic_0001>

<bundles_post_ra>
// kernel: tpu_custom_call.1
= control target key start
LH: loop header
LB: loop body
LE: loop exit
PB: predicated region body
PF: predicated region fallthrough
CT: control target
= control target key end

     0   :  { %s18588_s0 = inlined_call_operand.hbm [shape: f32[2,1,8], index: 0, kind: input, shape index: {}]   ;;  %s18589_s1 = inlined_call_operand.hbm [shape: f32[16,256], index: 1, kind: input, shape index: {}]   ;;  %s18590_s2 = inlined_call_operand.hbm [shape: bf16[6,256,1536], index: 2, kind: input, shape index: {}]   ;;  %s18591_s3 = inlined_call_operand.hbm [shape: bf16[6,512,256], index: 3, kind: input, shape index: {}]   ;;  %s18592_s4 = inlined_call_operand.hbm [shape: f32[6,1,256], index: 4, kind: input, shape index: {}]   ;;  %s18593_s5 = inlined_call_operand.hbm [shape: f32[6,1,256], index: 5, kind: input, shape index: {}]   ;;  %s18594_s6 = inlined_call_operand.hbm [shape: bf16[6,256,2048], index: 6, kind: input, shape index: {}]   ;;  %s18595_s7 = inlined_call_operand.hbm [shape: bf16[6,2048,256], index: 7, kind: input, shape index: {}]   ;;  %s18596_s8 = inlined_call_operand.hbm [shape: f32[6,1,256], index: 8, kind: input, shape index: {}]   ;;  %s18597_s9 = inlined_call_operand.hbm [shape: f32[6,1,256], index: 9, kind: input, shape index: {}]   ;;  %s18598_s10 = inlined_call_operand.hbm [shape: f32[16,256], index: 10, kind: output, shape index: {0}]   ;;  %s18599_s11 = inlined_call_operand.hbm [shape: f32[6,2,8,8,8], index: 11, kind: output, shape index: {1}]  }
   0x1   :  { %18613 = sst [smem:[#allocation31_spill]] %s18588_s0 }
   0x2   :  { %18614 = sst [smem:[#allocation32_spill]] %s18590_s2 }
   0x3   :  { %18615 = sst [smem:[#allocation33_spill]] %s18591_s3 }
   0x4   :  { %18616 = sst [smem:[#allocation34_spill]] %s18592_s4 }
   0x5   :  { %18617 = sst [smem:[#allocation35_spill]] %s18593_s5 }
   0x6   :  { %18618 = sst [smem:[#allocation36_spill]] %s18598_s10 }
   0x7   :  { %18619 = sst [smem:[#allocation37_spill]] %s18599_s11 }
   0x8   :  { %17 = vsyncpa [#allocation3], 0 }
   0x9   :  { %18 = vsyncpa [#allocation6], 0 }
   0xa   :  { %19 = vsyncpa [#allocation4], 0 }
   0xb   :  { %20 = vsyncpa [#allocation17], 0 }
   0xc   :  { %22 = vsyncpa [#allocation17 + $0x1], 0  ;;  %s14780_s17 = smov 0   ;;  %s14782_s18 = smov 0  }
   0xd   :  { %s14784_s19 = smov 0   ;;  %s14786_s20 = smov 0  }
   0xe   :  { %s14788_s21 = smov 0   ;;  %s14790_s22 = smov 0  }
   0xf LB: > { %18620 = sst [smem:[#allocation23_spill]] %s14677_s17  ;;  %s14811_s23 = sadd.s32 4294967295, %s14697_s22   ;;  %s14697_s22 = sphi %s14790_s22, %s28_s22   ;;  %s14693_s21 = sphi %s14788_s21, %s18671_s21   ;;  %s14689_s20 = sphi %s14786_s20, %s18670_s20   ;;  %s14685_s19 = sphi %s14784_s19, %s18669_s19   ;;  %s14681_s18 = sphi %s14782_s18, %s18668_s18   ;;  %s14677_s17 = sphi %s14780_s17, %s18667_s17  }
  0x10   : > { %18621 = sst [smem:[#allocation24_spill]] %s14689_s20  ;;  %s10054_s24 = sadd.s32 4294967294, %s14697_s22  }
  0x11   : > { %18622 = sst [smem:[#allocation25_spill]] %s14697_s22  ;;  %p106_p0 = scmp.ne.s32.totalorder %s14685_s19, %s14681_s18 }
  0x12   : > { %p107_p1 = scmp.eq.s32.totalorder %s14697_s22, 0  ;;  %p112_p2 = scmp.ne.s32.totalorder %s14681_s18, %s14677_s17 }
  0x13   : > { %p113_p3 = scmp.eq.s32.totalorder %s14811_s23, 0  ;;  %p346_p4 = scmp.eq.s32.totalorder %s14811_s23, 5 }
  0x14   : > { %p14822_p5 = por %p107_p1, %p106_p0  ;;  %p352_p6 = scmp.eq.s32.totalorder %s10054_s24, 5 }
  0x15   : > { %p14828_p7 = por %p113_p3, %p112_p2  ;;  %p14834_p8 = por %p346_p4, %p106_p0 }
  0x16   : > { %p14838_p9 = por %p352_p6, %p112_p2  ;;  %p10055_p10 = scmp.ge.s32.totalorder %s14697_s22, 1 }
  0x17   : > { %s18624_s27 = scalar_select %p14828_p7, 1, 0 }
  0x18   : > { %s18626_s28 = scalar_select %p14834_p8, 1, 0 }
  0x19   : > { %18625 = sst [smem:[#allocation26_spill]] %s18624_s27  ;;  %p359_p11 = scmp.lt.s32.totalorder %s14697_s22, 7 }
  0x1a   : > { %18627 = sst [smem:[#allocation27_spill]] %s18626_s28  ;;  %s14699_s15 = smov [#allocation2]  }
  0x1b   : > { %s18628_s29 = scalar_select %p14838_p9, 1, 0 }
  0x1c   : > { %s18630_s0 = sld [smem:[#allocation31_spill]]  ;;  %p14847_p12 = pnand %p10055_p10, %p359_p11 }
  0x1d   : > { %18629 = sst [smem:[#allocation28_spill]] %s18628_s29  ;;  %s374_s16 = sshll.u32 %s14699_s15, 4  ;;  %s375_s16 = int_to_ptr.vmem [resolvable:$true] %s374_s16 }
  0x1e   : > { %p14006_p13 = pneg %p14847_p12  ;;  %p14044_p1 = scmp.lt.s32.totalorder %s14697_s22, 6 }
  0x1f   : > { %s406_s30 = sand.u32 1, %s14697_s22   ;;  %s18607_s25 = smov 16  }
  0x20   : > { %p14855_p0 = pnand %p14006_p13, %p113_p3  ;;  %p14863_p2 = pnand %p14044_p1, %p14822_p5 }
  0x21   : > { %s14701_s15 = smov 1   ;;  %s14873_s29 = sand.u32 1, %s14685_s19  }
  0x22   : > { %s372_s13 = sshll.u32 %s18630_s0, 4  ;;  %s37_s0 = sadd.s32 1, %s14693_s21  ;;  %s373_s13 = int_to_ptr.hbm [resolvable:$true] %s372_s13 }
  0x23   : > { %14009 = dma.hbm_to_vmem [thread:$0]  (!%p14855_p0), %s373_s13, 32, %s375_s16, [#allocation3], %s18607_s25, %s18607_s25, %s14701_s15  }
  0x24   : > { %p38_p6 = scmp.ge.s32.totalorder %s37_s0, 6  ;;  %s13973_s17 = smul.u32 1536, %s14873_s29 }
  0x25   : > { %s13974_s26 = smul.u32 1536, %s14693_s21  ;;  %s18635_s2 = sld [smem:[#allocation32_spill]] }
  0x26   : > { %s18673_s0 = smov (%p38_p6, %s37_s0), 0  ;;  %s410_s10 = scalar_lea.vmem [#allocation7], %s13973_s17 }
  0x27   : > { %18634 = sst [smem:[#allocation29_spill]] %s18673_s0  ;;  %s96_s22 = ssub.s32 %s14693_s21, %s18673_s0 }
  0x28   : > { %s418_s11 = sshll.u32 %s410_s10, 4  ;;  %p97_p5 = scmp.eq.s32.totalorder %s96_s22, 0  ;;  %s419_s11 = int_to_ptr.vmem [resolvable:$true] %s418_s11 }
  0x29   : > { %s18636_s15 = sadd.s32 1, %s14685_s19  ;;  %s14889_s27 = scalar_lea.sflag [#allocation3], %s406_s30 }
  0x2a   : > { %s14887_s25 = scalar_select %p97_p5, %s14685_s19, %s18636_s15  }
  0x2b   : > { %s415_s13 = scalar_lea.hbm %s18635_s2, %s13974_s26  ;;  %s14702_s17 = smov 768  }
  0x2c   : > { %s416_s16 = sshll.u32 %s415_s13, 4  ;;  %18637 = sst [smem:[#allocation30_spill]] %s14887_s25  ;;  %s417_s16 = int_to_ptr.hbm [resolvable:$true] %s416_s16 }
  0x2d   : > { %s14703_s10 = smov 48   ;;  %s10060_s22 = sshll.u32 %s14873_s29, 9 }
  0x2e   : > { %14016 = dma.hbm_to_vmem [thread:$0]  (!%p14863_p2), %s417_s16, 24576, %s419_s11, %s14889_s27, %s14702_s17, %s14702_s17, %s14703_s10  }
  0x2f   : > { %s13201_s20 = sshll.u32 %s14693_s21, 9  ;;  %s18638_s3 = sld [smem:[#allocation33_spill]] }
  0x30   : > { %s432_s2 = scalar_lea.vmem [#allocation8], %s10060_s22  ;;  %s18611_s30 = smov 128  }
  0x31   : > { %s440_s0 = sshll.u32 %s432_s2, 4  ;;  %s18612_s25 = smov 8   ;;  %s441_s0 = int_to_ptr.vmem [resolvable:$true] %s440_s0 }
  0x32   : > { %s14906_s11 = sshll.u32 %s14873_s29, 1  ;;  %s14909_s16 = sshll.u32 %s14693_s21, 1 }
  0x33   : > { %s18639_s4 = sld [smem:[#allocation34_spill]]  ;;  %s10067_s2 = sshll.u32 %s14873_s29, 11 }
  0x34   : > { %s18640_s5 = sld [smem:[#allocation35_spill]]  ;;  %s13202_s17 = sshll.u32 %s14693_s21, 11 }
  0x35   : > { %s437_s13 = scalar_lea.hbm %s18638_s3, %s13201_s20  ;;  %s454_s20 = scalar_lea.vmem [#allocation9], %s14906_s11 }
  0x36   : > { %s438_s15 = sshll.u32 %s437_s13, 4  ;;  %s462_s28 = sshll.u32 %s454_s20, 4  ;;  %s439_s15 = int_to_ptr.hbm [resolvable:$true] %s438_s15  ;;  %s463_s28 = int_to_ptr.vmem [resolvable:$true] %s462_s28 }
  0x37   : > { %14019 = dma.hbm_to_vmem [thread:$0]  (!%p14863_p2), %s439_s15, 8192, %s441_s0, %s14889_s27, %s18611_s30, %s18611_s30, %s18612_s25  }
  0x38   : > { %s473_s30 = scalar_lea.vmem [#allocation10], %s14906_s11  ;;  %s492_s0 = scalar_lea.vmem [#allocation11], %s10067_s2 }
  0x39   : > { %s458_s10 = scalar_lea.hbm %s18639_s4, %s14909_s16  ;;  %s481_s25 = sshll.u32 %s473_s30, 4  ;;  %s482_s25 = int_to_ptr.vmem [resolvable:$true] %s481_s25 }
  0x3a   : > { %s460_s22 = sshll.u32 %s458_s10, 4  ;;  %s477_s13 = scalar_lea.hbm %s18640_s5, %s14909_s16  ;;  %s461_s22 = int_to_ptr.hbm [resolvable:$true] %s460_s22 }
  0x3b   : > { %14022 = dma.hbm_to_vmem [thread:$0]  (!%p14863_p2), %s461_s22, 32, %s463_s28, %s14889_s27  }
  0x3c   : > { %s479_s15 = sshll.u32 %s477_s13, 4  ;;  %s497_s22 = scalar_lea.hbm %s18594_s6, %s13202_s17  ;;  %s480_s15 = int_to_ptr.hbm [resolvable:$true] %s479_s15 }
  0x3d   : > { %14025 = dma.hbm_to_vmem [thread:$0]  (!%p14863_p2), %s480_s15, 32, %s482_s25, %s14889_s27  }
  0x3e   : > { %s498_s28 = sshll.u32 %s497_s22, 4  ;;  %s500_s26 = sshll.u32 %s492_s0, 4  ;;  %s499_s28 = int_to_ptr.hbm [resolvable:$true] %s498_s28  ;;  %s501_s26 = int_to_ptr.vmem [resolvable:$true] %s500_s26 }
  0x3f   : > { %s14706_s30 = smov 1024   ;;  %s14707_s13 = smov 64  }
  0x40   : > { %14028 = dma.hbm_to_vmem [thread:$0]  (!%p14863_p2), %s499_s28, 32768, %s501_s26, %s14889_s27, %s14706_s30, %s14706_s30, %s14707_s13  }
  0x41   : > { %s519_s15 = scalar_lea.hbm %s18595_s7, %s13202_s17  ;;  %s514_s20 = scalar_lea.vmem [#allocation12], %s10067_s2 }
  0x42   : > { %s520_s10 = sshll.u32 %s519_s15, 4  ;;  %s522_s3 = sshll.u32 %s514_s20, 4  ;;  %s521_s10 = int_to_ptr.hbm [resolvable:$true] %s520_s10  ;;  %s523_s3 = int_to_ptr.vmem [resolvable:$true] %s522_s3 }
  0x43   : > { %s18641_s22 = smov 8   ;;  %s18642_s0 = smov 128  }
  0x44   : > { %14031 = dma.hbm_to_vmem [thread:$0]  (!%p14863_p2), %s521_s10, 32768, %s523_s3, %s14889_s27, %s18642_s0, %s18642_s0, %s18641_s22  }
  0x45   : > { %s540_s28 = scalar_lea.hbm %s18596_s8, %s14909_s16  ;;  %s536_s30 = scalar_lea.vmem [#allocation13], %s14906_s11 }
  0x46   : > { %s542_s26 = sshll.u32 %s540_s28, 4  ;;  %s544_s17 = sshll.u32 %s536_s30, 4  ;;  %s543_s26 = int_to_ptr.hbm [resolvable:$true] %s542_s26  ;;  %s545_s17 = int_to_ptr.vmem [resolvable:$true] %s544_s17 }
  0x47   : > { %14034 = dma.hbm_to_vmem [thread:$0]  (!%p14863_p2), %s543_s26, 32, %s545_s17, %s14889_s27  }
  0x48   : > { %s390_s25 = sshll.u32 %s18589_s1, 4  ;;  %s14708_s3 = smov [#allocation5]   ;;  %s391_s25 = int_to_ptr.hbm [resolvable:$true] %s390_s25 }
  0x49   : > { %s392_s29 = sshll.u32 %s14708_s3, 4  ;;  %s14709_s4 = smov 256   ;;  %s393_s29 = int_to_ptr.vmem [resolvable:$true] %s392_s29 }
  0x4a   : > { %s18643_s5 = smov 16   ;;  %s559_s20 = scalar_lea.hbm %s18597_s9, %s14909_s16 }
  0x4b   : > { %14012 = dma.hbm_to_vmem [thread:$0]  (!%p14855_p0), %s391_s25, 512, %s393_s29, [#allocation6], %s14709_s4, %s14709_s4, %s18643_s5  }
  0x4c   : > { %s561_s22 = sshll.u32 %s559_s20, 4  ;;  %s555_s0 = scalar_lea.vmem [#allocation14], %s14906_s11  ;;  %s562_s22 = int_to_ptr.hbm [resolvable:$true] %s561_s22 }
  0x4d   : > { %s563_s28 = sshll.u32 %s555_s0, 4  ;;  %572 = sbr.rel (%p14847_p12) target bundleno = 2633 (0xa49), region = 60  ;;  %s564_s28 = int_to_ptr.vmem [resolvable:$true] %s563_s28 }
  0x4e   : > { %14037 = dma.hbm_to_vmem [thread:$0]  (!%p14863_p2), %s562_s22, 32, %s564_s28, %s14889_s27  }
  0x52   : > { %14656 = dma.done.wait (%p113_p3), [#allocation3], 32  }
  0x53   : > { %14658 = vsyncadd (%p113_p3), [#allocation3], 4294967264 }
  0x54   : > { %14660 = dma.done.wait (%p113_p3), [#allocation6], 512  }
  0x55   : > { %14662 = vsyncadd (%p113_p3), [#allocation6], 4294966784  ;;  %s584_s12 = sand.u32 1, %s14811_s23   ;;  %s14978_s27 = sand.u32 1, %s14681_s18  }
  0x56   : > { %s13975_s14 = smul.u32 1536, %s14978_s27  ;;  %s585_s11 = scalar_lea.sflag [#allocation3], %s584_s12 }
  0x58   : > { %s14981_s16 = scalar_lea.vmem [#allocation7], %s13975_s14 }
  0x59   : > { %14664 = dma.done.wait (%p14828_p7), %s585_s11, 98432  }
  0x5a   : > { %14666 = vsyncadd (%p14828_p7), %s585_s11, 4294868864  ;;  %s10080_s26 = sshll.u32 %s14978_s27, 9  ;;  %s14989_s30 = sshll.u32 %s14978_s27, 1 }
  0x5b   : > { %s10083_s17 = sshll.u32 %s14978_s27, 11  ;;  %s10087_s2 = sshll.u32 %s14978_s27, 7 }
  0x5c   : > { %s14993_s13 = scalar_lea.vmem [#allocation8], %s10080_s26  ;;  %s608_s25 = scalar_lea.vmem [#allocation9], %s14989_s30 }
  0x5d   : > { %s618_s3 = scalar_lea.vmem [#allocation10], %s14989_s30  ;;  %s14997_s29 = scalar_lea.vmem [#allocation11], %s10083_s17 }
  0x5e   : > { %s14999_s4 = scalar_lea.vmem [#allocation12], %s10083_s17  ;;  %s648_s5 = scalar_lea.vmem [#allocation13], %s14989_s30 }
  0x5f   : > { %s658_s15 = scalar_lea.vmem [#allocation14], %s14989_s30  ;;  %s15003_s10 = scalar_lea.vmem [#allocation16], %s10087_s2 }
  0x60   : > { %s18645_s20 = sld [smem:[#allocation24_spill]] }
  0x66   : > { %p10088_p3 = scmp.ne.s32.totalorder %s18645_s20, 0 }
  0x68   : > { %741 = sbr.rel (%p10088_p3) target bundleno = 114 (0x72), region = 104 }
  0x6d   : > { %v742_v0 = vld [vmem:[#allocation5] sm:$0xff]  ;;  %v743_v1 = vld [vmem:[#allocation5 + $0x8] sm:$0xff]  ;;  %v744_v2 = vld [vmem:[#allocation5 + $0x10] sm:$0xff] }
  0x6e   : > { %746 = vst [vmem:[#allocation15] sm:$0xff] %v742_v0  ;;  %v745_v3 = vld [vmem:[#allocation5 + $0x18] sm:$0xff] }
  0x6f   : > { %747 = vst [vmem:[#allocation15 + $0x8] sm:$0xff] %v743_v1 }
  0x70   : > { %748 = vst [vmem:[#allocation15 + $0x10] sm:$0xff] %v744_v2 }
  0x71   : > { %749 = vst [vmem:[#allocation15 + $0x18] sm:$0xff] %v745_v3 }
  0x72 PF: > { %v10428_v4 = vld [vmem:[%s14981_s16 + $0x2a0] sm:$0xf]  ;;  %v13294_v5 = vld [vmem:[%s14981_s16 + $0x2cc] sm:$0xf0]  ;;  %v13288_v9 = vld [vmem:[%s14981_s16 + $0x2a4] sm:$0xf] }
  0x73   : > { %v10812_v6 = vld [vmem:[%s14981_s16 + $0x5a0] sm:$0xf]  ;;  %v10429_v7 = vor.u32 %v13294_v5, %v10428_v4  ;;  %v13390_v8 = vld [vmem:[%s14981_s16 + $0x5cc] sm:$0xf0]  ;;  %v10430_v10 = vld [vmem:[%s14981_s16 + $0x2d0] sm:$0xf0] }
  0x74   : > { %v10813_v11 = vor.u32 %v13390_v8, %v10812_v6  ;;  %v10433_v12 = vor.u32 %v13288_v9, %v10430_v10  ;;  %v13384_v13 = vld [vmem:[%s14981_s16 + $0x5a4] sm:$0xf]  ;;  %v10814_v14 = vld [vmem:[%s14981_s16 + $0x5d0] sm:$0xf0]  ;;  %v10380_v15 = vld [vmem:[%s14981_s16 + $0x240] sm:$0xf] }
  0x75   : > { %1917 = vmatpush.bf16.msra.mxu0 %v10429_v7  ;;  %v10817_v16 = vor.u32 %v13384_v13, %v10814_v14  ;;  %v13282_v17 = vld [vmem:[%s14981_s16 + $0x26c] sm:$0xf0]  ;;  %v10764_v18 = vld [vmem:[%s14981_s16 + $0x540] sm:$0xf]  ;;  %v13276_v22 = vld [vmem:[%s14981_s16 + $0x244] sm:$0xf] }
  0x76   : > { %v13378_v19 = vld [vmem:[%s14981_s16 + $0x56c] sm:$0xf0]  ;;  %1931 = vmatpush.bf16.msra.mxu1 %v10813_v11  ;;  %1945 = vmatpush.bf16.msra.mxu2 %v10433_v12  ;;  %v10381_v20 = vor.u32 %v13282_v17, %v10380_v15  ;;  %v10382_v23 = vld [vmem:[%s14981_s16 + $0x270] sm:$0xf0]  ;;  %v13372_v24 = vld [vmem:[%s14981_s16 + $0x544] sm:$0xf] }
  0x77   : > { %v10765_v21 = vor.u32 %v13378_v19, %v10764_v18  ;;  %1959 = vmatpush.bf16.msra.mxu3 %v10817_v16  ;;  %v10385_v25 = vor.u32 %v13276_v22, %v10382_v23  ;;  %v10766_v26 = vld [vmem:[%s14981_s16 + $0x570] sm:$0xf0]  ;;  %v10332_v27 = vld [vmem:[%s14981_s16 + $0x1e0] sm:$0xf]  ;;  %v13270_v28 = vld [vmem:[%s14981_s16 + $0x20c] sm:$0xf0] }
  0x78   : > { %v10769_v29 = vor.u32 %v13372_v24, %v10766_v26  ;;  %v10716_v30 = vld [vmem:[%s14981_s16 + $0x4e0] sm:$0xf]  ;;  %v13366_v31 = vld [vmem:[%s14981_s16 + $0x50c] sm:$0xf0]  ;;  %v13264_v32 = vld [vmem:[%s14981_s16 + $0x1e4] sm:$0xf]  ;;  %v10333_v33 = vor.u32 %v13270_v28, %v10332_v27 }
  0x79   : > { %1918 = vmatpush.bf16.msra.mxu0 %v10381_v20  ;;  %v10334_v34 = vld [vmem:[%s14981_s16 + $0x210] sm:$0xf0]  ;;  %v13360_v35 = vld [vmem:[%s14981_s16 + $0x4e4] sm:$0xf]  ;;  %v10717_v37 = vor.u32 %v13366_v31, %v10716_v30  ;;  %v10284_v39 = vld [vmem:[%s14981_s16 + $0x180] sm:$0xf] }
  0x7a   : > { %v10718_v36 = vld [vmem:[%s14981_s16 + $0x510] sm:$0xf0]  ;;  %1932 = vmatpush.bf16.msra.mxu1 %v10765_v21  ;;  %1946 = vmatpush.bf16.msra.mxu2 %v10385_v25  ;;  %v10337_v38 = vor.u32 %v13264_v32, %v10334_v34  ;;  %v13258_v40 = vld [vmem:[%s14981_s16 + $0x1ac] sm:$0xf0]  ;;  %v10668_v41 = vld [vmem:[%s14981_s16 + $0x480] sm:$0xf] }
  0x7b   : > { %1960 = vmatpush.bf16.msra.mxu3 %v10769_v29  ;;  %v10721_v42 = vor.u32 %v13360_v35, %v10718_v36  ;;  %v13354_v43 = vld [vmem:[%s14981_s16 + $0x4ac] sm:$0xf0]  ;;  %v13252_v44 = vld [vmem:[%s14981_s16 + $0x184] sm:$0xf]  ;;  %v10286_v45 = vld [vmem:[%s14981_s16 + $0x1b0] sm:$0xf0]  ;;  %v10285_v48 = vor.u32 %v13258_v40, %v10284_v39 }
  0x7c   : > { %v13348_v46 = vld [vmem:[%s14981_s16 + $0x484] sm:$0xf]  ;;  %v10670_v47 = vld [vmem:[%s14981_s16 + $0x4b0] sm:$0xf0]  ;;  %v10669_v49 = vor.u32 %v13354_v43, %v10668_v41  ;;  %v10289_v50 = vor.u32 %v13252_v44, %v10286_v45  ;;  %v10236_v51 = vld [vmem:[%s14981_s16 + $0x120] sm:$0xf] }
  0x7d   : > { %1919 = vmatpush.bf16.msra.mxu0 %v10333_v33  ;;  %v13246_v52 = vld [vmem:[%s14981_s16 + $0x14c] sm:$0xf0]  ;;  %v10620_v53 = vld [vmem:[%s14981_s16 + $0x420] sm:$0xf]  ;;  %v10673_v54 = vor.u32 %v13348_v46, %v10670_v47  ;;  %v13240_v56 = vld [vmem:[%s14981_s16 + $0x124] sm:$0xf] }
  0x7e   : > { %1933 = vmatpush.bf16.msra.mxu1 %v10717_v37  ;;  %1947 = vmatpush.bf16.msra.mxu2 %v10337_v38  ;;  %v13342_v55 = vld [vmem:[%s14981_s16 + $0x44c] sm:$0xf0]  ;;  %v10238_v57 = vld [vmem:[%s14981_s16 + $0x150] sm:$0xf0]  ;;  %v13336_v58 = vld [vmem:[%s14981_s16 + $0x424] sm:$0xf]  ;;  %v10237_v60 = vor.u32 %v13246_v52, %v10236_v51 }
  0x7f   : > { %1961 = vmatpush.bf16.msra.mxu3 %v10721_v42  ;;  %v10622_v59 = vld [vmem:[%s14981_s16 + $0x450] sm:$0xf0]  ;;  %v10621_v61 = vor.u32 %v13342_v55, %v10620_v53  ;;  %v10241_v62 = vor.u32 %v13240_v56, %v10238_v57  ;;  %v10188_v63 = vld [vmem:[%s14981_s16 + $0xc0] sm:$0xf]  ;;  %v13234_v0 = vld [vmem:[%s14981_s16 + $0xec] sm:$0xf0] }
  0x80   : > { %v10572_v1 = vld [vmem:[%s14981_s16 + $0x3c0] sm:$0xf]  ;;  %v10625_v2 = vor.u32 %v13336_v58, %v10622_v59  ;;  %v13330_v3 = vld [vmem:[%s14981_s16 + $0x3ec] sm:$0xf0]  ;;  %v13228_v4 = vld [vmem:[%s14981_s16 + $0xc4] sm:$0xf]  ;;  %v10189_v8 = vor.u32 %v13234_v0, %v10188_v63 }
  0x81   : > { %1920 = vmatpush.bf16.msra.mxu0 %v10285_v48  ;;  %v10190_v5 = vld [vmem:[%s14981_s16 + $0xf0] sm:$0xf0]  ;;  %v13324_v6 = vld [vmem:[%s14981_s16 + $0x3c4] sm:$0xf]  ;;  %v10573_v9 = vor.u32 %v13330_v3, %v10572_v1  ;;  %v10140_v11 = vld [vmem:[%s14981_s16 + $0x60] sm:$0xf] }
  0x82   : > { %1934 = vmatpush.bf16.msra.mxu1 %v10669_v49  ;;  %1948 = vmatpush.bf16.msra.mxu2 %v10289_v50  ;;  %v10574_v7 = vld [vmem:[%s14981_s16 + $0x3f0] sm:$0xf0]  ;;  %v10193_v10 = vor.u32 %v13228_v4, %v10190_v5  ;;  %v13222_v12 = vld [vmem:[%s14981_s16 + $0x8c] sm:$0xf0]  ;;  %v10524_v13 = vld [vmem:[%s14981_s16 + $0x360] sm:$0xf] }
  0x83   : > { %1962 = vmatpush.bf16.msra.mxu3 %v10673_v54  ;;  %v10577_v14 = vor.u32 %v13324_v6, %v10574_v7  ;;  %v13318_v15 = vld [vmem:[%s14981_s16 + $0x38c] sm:$0xf0]  ;;  %v13216_v16 = vld [vmem:[%s14981_s16 + $0x64] sm:$0xf]  ;;  %v10142_v17 = vld [vmem:[%s14981_s16 + $0x90] sm:$0xf0]  ;;  %v10141_v20 = vor.u32 %v13222_v12, %v10140_v11 }
  0x84   : > { %v13312_v18 = vld [vmem:[%s14981_s16 + $0x364] sm:$0xf]  ;;  %v10526_v19 = vld [vmem:[%s14981_s16 + $0x390] sm:$0xf0]  ;;  %v10092_v21 = vld [vmem:[%s14981_s16] sm:$0xf]  ;;  %v10525_v23 = vor.u32 %v13318_v15, %v10524_v13  ;;  %v10145_v24 = vor.u32 %v13216_v16, %v10142_v17 }
  0x85   : > { %1921 = vmatpush.bf16.msra.mxu0 %v10237_v60  ;;  %v13210_v22 = vld [vmem:[%s14981_s16 + $0x2c] sm:$0xf0]  ;;  %v10476_v25 = vld [vmem:[%s14981_s16 + $0x300] sm:$0xf]  ;;  %v13204_v27 = vld [vmem:[%s14981_s16 + $0x4] sm:$0xf]  ;;  %v10529_v28 = vor.u32 %v13312_v18, %v10526_v19 }
  0x86   : > { %1935 = vmatpush.bf16.msra.mxu1 %v10621_v61  ;;  %1949 = vmatpush.bf16.msra.mxu2 %v10241_v62  ;;  %v13306_v26 = vld [vmem:[%s14981_s16 + $0x32c] sm:$0xf0]  ;;  %v10094_v29 = vld [vmem:[%s14981_s16 + $0x30] sm:$0xf0]  ;;  %v13300_v30 = vld [vmem:[%s14981_s16 + $0x304] sm:$0xf]  ;;  %v10093_v35 = vor.u32 %v13210_v22, %v10092_v21 }
  0x87   : > { %1963 = vmatpush.bf16.msra.mxu3 %v10625_v2  ;;  %v10478_v31 = vld [vmem:[%s14981_s16 + $0x330] sm:$0xf0]  ;;  %v10436_v32 = vld [vmem:[%s14981_s16 + $0x2a8] sm:$0xf]  ;;  %v13295_v33 = vld [vmem:[%s14981_s16 + $0x2d4] sm:$0xf0]  ;;  %v10477_v39 = vor.u32 %v13306_v26, %v10476_v25  ;;  %v10097_v40 = vor.u32 %v13204_v27, %v10094_v29 }
  0x88   : > { %v10820_v34 = vld [vmem:[%s14981_s16 + $0x5a8] sm:$0xf]  ;;  %v13391_v36 = vld [vmem:[%s14981_s16 + $0x5d4] sm:$0xf0]  ;;  %v13289_v37 = vld [vmem:[%s14981_s16 + $0x2ac] sm:$0xf]  ;;  %v10481_v43 = vor.u32 %v13300_v30, %v10478_v31  ;;  %v10437_v44 = vor.u32 %v13295_v33, %v10436_v32 }
  0x89   : > { %1922 = vmatpush.bf16.msra.mxu0 %v10189_v8  ;;  %v10438_v38 = vld [vmem:[%s14981_s16 + $0x2d8] sm:$0xf0]  ;;  %v13385_v41 = vld [vmem:[%s14981_s16 + $0x5ac] sm:$0xf]  ;;  %v10388_v45 = vld [vmem:[%s14981_s16 + $0x248] sm:$0xf]  ;;  %v10821_v47 = vor.u32 %v13391_v36, %v10820_v34 }
  0x8a   : > { %1936 = vmatpush.bf16.msra.mxu1 %v10573_v9  ;;  %1950 = vmatpush.bf16.msra.mxu2 %v10193_v10  ;;  %v10822_v42 = vld [vmem:[%s14981_s16 + $0x5d8] sm:$0xf0]  ;;  %v13283_v46 = vld [vmem:[%s14981_s16 + $0x274] sm:$0xf0]  ;;  %v10441_v48 = vor.u32 %v13289_v37, %v10438_v38  ;;  %v10772_v49 = vld [vmem:[%s14981_s16 + $0x548] sm:$0xf] }
  0x8b   : > { %1964 = vmatpush.bf16.msra.mxu3 %v10577_v14  ;;  %v13379_v50 = vld [vmem:[%s14981_s16 + $0x574] sm:$0xf0]  ;;  %v13277_v51 = vld [vmem:[%s14981_s16 + $0x24c] sm:$0xf]  ;;  %v10825_v52 = vor.u32 %v13385_v41, %v10822_v42  ;;  %v10390_v53 = vld [vmem:[%s14981_s16 + $0x278] sm:$0xf0]  ;;  %v10389_v59 = vor.u32 %v13283_v46, %v10388_v45 }
  0x8c   : > { %v13373_v54 = vld [vmem:[%s14981_s16 + $0x54c] sm:$0xf]  ;;  %v10774_v55 = vld [vmem:[%s14981_s16 + $0x578] sm:$0xf0]  ;;  %v750_v56 = vld [vmem:[#allocation15] sm:$0xff]  ;;  %v10773_v62 = vor.u32 %v13379_v50, %v10772_v49  ;;  %v10393_v63 = vor.u32 %v13277_v51, %v10390_v53  ;;  %vm2350_vm0 = vcmask 1047556  }
  0x8d   : > { %1923 = vmatpush.bf16.msra.mxu0 %v10141_v20  ;;  %v752_v57 = vld [vmem:[#allocation15 + $0x10] sm:$0xff]  ;;  %v751_v58 = vld [vmem:[#allocation15 + $0x8] sm:$0xff]  ;;  %v753_v61 = vld [vmem:[#allocation15 + $0x18] sm:$0xff]  ;;  %v10777_v4 = vor.u32 %v13373_v54, %v10774_v55  ;;  %s14710_s22 = smov 64   ;;  %vm3742_vm1 = vcmask 523264   ;;  %vm4073_vm4 = vcmask 64512  }
  0x8e   : > { %1937 = vmatpush.bf16.msra.mxu1 %v10525_v23  ;;  %1951 = vmatpush.bf16.msra.mxu2 %v10145_v24  ;;  %v15086_v60 = vpack.c.bf16 %v752_v57, %v750_v56  ;;  %v10340_v0 = vld [vmem:[%s14981_s16 + $0x1e8] sm:$0xf]  ;;  %v13271_v1 = vld [vmem:[%s14981_s16 + $0x214] sm:$0xf0]  ;;  %v15091_v3 = vpack.c.bf16 %v753_v61, %v751_v58  ;;  %v13265_v6 = vld [vmem:[%s14981_s16 + $0x1ec] sm:$0xf] }
  0x8f   : > { %1965 = vmatpush.bf16.msra.mxu3 %v10529_v28  ;;  %v10724_v2 = vld [vmem:[%s14981_s16 + $0x4e8] sm:$0xf]  ;;  %v13367_v5 = vld [vmem:[%s14981_s16 + $0x514] sm:$0xf0]  ;;  %v10342_v7 = vld [vmem:[%s14981_s16 + $0x218] sm:$0xf0]  ;;  %v10341_v10 = vor.u32 %v13271_v1, %v10340_v0 }
  0x90   : > { %v13361_v8 = vld [vmem:[%s14981_s16 + $0x4ec] sm:$0xf]  ;;  %v10726_v9 = vld [vmem:[%s14981_s16 + $0x518] sm:$0xf0]  ;;  %v10725_v11 = vor.u32 %v13367_v5, %v10724_v2  ;;  %v10345_v12 = vor.u32 %v13265_v6, %v10342_v7  ;;  %v10292_v13 = vld [vmem:[%s14981_s16 + $0x188] sm:$0xf] }
  0x91   : > { %1924 = vmatpush.bf16.msra.mxu0 %v10093_v35  ;;  %v13259_v14 = vld [vmem:[%s14981_s16 + $0x1b4] sm:$0xf0]  ;;  %v10676_v15 = vld [vmem:[%s14981_s16 + $0x488] sm:$0xf]  ;;  %v10729_v16 = vor.u32 %v13361_v8, %v10726_v9  ;;  %v13253_v18 = vld [vmem:[%s14981_s16 + $0x18c] sm:$0xf] }
  0x92   : > { %1938 = vmatpush.bf16.msra.mxu1 %v10477_v39  ;;  %1952 = vmatpush.bf16.msra.mxu2 %v10097_v40  ;;  %v13355_v17 = vld [vmem:[%s14981_s16 + $0x4b4] sm:$0xf0]  ;;  %v10294_v19 = vld [vmem:[%s14981_s16 + $0x1b8] sm:$0xf0]  ;;  %v13349_v20 = vld [vmem:[%s14981_s16 + $0x48c] sm:$0xf]  ;;  %v10293_v22 = vor.u32 %v13259_v14, %v10292_v13 }
  0x93   : > { %1966 = vmatpush.bf16.msra.mxu3 %v10481_v43  ;;  %v10678_v21 = vld [vmem:[%s14981_s16 + $0x4b8] sm:$0xf0]  ;;  %v10677_v23 = vor.u32 %v13355_v17, %v10676_v15  ;;  %v10297_v24 = vor.u32 %v13253_v18, %v10294_v19  ;;  %v10244_v25 = vld [vmem:[%s14981_s16 + $0x128] sm:$0xf]  ;;  %v13247_v26 = vld [vmem:[%s14981_s16 + $0x154] sm:$0xf0] }
  0x94   : > { %1925 = vmatmul.bf16.vlgmr.msra.gmra.mxu0 %v15086_v60  ;;  %v10628_v27 = vld [vmem:[%s14981_s16 + $0x428] sm:$0xf]  ;;  %v10681_v28 = vor.u32 %v13349_v20, %v10678_v21  ;;  %v13343_v29 = vld [vmem:[%s14981_s16 + $0x454] sm:$0xf0]  ;;  %v13241_v30 = vld [vmem:[%s14981_s16 + $0x12c] sm:$0xf]  ;;  %v10245_v34 = vor.u32 %v13247_v26, %v10244_v25 }
  0x95   : > { %1973 = vmatpush.bf16.msrb.mxu0 %v10437_v44  ;;  %1953 = vmatmul.bf16.vlgmr.msra.gmra.mxu2 %v15086_v60  ;;  %v10246_v31 = vld [vmem:[%s14981_s16 + $0x158] sm:$0xf0]  ;;  %v13337_v32 = vld [vmem:[%s14981_s16 + $0x42c] sm:$0xf]  ;;  %v10629_v35 = vor.u32 %v13343_v29, %v10628_v27  ;;  %v10196_v37 = vld [vmem:[%s14981_s16 + $0xc8] sm:$0xf] }
  0x96   : > { %1987 = vmatpush.bf16.msrb.mxu1 %v10821_v47  ;;  %2001 = vmatpush.bf16.msrb.mxu2 %v10441_v48  ;;  %v10630_v33 = vld [vmem:[%s14981_s16 + $0x458] sm:$0xf0]  ;;  %v10249_v36 = vor.u32 %v13241_v30, %v10246_v31  ;;  %v13235_v38 = vld [vmem:[%s14981_s16 + $0xf4] sm:$0xf0]  ;;  %v10580_v39 = vld [vmem:[%s14981_s16 + $0x3c8] sm:$0xf] }
  0x97   : > { %2015 = vmatpush.bf16.msrb.mxu3 %v10825_v52  ;;  %1939 = vmatmul.bf16.vlgmr.msra.gmra.mxu1 %v15091_v3  ;;  %v10633_v40 = vor.u32 %v13337_v32, %v10630_v33  ;;  %v13331_v41 = vld [vmem:[%s14981_s16 + $0x3f4] sm:$0xf0]  ;;  %v13229_v42 = vld [vmem:[%s14981_s16 + $0xcc] sm:$0xf]  ;;  %v10198_v43 = vld [vmem:[%s14981_s16 + $0xf8] sm:$0xf0]  ;;  %v10197_v46 = vor.u32 %v13235_v38, %v10196_v37 }
  0x98   : > { %1967 = vmatmul.bf16.vlgmr.msra.gmra.mxu3 %v15091_v3  ;;  %v13325_v44 = vld [vmem:[%s14981_s16 + $0x3cc] sm:$0xf]  ;;  %v10582_v45 = vld [vmem:[%s14981_s16 + $0x3f8] sm:$0xf0]  ;;  %v10581_v47 = vor.u32 %v13331_v41, %v10580_v39  ;;  %v10201_v48 = vor.u32 %v13229_v42, %v10198_v43  ;;  %v10148_v49 = vld [vmem:[%s14981_s16 + $0x68] sm:$0xf] }
  0x99   : > { %1974 = vmatpush.bf16.msrb.mxu0 %v10389_v59  ;;  %v13223_v50 = vld [vmem:[%s14981_s16 + $0x94] sm:$0xf0]  ;;  %v10532_v51 = vld [vmem:[%s14981_s16 + $0x368] sm:$0xf]  ;;  %v10585_v52 = vor.u32 %v13325_v44, %v10582_v45  ;;  %v13217_v54 = vld [vmem:[%s14981_s16 + $0x6c] sm:$0xf] }
  0x9a   : > { %1988 = vmatpush.bf16.msrb.mxu1 %v10773_v62  ;;  %2002 = vmatpush.bf16.msrb.mxu2 %v10393_v63  ;;  %v13319_v53 = vld [vmem:[%s14981_s16 + $0x394] sm:$0xf0]  ;;  %v10150_v55 = vld [vmem:[%s14981_s16 + $0x98] sm:$0xf0]  ;;  %v13313_v56 = vld [vmem:[%s14981_s16 + $0x36c] sm:$0xf]  ;;  %v10149_v58 = vor.u32 %v13223_v50, %v10148_v49 }
  0x9b   : > { %2016 = vmatpush.bf16.msrb.mxu3 %v10777_v4  ;;  %v10534_v57 = vld [vmem:[%s14981_s16 + $0x398] sm:$0xf0]  ;;  %v10100_v59 = vld [vmem:[%s14981_s16 + $0x8] sm:$0xf]  ;;  %v13211_v61 = vld [vmem:[%s14981_s16 + $0x34] sm:$0xf0]  ;;  %v10533_v62 = vor.u32 %v13319_v53, %v10532_v51  ;;  %v10153_v63 = vor.u32 %v13217_v54, %v10150_v55 }
  0x9c   : > { %v10484_v0 = vld [vmem:[%s14981_s16 + $0x308] sm:$0xf]  ;;  %v13307_v1 = vld [vmem:[%s14981_s16 + $0x334] sm:$0xf0]  ;;  %v13205_v2 = vld [vmem:[%s14981_s16 + $0xc] sm:$0xf]  ;;  %v10537_v4 = vor.u32 %v13313_v56, %v10534_v57 }
  0x9d   : > { %1975 = vmatpush.bf16.msrb.mxu0 %v10341_v10  ;;  %v10102_v5 = vld [vmem:[%s14981_s16 + $0x38] sm:$0xf0]  ;;  %v13301_v6 = vld [vmem:[%s14981_s16 + $0x30c] sm:$0xf]  ;;  %v10444_v8 = vld [vmem:[%s14981_s16 + $0x2b0] sm:$0xf]  ;;  %v10485_v15 = vor.u32 %v13307_v1, %v10484_v0 }
  0x9e   : > { %1989 = vmatpush.bf16.msrb.mxu1 %v10725_v11  ;;  %2003 = vmatpush.bf16.msrb.mxu2 %v10345_v12  ;;  %v10486_v7 = vld [vmem:[%s14981_s16 + $0x338] sm:$0xf0]  ;;  %v13296_v9 = vld [vmem:[%s14981_s16 + $0x2dc] sm:$0xf0]  ;;  %v10828_v10 = vld [vmem:[%s14981_s16 + $0x5b0] sm:$0xf]  ;;  %v10101_v11 = vor.u32 %v13211_v61, %v10100_v59 }
  0x9f   : > { %2017 = vmatpush.bf16.msrb.mxu3 %v10729_v16  ;;  %v13392_v12 = vld [vmem:[%s14981_s16 + $0x5dc] sm:$0xf0]  ;;  %v13290_v13 = vld [vmem:[%s14981_s16 + $0x2b4] sm:$0xf]  ;;  %v10446_v14 = vld [vmem:[%s14981_s16 + $0x2e0] sm:$0xf0]  ;;  %v10105_v16 = vor.u32 %v13205_v2, %v10102_v5  ;;  %v10489_v19 = vor.u32 %v13301_v6, %v10486_v7  ;;  %v10445_v20 = vor.u32 %v13296_v9, %v10444_v8 }
  0xa0   : > { %v13386_v17 = vld [vmem:[%s14981_s16 + $0x5b4] sm:$0xf]  ;;  %v10830_v18 = vld [vmem:[%s14981_s16 + $0x5e0] sm:$0xf0]  ;;  %v10829_v21 = vor.u32 %v13392_v12, %v10828_v10  ;;  %v10780_v25 = vld [vmem:[%s14981_s16 + $0x550] sm:$0xf] }
  0xa1   : > { %1976 = vmatpush.bf16.msrb.mxu0 %v10293_v22  ;;  %v10449_v22 = vor.u32 %v13290_v13, %v10446_v14  ;;  %v10833_v26 = vor.u32 %v13386_v17, %v10830_v18  ;;  %v13380_v27 = vld [vmem:[%s14981_s16 + $0x57c] sm:$0xf0]  ;;  %v10398_v29 = vld [vmem:[%s14981_s16 + $0x280] sm:$0xf0]  ;;  %v13374_v30 = vld [vmem:[%s14981_s16 + $0x554] sm:$0xf] }
  0xa2   : > { %1990 = vmatpush.bf16.msrb.mxu1 %v10677_v23  ;;  %2004 = vmatpush.bf16.msrb.mxu2 %v10297_v24  ;;  %v10396_v23 = vld [vmem:[%s14981_s16 + $0x250] sm:$0xf]  ;;  %v13284_v24 = vld [vmem:[%s14981_s16 + $0x27c] sm:$0xf0]  ;;  %v10782_v31 = vld [vmem:[%s14981_s16 + $0x580] sm:$0xf0]  ;;  %v10781_v33 = vor.u32 %v13380_v27, %v10780_v25 }
  0xa3   : > { %2018 = vmatpush.bf16.msrb.mxu3 %v10681_v28  ;;  %v13278_v28 = vld [vmem:[%s14981_s16 + $0x254] sm:$0xf]  ;;  %v10397_v32 = vor.u32 %v13284_v24, %v10396_v23  ;;  %v10732_v37 = vld [vmem:[%s14981_s16 + $0x4f0] sm:$0xf]  ;;  %v10785_v38 = vor.u32 %v13374_v30, %v10782_v31  ;;  %v13368_v39 = vld [vmem:[%s14981_s16 + $0x51c] sm:$0xf0] }
  0xa4   : > { %v10350_v41 = vld [vmem:[%s14981_s16 + $0x220] sm:$0xf0]  ;;  %v13362_v42 = vld [vmem:[%s14981_s16 + $0x4f4] sm:$0xf]  ;;  %v10733_v45 = vor.u32 %v13368_v39, %v10732_v37  ;;  %v10684_v49 = vld [vmem:[%s14981_s16 + $0x490] sm:$0xf] }
  0xa5   : > { %1977 = vmatpush.bf16.msrb.mxu0 %v10245_v34  ;;  %v10401_v34 = vor.u32 %v13278_v28, %v10398_v29  ;;  %v10734_v43 = vld [vmem:[%s14981_s16 + $0x520] sm:$0xf0]  ;;  %v13356_v51 = vld [vmem:[%s14981_s16 + $0x4bc] sm:$0xf0]  ;;  %v13350_v54 = vld [vmem:[%s14981_s16 + $0x494] sm:$0xf] }
  0xa6   : > { %1991 = vmatpush.bf16.msrb.mxu1 %v10629_v35  ;;  %2005 = vmatpush.bf16.msrb.mxu2 %v10249_v36  ;;  %v10348_v35 = vld [vmem:[%s14981_s16 + $0x1f0] sm:$0xf]  ;;  %v13272_v36 = vld [vmem:[%s14981_s16 + $0x21c] sm:$0xf0]  ;;  %v10737_v50 = vor.u32 %v13362_v42, %v10734_v43  ;;  %v10302_v53 = vld [vmem:[%s14981_s16 + $0x1c0] sm:$0xf0]  ;;  %v10685_v57 = vor.u32 %v13356_v51, %v10684_v49 }
  0xa7   : > { %2019 = vmatpush.bf16.msrb.mxu3 %v10633_v40  ;;  %v13266_v40 = vld [vmem:[%s14981_s16 + $0x1f4] sm:$0xf]  ;;  %v10349_v44 = vor.u32 %v13272_v36, %v10348_v35  ;;  %v10686_v55 = vld [vmem:[%s14981_s16 + $0x4c0] sm:$0xf0]  ;;  %v10252_v59 = vld [vmem:[%s14981_s16 + $0x130] sm:$0xf] }
  0xa8   : > { %v13248_v61 = vld [vmem:[%s14981_s16 + $0x15c] sm:$0xf0]  ;;  %v13242_v1 = vld [vmem:[%s14981_s16 + $0x134] sm:$0xf]  ;;  %v10254_v2 = vld [vmem:[%s14981_s16 + $0x160] sm:$0xf0] }
  0xa9   : > { %1978 = vmatpush.bf16.msrb.mxu0 %v10197_v46  ;;  %v10353_v46 = vor.u32 %v13266_v40, %v10350_v41  ;;  %v13344_v0 = vld [vmem:[%s14981_s16 + $0x45c] sm:$0xf0]  ;;  %v10638_v5 = vld [vmem:[%s14981_s16 + $0x460] sm:$0xf0]  ;;  %v10253_v6 = vor.u32 %v13248_v61, %v10252_v59  ;;  %v10257_v8 = vor.u32 %v13242_v1, %v10254_v2  ;;  %v10204_v9 = vld [vmem:[%s14981_s16 + $0xd0] sm:$0xf] }
  0xaa   : > { %1992 = vmatpush.bf16.msrb.mxu1 %v10581_v47  ;;  %2006 = vmatpush.bf16.msrb.mxu2 %v10201_v48  ;;  %v10300_v47 = vld [vmem:[%s14981_s16 + $0x190] sm:$0xf]  ;;  %v13260_v48 = vld [vmem:[%s14981_s16 + $0x1bc] sm:$0xf0]  ;;  %v13230_v14 = vld [vmem:[%s14981_s16 + $0xd4] sm:$0xf] }
  0xab   : > { %2020 = vmatpush.bf16.msrb.mxu3 %v10585_v52  ;;  %v13254_v52 = vld [vmem:[%s14981_s16 + $0x194] sm:$0xf]  ;;  %v10301_v56 = vor.u32 %v13260_v48, %v10300_v47  ;;  %v13236_v10 = vld [vmem:[%s14981_s16 + $0xfc] sm:$0xf0]  ;;  %v10590_v17 = vld [vmem:[%s14981_s16 + $0x400] sm:$0xf0] }
  0xac   : > { %v13332_v13 = vld [vmem:[%s14981_s16 + $0x3fc] sm:$0xf0]  ;;  %v10205_v18 = vor.u32 %v13236_v10, %v10204_v9  ;;  %v10540_v23 = vld [vmem:[%s14981_s16 + $0x370] sm:$0xf]  ;;  %v10158_v27 = vld [vmem:[%s14981_s16 + $0xa0] sm:$0xf0] }
  0xad   : > { %1979 = vmatpush.bf16.msrb.mxu0 %v10149_v58  ;;  %v10305_v58 = vor.u32 %v13254_v52, %v10302_v53  ;;  %v13320_v25 = vld [vmem:[%s14981_s16 + $0x39c] sm:$0xf0]  ;;  %v13314_v28 = vld [vmem:[%s14981_s16 + $0x374] sm:$0xf]  ;;  %v10542_v29 = vld [vmem:[%s14981_s16 + $0x3a0] sm:$0xf0] }
  0xae   : > { %1993 = vmatpush.bf16.msrb.mxu1 %v10533_v62  ;;  %2007 = vmatpush.bf16.msrb.mxu2 %v10153_v63  ;;  %v10636_v62 = vld [vmem:[%s14981_s16 + $0x430] sm:$0xf]  ;;  %v10689_v63 = vor.u32 %v13350_v54, %v10686_v55  ;;  %v13308_v36 = vld [vmem:[%s14981_s16 + $0x33c] sm:$0xf0]  ;;  %v13206_v37 = vld [vmem:[%s14981_s16 + $0x14] sm:$0xf] }
  0xaf   : > { %2021 = vmatpush.bf16.msrb.mxu3 %v10537_v4  ;;  %v13338_v4 = vld [vmem:[%s14981_s16 + $0x434] sm:$0xf]  ;;  %v10637_v7 = vor.u32 %v13344_v0, %v10636_v62  ;;  %v10108_v31 = vld [vmem:[%s14981_s16 + $0x10] sm:$0xf]  ;;  %v10110_v39 = vld [vmem:[%s14981_s16 + $0x40] sm:$0xf0] }
  0xb0   : > { %v10641_v12 = vor.u32 %v13338_v4, %v10638_v5  ;;  %v10492_v35 = vld [vmem:[%s14981_s16 + $0x310] sm:$0xf]  ;;  %v13302_v40 = vld [vmem:[%s14981_s16 + $0x314] sm:$0xf]  ;;  %v10494_v41 = vld [vmem:[%s14981_s16 + $0x340] sm:$0xf0] }
  0xb1   : > { %1980 = vmatpush.bf16.msrb.mxu0 %v10101_v11  ;;  %v10588_v11 = vld [vmem:[%s14981_s16 + $0x3d0] sm:$0xf]  ;;  %v10452_v42 = vld [vmem:[%s14981_s16 + $0x2b8] sm:$0xf]  ;;  %v13297_v43 = vld [vmem:[%s14981_s16 + $0x2e4] sm:$0xf0]  ;;  %v10493_v49 = vor.u32 %v13308_v36, %v10492_v35  ;;  %v10497_v53 = vor.u32 %v13302_v40, %v10494_v41 }
  0xb2   : > { %1994 = vmatpush.bf16.msrb.mxu1 %v10485_v15  ;;  %2008 = vmatpush.bf16.msrb.mxu2 %v10105_v16  ;;  %v10206_v15 = vld [vmem:[%s14981_s16 + $0x100] sm:$0xf0]  ;;  %v13326_v16 = vld [vmem:[%s14981_s16 + $0x3d4] sm:$0xf]  ;;  %v13291_v47 = vld [vmem:[%s14981_s16 + $0x2bc] sm:$0xf]  ;;  %v10453_v54 = vor.u32 %v13297_v43, %v10452_v42 }
  0xb3   : > { %2022 = vmatpush.bf16.msrb.mxu3 %v10489_v19  ;;  %v10589_v19 = vor.u32 %v13332_v13, %v10588_v11  ;;  %v10593_v24 = vor.u32 %v13326_v16, %v10590_v17  ;;  %v10454_v48 = vld [vmem:[%s14981_s16 + $0x2e8] sm:$0xf0]  ;;  %v13387_v51 = vld [vmem:[%s14981_s16 + $0x5bc] sm:$0xf]  ;;  %v10788_v59 = vld [vmem:[%s14981_s16 + $0x558] sm:$0xf] }
  0xb4   : > { %1981 = vmatmul.bf16.vlgmr.msrb.gmra.mxu0 %v15086_v60  ;;  %v10838_v52 = vld [vmem:[%s14981_s16 + $0x5e8] sm:$0xf0]  ;;  %v13381_v62 = vld [vmem:[%s14981_s16 + $0x584] sm:$0xf0]  ;;  %v13375_v1 = vld [vmem:[%s14981_s16 + $0x55c] sm:$0xf] }
  0xb5   : > { %2029 = vmatpush.bf16.msra.mxu0 %v10445_v20  ;;  %2009 = vmatmul.bf16.vlgmr.msrb.gmra.mxu2 %v15086_v60  ;;  %v10209_v20 = vor.u32 %v13230_v14, %v10206_v15  ;;  %v10841_v61 = vor.u32 %v13387_v51, %v10838_v52  ;;  %v10406_v0 = vld [vmem:[%s14981_s16 + $0x288] sm:$0xf0]  ;;  %v10789_v5 = vor.u32 %v13381_v62, %v10788_v59  ;;  %v10740_v9 = vld [vmem:[%s14981_s16 + $0x4f8] sm:$0xf]  ;;  %v13369_v11 = vld [vmem:[%s14981_s16 + $0x524] sm:$0xf0] }
  0xb6   : > { %2043 = vmatpush.bf16.msra.mxu1 %v10829_v21  ;;  %2057 = vmatpush.bf16.msra.mxu2 %v10449_v22  ;;  %v10156_v21 = vld [vmem:[%s14981_s16 + $0x70] sm:$0xf]  ;;  %v13224_v22 = vld [vmem:[%s14981_s16 + $0x9c] sm:$0xf0]  ;;  %v10790_v2 = vld [vmem:[%s14981_s16 + $0x588] sm:$0xf0]  ;;  %v10741_v17 = vor.u32 %v13369_v11, %v10740_v9 }
  0xb7   : > { %2071 = vmatpush.bf16.msra.mxu3 %v10833_v26  ;;  %1995 = vmatmul.bf16.vlgmr.msrb.gmra.mxu1 %v15091_v3  ;;  %v13218_v26 = vld [vmem:[%s14981_s16 + $0x74] sm:$0xf]  ;;  %v10157_v30 = vor.u32 %v13224_v22, %v10156_v21  ;;  %v10793_v10 = vor.u32 %v13375_v1, %v10790_v2  ;;  %v10358_v13 = vld [vmem:[%s14981_s16 + $0x228] sm:$0xf0]  ;;  %v13363_v14 = vld [vmem:[%s14981_s16 + $0x4fc] sm:$0xf] }
  0xb8   : > { %2023 = vmatmul.bf16.vlgmr.msrb.gmra.mxu3 %v15091_v3  ;;  %v10742_v15 = vld [vmem:[%s14981_s16 + $0x528] sm:$0xf0]  ;;  %v10692_v21 = vld [vmem:[%s14981_s16 + $0x498] sm:$0xf]  ;;  %v13345_v35 = vld [vmem:[%s14981_s16 + $0x464] sm:$0xf0] }
  0xb9   : > { %2030 = vmatpush.bf16.msra.mxu0 %v10397_v32  ;;  %v13212_v32 = vld [vmem:[%s14981_s16 + $0x3c] sm:$0xf0]  ;;  %v10745_v22 = vor.u32 %v13363_v14, %v10742_v15  ;;  %v13243_v36 = vld [vmem:[%s14981_s16 + $0x13c] sm:$0xf]  ;;  %v10212_v43 = vld [vmem:[%s14981_s16 + $0xd8] sm:$0xf] }
  0xba   : > { %2044 = vmatpush.bf16.msra.mxu1 %v10781_v33  ;;  %2058 = vmatpush.bf16.msra.mxu2 %v10401_v34  ;;  %v10541_v33 = vor.u32 %v13320_v25, %v10540_v23  ;;  %v10161_v34 = vor.u32 %v13218_v26, %v10158_v27  ;;  %v13357_v23 = vld [vmem:[%s14981_s16 + $0x4c4] sm:$0xf0]  ;;  %v10310_v25 = vld [vmem:[%s14981_s16 + $0x1c8] sm:$0xf0]  ;;  %v13351_v26 = vld [vmem:[%s14981_s16 + $0x49c] sm:$0xf] }
  0xbb   : > { %2072 = vmatpush.bf16.msra.mxu3 %v10785_v38  ;;  %v10545_v38 = vor.u32 %v13314_v28, %v10542_v29  ;;  %v10694_v27 = vld [vmem:[%s14981_s16 + $0x4c8] sm:$0xf0]  ;;  %v10693_v29 = vor.u32 %v13357_v23, %v10692_v21  ;;  %v13321_v59 = vld [vmem:[%s14981_s16 + $0x3a4] sm:$0xf0]  ;;  %vm4285_vm7 = vcmask 1043456   ;;  %s18658_s0 = sld [smem:[#allocation24_spill]] }
  0xbc   : > { %v10598_v51 = vld [vmem:[%s14981_s16 + $0x408] sm:$0xf0]  ;;  %v13309_v9 = vld [vmem:[%s14981_s16 + $0x344] sm:$0xf0]  ;;  %s9787_s12 = sshll.u32 %s15003_s10, 4  ;;  %s9754_s2 = scalar_lea.sflag [#allocation17], %s14978_s27  ;;  %s9788_s12 = int_to_ptr.vmem [resolvable:$true] %s9787_s12 }
  0xbd   : > { %2031 = vmatpush.bf16.msra.mxu0 %v10349_v44  ;;  %v10836_v44 = vld [vmem:[%s14981_s16 + $0x5b8] sm:$0xf]  ;;  %v10166_v62 = vld [vmem:[%s14981_s16 + $0xa8] sm:$0xf0] }
  0xbe   : > { %2045 = vmatpush.bf16.msra.mxu1 %v10733_v45  ;;  %2059 = vmatpush.bf16.msra.mxu2 %v10353_v46  ;;  %v10109_v45 = vor.u32 %v13212_v32, %v10108_v31  ;;  %v13393_v46 = vld [vmem:[%s14981_s16 + $0x5e4] sm:$0xf0]  ;;  %v10260_v31 = vld [vmem:[%s14981_s16 + $0x138] sm:$0xf]  ;;  %v10118_v11 = vld [vmem:[%s14981_s16 + $0x48] sm:$0xf0] }
  0xbf   : > { %2073 = vmatpush.bf16.msra.mxu3 %v10737_v50  ;;  %v10113_v50 = vor.u32 %v13206_v37, %v10110_v39  ;;  %v10837_v55 = vor.u32 %v13393_v46, %v10836_v44  ;;  %v13249_v32 = vld [vmem:[%s14981_s16 + $0x164] sm:$0xf0]  ;;  %v10262_v37 = vld [vmem:[%s14981_s16 + $0x168] sm:$0xf0] }
  0xc0   : > { %v10646_v39 = vld [vmem:[%s14981_s16 + $0x468] sm:$0xf0]  ;;  %v10261_v40 = vor.u32 %v13249_v32, %v10260_v31  ;;  %v10265_v42 = vor.u32 %v13243_v36, %v10262_v37  ;;  %v13237_v44 = vld [vmem:[%s14981_s16 + $0x104] sm:$0xf0] }
  0xc1   : > { %2032 = vmatpush.bf16.msra.mxu0 %v10301_v56  ;;  %v10457_v56 = vor.u32 %v13291_v47, %v10454_v48  ;;  %v13333_v47 = vld [vmem:[%s14981_s16 + $0x404] sm:$0xf0]  ;;  %v13231_v48 = vld [vmem:[%s14981_s16 + $0xdc] sm:$0xf]  ;;  %v10213_v52 = vor.u32 %v13237_v44, %v10212_v43  ;;  %s13972_s24 = sshll.u32 %s18658_s0, 7 }
  0xc2   : > { %2046 = vmatpush.bf16.msra.mxu1 %v10685_v57  ;;  %2060 = vmatpush.bf16.msra.mxu2 %v10305_v58  ;;  %v10404_v57 = vld [vmem:[%s14981_s16 + $0x258] sm:$0xf]  ;;  %v13285_v58 = vld [vmem:[%s14981_s16 + $0x284] sm:$0xf0] }
  0xc3   : > { %2074 = vmatpush.bf16.msra.mxu3 %v10689_v63  ;;  %v13279_v63 = vld [vmem:[%s14981_s16 + $0x25c] sm:$0xf]  ;;  %v10405_v4 = vor.u32 %v13285_v58, %v10404_v57  ;;  %v10548_v57 = vld [vmem:[%s14981_s16 + $0x378] sm:$0xf] }
  0xc4   : > { %v10549_v2 = vor.u32 %v13321_v59, %v10548_v57 }
  0xc5   : > { %2033 = vmatpush.bf16.msra.mxu0 %v10253_v6  ;;  %v10409_v6 = vor.u32 %v13279_v63, %v10406_v0  ;;  %v13315_v63 = vld [vmem:[%s14981_s16 + $0x37c] sm:$0xf]  ;;  %v10550_v0 = vld [vmem:[%s14981_s16 + $0x3a8] sm:$0xf0] }
  0xc6   : > { %2047 = vmatpush.bf16.msra.mxu1 %v10637_v7  ;;  %2061 = vmatpush.bf16.msra.mxu2 %v10257_v8  ;;  %v10356_v7 = vld [vmem:[%s14981_s16 + $0x1f8] sm:$0xf]  ;;  %v13273_v8 = vld [vmem:[%s14981_s16 + $0x224] sm:$0xf0] }
  0xc7   : > { %2075 = vmatpush.bf16.msra.mxu3 %v10641_v12  ;;  %v13267_v12 = vld [vmem:[%s14981_s16 + $0x1fc] sm:$0xf]  ;;  %v10357_v16 = vor.u32 %v13273_v8, %v10356_v7  ;;  %v10500_v7 = vld [vmem:[%s14981_s16 + $0x318] sm:$0xf]  ;;  %v10553_v8 = vor.u32 %v13315_v63, %v10550_v0 }
  0xc8   : > { %v10501_v15 = vor.u32 %v13309_v9, %v10500_v7 }
  0xc9   : > { %2034 = vmatpush.bf16.msra.mxu0 %v10205_v18  ;;  %v10361_v18 = vor.u32 %v13267_v12, %v10358_v13  ;;  %v13303_v12 = vld [vmem:[%s14981_s16 + $0x31c] sm:$0xf]  ;;  %v10502_v13 = vld [vmem:[%s14981_s16 + $0x348] sm:$0xf0] }
  0xca   : > { %2048 = vmatpush.bf16.msra.mxu1 %v10589_v19  ;;  %2062 = vmatpush.bf16.msra.mxu2 %v10209_v20  ;;  %v10308_v19 = vld [vmem:[%s14981_s16 + $0x198] sm:$0xf]  ;;  %v13261_v20 = vld [vmem:[%s14981_s16 + $0x1c4] sm:$0xf0] }
  0xcb   : > { %2076 = vmatpush.bf16.msra.mxu3 %v10593_v24  ;;  %v13255_v24 = vld [vmem:[%s14981_s16 + $0x19c] sm:$0xf]  ;;  %v10309_v28 = vor.u32 %v13261_v20, %v10308_v19 }
  0xcd   : > { %2035 = vmatpush.bf16.msra.mxu0 %v10157_v30  ;;  %v10313_v30 = vor.u32 %v13255_v24, %v10310_v25 }
  0xce   : > { %2049 = vmatpush.bf16.msra.mxu1 %v10541_v33  ;;  %2063 = vmatpush.bf16.msra.mxu2 %v10161_v34  ;;  %v10644_v33 = vld [vmem:[%s14981_s16 + $0x438] sm:$0xf]  ;;  %v10697_v34 = vor.u32 %v13351_v26, %v10694_v27 }
  0xcf   : > { %2077 = vmatpush.bf16.msra.mxu3 %v10545_v38  ;;  %v13339_v38 = vld [vmem:[%s14981_s16 + $0x43c] sm:$0xf]  ;;  %v10645_v41 = vor.u32 %v13345_v35, %v10644_v33 }
  0xd0   : > { %v10649_v46 = vor.u32 %v13339_v38, %v10646_v39 }
  0xd1   : > { %2036 = vmatpush.bf16.msra.mxu0 %v10109_v45  ;;  %v10596_v45 = vld [vmem:[%s14981_s16 + $0x3d8] sm:$0xf] }
  0xd2   : > { %2050 = vmatpush.bf16.msra.mxu1 %v10493_v49  ;;  %2064 = vmatpush.bf16.msra.mxu2 %v10113_v50  ;;  %v10214_v49 = vld [vmem:[%s14981_s16 + $0x108] sm:$0xf0]  ;;  %v13327_v50 = vld [vmem:[%s14981_s16 + $0x3dc] sm:$0xf] }
  0xd3   : > { %2078 = vmatpush.bf16.msra.mxu3 %v10497_v53  ;;  %v10597_v53 = vor.u32 %v13333_v47, %v10596_v45  ;;  %v10601_v58 = vor.u32 %v13327_v50, %v10598_v51 }
  0xd4   : > { %2037 = vmatmul.bf16.vlgmr.msra.gmra.mxu0 %v15086_v60 }
  0xd5   : > { %2085 = vmatpush.bf16.msrb.mxu0 %v10453_v54  ;;  %2065 = vmatmul.bf16.vlgmr.msra.gmra.mxu2 %v15086_v60  ;;  %v10217_v54 = vor.u32 %v13231_v48, %v10214_v49 }
  0xd6   : > { %2099 = vmatpush.bf16.msrb.mxu1 %v10837_v55  ;;  %2113 = vmatpush.bf16.msrb.mxu2 %v10457_v56  ;;  %v10164_v55 = vld [vmem:[%s14981_s16 + $0x78] sm:$0xf]  ;;  %v13225_v56 = vld [vmem:[%s14981_s16 + $0xa4] sm:$0xf0] }
  0xd7   : > { %2127 = vmatpush.bf16.msrb.mxu3 %v10841_v61  ;;  %2051 = vmatmul.bf16.vlgmr.msra.gmra.mxu1 %v15091_v3  ;;  %v13219_v61 = vld [vmem:[%s14981_s16 + $0x7c] sm:$0xf]  ;;  %v10165_v1 = vor.u32 %v13225_v56, %v10164_v55 }
  0xd8   : > { %2079 = vmatmul.bf16.vlgmr.msra.gmra.mxu3 %v15091_v3 }
  0xd9   : > { %2086 = vmatpush.bf16.msrb.mxu0 %v10405_v4  ;;  %v10169_v4 = vor.u32 %v13219_v61, %v10166_v62 }
  0xda   : > { %2100 = vmatpush.bf16.msrb.mxu1 %v10789_v5  ;;  %2114 = vmatpush.bf16.msrb.mxu2 %v10409_v6  ;;  %v10116_v5 = vld [vmem:[%s14981_s16 + $0x18] sm:$0xf]  ;;  %v13213_v6 = vld [vmem:[%s14981_s16 + $0x44] sm:$0xf0] }
  0xdb   : > { %2128 = vmatpush.bf16.msrb.mxu3 %v10793_v10  ;;  %v13207_v10 = vld [vmem:[%s14981_s16 + $0x1c] sm:$0xf]  ;;  %v10117_v14 = vor.u32 %v13213_v6, %v10116_v5 }
  0xdd   : > { %2087 = vmatpush.bf16.msrb.mxu0 %v10357_v16  ;;  %v10121_v16 = vor.u32 %v13207_v10, %v10118_v11 }
  0xde   : > { %2101 = vmatpush.bf16.msrb.mxu1 %v10741_v17  ;;  %2115 = vmatpush.bf16.msrb.mxu2 %v10361_v18  ;;  %v10505_v17 = vor.u32 %v13303_v12, %v10502_v13 }
  0xdf   : > { %2129 = vmatpush.bf16.msrb.mxu3 %v10745_v22 }
  0xe1   : > { %2088 = vmatpush.bf16.msrb.mxu0 %v10309_v28 }
  0xe2   : > { %2102 = vmatpush.bf16.msrb.mxu1 %v10693_v29  ;;  %2116 = vmatpush.bf16.msrb.mxu2 %v10313_v30 }
  0xe3   : > { %2130 = vmatpush.bf16.msrb.mxu3 %v10697_v34 }
  0xe5   : > { %2089 = vmatpush.bf16.msrb.mxu0 %v10261_v40 }
  0xe6   : > { %2103 = vmatpush.bf16.msrb.mxu1 %v10645_v41  ;;  %2117 = vmatpush.bf16.msrb.mxu2 %v10265_v42 }
  0xe7   : > { %2131 = vmatpush.bf16.msrb.mxu3 %v10649_v46 }
  0xe9   : > { %2090 = vmatpush.bf16.msrb.mxu0 %v10213_v52 }
  0xea   : > { %2104 = vmatpush.bf16.msrb.mxu1 %v10597_v53  ;;  %2118 = vmatpush.bf16.msrb.mxu2 %v10217_v54 }
  0xeb   : > { %2132 = vmatpush.bf16.msrb.mxu3 %v10601_v58 }
  0xed   : > { %2091 = vmatpush.bf16.msrb.mxu0 %v10165_v1 }
  0xee   : > { %2105 = vmatpush.bf16.msrb.mxu1 %v10549_v2  ;;  %2119 = vmatpush.bf16.msrb.mxu2 %v10169_v4 }
  0xef   : > { %2133 = vmatpush.bf16.msrb.mxu3 %v10553_v8 }
  0xf1   : > { %2092 = vmatpush.bf16.msrb.mxu0 %v10117_v14 }
  0xf2   : > { %2106 = vmatpush.bf16.msrb.mxu1 %v10501_v15  ;;  %2120 = vmatpush.bf16.msrb.mxu2 %v10121_v16 }
  0xf3   : > { %2134 = vmatpush.bf16.msrb.mxu3 %v10505_v17 }
  0xf4   : > { %2093 = vmatmul.bf16.vlgmr.msrb.gmra.mxu0 %v15086_v60 }
  0xf5   : > { %2107 = vmatmul.bf16.vlgmr.msrb.gmra.mxu1 %v15091_v3  ;;  %2121 = vmatmul.bf16.vlgmr.msrb.gmra.mxu2 %v15086_v60 }
  0xf6   : > { %2135 = vmatmul.bf16.vlgmr.msrb.gmra.mxu3 %v15091_v3 }
 0x111   : > { %v1926_v18 = vpop.f32.mrf.mxu0 }
 0x114   : > { %v1940_v19 = vpop.f32.mrf.mxu1 }
 0x115   : > { %v1941_v20 = vadd.f32 %v1940_v19, %v1926_v18  ;;  %v10460_v19 = vld [vmem:[%s14981_s16 + $0x2c0] sm:$0xf] }
 0x117   : > { %v2352_v21 = vrot.slane %v1941_v20, 4 }
 0x118   : > { %v1954_v22 = vpop.f32.mrf.mxu2 }
 0x119   : > { %v1928_v27 = vpop.f32.mrf.mxu0 }
 0x11b   : > { %v1968_v23 = vpop.f32.mrf.mxu3 }
 0x11c   : > { %v1969_v24 = vadd.f32 %v1968_v23, %v1954_v22  ;;  %v1942_v28 = vpop.f32.mrf.mxu1  ;;  %v13394_v23 = vld [vmem:[%s14981_s16 + $0x5ec] sm:$0xf0] }
 0x11d   : > { %v1943_v29 = vadd.f32 %v1942_v28, %v1928_v27  ;;  %v10796_v28 = vld [vmem:[%s14981_s16 + $0x560] sm:$0xf] }
 0x11e   : > { %v2349_v25 = vrot.slane %v1969_v24, 4  ;;  %v15283_v26 = vsel %vm2350_vm0, %v1969_v24, %v2352_v21  ;;  %v10844_v21 = vld [vmem:[%s14981_s16 + $0x5c0] sm:$0xf] }
 0x11f   : > { %v2688_v31 = vrot.slane %v1943_v29, 4  ;;  %v10845_v27 = vor.u32 %v13394_v23, %v10844_v21  ;;  %v10268_v23 = vld [vmem:[%s14981_s16 + $0x140] sm:$0xf] }
 0x120   : > { %v15286_v30 = vsel %vm2350_vm0, %v2349_v25, %v1941_v20  ;;  %v1956_v32 = vpop.f32.mrf.mxu2  ;;  %v13286_v25 = vld [vmem:[%s14981_s16 + $0x28c] sm:$0xf0] }
 0x121   : > { %2155 = vmatpush.bf16.msra.mxu1 %v10845_v27 }
 0x123   : > { %v1970_v33 = vpop.f32.mrf.mxu3 }
 0x124   : > { %v15288_v34 = vadd.f32 %v1970_v33, %v1956_v32  ;;  %v10364_v33 = vld [vmem:[%s14981_s16 + $0x200] sm:$0xf] }
 0x126   : > { %v2686_v35 = vrot.slane %v15288_v34, 4  ;;  %v15293_v36 = vsel %vm2350_vm0, %v15288_v34, %v2688_v31 }
 0x128   : > { %v15296_v37 = vsel %vm2350_vm0, %v2686_v35, %v1943_v29  ;;  %v13274_v35 = vld [vmem:[%s14981_s16 + $0x22c] sm:$0xf0] }
 0x131   : > { %v1982_v38 = vpop.f32.mrf.mxu0 }
 0x134   : > { %v1996_v39 = vpop.f32.mrf.mxu1 }
 0x135   : > { %v1997_v40 = vadd.f32 %v1996_v39, %v1982_v38 }
 0x137   : > { %v2376_v41 = vrot.slane %v1997_v40, 4  ;;  %v14134_v58 = vpack.i.bf16 %v1941_v20, %v1997_v40  ;;  %v13298_v20 = vld [vmem:[%s14981_s16 + $0x2ec] sm:$0xf0] }
 0x138   : > { %v2010_v42 = vpop.f32.mrf.mxu2  ;;  %v10461_v22 = vor.u32 %v13298_v20, %v10460_v19 }
 0x139   : > { %v1984_v45 = vpop.f32.mrf.mxu0 }
 0x13a   : > { %2141 = vmatpush.bf16.msra.mxu0 %v10461_v22 }
 0x13b   : > { %v2024_v43 = vpop.f32.mrf.mxu3 }
 0x13c   : > { %v2025_v44 = vadd.f32 %v2024_v43, %v2010_v42  ;;  %v1998_v49 = vpop.f32.mrf.mxu1  ;;  %v13388_v42 = vld [vmem:[%s14981_s16 + $0x5c4] sm:$0xf]  ;;  %v10748_v43 = vld [vmem:[%s14981_s16 + $0x500] sm:$0xf] }
 0x13d   : > { %v1999_v51 = vadd.f32 %v1998_v49, %v1984_v45  ;;  %v13280_v49 = vld [vmem:[%s14981_s16 + $0x264] sm:$0xf] }
 0x13e   : > { %v2374_v46 = vrot.slane %v2025_v44, 4  ;;  %v15299_v47 = vsel %vm2350_vm0, %v2025_v44, %v2376_v41  ;;  %v14129_v48 = vpack.i.bf16 %v1969_v24, %v2025_v44  ;;  %v10412_v24 = vld [vmem:[%s14981_s16 + $0x260] sm:$0xf]  ;;  %v10462_v41 = vld [vmem:[%s14981_s16 + $0x2f0] sm:$0xf0] }
 0x13f   : > { %v2712_v52 = vrot.slane %v1999_v51, 4  ;;  %v14154_v61 = vpack.i.bf16 %v1943_v29, %v1999_v51  ;;  %v13382_v29 = vld [vmem:[%s14981_s16 + $0x58c] sm:$0xf0]  ;;  %v10413_v32 = vor.u32 %v13286_v25, %v10412_v24 }
 0x140   : > { %v15302_v50 = vsel %vm2350_vm0, %v2374_v46, %v1997_v40  ;;  %14130 = vrot.lane.b32.xlu1 %v14129_v48, %s14710_s22  ;;  %v2012_v53 = vpop.f32.mrf.mxu2  ;;  %v10797_v39 = vor.u32 %v13382_v29, %v10796_v28  ;;  %v13292_v40 = vld [vmem:[%s14981_s16 + $0x2c4] sm:$0xf]  ;;  %v13370_v44 = vld [vmem:[%s14981_s16 + $0x52c] sm:$0xf0]  ;;  %v10846_v46 = vld [vmem:[%s14981_s16 + $0x5f0] sm:$0xf0] }
 0x141   : > { %v10465_v45 = vor.u32 %v13292_v40, %v10462_v41  ;;  %v10849_v48 = vor.u32 %v13388_v42, %v10846_v46  ;;  %2142 = vmatpush.bf16.msra.mxu0 %v10413_v32  ;;  %v13250_v24 = vld [vmem:[%s14981_s16 + $0x16c] sm:$0xf0]  ;;  %v10652_v28 = vld [vmem:[%s14981_s16 + $0x440] sm:$0xf] }
 0x142   : > { %2156 = vmatpush.bf16.msra.mxu1 %v10797_v39  ;;  %v13346_v29 = vld [vmem:[%s14981_s16 + $0x46c] sm:$0xf0] }
 0x143   : > { %v2026_v54 = vpop.f32.mrf.mxu3  ;;  %2169 = vmatpush.bf16.msra.mxu2 %v10465_v45  ;;  %2183 = vmatpush.bf16.msra.mxu3 %v10849_v48  ;;  %v10653_v41 = vor.u32 %v13346_v29, %v10652_v28  ;;  %v13232_v28 = vld [vmem:[%s14981_s16 + $0xe4] sm:$0xf]  ;;  %v10222_v29 = vld [vmem:[%s14981_s16 + $0x110] sm:$0xf0] }
 0x144   : > { %v15305_v55 = vadd.f32 %v2026_v54, %v2012_v53  ;;  %v10316_v53 = vld [vmem:[%s14981_s16 + $0x1a0] sm:$0xf]  ;;  %v10414_v54 = vld [vmem:[%s14981_s16 + $0x290] sm:$0xf0] }
 0x146   : > { %v2710_v56 = vrot.slane %v15305_v55, 4  ;;  %v15310_v57 = vsel %vm2350_vm0, %v15305_v55, %v2712_v52  ;;  %v10365_v52 = vor.u32 %v13274_v35, %v10364_v33 }
 0x148   : > { %v15313_v59 = vsel %vm2350_vm0, %v2710_v56, %v1999_v51  ;;  %14135 = vrot.lane.b32.xlu1 %v14134_v58, %s14710_s22  ;;  %v13376_v56 = vld [vmem:[%s14981_s16 + $0x564] sm:$0xf]  ;;  %v10749_v58 = vor.u32 %v13370_v44, %v10748_v43  ;;  %2143 = vmatpush.bf16.msra.mxu0 %v10365_v52 }
 0x14a   : > { %2157 = vmatpush.bf16.msra.mxu1 %v10749_v58  ;;  %v13334_v58 = vld [vmem:[%s14981_s16 + $0x40c] sm:$0xf0] }
 0x150   : > { %14155 = vrot.lane.b32.xlu1 %v14154_v61, %s14710_s22  ;;  %v13262_v61 = vld [vmem:[%s14981_s16 + $0x1cc] sm:$0xf0] }
 0x151   : > { %v2038_v62 = vpop.f32.mrf.mxu0  ;;  %v10317_v19 = vor.u32 %v13262_v61, %v10316_v53  ;;  %v14149_v53 = vpack.i.bf16 %v15288_v34, %v15305_v55  ;;  %v13256_v61 = vld [vmem:[%s14981_s16 + $0x1a4] sm:$0xf] }
 0x153   : > { %2144 = vmatpush.bf16.msra.mxu0 %v10317_v19  ;;  %v13340_v19 = vld [vmem:[%s14981_s16 + $0x444] sm:$0xf] }
 0x154   : > { %v2052_v63 = vpop.f32.mrf.mxu1 }
 0x155   : > { %v15317_v0 = vadd.f32 %v2052_v63, %v2038_v62  ;;  %v10700_v62 = vld [vmem:[%s14981_s16 + $0x4a0] sm:$0xf]  ;;  %v10417_v63 = vor.u32 %v13280_v49, %v10414_v54 }
 0x157   : > { %v2464_v1 = vrot.slane %v15317_v0, 4  ;;  %2170 = vmatpush.bf16.msra.mxu2 %v10417_v63  ;;  %v10702_v63 = vld [vmem:[%s14981_s16 + $0x4d0] sm:$0xf0] }
 0x158   : > { %v2066_v2 = vpop.f32.mrf.mxu2 }
 0x159   : > { %v2040_v6 = vpop.f32.mrf.mxu0 }
 0x15b   : > { %v2080_v4 = vpop.f32.mrf.mxu3 }
 0x15c   : > { %v15320_v5 = vadd.f32 %v2080_v4, %v2066_v2  ;;  %v2054_v9 = vpop.f32.mrf.mxu1  ;;  %v13358_v4 = vld [vmem:[%s14981_s16 + $0x4cc] sm:$0xf0] }
 0x15d   : > { %v15327_v10 = vadd.f32 %v2054_v9, %v2040_v6  ;;  %v10701_v22 = vor.u32 %v13358_v4, %v10700_v62  ;;  %v10318_v62 = vld [vmem:[%s14981_s16 + $0x1d0] sm:$0xf0]  ;;  %v13226_v4 = vld [vmem:[%s14981_s16 + $0xac] sm:$0xf0] }
 0x15e   : > { %v2462_v7 = vrot.slane %v15320_v5, 4  ;;  %v15325_v8 = vsel %vm2350_vm0, %v15320_v5, %v2464_v1  ;;  %v10798_v1 = vld [vmem:[%s14981_s16 + $0x590] sm:$0xf0]  ;;  %v10321_v55 = vor.u32 %v13256_v61, %v10318_v62 }
 0x15f   : > { %v2800_v12 = vrot.slane %v15327_v10, 4  ;;  %v10801_v6 = vor.u32 %v13376_v56, %v10798_v1  ;;  %2158 = vmatpush.bf16.msra.mxu1 %v10701_v22  ;;  %v10124_v22 = vld [vmem:[%s14981_s16 + $0x20] sm:$0xf] }
 0x160   : > { %v15331_v11 = vsel %vm2350_vm0, %v2462_v7, %v15317_v0  ;;  %v2068_v13 = vpop.f32.mrf.mxu2  ;;  %v13268_v7 = vld [vmem:[%s14981_s16 + $0x204] sm:$0xf] }
 0x161   : > { %2184 = vmatpush.bf16.msra.mxu3 %v10801_v6  ;;  %v10556_v6 = vld [vmem:[%s14981_s16 + $0x380] sm:$0xf] }
 0x163   : > { %v2082_v14 = vpop.f32.mrf.mxu3  ;;  %2159 = vmatpush.bf16.msra.mxu1 %v10653_v41  ;;  %v14711_v41 = vmov 1983009808  }
 0x164   : > { %v15334_v15 = vadd.f32 %v2082_v14, %v2068_v13  ;;  %v13364_v13 = vld [vmem:[%s14981_s16 + $0x504] sm:$0xf]  ;;  %v10750_v14 = vld [vmem:[%s14981_s16 + $0x530] sm:$0xf0] }
 0x166   : > { %v2798_v16 = vrot.slane %v15334_v15, 4  ;;  %v15339_v17 = vsel %vm2350_vm0, %v15334_v15, %v2800_v12  ;;  %v10366_v12 = vld [vmem:[%s14981_s16 + $0x230] sm:$0xf0] }
 0x167   : > { %v10369_v20 = vor.u32 %v13268_v7, %v10366_v12  ;;  %v13244_v12 = vld [vmem:[%s14981_s16 + $0x144] sm:$0xf] }
 0x168   : > { %v15343_v18 = vsel %vm2350_vm0, %v2798_v16, %v15327_v10 }
 0x169   : > { %2171 = vmatpush.bf16.msra.mxu2 %v10369_v20  ;;  %v10654_v20 = vld [vmem:[%s14981_s16 + $0x470] sm:$0xf0] }
 0x16d   : > { %2172 = vmatpush.bf16.msra.mxu2 %v10321_v55  ;;  %v13383_v55 = vld [vmem:[%s14981_s16 + $0x594] sm:$0xf0] }
 0x171   : > { %v2094_v31 = vpop.f32.mrf.mxu0 }
 0x172   : > { %v2108_v38 = vpop.f32.mrf.mxu1 }
 0x173   : > { %v2109_v51 = vadd.f32 %v2108_v38, %v2094_v31  ;;  %v10753_v31 = vor.u32 %v13364_v13, %v10750_v14  ;;  %v10269_v38 = vor.u32 %v13250_v24, %v10268_v23  ;;  %v10270_v13 = vld [vmem:[%s14981_s16 + $0x170] sm:$0xf0]  ;;  %v13214_v23 = vld [vmem:[%s14981_s16 + $0x4c] sm:$0xf0]  ;;  %v10508_v24 = vld [vmem:[%s14981_s16 + $0x320] sm:$0xf] }
 0x175   : > { %v2488_v2 = vrot.slane %v2109_v51, 4  ;;  %2185 = vmatpush.bf16.msra.mxu3 %v10753_v31  ;;  %2145 = vmatpush.bf16.msra.mxu0 %v10269_v38  ;;  %v14124_v49 = vpack.i.bf16 %v15317_v0, %v2109_v51  ;;  %v10220_v0 = vld [vmem:[%s14981_s16 + $0xe0] sm:$0xf]  ;;  %v10606_v38 = vld [vmem:[%s14981_s16 + $0x410] sm:$0xf0] }
 0x178   : > { %v2122_v9 = vpop.f32.mrf.mxu2 }
 0x179   : > { %v2136_v16 = vpop.f32.mrf.mxu3  ;;  %v2096_v25 = vpop.f32.mrf.mxu0 }
 0x17a   : > { %v2137_v21 = vadd.f32 %v2136_v16, %v2122_v9  ;;  %v2110_v27 = vpop.f32.mrf.mxu1  ;;  %v13322_v9 = vld [vmem:[%s14981_s16 + $0x3ac] sm:$0xf0]  ;;  %v10273_v16 = vor.u32 %v13244_v12, %v10270_v13  ;;  %v10126_v12 = vld [vmem:[%s14981_s16 + $0x50] sm:$0xf0]  ;;  %v13304_v13 = vld [vmem:[%s14981_s16 + $0x324] sm:$0xf] }
 0x17b   : > { %v2111_v40 = vadd.f32 %v2110_v27, %v2096_v25  ;;  %v10557_v14 = vor.u32 %v13322_v9, %v10556_v6  ;;  %v10125_v25 = vor.u32 %v13214_v23, %v10124_v22  ;;  %v13310_v27 = vld [vmem:[%s14981_s16 + $0x34c] sm:$0xf0]  ;;  %v10756_v22 = vld [vmem:[%s14981_s16 + $0x508] sm:$0xf]  ;;  %v13371_v23 = vld [vmem:[%s14981_s16 + $0x534] sm:$0xf0] }
 0x17c   : > { %v2486_v32 = vrot.slane %v2137_v21, 4  ;;  %v15378_v33 = vsel %vm2350_vm0, %v2137_v21, %v2488_v2  ;;  %v14119_v35 = vpack.i.bf16 %v15320_v5, %v2137_v21  ;;  %v10172_v2 = vld [vmem:[%s14981_s16 + $0x80] sm:$0xf]  ;;  %v10657_v21 = vor.u32 %v13340_v19, %v10654_v20  ;;  %2173 = vmatpush.bf16.msra.mxu2 %v10273_v16  ;;  %v10372_v16 = vld [vmem:[%s14981_s16 + $0x208] sm:$0xf] }
 0x17d   : > { %v2824_v42 = vrot.slane %v2111_v40, 4  ;;  %v14144_v54 = vpack.i.bf16 %v15327_v10, %v2111_v40  ;;  %v13352_v10 = vld [vmem:[%s14981_s16 + $0x4a4] sm:$0xf]  ;;  %v10173_v7 = vor.u32 %v13226_v4, %v10172_v2  ;;  %v10509_v31 = vor.u32 %v13310_v27, %v10508_v24  ;;  %v13275_v19 = vld [vmem:[%s14981_s16 + $0x234] sm:$0xf0] }
 0x17e   : > { %v15382_v39 = vsel %vm2350_vm0, %v2486_v32, %v2109_v51  ;;  %14120 = vrot.lane.b32.xlu0 %v14119_v35, %s14710_s22  ;;  %v10604_v51 = vld [vmem:[%s14981_s16 + $0x3e0] sm:$0xf]  ;;  %v10705_v1 = vor.u32 %v13352_v10, %v10702_v63  ;;  %v10225_v32 = vor.u32 %v13232_v28, %v10222_v29  ;;  %v13328_v35 = vld [vmem:[%s14981_s16 + $0x3e4] sm:$0xf]  ;;  %v13293_v24 = vld [vmem:[%s14981_s16 + $0x2cc] sm:$0xf] }
 0x17f   : > { %v10605_v34 = vor.u32 %v13334_v58, %v10604_v51  ;;  %v10558_v51 = vld [vmem:[%s14981_s16 + $0x3b0] sm:$0xf0]  ;;  %v13287_v58 = vld [vmem:[%s14981_s16 + $0x294] sm:$0xf0]  ;;  %v13389_v27 = vld [vmem:[%s14981_s16 + $0x5cc] sm:$0xf] }
 0x180   : > { %v2124_v43 = vpop.f32.mrf.mxu2  ;;  %2186 = vmatpush.bf16.msra.mxu3 %v10705_v1  ;;  %2174 = vmatpush.bf16.msra.mxu2 %v10225_v32  ;;  %v10854_v28 = vld [vmem:[%s14981_s16 + $0x5f8] sm:$0xf0] }
 0x181   : > { %v2138_v44 = vpop.f32.mrf.mxu3  ;;  %2160 = vmatpush.bf16.msra.mxu1 %v10605_v34  ;;  %v10804_v34 = vld [vmem:[%s14981_s16 + $0x568] sm:$0xf]  ;;  %v10857_v32 = vor.u32 %v13389_v27, %v10854_v28  ;;  %v10326_v27 = vld [vmem:[%s14981_s16 + $0x1d8] sm:$0xf0]  ;;  %v13353_v28 = vld [vmem:[%s14981_s16 + $0x4ac] sm:$0xf] }
 0x182   : > { %v2139_v5 = vadd.f32 %v2138_v44, %v2124_v43  ;;  %v10609_v43 = vor.u32 %v13328_v35, %v10606_v38  ;;  %v13299_v44 = vld [vmem:[%s14981_s16 + $0x2f4] sm:$0xf0]  ;;  %v10805_v63 = vor.u32 %v13383_v55, %v10804_v34  ;;  %v10324_v35 = vld [vmem:[%s14981_s16 + $0x1a8] sm:$0xf]  ;;  %v13269_v55 = vld [vmem:[%s14981_s16 + $0x20c] sm:$0xf] }
 0x183   : > { %v13263_v38 = vld [vmem:[%s14981_s16 + $0x1d4] sm:$0xf0] }
 0x184   : > { %v2822_v45 = vrot.slane %v2139_v5, 4  ;;  %v15386_v46 = vsel %vm2350_vm0, %v2139_v5, %v2824_v42  ;;  %v14139_v48 = vpack.i.bf16 %v15334_v15, %v2139_v5  ;;  %v13238_v15 = vld [vmem:[%s14981_s16 + $0x10c] sm:$0xf0]  ;;  %2187 = vmatpush.bf16.msra.mxu3 %v10657_v21  ;;  %v2355_v42 = vunpack.c.l.s4 %v14711_v41  ;;  %v10852_v5 = vld [vmem:[%s14981_s16 + $0x5c8] sm:$0xf] }
 0x185   : > { %v10221_v56 = vor.u32 %v13238_v15, %v10220_v0  ;;  %2161 = vmatpush.bf16.msra.mxu1 %v10557_v14  ;;  %v13316_v0 = vld [vmem:[%s14981_s16 + $0x384] sm:$0xf]  ;;  %v10373_v21 = vor.u32 %v13275_v19, %v10372_v16  ;;  %v10325_v41 = vor.u32 %v13263_v38, %v10324_v35  ;;  %v10228_v16 = vld [vmem:[%s14981_s16 + $0xe8] sm:$0xf]  ;;  %v13227_v38 = vld [vmem:[%s14981_s16 + $0xb4] sm:$0xf0] }
 0x186   : > { %v15391_v52 = vsel %vm2350_vm0, %v2822_v45, %v2111_v40  ;;  %14140 = vrot.lane.b32.xlu2 %v14139_v48, %s14710_s22  ;;  %14125 = vrot.lane.b32.xlu0 %v14124_v49, %s14710_s22  ;;  %v10468_v40 = vld [vmem:[%s14981_s16 + $0x2c8] sm:$0xf]  ;;  %v13395_v45 = vld [vmem:[%s14981_s16 + $0x5f4] sm:$0xf0]  ;;  %v10561_v61 = vor.u32 %v13316_v0, %v10558_v51  ;;  %v15436_v10 = vunpack.c.0.s8 %v2355_v42 }
 0x187   : > { %2146 = vmatpush.bf16.msra.mxu0 %v10221_v56  ;;  %v10469_v48 = vor.u32 %v13299_v44, %v10468_v40  ;;  %v10853_v49 = vor.u32 %v13395_v45, %v10852_v5  ;;  %v10420_v56 = vld [vmem:[%s14981_s16 + $0x268] sm:$0xf]  ;;  %v13359_v42 = vld [vmem:[%s14981_s16 + $0x4d4] sm:$0xf0]  ;;  %v10422_v44 = vld [vmem:[%s14981_s16 + $0x298] sm:$0xf0] }
 0x188   : > { %2188 = vmatpush.bf16.msra.mxu3 %v10609_v43  ;;  %v10421_v62 = vor.u32 %v13287_v58, %v10420_v56  ;;  %v15442_v1 = vperm.slane %v15286_v30, %v15436_v10  ;;  %v15446_v2 = vperm.slane %v15283_v26, %v15436_v10  ;;  %v15450_v4 = vperm.slane %v15299_v47, %v15436_v10  ;;  %v13208_v26 = vld [vmem:[%s14981_s16 + $0x24] sm:$0xf]  ;;  %v10510_v47 = vld [vmem:[%s14981_s16 + $0x350] sm:$0xf0]  ;;  %v10708_v40 = vld [vmem:[%s14981_s16 + $0x4a8] sm:$0xf] }
 0x189   : > { %2162 = vmatpush.bf16.msra.mxu1 %v10509_v31  ;;  %v15457_v30 = vperm.slane %v15302_v50, %v15436_v10  ;;  %v10129_v14 = vor.u32 %v13208_v26, %v10126_v12  ;;  %v10513_v20 = vor.u32 %v13304_v13, %v10510_v47  ;;  %v10757_v50 = vor.u32 %v13371_v23, %v10756_v22  ;;  %v13281_v43 = vld [vmem:[%s14981_s16 + $0x26c] sm:$0xf]  ;;  %v13251_v56 = vld [vmem:[%s14981_s16 + $0x174] sm:$0xf0]  ;;  %v10660_v58 = vld [vmem:[%s14981_s16 + $0x448] sm:$0xf] }
 0x18a   : > { %v2400_v6 = vrot.slane %v15442_v1, 4  ;;  %v2436_v9 = vrot.slane %v15450_v4, 4  ;;  %v10709_v45 = vor.u32 %v13359_v42, %v10708_v40  ;;  %v13365_v26 = vld [vmem:[%s14981_s16 + $0x50c] sm:$0xf]  ;;  %v10758_v47 = vld [vmem:[%s14981_s16 + $0x538] sm:$0xf0] }
 0x18b   : > { %2147 = vmatpush.bf16.msra.mxu0 %v10173_v7  ;;  %v2412_v7 = vrot.slane %v15446_v2, 4  ;;  %v2424_v29 = vrot.slane %v15457_v30, 4  ;;  %v10761_v19 = vor.u32 %v13365_v26, %v10758_v47  ;;  %v13335_v22 = vld [vmem:[%s14981_s16 + $0x414] sm:$0xf0]  ;;  %v14712_v23 = vmov 1934713408  }
 0x18c   : > { %2163 = vmatmul.bf16.vlgmr.msra.gmra.mxu1 %v15091_v3  ;;  %2189 = vmatpush.bf16.msra.mxu3 %v10561_v61  ;;  %v13347_v61 = vld [vmem:[%s14981_s16 + $0x474] sm:$0xf0]  ;;  %v10180_v35 = vld [vmem:[%s14981_s16 + $0x88] sm:$0xf] }
 0x18d   : > { %2211 = vmatpush.bf16.msrb.mxu1 %v10853_v49  ;;  %v13377_v49 = vld [vmem:[%s14981_s16 + $0x56c] sm:$0xf]  ;;  %v10661_v34 = vor.u32 %v13347_v61, %v10660_v58  ;;  %v10564_v42 = vld [vmem:[%s14981_s16 + $0x388] sm:$0xf]  ;;  %v10181_v58 = vor.u32 %v13227_v38, %v10180_v35  ;;  %v13311_v47 = vld [vmem:[%s14981_s16 + $0x354] sm:$0xf0] }
 0x18e   : > { %14150 = vrot.lane.b32.xlu0 %v14149_v53, %s14710_s22  ;;  %14145 = vrot.lane.b32.xlu2 %v14144_v54, %s14710_s22  ;;  %v13220_v53 = vld [vmem:[%s14981_s16 + $0x84] sm:$0xf]  ;;  %v10174_v54 = vld [vmem:[%s14981_s16 + $0xb0] sm:$0xf0] }
 0x18f   : > { %2148 = vmatpush.bf16.msra.mxu0 %v10125_v25  ;;  %v10177_v15 = vor.u32 %v13220_v53, %v10174_v54  ;;  %v10470_v25 = vld [vmem:[%s14981_s16 + $0x2f8] sm:$0xf0]  ;;  %v10276_v54 = vld [vmem:[%s14981_s16 + $0x148] sm:$0xf]  ;;  %v13317_v38 = vld [vmem:[%s14981_s16 + $0x38c] sm:$0xf] }
 0x190   : > { %2190 = vmatpush.bf16.msra.mxu3 %v10513_v20  ;;  %v10473_v31 = vor.u32 %v13293_v24, %v10470_v25  ;;  %v10806_v53 = vld [vmem:[%s14981_s16 + $0x598] sm:$0xf0]  ;;  %v13239_v20 = vld [vmem:[%s14981_s16 + $0x114] sm:$0xf0]  ;;  %v2403_v24 = vunpack.c.l.s4 %v14712_v23  ;;  %v13257_v25 = vld [vmem:[%s14981_s16 + $0x1ac] sm:$0xf] }
 0x191   : > { %2175 = vmatpush.bf16.msra.mxu2 %v10177_v15  ;;  %2212 = vmatpush.bf16.msrb.mxu1 %v10805_v63  ;;  %v10809_v51 = vor.u32 %v13377_v49, %v10806_v53  ;;  %v10374_v63 = vld [vmem:[%s14981_s16 + $0x238] sm:$0xf0]  ;;  %v10329_v40 = vor.u32 %v13257_v25, %v10326_v27  ;;  %v13341_v49 = vld [vmem:[%s14981_s16 + $0x44c] sm:$0xf]  ;;  %v10132_v61 = vld [vmem:[%s14981_s16 + $0x28] sm:$0xf] }
 0x192   : > { %2149 = vmatmul.bf16.vlgmr.msra.gmra.mxu0 %v15086_v60  ;;  %v10662_v53 = vld [vmem:[%s14981_s16 + $0x478] sm:$0xf0] }
 0x193   : > { %2197 = vmatpush.bf16.msrb.mxu0 %v10469_v48  ;;  %v10425_v48 = vor.u32 %v13281_v43, %v10422_v44  ;;  %2191 = vmatmul.bf16.vlgmr.msra.gmra.mxu3 %v15091_v3  ;;  %v13323_v43 = vld [vmem:[%s14981_s16 + $0x3b4] sm:$0xf0]  ;;  %v13245_v44 = vld [vmem:[%s14981_s16 + $0x14c] sm:$0xf]  ;;  %v10665_v26 = vor.u32 %v13341_v49, %v10662_v53  ;;  %v10182_v35 = vld [vmem:[%s14981_s16 + $0xb8] sm:$0xf0] }
 0x194   : > { %2239 = vmatpush.bf16.msrb.mxu3 %v10857_v32  ;;  %v10710_v32 = vld [vmem:[%s14981_s16 + $0x4d8] sm:$0xf0] }
 0x195   : > { %2176 = vmatpush.bf16.msra.mxu2 %v10129_v14  ;;  %2213 = vmatpush.bf16.msrb.mxu1 %v10757_v50  ;;  %v10377_v14 = vor.u32 %v13269_v55, %v10374_v63  ;;  %v10229_v50 = vor.u32 %v13239_v20, %v10228_v16  ;;  %v10565_v55 = vor.u32 %v13323_v43, %v10564_v42  ;;  %v13233_v16 = vld [vmem:[%s14981_s16 + $0xec] sm:$0xf]  ;;  %v10566_v42 = vld [vmem:[%s14981_s16 + $0x3b8] sm:$0xf0] }
 0x197   : > { %2198 = vmatpush.bf16.msrb.mxu0 %v10421_v62  ;;  %v10277_v62 = vor.u32 %v13251_v56, %v10276_v54  ;;  %v15514_v54 = vunpack.c.0.s8 %v2403_v24  ;;  %v13329_v24 = vld [vmem:[%s14981_s16 + $0x3ec] sm:$0xf] }
 0x198   : > { %2177 = vmatmul.bf16.vlgmr.msra.gmra.mxu2 %v15086_v60  ;;  %2240 = vmatpush.bf16.msrb.mxu3 %v10809_v51 }
 0x199   : > { %2225 = vmatpush.bf16.msrb.mxu2 %v10473_v31  ;;  %2214 = vmatpush.bf16.msrb.mxu1 %v10709_v45 }
 0x19b   : > { %2199 = vmatpush.bf16.msrb.mxu0 %v10373_v21  ;;  %v10612_v21 = vld [vmem:[%s14981_s16 + $0x3e8] sm:$0xf] }
 0x19c   : > { %v10613_v31 = vor.u32 %v13335_v22, %v10612_v21  ;;  %2241 = vmatpush.bf16.msrb.mxu3 %v10761_v19  ;;  %v10230_v19 = vld [vmem:[%s14981_s16 + $0x118] sm:$0xf0] }
 0x19d   : > { %2226 = vmatpush.bf16.msrb.mxu2 %v10425_v48  ;;  %2215 = vmatpush.bf16.msrb.mxu1 %v10661_v34  ;;  %v10278_v48 = vld [vmem:[%s14981_s16 + $0x178] sm:$0xf0]  ;;  %v10516_v34 = vld [vmem:[%s14981_s16 + $0x328] sm:$0xf] }
 0x19e   : > { %v10281_v63 = vor.u32 %v13245_v44, %v10278_v48 }
 0x19f   : > { %2200 = vmatpush.bf16.msrb.mxu0 %v10325_v41  ;;  %v10713_v41 = vor.u32 %v13353_v28, %v10710_v32  ;;  %v10517_v28 = vor.u32 %v13311_v47, %v10516_v34  ;;  %v13221_v32 = vld [vmem:[%s14981_s16 + $0x8c] sm:$0xf] }
 0x1a1   : > { %2227 = vmatpush.bf16.msrb.mxu2 %v10377_v14  ;;  %2216 = vmatpush.bf16.msrb.mxu1 %v10613_v31  ;;  %v10233_v31 = vor.u32 %v13233_v16, %v10230_v19 }
 0x1a2   : > { %2242 = vmatpush.bf16.msrb.mxu3 %v10713_v41  ;;  %v10185_v41 = vor.u32 %v13221_v32, %v10182_v35 }
 0x1a3   : > { %2201 = vmatpush.bf16.msrb.mxu0 %v10277_v62  ;;  %v13215_v62 = vld [vmem:[%s14981_s16 + $0x54] sm:$0xf0] }
 0x1a4   : > { %v10133_v14 = vor.u32 %v13215_v62, %v10132_v61 }
 0x1a5   : > { %2228 = vmatpush.bf16.msrb.mxu2 %v10329_v40  ;;  %2217 = vmatpush.bf16.msrb.mxu1 %v10565_v55 }
 0x1a6   : > { %2243 = vmatpush.bf16.msrb.mxu3 %v10665_v26 }
 0x1a7   : > { %2202 = vmatpush.bf16.msrb.mxu0 %v10229_v50  ;;  %v10614_v50 = vld [vmem:[%s14981_s16 + $0x418] sm:$0xf0] }
 0x1a8   : > { %v10617_v40 = vor.u32 %v13329_v24, %v10614_v50 }
 0x1a9   : > { %2229 = vmatpush.bf16.msrb.mxu2 %v10281_v63  ;;  %2218 = vmatpush.bf16.msrb.mxu1 %v10517_v28 }
 0x1aa   : > { %2244 = vmatpush.bf16.msrb.mxu3 %v10617_v40 }
 0x1ab   : > { %2203 = vmatpush.bf16.msrb.mxu0 %v10181_v58 }
 0x1ac   : > { %2219 = vmatmul.bf16.vlgmr.msrb.gmra.mxu1 %v15091_v3 }
 0x1ad   : > { %2230 = vmatpush.bf16.msrb.mxu2 %v10233_v31 }
 0x1af   : > { %2204 = vmatpush.bf16.msrb.mxu0 %v10133_v14 }
 0x1b1   : > { %2231 = vmatpush.bf16.msrb.mxu2 %v10185_v41  ;;  %v10518_v41 = vld [vmem:[%s14981_s16 + $0x358] sm:$0xf0] }
 0x1b2   : > { %v15478_v5 = vpop.permute.xlu1 %14130  ;;  %2205 = vmatmul.bf16.vlgmr.msrb.gmra.mxu0 %v15086_v60 }
 0x1b3   : > { %v14133_v0 = vunpack.i.h.bf16 %v15478_v5  ;;  %v14132_v15 = vunpack.i.l.bf16 %v15478_v5 }
 0x1b5   : > { %v2362_v12 = vrot.slane %v14133_v0, 4  ;;  %v2386_v13 = vrot.slane %v14132_v15, 4 }
 0x1ba   : > { %v14136_v45 = vpop.permute.xlu1 %14135 }
 0x1bb   : > { %v14138_v51 = vunpack.i.h.bf16 %v14136_v45  ;;  %v14137_v56 = vunpack.i.l.bf16 %v14136_v45 }
 0x1bd   : > { %v2363_v20 = vsel %vm2350_vm0, %v2362_v12, %v14138_v51  ;;  %v2364_v21 = vrot.slane %v14138_v51, 4  ;;  %v2387_v22 = vsel %vm2350_vm0, %v2386_v13, %v14137_v56  ;;  %v2388_v23 = vrot.slane %v14137_v56, 4 }
 0x1be   : > { %v2369_v25 = vperm.slane %v2363_v20, %v15436_v10  ;;  %v2393_v27 = vperm.slane %v2387_v22, %v15436_v10 }
 0x1bf   : > { %v2365_v12 = vsel %vm2350_vm0, %v14133_v0, %v2364_v21  ;;  %v2389_v13 = vsel %vm2350_vm0, %v14132_v15, %v2388_v23  ;;  %v10569_v15 = vor.u32 %v13317_v38, %v10566_v42  ;;  %v13209_v42 = vld [vmem:[%s14981_s16 + $0x2c] sm:$0xf] }
 0x1c0   : > { %v2373_v43 = vperm.slane %v2365_v12, %v15436_v10  ;;  %v2398_v44 = vrot.slane %v2369_v25, 4  ;;  %v2401_v45 = vsel %vm2350_vm0, %v2369_v25, %v2400_v6  ;;  %v2397_v48 = vperm.slane %v2389_v13, %v15436_v10 }
 0x1c1   : > { %v2409_v0 = vperm.slane %v2401_v45, %v15514_v54  ;;  %v2422_v49 = vrot.slane %v2393_v27, 4  ;;  %v2425_v5 = vsel %vm2350_vm0, %v2393_v27, %v2424_v29  ;;  %2245 = vmatpush.bf16.msrb.mxu3 %v10569_v15 }
 0x1c2   : > { %v2399_v53 = vsel %vm2350_vm0, %v2398_v44, %v15442_v1  ;;  %v2410_v51 = vrot.slane %v2373_v43, 4  ;;  %v2413_v6 = vsel %vm2350_vm0, %v2373_v43, %v2412_v7  ;;  %v2433_v56 = vperm.slane %v2425_v5, %v15514_v54  ;;  %v10134_v43 = vld [vmem:[%s14981_s16 + $0x58] sm:$0xf0] }
 0x1c3   : > { %v2405_v58 = vperm.slane %v2399_v53, %v15514_v54  ;;  %v2421_v61 = vperm.slane %v2413_v6, %v15514_v54  ;;  %v2452_v62 = vrot.slane %v2409_v0, 4  ;;  %v2423_v29 = vsel %vm2350_vm0, %v2422_v49, %v15457_v30  ;;  %v13305_v49 = vld [vmem:[%s14981_s16 + $0x32c] sm:$0xf]  ;;  %s18660_s16 = sld [smem:[#allocation37_spill]] }
 0x1c4   : > { %v2411_v34 = vsel %vm2350_vm0, %v2410_v51, %v15446_v2  ;;  %v2429_v1 = vperm.slane %v2423_v29, %v15514_v54  ;;  %v2434_v55 = vrot.slane %v2397_v48, 4  ;;  %v2437_v7 = vsel %vm2350_vm0, %v2397_v48, %v2436_v9 }
 0x1c5   : > { %v2417_v63 = vperm.slane %v2411_v34, %v15514_v54  ;;  %v2448_v26 = vrot.slane %v2405_v58, 4  ;;  %v2460_v47 = vrot.slane %v2421_v61, 4  ;;  %v2445_v16 = vperm.slane %v2437_v7, %v15514_v54 }
 0x1c6   : > { %v2435_v30 = vsel %vm2350_vm0, %v2434_v55, %v15450_v4  ;;  %v2446_v2 = vrot.slane %v2429_v1, 4  ;;  %v2450_v14 = vrot.slane %v2433_v56, 4  ;;  %v2453_v19 = vsel %vm2350_vm0, %v2433_v56, %v2452_v62 }
 0x1c7   : > { %v2456_v20 = vrot.slane %v2417_v63, 4  ;;  %v2441_v9 = vperm.slane %v2435_v30, %v15514_v54  ;;  %v2449_v21 = vsel %vm2350_vm0, %v2429_v1, %v2448_v26  ;;  %v2458_v22 = vrot.slane %v2445_v16, 4 }
 0x1c8   : > { %v2447_v23 = vsel %vm2350_vm0, %v2446_v2, %v2405_v58  ;;  %v2451_v24 = vsel %vm2350_vm0, %v2450_v14, %v2409_v0  ;;  %v2461_v4 = vsel %vm2350_vm0, %v2445_v16, %v2460_v47  ;;  %v3034_v50 = vrot.slane %v2453_v19, 4 }
 0x1c9   : > { %v2454_v25 = vrot.slane %v2441_v9, 4  ;;  %v2457_v27 = vsel %vm2350_vm0, %v2441_v9, %v2456_v20  ;;  %v2459_v28 = vsel %vm2350_vm0, %v2458_v22, %v2421_v61  ;;  %v3022_v31 = vrot.slane %v2451_v24, 4  ;;  %s9786_s26 = scalar_lea.hbm %s18660_s16, %s13972_s24 }
 0x1ca   : > { %v3024_v32 = vrot.slane %v2447_v23, 4  ;;  %v3035_v35 = vsel %vm2350_vm0, %v3034_v50, %v2449_v21  ;;  %v3036_v38 = vrot.slane %v2449_v21, 4  ;;  %v3058_v40 = vrot.slane %v2461_v4, 4  ;;  %s9789_s17 = sshll.u32 %s9786_s26, 4  ;;  %s9790_s17 = int_to_ptr.hbm [resolvable:$true] %s9789_s17 }
 0x1cb   : > { %v2455_v12 = vsel %vm2350_vm0, %v2454_v25, %v2417_v63  ;;  %v3023_v13 = vsel %vm2350_vm0, %v3022_v31, %v2447_v23  ;;  %v3046_v48 = vrot.slane %v2459_v28, 4  ;;  %v3041_v15 = vperm.slane %v3035_v35, %v15436_v10 }
 0x1cc   : > { %v3025_v44 = vsel %vm2350_vm0, %v2451_v24, %v3024_v32  ;;  %v3037_v45 = vsel %vm2350_vm0, %v2453_v19, %v3036_v38  ;;  %v3048_v0 = vrot.slane %v2455_v12, 4  ;;  %v3029_v5 = vperm.slane %v3023_v13, %v15436_v10 }
 0x1cd   : > { %v3059_v53 = vsel %vm2350_vm0, %v3058_v40, %v2457_v27  ;;  %v3060_v51 = vrot.slane %v2457_v27, 4  ;;  %v10137_v56 = vor.u32 %v13209_v42, %v10134_v43  ;;  %v10521_v61 = vor.u32 %v13305_v49, %v10518_v41 }
 0x1ce   : > { %v15590_v6 = vsel %vm2350_vm0, %v2459_v28, %v3048_v0  ;;  %v3047_v62 = vsel %vm2350_vm0, %v3046_v48, %v2455_v12  ;;  %v3065_v34 = vperm.slane %v3059_v53, %v15436_v10  ;;  %v3070_v1 = vrot.slane %v3041_v15, 4 }
 0x1cf   : > { %v3061_v58 = vsel %vm2350_vm0, %v2461_v4, %v3060_v51  ;;  %2232 = vmatpush.bf16.msrb.mxu2 %v10137_v56  ;;  %2246 = vmatpush.bf16.msrb.mxu3 %v10521_v61  ;;  %v3053_v29 = vperm.slane %v3047_v62, %v15436_v10  ;;  %v3072_v55 = vrot.slane %v3029_v5, 4  ;;  %v15626_v22 = vperm.slane %v15296_v37, %v15436_v10 }
 0x1d0   : > { %v3071_v7 = vsel %vm2350_vm0, %v3070_v1, %v3029_v5  ;;  %v3094_v63 = vrot.slane %v3065_v34, 4  ;;  %v15630_v23 = vperm.slane %v15293_v36, %v15436_v10  ;;  %v15634_v24 = vperm.slane %v15310_v57, %v15436_v10  ;;  %v15653_v57 = vpop.permute.xlu1 %14155 }
 0x1d1   : > { %v3073_v26 = vsel %vm2350_vm0, %v3041_v15, %v3072_v55  ;;  %v3096_v47 = vrot.slane %v3053_v29, 4  ;;  %v15601_v16 = vperm.slane %v3071_v7, %v15514_v54  ;;  %v15638_v4 = vperm.slane %v15313_v59, %v15436_v10 }
 0x1d2   : > { %2233 = vmatmul.bf16.vlgmr.msrb.gmra.mxu2 %v15086_v60  ;;  %2247 = vmatmul.bf16.vlgmr.msrb.gmra.mxu3 %v15091_v3  ;;  %v15604_v30 = vperm.slane %v3073_v26, %v15514_v54  ;;  %v3095_v2 = vsel %vm2350_vm0, %v3094_v63, %v3053_v29  ;;  %v15641_v50 = vperm.slane %v3037_v45, %v15436_v10  ;;  %v2736_v25 = vrot.slane %v15626_v22, 4 }
 0x1d3   : > { %v3097_v14 = vsel %vm2350_vm0, %v3065_v34, %v3096_v47  ;;  %v15609_v60 = vperm.slane %v3095_v2, %v15514_v54  ;;  %v3120_v19 = vrot.slane %v15601_v16, 4  ;;  %v2748_v37 = vrot.slane %v15630_v23, 4 }
 0x1d4   : > { %v15613_v20 = vperm.slane %v3097_v14, %v15514_v54  ;;  %v3124_v3 = vrot.slane %v15604_v30, 4  ;;  %v15647_v27 = vperm.slane %v15331_v11, %v15436_v10  ;;  %v15651_v36 = vperm.slane %v15325_v8, %v15436_v10 }
 0x1d5   : > { %v15618_v9 = vsel %vm2350_vm0, %v15609_v60, %v3120_v19  ;;  %v2772_v59 = vrot.slane %v15634_v24, 4  ;;  %v2805_v31 = vperm.slane %v15343_v18, %v15436_v10  ;;  %v15660_v32 = vperm.slane %v15339_v17, %v15436_v10 }
 0x1d6   : > { %v15622_v21 = vsel %vm2350_vm0, %v15613_v20, %v3124_v3  ;;  %v15664_v11 = vperm.slane %v15378_v33, %v15436_v10  ;;  %v15668_v8 = vperm.slane %v15382_v39, %v15436_v10  ;;  %v15672_v35 = vperm.slane %v15391_v52, %v15436_v10 }
 0x1d7   : > { %v15676_v38 = vperm.slane %v15386_v46, %v15436_v10  ;;  %v15679_v18 = vperm.slane %v3025_v44, %v15436_v10  ;;  %v2760_v17 = vrot.slane %v15638_v4, 4  ;;  %v15683_v33 = vperm.slane %v3061_v58, %v15436_v10 }
 0x1d8   : > { %v3082_v12 = vrot.slane %v15641_v50, 4  ;;  %v14158_v39 = vunpack.i.h.bf16 %v15653_v57  ;;  %v2512_v13 = vrot.slane %v15647_v27, 4  ;;  %v2524_v52 = vrot.slane %v15651_v36, 4 }
 0x1d9   : > { %v14157_v40 = vunpack.i.l.bf16 %v15653_v57  ;;  %v2848_v42 = vrot.slane %v2805_v31, 4  ;;  %v2860_v43 = vrot.slane %v15660_v32, 4  ;;  %v2548_v44 = vrot.slane %v15664_v11, 4 }
 0x1da   : > { %v2536_v48 = vrot.slane %v15668_v8, 4  ;;  %v2872_v0 = vrot.slane %v15672_v35, 4  ;;  %v2884_v49 = vrot.slane %v15676_v38, 4  ;;  %v15698_v5 = vrot.slane %v14158_v39, 4 }
 0x1db   : > { %v15702_v15 = vperm.slane %v15590_v6, %v15436_v10  ;;  %v3083_v53 = vsel %vm2350_vm0, %v3082_v12, %v15679_v18  ;;  %v3106_v51 = vrot.slane %v15683_v33, 4  ;;  %v15709_v56 = vrot.slane %v14157_v40, 4 }
 0x1dc   : > { %v15714_v29 = vperm.slane %v3083_v53, %v15514_v54  ;;  %v3118_v7 = vrot.slane %v15609_v60, 4  ;;  %v3122_v63 = vrot.slane %v15613_v20, 4 }
 0x1dd   : > { %v3107_v55 = vsel %vm2350_vm0, %v3106_v51, %v15702_v15 }
 0x1de   : > { %v15721_v26 = vperm.slane %v3107_v55, %v15514_v54  ;;  %v3128_v47 = vrot.slane %v15714_v29, 4  ;;  %v15730_v60 = vsel %vm2350_vm0, %v3118_v7, %v15601_v16  ;;  %v15734_v20 = vsel %vm2350_vm0, %v3122_v63, %v15604_v30 }
 0x1e0   : > { %v14141_v28 = vpop.permute.xlu2 %14140 }
 0x1e1   : > { %v14143_v46 = vunpack.i.h.bf16 %v14141_v28  ;;  %v14142_v45 = vunpack.i.l.bf16 %v14141_v28 }
 0x1e3   : > { %v2810_v58 = vrot.slane %v14143_v46, 4  ;;  %v2834_v34 = vrot.slane %v14142_v45, 4 }
 0x1e8   : > { %v14146_v61 = vpop.permute.xlu2 %14145 }
 0x1e9   : > { %v14148_v6 = vunpack.i.h.bf16 %v14146_v61  ;;  %v14147_v1 = vunpack.i.l.bf16 %v14146_v61 }
 0x1eb   : > { %v2811_v2 = vsel %vm2350_vm0, %v2810_v58, %v14148_v6  ;;  %v2812_v14 = vrot.slane %v14148_v6, 4  ;;  %v2835_v19 = vsel %vm2350_vm0, %v2834_v34, %v14147_v1  ;;  %v2836_v3 = vrot.slane %v14147_v1, 4 }
 0x1ec   : > { %v2817_v28 = vperm.slane %v2811_v2, %v15436_v10  ;;  %v2841_v12 = vperm.slane %v2835_v19, %v15436_v10 }
 0x1ed   : > { %v2813_v53 = vsel %vm2350_vm0, %v14143_v46, %v2812_v14  ;;  %v2837_v51 = vsel %vm2350_vm0, %v14142_v45, %v2836_v3  ;;  %v15749_v45 = vsel %vm2350_vm0, %v15721_v26, %v3128_v47 }
 0x1ee   : > { %v2821_v34 = vperm.slane %v2813_v53, %v15436_v10  ;;  %v2846_v6 = vrot.slane %v2817_v28, 4  ;;  %v2845_v16 = vperm.slane %v2837_v51, %v15436_v10  ;;  %v2849_v1 = vsel %vm2350_vm0, %v2817_v28, %v2848_v42 }
 0x1ef   : > { %v2857_v30 = vperm.slane %v2849_v1, %v15514_v54  ;;  %v2870_v55 = vrot.slane %v2841_v12, 4  ;;  %v2873_v46 = vsel %vm2350_vm0, %v2841_v12, %v2872_v0 }
 0x1f0   : > { %v2858_v7 = vrot.slane %v2821_v34, 4  ;;  %v2847_v63 = vsel %vm2350_vm0, %v2846_v6, %v2805_v31  ;;  %v2861_v2 = vsel %vm2350_vm0, %v2821_v34, %v2860_v43  ;;  %v2881_v14 = vperm.slane %v2873_v46, %v15514_v54  ;;  %v14121_v19 = vpop.permute.xlu0 %14120 }
 0x1f1   : > { %v2853_v3 = vperm.slane %v2847_v63, %v15514_v54  ;;  %v2869_v42 = vperm.slane %v2861_v2, %v15514_v54  ;;  %v2871_v28 = vsel %vm2350_vm0, %v2870_v55, %v15672_v35  ;;  %v2882_v0 = vrot.slane %v2845_v16, 4 }
 0x1f2   : > { %v2859_v47 = vsel %vm2350_vm0, %v2858_v7, %v15660_v32  ;;  %v2877_v12 = vperm.slane %v2871_v28, %v15514_v54  ;;  %v2885_v31 = vsel %vm2350_vm0, %v2845_v16, %v2884_v49  ;;  %v2898_v53 = vrot.slane %v2881_v14, 4 }
 0x1f3   : > { %v2865_v43 = vperm.slane %v2859_v47, %v15514_v54  ;;  %v2883_v51 = vsel %vm2350_vm0, %v2882_v0, %v15676_v38  ;;  %v2893_v34 = vperm.slane %v2885_v31, %v15514_v54  ;;  %v2896_v6 = vrot.slane %v2853_v3, 4 }
 0x1f4   : > { %v2889_v1 = vperm.slane %v2883_v51, %v15514_v54  ;;  %v2894_v35 = vrot.slane %v2877_v12, 4  ;;  %v15768_v55 = vsel %vm2350_vm0, %v2898_v53, %v2857_v30  ;;  %v2900_v32 = vrot.slane %v2857_v30, 4 }
 0x1f5   : > { %v2897_v46 = vsel %vm2350_vm0, %v2877_v12, %v2896_v6  ;;  %v2906_v7 = vrot.slane %v2893_v34, 4  ;;  %v2908_v49 = vrot.slane %v2869_v42, 4  ;;  %v2904_v28 = vrot.slane %v2865_v43, 4 }
 0x1f6   : > { %v15774_v63 = vsel %vm2350_vm0, %v2894_v35, %v2853_v3  ;;  %v2901_v38 = vsel %vm2350_vm0, %v2881_v14, %v2900_v32  ;;  %v2902_v2 = vrot.slane %v2889_v1, 4  ;;  %v3470_v30 = vrot.slane %v15768_v55, 4 }
 0x1f7   : > { %v15778_v0 = vsel %vm2350_vm0, %v2906_v7, %v2869_v42  ;;  %v15781_v47 = vsel %vm2350_vm0, %v2893_v34, %v2908_v49  ;;  %v3482_v31 = vrot.slane %v2901_v38, 4  ;;  %v3484_v53 = vrot.slane %v2897_v46, 4 }
 0x1f8   : > { %v3494_v51 = vrot.slane %v15778_v0, 4  ;;  %v14123_v3 = vunpack.i.h.bf16 %v14121_v19  ;;  %v14126_v6 = vpop.permute.xlu0 %14125  ;;  %v14122_v35 = vunpack.i.l.bf16 %v14121_v19  ;;  %v15791_v7 = vsel %vm2350_vm0, %v2902_v2, %v2865_v43 }
 0x1f9   : > { %v14128_v32 = vunpack.i.h.bf16 %v14126_v6  ;;  %v14127_v16 = vunpack.i.l.bf16 %v14126_v6  ;;  %v15788_v42 = vsel %vm2350_vm0, %v2901_v38, %v3484_v53  ;;  %v15794_v49 = vsel %vm2350_vm0, %v2889_v1, %v2904_v28 }
 0x1fa   : > { %v2474_v34 = vrot.slane %v14123_v3, 4  ;;  %v2498_v12 = vrot.slane %v14122_v35, 4  ;;  %v3471_v62 = vsel %vm2350_vm0, %v3470_v30, %v15774_v63  ;;  %v3483_v38 = vsel %vm2350_vm0, %v3482_v31, %v2897_v46 }
 0x1fb   : > { %v2476_v41 = vrot.slane %v14128_v32, 4  ;;  %v2500_v61 = vrot.slane %v14127_v16, 4  ;;  %v15800_v6 = vperm.slane %v3471_v62, %v15436_v10  ;;  %v3495_v43 = vsel %vm2350_vm0, %v3494_v51, %v15791_v7 }
 0x1fc   : > { %v2475_v19 = vsel %vm2350_vm0, %v2474_v34, %v14128_v32  ;;  %v2499_v28 = vsel %vm2350_vm0, %v2498_v12, %v14127_v16  ;;  %v15813_v34 = vperm.slane %v3483_v38, %v15436_v10  ;;  %v15820_v16 = vperm.slane %v3495_v43, %v15436_v10 }
 0x1fd   : > { %v2477_v2 = vsel %vm2350_vm0, %v14123_v3, %v2476_v41  ;;  %v2481_v1 = vperm.slane %v2475_v19, %v15436_v10  ;;  %v2501_v53 = vsel %vm2350_vm0, %v14122_v35, %v2500_v61  ;;  %v2505_v32 = vperm.slane %v2499_v28, %v15436_v10 }
 0x1fe   : > { %v2485_v30 = vperm.slane %v2477_v2, %v15436_v10  ;;  %v2509_v62 = vperm.slane %v2501_v53, %v15436_v10 }
 0x1ff   : > { %v2510_v46 = vrot.slane %v2481_v1, 4  ;;  %v2513_v41 = vsel %vm2350_vm0, %v2481_v1, %v2512_v13  ;;  %v2534_v3 = vrot.slane %v2505_v32, 4  ;;  %v2537_v13 = vsel %vm2350_vm0, %v2505_v32, %v2536_v48 }
 0x200   : > { %v2521_v61 = vperm.slane %v2513_v41, %v15514_v54  ;;  %v2522_v12 = vrot.slane %v2485_v30, 4  ;;  %v2525_v51 = vsel %vm2350_vm0, %v2485_v30, %v2524_v52  ;;  %v2546_v38 = vrot.slane %v2509_v62, 4  ;;  %v14151_v43 = vpop.permute.xlu0 %14150 }
 0x201   : > { %v2511_v35 = vsel %vm2350_vm0, %v2510_v46, %v15647_v27  ;;  %v2533_v19 = vperm.slane %v2525_v51, %v15514_v54  ;;  %v2535_v52 = vsel %vm2350_vm0, %v2534_v3, %v15668_v8  ;;  %v2545_v46 = vperm.slane %v2537_v13, %v15514_v54 }
 0x202   : > { %v2517_v2 = vperm.slane %v2511_v35, %v15514_v54  ;;  %v2523_v1 = vsel %vm2350_vm0, %v2522_v12, %v15651_v36  ;;  %v2564_v28 = vrot.slane %v2521_v61, 4  ;;  %v2541_v30 = vperm.slane %v2535_v52, %v15514_v54 }
 0x203   : > { %v2529_v53 = vperm.slane %v2523_v1, %v15514_v54  ;;  %v2572_v27 = vrot.slane %v2533_v19, 4  ;;  %v2547_v48 = vsel %vm2350_vm0, %v2546_v38, %v15664_v11  ;;  %v2549_v32 = vsel %vm2350_vm0, %v2509_v62, %v2548_v44 }
 0x204   : > { %v2560_v41 = vrot.slane %v2517_v2, 4  ;;  %v14153_v36 = vunpack.i.h.bf16 %v14151_v43  ;;  %v2553_v51 = vperm.slane %v2547_v48, %v15514_v54  ;;  %v2557_v8 = vperm.slane %v2549_v32, %v15514_v54 }
 0x205   : > { %v2568_v12 = vrot.slane %v2529_v53, 4  ;;  %v2558_v3 = vrot.slane %v2541_v30, 4  ;;  %v2562_v1 = vrot.slane %v2545_v46, 4  ;;  %v15851_v13 = vsel %vm2350_vm0, %v2545_v46, %v2564_v28 }
 0x206   : > { %v15848_v35 = vsel %vm2350_vm0, %v2541_v30, %v2560_v41  ;;  %v2698_v52 = vrot.slane %v14153_v36, 4  ;;  %v2566_v11 = vrot.slane %v2553_v51, 4  ;;  %v2570_v44 = vrot.slane %v2557_v8, 4 }
 0x207   : > { %v15854_v38 = vsel %vm2350_vm0, %v2558_v3, %v2517_v2  ;;  %v15857_v62 = vsel %vm2350_vm0, %v2557_v8, %v2572_v27  ;;  %v15860_v48 = vsel %vm2350_vm0, %v2562_v1, %v2521_v61  ;;  %v3146_v30 = vrot.slane %v15851_v13, 4 }
 0x208   : > { %v3136_v32 = vrot.slane %v15854_v38, 4  ;;  %v3148_v41 = vrot.slane %v15848_v35, 4  ;;  %v15866_v28 = vsel %vm2350_vm0, %v2570_v44, %v2533_v19  ;;  %v3134_v2 = vrot.slane %v15860_v48, 4 }
 0x209   : > { %v3170_v46 = vrot.slane %v15857_v62, 4  ;;  %v14152_v3 = vunpack.i.l.bf16 %v14151_v43  ;;  %v3158_v61 = vrot.slane %v15866_v28, 4  ;;  %v2699_v8 = vsel %vm2350_vm0, %v2698_v52, %v14158_v39 }
 0x20a   : > { %v15872_v27 = vsel %vm2350_vm0, %v15851_v13, %v3148_v41  ;;  %v2701_v1 = vsel %vm2350_vm0, %v14153_v36, %v15698_v5  ;;  %v2705_v19 = vperm.slane %v2699_v8, %v15436_v10  ;;  %v15886_v58 = vsel %vm2350_vm0, %v2566_v11, %v2529_v53 }
 0x20b   : > { %v2709_v44 = vperm.slane %v2701_v1, %v15436_v10  ;;  %v2722_v31 = vrot.slane %v14152_v3, 4  ;;  %v2725_v43 = vsel %vm2350_vm0, %v14152_v3, %v15709_v56  ;;  %v15889_v14 = vsel %vm2350_vm0, %v2553_v51, %v2568_v12 }
 0x20c   : > { %v2733_v41 = vperm.slane %v2725_v43, %v15436_v10  ;;  %v3135_v39 = vsel %vm2350_vm0, %v3134_v2, %v15854_v38  ;;  %v2734_v36 = vrot.slane %v2705_v19, 4  ;;  %v2737_v56 = vsel %vm2350_vm0, %v2705_v19, %v2736_v25 }
 0x20d   : > { %v2723_v5 = vsel %vm2350_vm0, %v2722_v31, %v14157_v40  ;;  %v2746_v52 = vrot.slane %v2709_v44, 4  ;;  %v2745_v53 = vperm.slane %v2737_v56, %v15514_v54  ;;  %v2749_v12 = vsel %vm2350_vm0, %v2709_v44, %v2748_v37 }
 0x20e   : > { %v2729_v3 = vperm.slane %v2723_v5, %v15436_v10  ;;  %v2770_v51 = vrot.slane %v2733_v41, 4  ;;  %v2735_v57 = vsel %vm2350_vm0, %v2734_v36, %v15626_v22  ;;  %v2757_v31 = vperm.slane %v2749_v12, %v15514_v54 }
 0x20f   : > { %v2747_v40 = vsel %vm2350_vm0, %v2746_v52, %v15630_v23  ;;  %v2773_v25 = vsel %vm2350_vm0, %v2733_v41, %v2772_v59  ;;  %v2741_v11 = vperm.slane %v2735_v57, %v15514_v54  ;;  %v2788_v19 = vrot.slane %v2745_v53, 4 }
 0x210   : > { %v2753_v2 = vperm.slane %v2747_v40, %v15514_v54  ;;  %v2758_v8 = vrot.slane %v2729_v3, 4  ;;  %v2761_v37 = vsel %vm2350_vm0, %v2729_v3, %v2760_v17  ;;  %v2771_v23 = vsel %vm2350_vm0, %v2770_v51, %v15634_v24 }
 0x211   : > { %v2769_v22 = vperm.slane %v2761_v37, %v15514_v54  ;;  %v2781_v1 = vperm.slane %v2773_v25, %v15514_v54  ;;  %v2777_v44 = vperm.slane %v2771_v23, %v15514_v54  ;;  %v2784_v43 = vrot.slane %v2741_v11, 4 }
 0x212   : > { %v2759_v59 = vsel %vm2350_vm0, %v2758_v8, %v15638_v4  ;;  %v2792_v41 = vrot.slane %v2753_v2, 4  ;;  %v2796_v24 = vrot.slane %v2757_v31, 4  ;;  %v3172_v13 = vrot.slane %v15889_v14, 4 }
 0x213   : > { %v2765_v5 = vperm.slane %v2759_v59, %v15514_v54  ;;  %v2786_v36 = vrot.slane %v2769_v22, 4  ;;  %v2789_v17 = vsel %vm2350_vm0, %v2769_v22, %v2788_v19  ;;  %v2794_v56 = vrot.slane %v2781_v1, 4 }
 0x214   : > { %v2790_v52 = vrot.slane %v2777_v44, 4  ;;  %v2793_v3 = vsel %vm2350_vm0, %v2777_v44, %v2792_v41  ;;  %v3370_v12 = vrot.slane %v2789_v17, 4  ;;  %v2797_v8 = vsel %vm2350_vm0, %v2781_v1, %v2796_v24 }
 0x215   : > { %v2782_v51 = vrot.slane %v2765_v5, 4  ;;  %v2785_v57 = vsel %vm2350_vm0, %v2765_v5, %v2784_v43  ;;  %v2787_v4 = vsel %vm2350_vm0, %v2786_v36, %v2745_v53  ;;  %v2795_v40 = vsel %vm2350_vm0, %v2794_v56, %v2757_v31 }
 0x216   : > { %v2791_v25 = vsel %vm2350_vm0, %v2790_v52, %v2753_v2  ;;  %v3358_v37 = vrot.slane %v2787_v4, 4  ;;  %v3371_v22 = vsel %vm2350_vm0, %v3370_v12, %v2785_v57  ;;  %v3372_v19 = vrot.slane %v2785_v57, 4 }
 0x217   : > { %v2783_v23 = vsel %vm2350_vm0, %v2782_v51, %v2741_v11  ;;  %v15935_v59 = vperm.slane %v3371_v22, %v15436_v10  ;;  %v3382_v44 = vrot.slane %v2795_v40, 4  ;;  %v3384_v41 = vrot.slane %v2791_v25, 4 }
 0x218   : > { %v15938_v43 = vsel %vm2350_vm0, %v3358_v37, %v2783_v23  ;;  %v3360_v53 = vrot.slane %v2783_v23, 4  ;;  %v3394_v31 = vrot.slane %v2797_v8, 4  ;;  %v3373_v2 = vsel %vm2350_vm0, %v2789_v17, %v3372_v19 }
 0x219   : > { %v15942_v1 = vsel %vm2350_vm0, %v3382_v44, %v2791_v25  ;;  %v3396_v5 = vrot.slane %v2793_v3, 4  ;;  %v3141_v36 = vperm.slane %v3135_v39, %v15436_v10  ;;  %v15947_v56 = vperm.slane %v3373_v2, %v15436_v10 }
 0x21a   : > { %v3361_v11 = vsel %vm2350_vm0, %v2787_v4, %v3360_v53  ;;  %v3385_v52 = vsel %vm2350_vm0, %v2795_v40, %v3384_v41  ;;  %v3395_v24 = vsel %vm2350_vm0, %v3394_v31, %v2793_v3  ;;  %v3147_v4 = vsel %vm2350_vm0, %v3146_v30, %v15848_v35 }
 0x21b   : > { %v15952_v12 = vperm.slane %v3361_v11, %v15436_v10  ;;  %v15955_v17 = vperm.slane %v3385_v52, %v15436_v10  ;;  %v3397_v51 = vsel %vm2350_vm0, %v2797_v8, %v3396_v5  ;;  %v15959_v57 = vperm.slane %v3395_v24, %v15436_v10 }
 0x21c   : > { %v15962_v39 = vperm.slane %v3397_v51, %v15436_v10  ;;  %v3159_v3 = vsel %vm2350_vm0, %v3158_v61, %v15886_v58  ;;  %v3160_v40 = vrot.slane %v15886_v58, 4  ;;  %v3153_v25 = vperm.slane %v3147_v4, %v15436_v10 }
 0x21d   : > { %v3165_v8 = vperm.slane %v3159_v3, %v15436_v10  ;;  %v3171_v37 = vsel %vm2350_vm0, %v3170_v46, %v15889_v14  ;;  %v3184_v30 = vrot.slane %v3141_v36, 4  ;;  %v3137_v61 = vsel %vm2350_vm0, %v15860_v48, %v3136_v32 }
 0x21e   : > { %v3177_v35 = vperm.slane %v3171_v37, %v15436_v10  ;;  %v3157_v58 = vperm.slane %v15872_v27, %v15436_v10  ;;  %v3182_v22 = vrot.slane %v3153_v25, 4  ;;  %v3145_v19 = vperm.slane %v3137_v61, %v15436_v10 }
 0x21f   : > { %v3208_v23 = vrot.slane %v3165_v8, 4  ;;  %v3161_v46 = vsel %vm2350_vm0, %v15866_v28, %v3160_v40  ;;  %v3185_v44 = vsel %vm2350_vm0, %v3153_v25, %v3184_v30  ;;  %v3173_v38 = vsel %vm2350_vm0, %v15857_v62, %v3172_v13 }
 0x220   : > { %v3206_v14 = vrot.slane %v3177_v35, 4  ;;  %v3169_v53 = vperm.slane %v3161_v46, %v15436_v10  ;;  %v3183_v48 = vsel %vm2350_vm0, %v3182_v22, %v3141_v36  ;;  %v3193_v32 = vperm.slane %v3185_v44, %v15514_v54 }
 0x221   : > { %v3209_v27 = vsel %vm2350_vm0, %v3177_v35, %v3208_v23  ;;  %v3181_v41 = vperm.slane %v3173_v38, %v15436_v10  ;;  %v3189_v31 = vperm.slane %v3183_v48, %v15514_v54  ;;  %v3194_v5 = vrot.slane %v3157_v58, 4 }
 0x222   : > { %v3207_v28 = vsel %vm2350_vm0, %v3206_v14, %v3165_v8  ;;  %v3217_v2 = vperm.slane %v3209_v27, %v15514_v54  ;;  %v3236_v52 = vrot.slane %v3193_v32, 4  ;;  %v3196_v62 = vrot.slane %v3145_v19, 4 }
 0x223   : > { %v3213_v11 = vperm.slane %v3207_v28, %v15514_v54  ;;  %v3218_v24 = vrot.slane %v3181_v41, 4  ;;  %v3232_v51 = vrot.slane %v3189_v31, 4  ;;  %v3195_v4 = vsel %vm2350_vm0, %v3194_v5, %v3145_v19 }
 0x224   : > { %v3234_v36 = vrot.slane %v3217_v2, 4  ;;  %v3220_v3 = vrot.slane %v3169_v53, 4  ;;  %v3237_v40 = vsel %vm2350_vm0, %v3217_v2, %v3236_v52  ;;  %v3201_v37 = vperm.slane %v3195_v4, %v15514_v54 }
 0x225   : > { %v3230_v25 = vrot.slane %v3213_v11, 4  ;;  %v3219_v8 = vsel %vm2350_vm0, %v3218_v24, %v3169_v53  ;;  %v3233_v13 = vsel %vm2350_vm0, %v3213_v11, %v3232_v51  ;;  %v3713_v35 = vpack.c.bf16 %v3237_v40, %v3237_v40 }
 0x226   : > { %v3235_v30 = vsel %vm2350_vm0, %v3234_v36, %v3193_v32  ;;  %v3225_v61 = vperm.slane %v3219_v8, %v15514_v54  ;;  %v3711_v22 = vpack.c.bf16 %v3233_v13, %v3233_v13  ;;  %v3240_v19 = vrot.slane %v3201_v37, 4 }
 0x227   : > { %v3231_v23 = vsel %vm2350_vm0, %v3230_v25, %v3189_v31  ;;  %v3712_v46 = vpack.c.bf16 %v3235_v30, %v3235_v30  ;;  %v3804_v14 = vsel %vm3742_vm1, %v3713_v35, 0  ;;  %v3197_v38 = vsel %vm2350_vm0, %v3157_v58, %v3196_v62 }
 0x228   : > { %v3710_v44 = vpack.c.bf16 %v3231_v23, %v3231_v23  ;;  %v3221_v48 = vsel %vm2350_vm0, %v3181_v41, %v3220_v3  ;;  %v3766_v53 = vsel %vm3742_vm1, %v3711_v22, 0  ;;  %3813 = vmatpush.bf16.xpose.msra.mxu3 %v3804_v14  ;;  %v3241_v32 = vsel %vm2350_vm0, %v3225_v61, %v3240_v19 }
 0x229   : > { %v3785_v27 = vsel %vm3742_vm1, %v3712_v46, 0  ;;  %v3205_v28 = vperm.slane %v3197_v38, %v15514_v54  ;;  %3775 = vmatpush.bf16.xpose.msra.mxu1 %v3766_v53  ;;  %v3715_v2 = vpack.c.bf16 %v3241_v32, %v3241_v32  ;;  %v3229_v5 = vperm.slane %v3221_v48, %v15514_v54 }
 0x22a   : > { %v3747_v31 = vsel %vm3742_vm1, %v3710_v44, 0  ;;  %3794 = vmatpush.bf16.xpose.msra.mxu2 %v3785_v27  ;;  %v3238_v11 = vrot.slane %v3225_v61, 4  ;;  %v18646_v41 = vrot.slane %v15781_v47, 4  ;;  %v3508_v24 = vrot.slane %v15794_v49, 4 }
 0x22b   : > { %3756 = vmatpush.bf16.xpose.msra.mxu0 %v3747_v31  ;;  %v3244_v58 = vrot.slane %v3205_v28, 4  ;;  %v3518_v62 = vrot.slane %v15813_v34, 4  ;;  %v3842_v51 = vsel %vm3742_vm1, %v3715_v2, 0  ;;  %v3242_v4 = vrot.slane %v3229_v5, 4 }
 0x22c   : > { %v3507_v52 = vsel %vm2350_vm0, %v18646_v41, %v15794_v49  ;;  %v3239_v36 = vsel %vm2350_vm0, %v3238_v11, %v3201_v37  ;;  %v3520_v13 = vrot.slane %v15800_v6, 4  ;;  %v3544_v19 = vrot.slane %v15820_v16, 4 }
 0x22d   : > { %v3513_v3 = vperm.slane %v3507_v52, %v15436_v10  ;;  %v3245_v40 = vsel %vm2350_vm0, %v3229_v5, %v3244_v58  ;;  %v3714_v25 = vpack.c.bf16 %v3239_v36, %v3239_v36  ;;  %v3519_v8 = vsel %vm2350_vm0, %v3518_v62, %v15800_v6 }
 0x22e   : > { %v3717_v35 = vpack.c.bf16 %v3245_v40, %v3245_v40  ;;  %v3243_v30 = vsel %vm2350_vm0, %v3242_v4, %v3205_v28  ;;  %v3525_v61 = vperm.slane %v3519_v8, %v15514_v54  ;;  %v3521_v46 = vsel %vm2350_vm0, %v15813_v34, %v3520_v13 }
 0x22f   : > { %v3542_v22 = vrot.slane %v3513_v3, 4  ;;  %v3823_v37 = vsel %vm3742_vm1, %v3714_v25, 0  ;;  %v3716_v23 = vpack.c.bf16 %v3243_v30, %v3243_v30  ;;  %v18647_v6 = vpack.c.bf16 %v15622_v21, %v15622_v21 }
 0x230   : > { %v3880_v14 = vsel %vm3742_vm1, %v3717_v35, 0  ;;  %v3568_v38 = vrot.slane %v3525_v61, 4  ;;  %v3529_v48 = vperm.slane %v3521_v46, %v15514_v54  ;;  %v18648_v34 = vpack.c.bf16 %v15618_v9, %v15618_v9 }
 0x231   : > { %3851 = vmatpush.bf16.xpose.msrb.mxu1 %v3842_v51  ;;  %10861 = vmatmul.msk.bf16.vlgmr.msra.gmra.mxu3 %vm3742_vm1, %v18647_v6  ;;  %v3543_v44 = vsel %vm2350_vm0, %v3542_v22, %v15820_v16  ;;  %v3861_v53 = vsel %vm3742_vm1, %v3716_v23, 0  ;;  %v3545_v21 = vsel %vm2350_vm0, %v3513_v3, %v3544_v19  ;;  %v3699_v32 = vpack.c.bf16 %v15749_v45, %v15749_v45 }
 0x232   : > { %3889 = vmatpush.bf16.xpose.msrb.mxu3 %v3880_v14  ;;  %10859 = vmatmul.msk.bf16.vlgmr.msra.gmra.mxu1 %vm3742_vm1, %v18648_v34  ;;  %v3549_v27 = vperm.slane %v3543_v44, %v15514_v54  ;;  %v3553_v16 = vperm.slane %v3545_v21, %v15514_v54  ;;  %v3572_v28 = vrot.slane %v3529_v48, 4  ;;  %v18649_v31 = vpack.c.bf16 %v15730_v60, %v15730_v60 }
 0x233   : > { %3832 = vmatpush.bf16.xpose.msrb.mxu0 %v3823_v37  ;;  %3870 = vmatpush.bf16.xpose.msrb.mxu2 %v3861_v53  ;;  %v18650_v9 = vrot.slane %v15679_v18, 4  ;;  %v3108_v5 = vrot.slane %v15702_v15, 4  ;;  %v18651_v58 = vpack.c.bf16 %v15734_v20, %v15734_v20  ;;  %v18652_v60 = vrot.slane %v15774_v63, 4 }
 0x234   : > { %10858 = vmatmul.msk.bf16.vlgmr.msra.gmra.mxu0 %vm3742_vm1, %v18649_v31  ;;  %v3569_v11 = vsel %vm2350_vm0, %v3549_v27, %v3568_v38  ;;  %v3566_v41 = vrot.slane %v3549_v27, 4  ;;  %v3570_v51 = vrot.slane %v3553_v16, 4  ;;  %v18653_v22 = vrot.slane %v15791_v7, 4 }
 0x235   : > { %v3085_v2 = vsel %vm2350_vm0, %v15641_v50, %v18650_v9  ;;  %10860 = vmatmul.msk.bf16.vlgmr.msra.gmra.mxu2 %vm3742_vm1, %v18651_v58  ;;  %v3473_v18 = vsel %vm2350_vm0, %v15768_v55, %v18652_v60  ;;  %v3719_v62 = vpack.c.bf16 %v3569_v11, %v3569_v11  ;;  %v3573_v50 = vsel %vm2350_vm0, %v3553_v16, %v3572_v28 }
 0x236   : > { %v3093_v52 = vperm.slane %v3085_v2, %v15514_v54  ;;  %v3109_v15 = vsel %vm2350_vm0, %v15683_v33, %v3108_v5  ;;  %v3721_v36 = vpack.c.bf16 %v3573_v50, %v3573_v50  ;;  %v3567_v20 = vsel %vm2350_vm0, %v3566_v41, %v3525_v61 }
 0x237   : > { %v3117_v4 = vperm.slane %v3109_v15, %v15514_v54  ;;  %v3918_v40 = vsel %vm3742_vm1, %v3719_v62, 0  ;;  %v3718_v25 = vpack.c.bf16 %v3567_v20, %v3567_v20  ;;  %v3571_v63 = vsel %vm2350_vm0, %v3570_v51, %v3529_v48  ;;  %v2150_v15 = vpop.f32.mrf.mxu0 }
 0x238   : > { %v3132_v3 = vrot.slane %v3093_v52, 4  ;;  %v3481_v55 = vperm.slane %v3473_v18, %v15436_v10  ;;  %v3956_v8 = vsel %vm3742_vm1, %v3721_v36, 0  ;;  %v3720_v13 = vpack.c.bf16 %v3571_v63, %v3571_v63  ;;  %v2164_v36 = vpop.f32.mrf.mxu1 }
 0x239   : > { %3927 = vmatpush.bf16.xpose.msra.mxu1 %v3918_v40  ;;  %v3493_v33 = vperm.slane %v15788_v42, %v15436_v10  ;;  %v3899_v30 = vsel %vm3742_vm1, %v3718_v25, 0  ;;  %v3497_v37 = vsel %vm2350_vm0, %v15778_v0, %v18653_v22  ;;  %v3509_v23 = vsel %vm2350_vm0, %v15781_v47, %v3508_v24 }
 0x23a   : > { %v3133_v35 = vsel %vm2350_vm0, %v3117_v4, %v3132_v3  ;;  %3965 = vmatpush.bf16.xpose.msra.mxu3 %v3956_v8  ;;  %v3937_v46 = vsel %vm3742_vm1, %v3720_v13, 0  ;;  %v3505_v19 = vperm.slane %v3497_v37, %v15436_v10  ;;  %v3517_v42 = vperm.slane %v3509_v23, %v15436_v10 }
 0x23b   : > { %v3701_v61 = vpack.c.bf16 %v3133_v35, %v3133_v35  ;;  %3908 = vmatpush.bf16.xpose.msra.mxu0 %v3899_v30  ;;  %v3530_v14 = vrot.slane %v3493_v33, 4  ;;  %3946 = vmatpush.bf16.xpose.msra.mxu2 %v3937_v46  ;;  %v3532_v6 = vrot.slane %v3481_v55, 4  ;;  %v3126_v7 = vrot.slane %v15721_v26, 4 }
 0x23c   : > { %v3130_v44 = vrot.slane %v3117_v4, 4  ;;  %v3365_v0 = vperm.slane %v15938_v43, %v15436_v10  ;;  %v3554_v38 = vrot.slane %v3517_v42, 4  ;;  %v3556_v47 = vrot.slane %v3505_v19, 4 }
 0x23d   : > { %v3531_v49 = vsel %vm2350_vm0, %v3530_v14, %v3481_v55  ;;  %v3389_v24 = vperm.slane %v15942_v1, %v15436_v10  ;;  %v3533_v53 = vsel %vm2350_vm0, %v3493_v33, %v3532_v6  ;;  %v3127_v34 = vsel %vm2350_vm0, %v3126_v7, %v15714_v29 }
 0x23e   : > { %v3537_v48 = vperm.slane %v3531_v49, %v15514_v54  ;;  %v3131_v26 = vsel %vm2350_vm0, %v3130_v44, %v3093_v52  ;;  %v3555_v27 = vsel %vm2350_vm0, %v3554_v38, %v3505_v19  ;;  %v3541_v43 = vperm.slane %v3533_v53, %v15514_v54 }
 0x23f   : > { %v3557_v21 = vsel %vm2350_vm0, %v3517_v42, %v3556_v47  ;;  %v3698_v16 = vpack.c.bf16 %v3127_v34, %v3127_v34  ;;  %v3561_v28 = vperm.slane %v3555_v27, %v15514_v54  ;;  %v3700_v9 = vpack.c.bf16 %v3131_v26, %v3131_v26  ;;  %v16155_v47 = vpop.f32.mrf.mxu0 }
 0x240   : > { %v3576_v31 = vrot.slane %v3537_v48, 4  ;;  %v3565_v1 = vperm.slane %v3557_v21, %v15514_v54  ;;  %v3580_v2 = vrot.slane %v3541_v43, 4  ;;  %v3406_v5 = vrot.slane %v15935_v59, 4 }
 0x241   : > { %v3430_v29 = vrot.slane %v15959_v57, 4  ;;  %v3408_v11 = vrot.slane %v3365_v0, 4  ;;  %10865 = vmatmul.msk.bf16.vlgmr.msrb.gmra.mxu3 %vm3742_vm1, %v3701_v61  ;;  %v3574_v41 = vrot.slane %v3561_v28, 4  ;;  %v3432_v60 = vrot.slane %v3389_v24, 4 }
 0x242   : > { %v3577_v58 = vsel %vm2350_vm0, %v3561_v28, %v3576_v31  ;;  %v3578_v52 = vrot.slane %v3565_v1, 4  ;;  %10863 = vmatmul.msk.bf16.vlgmr.msrb.gmra.mxu1 %vm3742_vm1, %v3699_v32  ;;  %v3581_v62 = vsel %vm2350_vm0, %v3565_v1, %v3580_v2  ;;  %v3407_v50 = vsel %vm2350_vm0, %v3406_v5, %v3365_v0 }
 0x243   : > { %v3723_v18 = vpack.c.bf16 %v3577_v58, %v3577_v58  ;;  %v3431_v51 = vsel %vm2350_vm0, %v3430_v29, %v3389_v24  ;;  %v3725_v20 = vpack.c.bf16 %v3581_v62, %v3581_v62  ;;  %v3575_v4 = vsel %vm2350_vm0, %v3574_v41, %v3537_v48  ;;  %v16157_v24 = vpop.f32.mrf.mxu1 }
 0x244   : > { %10862 = vmatmul.msk.bf16.vlgmr.msrb.gmra.mxu0 %vm3742_vm1, %v3698_v16  ;;  %v3579_v3 = vsel %vm2350_vm0, %v3578_v52, %v3541_v43  ;;  %v3413_v45 = vperm.slane %v3407_v50, %v15514_v54  ;;  %v3722_v40 = vpack.c.bf16 %v3575_v4, %v3575_v4  ;;  %v3437_v63 = vperm.slane %v3431_v51, %v15514_v54  ;;  %v2192_v50 = vpop.f32.mrf.mxu3  ;;  %v2178_v51 = vpop.f32.mrf.mxu2 }
 0x245   : > { %v3994_v32 = vsel %vm3742_vm1, %v3723_v18, 0  ;;  %10864 = vmatmul.msk.bf16.vlgmr.msrb.gmra.mxu2 %vm3742_vm1, %v3700_v9  ;;  %v3724_v25 = vpack.c.bf16 %v3579_v3, %v3579_v3  ;;  %v4032_v55 = vsel %vm3742_vm1, %v3725_v20, 0  ;;  %v3409_v13 = vsel %vm2350_vm0, %v15935_v59, %v3408_v11  ;;  %v4047_v20 = vld [vmem:[#allocation2] sm:$0x1] }
 0x246   : > { %4003 = vmatpush.bf16.xpose.msrb.mxu1 %v3994_v32  ;;  %v3456_v8 = vrot.slane %v3413_v45, 4  ;;  %v3433_v35 = vsel %vm2350_vm0, %v15959_v57, %v3432_v60  ;;  %4041 = vmatpush.bf16.xpose.msrb.mxu3 %v4032_v55  ;;  %v3975_v33 = vsel %vm3742_vm1, %v3722_v40, 0  ;;  %v3417_v61 = vperm.slane %v3409_v13, %v15514_v54 }
 0x247   : > { %v4013_v30 = vsel %vm3742_vm1, %v3724_v25, 0  ;;  %v3441_v22 = vperm.slane %v3433_v35, %v15514_v54  ;;  %3984 = vmatpush.bf16.xpose.msrb.mxu0 %v3975_v33  ;;  %v3454_v23 = vrot.slane %v3437_v63, 4  ;;  %v3418_v46 = vrot.slane %v15947_v56, 4  ;;  %v2206_v29 = vpop.f32.mrf.mxu0 }
 0x248   : > { %4022 = vmatpush.bf16.xpose.msrb.mxu2 %v4013_v30  ;;  %v3457_v37 = vsel %vm2350_vm0, %v3437_v63, %v3456_v8  ;;  %v3442_v59 = vrot.slane %v15962_v39, 4  ;;  %v3460_v19 = vrot.slane %v3417_v61, 4  ;;  %v3420_v42 = vrot.slane %v15952_v12, 4 }
 0x249   : > { %v3458_v57 = vrot.slane %v3441_v22, 4  ;;  %v3455_v14 = vsel %vm2350_vm0, %v3454_v23, %v3413_v45  ;;  %v3419_v6 = vsel %vm2350_vm0, %v3418_v46, %v15952_v12  ;;  %v3444_v44 = vrot.slane %v15955_v17, 4 }
 0x24a   : > { %v3443_v7 = vsel %vm2350_vm0, %v3442_v59, %v15955_v17  ;;  %v3461_v0 = vsel %vm2350_vm0, %v3441_v22, %v3460_v19  ;;  %v3425_v38 = vperm.slane %v3419_v6, %v15514_v54  ;;  %v3421_v12 = vsel %vm2350_vm0, %v15947_v56, %v3420_v42 }
 0x24b   : > { %v3459_v49 = vsel %vm2350_vm0, %v3458_v57, %v3417_v61  ;;  %v3449_v48 = vperm.slane %v3443_v7, %v15514_v54  ;;  %v3429_v34 = vperm.slane %v3421_v12, %v15514_v54  ;;  %v3445_v17 = vsel %vm2350_vm0, %v15962_v39, %v3444_v44  ;;  %v2220_v11 = vpop.f32.mrf.mxu1  ;;  %v4048_v12 = vld [vmem:[#allocation2 + $0x1] sm:$0x1] }
 0x24c   : > { %v3464_v53 = vrot.slane %v3425_v38, 4  ;;  %v3453_v26 = vperm.slane %v3445_v17, %v15514_v54  ;;  %v3705_v16 = vpack.c.bf16 %v3461_v0, %v3461_v0  ;;  %v3703_v1 = vpack.c.bf16 %v3457_v37, %v3457_v37 }
 0x24d   : > { %v3462_v27 = vrot.slane %v3449_v48, 4  ;;  %v3468_v21 = vrot.slane %v3429_v34, 4  ;;  %v3702_v56 = vpack.c.bf16 %v3455_v14, %v3455_v14  ;;  %v16170_v2 = vadd.f32 %v2164_v36, %v2150_v15  ;;  %v16185_v15 = vpop.f32.mrf.mxu3  ;;  %v16187_v36 = vpop.f32.mrf.mxu2 }
 0x24e   : > { %v3465_v43 = vsel %vm2350_vm0, %v3449_v48, %v3464_v53  ;;  %v3466_v31 = vrot.slane %v3453_v26, 4  ;;  %v3704_v5 = vpack.c.bf16 %v3459_v49, %v3459_v49  ;;  %v16175_v58 = vadd.f32 %v2220_v11, %v2206_v29 }
 0x24f   : > { %v3463_v28 = vsel %vm2350_vm0, %v3462_v27, %v3425_v38  ;;  %v3469_v9 = vsel %vm2350_vm0, %v3453_v26, %v3468_v21  ;;  %v3707_v60 = vpack.c.bf16 %v3465_v43, %v3465_v43  ;;  %vm4049_vm2 = vcmp.gt.f32.partialorder %v4047_v20, 0.5  ;;  %v16191_v25 = vpop.f32.mrf.mxu0 }
 0x250   : > { %v3467_v39 = vsel %vm2350_vm0, %v3466_v31, %v3429_v34  ;;  %v14164_v41 = vpack.i.bf16 %v16170_v2, %v16175_v58  ;;  %v3709_v52 = vpack.c.bf16 %v3469_v9, %v3469_v9  ;;  %v3706_v18 = vpack.c.bf16 %v3463_v28, %v3463_v28 }
 0x251   : > { %10869 = vmatmul.msk.bf16.vlgmr.msra.gmra.mxu3 %vm3742_vm1, %v3705_v16  ;;  %v3708_v62 = vpack.c.bf16 %v3467_v39, %v3467_v39  ;;  %v14713_v45 = vmov 0   ;;  %vm4050_vm5 = vcmp.gt.f32.partialorder %v4048_v12, 0.5  ;;  %v16231_v34 = vadd.f32 %v2192_v50, %v2178_v51 }
 0x252   : > { %10867 = vmatmul.msk.bf16.vlgmr.msra.gmra.mxu1 %vm3742_vm1, %v3703_v1  ;;  %14165 = vrot.lane.b32.xlu0 %v14164_v41, %s14710_s22  ;;  %v4051_v32 = vsel %vm4049_vm2, 1, %v14713_v45  ;;  %v4052_v1 = vsel %vm4050_vm5, 1, %v14713_v45 }
 0x253   : > { %v16189_v40 = vpop.f32.mrf.mxu1  ;;  %v4053_v63 = vperm.slane %v4051_v32, 0  ;;  %v4054_v39 = vperm.slane %v4052_v1, 0 }
 0x254   : > { %10866 = vmatmul.msk.bf16.vlgmr.msra.gmra.mxu0 %vm3742_vm1, %v3702_v56 }
 0x255   : > { %10868 = vmatmul.msk.bf16.vlgmr.msra.gmra.mxu2 %vm3742_vm1, %v3704_v5  ;;  %v2248_v4 = vpop.f32.mrf.mxu3  ;;  %v2234_v3 = vpop.f32.mrf.mxu2  ;;  %vm16195_vm3 = vcmp.eq.s32.totalorder %v4053_v63, 1  ;;  %vm16250_vm6 = vcmp.eq.s32.totalorder %v4054_v39, 1 }
 0x256   : > { %v16233_v17 = vadd.f32 %v2248_v4, %v2234_v3 }
 0x258   : > { %v14159_v31 = vpack.i.bf16 %v16231_v34, %v16233_v17 }
 0x25d   : > { %v16193_v55 = vpop.f32.mrf.mxu3  ;;  %v16199_v13 = vpop.f32.mrf.mxu2 }
 0x25e   : > { %v16312_v8 = vadd.f32 %v16193_v55, %v16199_v13 }
 0x261   : > { %10873 = vmatmul.msk.bf16.vlgmr.msrb.gmra.mxu3 %vm3742_vm1, %v3709_v52 }
 0x262   : > { %10871 = vmatmul.msk.bf16.vlgmr.msrb.gmra.mxu1 %vm3742_vm1, %v3707_v60 }
 0x264   : > { %10870 = vmatmul.msk.bf16.vlgmr.msrb.gmra.mxu0 %vm3742_vm1, %v3706_v18 }
 0x265   : > { %10872 = vmatmul.msk.bf16.vlgmr.msrb.gmra.mxu2 %vm3742_vm1, %v3708_v62 }
 0x2af   : > { %v3777_v35 = vpop.f32.mrf.mxu1 }
 0x2b0   : > { %v16203_v33 = vsel %vm16195_vm3, -1e+09, %v3777_v35 }
 0x2b1   : > { %v3758_v30 = vpop.f32.mrf.mxu0  ;;  %v4077_v22 = vsel %vm4073_vm4, %v16203_v33, -inf }
 0x2b2   : > { %v16207_v61 = vsel %vm16195_vm3, -1e+09, %v3758_v30  ;;  %4078 = vmax.xlane.f32.xlu1 %v4077_v22 }
 0x2b3   : > { %v4074_v37 = vsel %vm4073_vm4, %v16207_v61, -inf }
 0x2b4   : > { %4075 = vmax.xlane.f32.xlu2 %v4074_v37  ;;  %v3815_v23 = vpop.f32.mrf.mxu3 }
 0x2b5   : > { %v16215_v46 = vsel %vm16195_vm3, -1e+09, %v3815_v23 }
 0x2b6   : > { %v4083_v6 = vsel %vm4073_vm4, %v16215_v46, -inf }
 0x2b7   : > { %v3779_v59 = vpop.f32.mrf.mxu1 }
 0x2b8   : > { %v3796_v19 = vpop.f32.mrf.mxu2 }
 0x2b9   : > { %v16219_v57 = vsel %vm16195_vm3, -1e+09, %v3796_v19  ;;  %v3760_v42 = vpop.f32.mrf.mxu0 }
 0x2ba   : > { %v4080_v14 = vsel %vm4073_vm4, %v16219_v57, -inf }
 0x2bb   : > { %4081 = vmax.xlane.f32.xlu0 %v4080_v14 }
 0x2bc   : > { %4084 = vmax.xlane.f32.xlu2 %v4083_v6  ;;  %v3817_v7 = vpop.f32.mrf.mxu3 }
 0x2bf   : > { %v3853_v0 = vpop.f32.mrf.mxu1 }
 0x2c0   : > { %v3798_v44 = vpop.f32.mrf.mxu2 }
 0x2c1   : > { %v3834_v49 = vpop.f32.mrf.mxu0 }
 0x2c2   : > { %v16227_v38 = vsel %vm16195_vm3, -1e+09, %v3834_v49 }
 0x2c3   : > { %v4086_v48 = vsel %vm4073_vm4, %v16227_v38, -inf }
 0x2c4   : > { %4087 = vmax.xlane.f32.xlu2 %v4086_v48  ;;  %v3891_v53 = vpop.f32.mrf.mxu3  ;;  %v16319_v1 = vpop.permute.xlu0 %14165 }
 0x2c5   : > { %v16237_v26 = vsel %vm16195_vm3, -1e+09, %v3891_v53  ;;  %v16296_v53 = vsel %vm16195_vm3, -1e+09, %v3853_v0 }
 0x2c6   : > { %v4095_v9 = vsel %vm4073_vm4, %v16237_v26, -inf }
 0x2c7   : > { %v3855_v27 = vpop.f32.mrf.mxu1 }
 0x2c8   : > { %v3872_v43 = vpop.f32.mrf.mxu2 }
 0x2c9   : > { %v16241_v21 = vsel %vm16195_vm3, -1e+09, %v3872_v43  ;;  %v3836_v16 = vpop.f32.mrf.mxu0  ;;  %v4089_v43 = vsel %vm4073_vm4, %v16296_v53, -inf }
 0x2ca   : > { %v4092_v28 = vsel %vm4073_vm4, %v16241_v21, -inf }
 0x2cb   : > { %4093 = vmax.xlane.f32.xlu0 %v4092_v28  ;;  %14160 = vrot.lane.b32.xlu1 %v14159_v31, %s14710_s22  ;;  %v16308_v28 = vadd.f32 %v16185_v15, %v16187_v36 }
 0x2cc   : > { %4096 = vmax.xlane.f32.xlu2 %v4095_v9  ;;  %v3893_v56 = vpop.f32.mrf.mxu3 }
 0x2cd   : > { %v14169_v31 = vpack.i.bf16 %v16308_v28, %v16312_v8 }
 0x2cf   : > { %v3929_v29 = vpop.f32.mrf.mxu1 }
 0x2d0   : > { %v3874_v5 = vpop.f32.mrf.mxu2  ;;  %v16268_v51 = vsel %vm16250_vm6, -1e+09, %v3929_v29 }
 0x2d1   : > { %v3910_v41 = vpop.f32.mrf.mxu0  ;;  %v4101_v45 = vsel %vm4073_vm4, %v16268_v51, -inf }
 0x2d2   : > { %v16256_v52 = vsel %vm16250_vm6, -1e+09, %v3910_v41 }
 0x2d3   : > { %v4098_v60 = vsel %vm4073_vm4, %v16256_v52, -inf }
 0x2d4   : > { %4099 = vmax.xlane.f32.xlu2 %v4098_v60  ;;  %v3967_v18 = vpop.f32.mrf.mxu3 }
 0x2d5   : > { %v16262_v62 = vsel %vm16250_vm6, -1e+09, %v3967_v18 }
 0x2d6   : > { %v4107_v50 = vsel %vm4073_vm4, %v16262_v62, -inf }
 0x2d7   : > { %v3931_v20 = vpop.f32.mrf.mxu1  ;;  %4108 = vmax.xlane.f32.xlu0 %v4107_v50  ;;  %v2574_v50 = vrot.slane %v16231_v34, 4 }
 0x2d8   : > { %v3948_v4 = vpop.f32.mrf.mxu2  ;;  %v2600_v20 = vrot.slane %v16175_v58, 4 }
 0x2d9   : > { %v3912_v3 = vpop.f32.mrf.mxu0  ;;  %v16274_v63 = vsel %vm16250_vm6, -1e+09, %v3948_v4  ;;  %v2598_v4 = vrot.slane %v16233_v17, 4 }
 0x2da   : > { %v4104_v37 = vsel %vm4073_vm4, %v16274_v63, -inf  ;;  %v2575_v3 = vsel %vm2350_vm0, %v2574_v50, %v16170_v2 }
 0x2dc   : > { %4102 = vmax.xlane.f32.xlu2 %v4101_v45  ;;  %v3969_v32 = vpop.f32.mrf.mxu3 }
 0x2dd   : > { %v2601_v32 = vsel %vm2350_vm0, %v16233_v17, %v2600_v20  ;;  %v14168_v17 = vunpack.i.h.bf16 %v16319_v1 }
 0x2df   : > { %v4005_v30 = vpop.f32.mrf.mxu1 }
 0x2e0   : > { %v3950_v35 = vpop.f32.mrf.mxu2  ;;  %v16292_v48 = vsel %vm16250_vm6, -1e+09, %v4005_v30 }
 0x2e1   : > { %v3986_v22 = vpop.f32.mrf.mxu0  ;;  %v4113_v27 = vsel %vm4073_vm4, %v16292_v48, -inf }
 0x2e2   : > { %v16280_v59 = vsel %vm16250_vm6, -1e+09, %v3986_v22 }
 0x2e3   : > { %v4110_v44 = vsel %vm4073_vm4, %v16280_v59, -inf }
 0x2e4   : > { %4105 = vmax.xlane.f32.xlu2 %v4104_v37  ;;  %v4043_v23 = vpop.f32.mrf.mxu3  ;;  %v2599_v37 = vsel %vm2350_vm0, %v2598_v4, %v16175_v58 }
 0x2e5   : > { %v16304_v16 = vsel %vm16250_vm6, -1e+09, %v4043_v23  ;;  %v2581_v23 = vperm.slane %v2575_v3, %v15436_v10 }
 0x2e6   : > { %v4119_v0 = vsel %vm4073_vm4, %v16304_v16, -inf }
 0x2e7   : > { %v4007_v19 = vpop.f32.mrf.mxu1 }
 0x2e8   : > { %v4024_v42 = vpop.f32.mrf.mxu2 }
 0x2e9   : > { %v16284_v14 = vsel %vm16250_vm6, -1e+09, %v4024_v42  ;;  %v3988_v6 = vpop.f32.mrf.mxu0  ;;  %v14167_v42 = vunpack.i.l.bf16 %v16319_v1 }
 0x2ea   : > { %v4116_v7 = vsel %vm4073_vm4, %v16284_v14, -inf }
 0x2eb   : > { %4117 = vmax.xlane.f32.xlu0 %v4116_v7  ;;  %v2624_v7 = vrot.slane %v2581_v23, 4 }
 0x2ec   : > { %4111 = vmax.xlane.f32.xlu2 %v4110_v44  ;;  %v4045_v49 = vpop.f32.mrf.mxu3 }
 0x2f0   : > { %v4026_v12 = vpop.f32.mrf.mxu2 }
 0x2f4   : > { %4114 = vmax.xlane.f32.xlu2 %v4113_v27 }
 0x2f5   : > { %4090 = vmax.xlane.f32.xlu1 %v4089_v43  ;;  %v2588_v43 = vrot.slane %v14168_v17, 4 }
 0x2fd   : > { %4120 = vmax.xlane.f32.xlu1 %v4119_v0 }
 0x2ff   : > { %14170 = vrot.lane.b32.xlu0 %v14169_v31, %s14710_s22 }
 0x325   : > { %v4079_v9 = vpop.xlane.xlu1 %4078 }
 0x326   : > { %v4123_v56 = vsub.f32 %v16203_v33, %v4079_v9  ;;  %v2576_v33 = vrot.slane %v16170_v2, 4  ;;  %v2609_v2 = vperm.slane %v2601_v32, %v15436_v10 }
 0x327   : > { %v4076_v15 = vpop.xlane.xlu2 %4075 }
 0x328   : > { %v4122_v36 = vsub.f32 %v16207_v61, %v4076_v15  ;;  %v4140_v39 = vmul.f32 1.442695, %v4123_v56  ;;  %v2577_v45 = vsel %vm2350_vm0, %v16231_v34, %v2576_v33  ;;  %v2660_v44 = vrot.slane %v2609_v2, 4 }
 0x329   : > { %v2585_v19 = vperm.slane %v2577_v45, %v15436_v10 }
 0x32a   : > { %v4138_v55 = vmul.f32 1.442695, %v4122_v36  ;;  %14199 = vpow2.f32 %v4140_v39  ;;  %v2612_v36 = vrot.slane %v14167_v42, 4 }
 0x32b   : > { %v2636_v58 = vrot.slane %v2585_v19, 4 }
 0x32c   : > { %14201 = vpow2.f32 %v4138_v55 }
 0x32e   : > { %v4082_v13 = vpop.xlane.xlu0 %4081 }
 0x32f   : > { %v4124_v5 = vsub.f32 %v16219_v57, %v4082_v13  ;;  %v4085_v29 = vpop.xlane.xlu2 %4084 }
 0x330   : > { %v16324_v11 = vpop.eup %14199  ;;  %v4125_v60 = vsub.f32 %v16215_v46, %v4085_v29 }
 0x331   : > { %v4142_v41 = vmul.f32 1.442695, %v4124_v5  ;;  %v4173_v61 = vsel %vm4073_vm4, %v16324_v11, 0.0 }
 0x332   : > { %v16327_v18 = vpop.eup %14201  ;;  %4174 = vadd.xlane.f32.xlu2 %v4173_v61  ;;  %v4144_v46 = vmul.f32 1.442695, %v4125_v60 }
 0x333   : > { %14203 = vpow2.f32 %v4142_v41  ;;  %v4170_v57 = vsel %vm4073_vm4, %v16327_v18, 0.0 }
 0x334   : > { %4171 = vadd.xlane.f32.xlu1 %v4170_v57  ;;  %14205 = vpow2.f32 %v4144_v46 }
 0x337   : > { %v4088_v35 = vpop.xlane.xlu2 %4087 }
 0x338   : > { %v4126_v30 = vsub.f32 %v16227_v38, %v4088_v35  ;;  %v2605_v38 = vperm.slane %v2599_v37, %v15436_v10 }
 0x339   : > { %v16344_v22 = vpop.eup %14203 }
 0x33a   : > { %v4176_v34 = vsel %vm4073_vm4, %v16344_v22, 0.0  ;;  %v4146_v6 = vmul.f32 1.442695, %v4126_v30  ;;  %v16356_v27 = vpop.eup %14205  ;;  %v2648_v15 = vrot.slane %v2605_v38, 4 }
 0x33b   : > { %4177 = vadd.xlane.f32.xlu2 %v4176_v34 }
 0x33c   : > { %14207 = vpow2.f32 %v4146_v6 }
 0x33d   : > { %v14161_v12 = vpop.permute.xlu1 %14160 }
 0x33e   : > { %v4094_v49 = vpop.xlane.xlu0 %4093  ;;  %v14163_v31 = vunpack.i.h.bf16 %v14161_v12  ;;  %v14162_v9 = vunpack.i.l.bf16 %v14161_v12 }
 0x33f   : > { %v4128_v0 = vsub.f32 %v16241_v21, %v4094_v49  ;;  %v4097_v56 = vpop.xlane.xlu2 %4096  ;;  %v4179_v21 = vsel %vm4073_vm4, %v16356_v27, 0.0 }
 0x340   : > { %v4129_v39 = vsub.f32 %v16237_v26, %v4097_v56  ;;  %v2586_v55 = vrot.slane %v14163_v31, 4  ;;  %v2589_v13 = vsel %vm2350_vm0, %v14163_v31, %v2588_v43  ;;  %v2610_v5 = vrot.slane %v14162_v9, 4 }
 0x341   : > { %v4150_v1 = vmul.f32 1.442695, %v4128_v0  ;;  %v2597_v29 = vperm.slane %v2589_v13, %v15436_v10  ;;  %v2613_v41 = vsel %vm2350_vm0, %v14162_v9, %v2612_v36 }
 0x342   : > { %v4152_v60 = vmul.f32 1.442695, %v4129_v39  ;;  %v2587_v33 = vsel %vm2350_vm0, %v2586_v55, %v14168_v17  ;;  %v2611_v61 = vsel %vm2350_vm0, %v2610_v5, %v14167_v42  ;;  %v2621_v26 = vperm.slane %v2613_v41, %v15436_v10  ;;  %v16373_v32 = vpop.eup %14207 }
 0x343   : > { %14209 = vpow2.f32 %v4150_v1  ;;  %4180 = vadd.xlane.f32.xlu2 %v4179_v21  ;;  %v2593_v50 = vperm.slane %v2587_v33, %v15436_v10  ;;  %v2634_v20 = vrot.slane %v2597_v29, 4  ;;  %v2637_v57 = vsel %vm2350_vm0, %v2597_v29, %v2636_v58 }
 0x344   : > { %v2617_v4 = vperm.slane %v2611_v61, %v15436_v10  ;;  %v2645_v46 = vperm.slane %v2637_v57, %v15514_v54  ;;  %v2658_v3 = vrot.slane %v2621_v26, 4  ;;  %v2661_v45 = vsel %vm2350_vm0, %v2621_v26, %v2660_v44 }
 0x345   : > { %14211 = vpow2.f32 %v4152_v60  ;;  %v2622_v35 = vrot.slane %v2593_v50, 4  ;;  %v2625_v30 = vsel %vm2350_vm0, %v2593_v50, %v2624_v7  ;;  %v2635_v37 = vsel %vm2350_vm0, %v2634_v20, %v2585_v19 }
 0x346   : > { %v2646_v34 = vrot.slane %v2617_v4, 4  ;;  %v2633_v17 = vperm.slane %v2625_v30, %v15514_v54  ;;  %v2641_v42 = vperm.slane %v2635_v37, %v15514_v54  ;;  %v2684_v6 = vrot.slane %v2645_v46, 4 }
 0x347   : > { %v2649_v58 = vsel %vm2350_vm0, %v2617_v4, %v2648_v15  ;;  %v16380_v49 = vpop.xlane.xlu2 %4099  ;;  %v2623_v44 = vsel %vm2350_vm0, %v2622_v35, %v2581_v23  ;;  %v2659_v7 = vsel %vm2350_vm0, %v2658_v3, %v2609_v2  ;;  %v2669_v36 = vperm.slane %v2661_v45, %v15514_v54 }
 0x348   : > { %v2647_v12 = vsel %vm2350_vm0, %v2646_v34, %v2605_v38  ;;  %v2657_v43 = vperm.slane %v2649_v58, %v15514_v54  ;;  %v2629_v19 = vperm.slane %v2623_v44, %v15514_v54  ;;  %v2676_v31 = vrot.slane %v2633_v17, 4 }
 0x349   : > { %v16386_v0 = vpop.eup %14209  ;;  %v2680_v9 = vrot.slane %v2641_v42, 4  ;;  %v2653_v56 = vperm.slane %v2647_v12, %v15514_v54  ;;  %v2665_v15 = vperm.slane %v2659_v7, %v15514_v54  ;;  %v4182_v23 = vsel %vm4073_vm4, %v16373_v32, 0.0 }
 0x34a   : > { %v2674_v39 = vrot.slane %v2657_v43, 4  ;;  %v16398_v2 = vadd.f32 %v16157_v24, %v16155_v47  ;;  %v16402_v1 = vadd.f32 %v16189_v40, %v16191_v25  ;;  %v2677_v55 = vsel %vm2350_vm0, %v2657_v43, %v2676_v31  ;;  %4183 = vadd.xlane.f32.xlu1 %v4182_v23 }
 0x34b   : > { %v16394_v38 = vpop.eup %14211  ;;  %v2678_v5 = vrot.slane %v2665_v15, 4  ;;  %v2681_v29 = vsel %vm2350_vm0, %v2665_v15, %v2680_v9  ;;  %v2682_v41 = vrot.slane %v2669_v36, 4  ;;  %v2672_v60 = vrot.slane %v2629_v19, 4 }
 0x34c   : > { %v2675_v13 = vsel %vm2350_vm0, %v2674_v39, %v2633_v17  ;;  %v2670_v21 = vrot.slane %v2653_v56, 4  ;;  %v2685_v33 = vsel %vm2350_vm0, %v2669_v36, %v2684_v6  ;;  %v3284_v61 = vrot.slane %v2681_v29, 4 }
 0x34d   : > { %v2679_v47 = vsel %vm2350_vm0, %v2678_v5, %v2641_v42  ;;  %v2683_v24 = vsel %vm2350_vm0, %v2682_v41, %v2645_v46  ;;  %v3246_v40 = vrot.slane %v2675_v13, 4  ;;  %v3258_v25 = vrot.slane %v2677_v55, 4 }
 0x34e   : > { %v3270_v26 = vrot.slane %v2683_v24, 4  ;;  %v3285_v50 = vsel %vm2350_vm0, %v2685_v33, %v3284_v61  ;;  %v3282_v57 = vrot.slane %v2685_v33, 4  ;;  %v14174_v3 = vpack.i.bf16 %v16398_v2, %v16402_v1 }
 0x34f   : > { %v4103_v20 = vpop.xlane.xlu2 %4102  ;;  %v3272_v45 = vrot.slane %v2679_v47, 4  ;;  %v2671_v35 = vsel %vm2350_vm0, %v2670_v21, %v2629_v19  ;;  %v2673_v30 = vsel %vm2350_vm0, %v2653_v56, %v2672_v60  ;;  %v4188_v46 = vsel %vm4073_vm4, %v16386_v0, 0.0 }
 0x350   : > { %v4131_v4 = vsub.f32 %v16268_v51, %v4103_v20  ;;  %v3271_v37 = vsel %vm2350_vm0, %v3270_v26, %v2679_v47  ;;  %v3247_v34 = vsel %vm2350_vm0, %v3246_v40, %v2671_v35  ;;  %v3248_v17 = vrot.slane %v2671_v35, 4 }
 0x351   : > { %v3259_v42 = vsel %vm2350_vm0, %v3258_v25, %v2673_v30  ;;  %v4191_v51 = vsel %vm4073_vm4, %v16394_v38, 0.0  ;;  %v3253_v6 = vperm.slane %v3247_v34, %v15436_v10  ;;  %v3260_v58 = vrot.slane %v2673_v30, 4 }
 0x352   : > { %4189 = vadd.xlane.f32.xlu1 %v4188_v46  ;;  %v3265_v44 = vperm.slane %v3259_v42, %v15436_v10  ;;  %v16425_v12 = vmul.f32 1.442695, %v4131_v4  ;;  %v3277_v43 = vperm.slane %v3271_v37, %v15436_v10  ;;  %v3283_v7 = vsel %vm2350_vm0, %v3282_v57, %v2681_v29 }
 0x353   : > { %v3249_v19 = vsel %vm2350_vm0, %v2675_v13, %v3248_v17  ;;  %v3289_v31 = vperm.slane %v3283_v7, %v15436_v10  ;;  %v3296_v56 = vrot.slane %v3253_v6, 4  ;;  %v3261_v39 = vsel %vm2350_vm0, %v2677_v55, %v3260_v58 }
 0x354   : > { %v3294_v9 = vrot.slane %v3265_v44, 4  ;;  %v3257_v15 = vperm.slane %v3249_v19, %v15436_v10  ;;  %v3320_v36 = vrot.slane %v3277_v43, 4  ;;  %v3273_v23 = vsel %vm2350_vm0, %v2683_v24, %v3272_v45 }
 0x355   : > { %v3293_v5 = vperm.slane %v3285_v50, %v15436_v10  ;;  %v3318_v29 = vrot.slane %v3289_v31, 4  ;;  %v3297_v13 = vsel %vm2350_vm0, %v3265_v44, %v3296_v56  ;;  %v3269_v21 = vperm.slane %v3261_v39, %v15436_v10 }
 0x356   : > { %v3295_v60 = vsel %vm2350_vm0, %v3294_v9, %v3253_v6  ;;  %v3305_v47 = vperm.slane %v3297_v13, %v15514_v54  ;;  %v3321_v55 = vsel %vm2350_vm0, %v3289_v31, %v3320_v36  ;;  %v3281_v25 = vperm.slane %v3273_v23, %v15436_v10 }
 0x357   : > { %v4106_v41 = vpop.xlane.xlu2 %4105  ;;  %v3301_v61 = vperm.slane %v3295_v60, %v15514_v54  ;;  %v3319_v24 = vsel %vm2350_vm0, %v3318_v29, %v3277_v43  ;;  %v3329_v40 = vperm.slane %v3321_v55, %v15514_v54  ;;  %v3306_v26 = vrot.slane %v3269_v21, 4 }
 0x358   : > { %v4132_v33 = vsub.f32 %v16274_v63, %v4106_v41  ;;  %v3325_v20 = vperm.slane %v3319_v24, %v15514_v54  ;;  %v3348_v4 = vrot.slane %v3305_v47, 4  ;;  %v3330_v35 = vrot.slane %v3293_v5, 4 }
 0x359   : > { %v3344_v57 = vrot.slane %v3301_v61, 4  ;;  %v3346_v63 = vrot.slane %v3329_v40, 4  ;;  %v3307_v45 = vsel %vm2350_vm0, %v3306_v26, %v3257_v15  ;;  %v3308_v30 = vrot.slane %v3257_v15, 4 }
 0x35a   : > { %v4158_v50 = vmul.f32 1.442695, %v4132_v33  ;;  %4192 = vadd.xlane.f32.xlu1 %v4191_v51  ;;  %v3342_v37 = vrot.slane %v3325_v20, 4  ;;  %v3349_v34 = vsel %vm2350_vm0, %v3329_v40, %v3348_v4  ;;  %v3313_v58 = vperm.slane %v3307_v45, %v15514_v54 }
 0x35b   : > { %14175 = vrot.lane.b32.xlu2 %v14174_v3, %s14710_s22  ;;  %v3345_v46 = vsel %vm2350_vm0, %v3325_v20, %v3344_v57  ;;  %v3347_v17 = vsel %vm2350_vm0, %v3346_v63, %v3305_v47  ;;  %v3729_v6 = vpack.c.bf16 %v3349_v34, %v3349_v34  ;;  %v3331_v3 = vsel %vm2350_vm0, %v3330_v35, %v3281_v25  ;;  %v4109_v57 = vpop.xlane.xlu0 %4108 }
 0x35c   : > { %14213 = vpow2.f32 %v4158_v50  ;;  %v3727_v42 = vpack.c.bf16 %v3345_v46, %v3345_v46  ;;  %v3343_v51 = vsel %vm2350_vm0, %v3342_v37, %v3301_v61  ;;  %v3728_v44 = vpack.c.bf16 %v3347_v17, %v3347_v17 }
 0x35d   : > { %v3309_v43 = vsel %vm2350_vm0, %v3269_v21, %v3308_v30  ;;  %v3726_v7 = vpack.c.bf16 %v3343_v51, %v3343_v51  ;;  %v4344_v31 = vsel %vm4285_vm7, %v3729_v6, 0  ;;  %v3337_v9 = vperm.slane %v3331_v3, %v15514_v54 }
 0x35e   : > { %v4306_v19 = vsel %vm4285_vm7, %v3727_v42, 0  ;;  %v4325_v15 = vsel %vm4285_vm7, %v3728_v44, 0  ;;  %4353 = vmatpush.bf16.msra.mxu3 %v4344_v31  ;;  %v3317_v36 = vperm.slane %v3309_v43, %v15514_v54  ;;  %v3332_v39 = vrot.slane %v3281_v25, 4 }
 0x35f   : > { %v16458_v56 = vpop.xlane.xlu2 %4111  ;;  %4315 = vmatpush.bf16.msra.mxu1 %v4306_v19  ;;  %v4287_v23 = vsel %vm4285_vm7, %v3726_v7, 0  ;;  %4334 = vmatpush.bf16.msra.mxu2 %v4325_v15  ;;  %v3350_v41 = vrot.slane %v3337_v9, 4  ;;  %v3352_v60 = vrot.slane %v3313_v58, 4  ;;  %v4130_v13 = vsub.f32 %v16256_v52, %v16380_v49 }
 0x360   : > { %4296 = vmatpush.bf16.msra.mxu0 %v4287_v23  ;;  %v3333_v21 = vsel %vm2350_vm0, %v3293_v5, %v3332_v39  ;;  %v3356_v33 = vrot.slane %v3317_v36, 4  ;;  %14215 = vpow2.f32 %v16425_v12  ;;  %v4133_v3 = vsub.f32 %v16262_v62, %v4109_v57 }
 0x361   : > { %v3351_v61 = vsel %vm2350_vm0, %v3350_v41, %v3313_v58  ;;  %v3341_v47 = vperm.slane %v3333_v21, %v15514_v54  ;;  %v3353_v55 = vsel %vm2350_vm0, %v3337_v9, %v3352_v60  ;;  %v4154_v50 = vmul.f32 1.442695, %v4130_v13 }
 0x362   : > { %v16463_v29 = vpop.eup %14213  ;;  %v3730_v24 = vpack.c.bf16 %v3351_v61, %v3351_v61  ;;  %v3731_v40 = vpack.c.bf16 %v3353_v55, %v3353_v55  ;;  %v4160_v9 = vmul.f32 1.442695, %v4133_v3 }
 0x363   : > { %v4200_v25 = vsel %vm4073_vm4, %v16463_v29, 0.0  ;;  %v3354_v26 = vrot.slane %v3341_v47, 4  ;;  %v3357_v52 = vsel %vm2350_vm0, %v3341_v47, %v3356_v33  ;;  %14217 = vpow2.f32 %v4154_v50  ;;  %v4118_v51 = vpop.xlane.xlu0 %4117 }
 0x364   : > { %4201 = vadd.xlane.f32.xlu1 %v4200_v25  ;;  %v4363_v49 = vsel %vm4285_vm7, %v3730_v24, 0  ;;  %v3733_v5 = vpack.c.bf16 %v3357_v52, %v3357_v52  ;;  %v4382_v12 = vsel %vm4285_vm7, %v3731_v40, 0  ;;  %v4136_v7 = vsub.f32 %v16284_v14, %v4118_v51 }
 0x365   : > { %4372 = vmatpush.bf16.msrb.mxu0 %v4363_v49  ;;  %v3355_v20 = vsel %vm2350_vm0, %v3354_v26, %v3317_v36  ;;  %4391 = vmatpush.bf16.msrb.mxu1 %v4382_v12  ;;  %v2934_v50 = vrot.slane %v16312_v8, 4 }
 0x366   : > { %v3732_v4 = vpack.c.bf16 %v3355_v20, %v3355_v20  ;;  %v4420_v63 = vsel %vm4285_vm7, %v3733_v5, 0  ;;  %v16479_v45 = vpop.eup %14215  ;;  %v4166_v15 = vmul.f32 1.442695, %v4136_v7  ;;  %v2910_v5 = vrot.slane %v16308_v28, 4 }
 0x367   : > { %4429 = vmatpush.bf16.msrb.mxu3 %v4420_v63  ;;  %v4115_v35 = vpop.xlane.xlu2 %4114  ;;  %v4197_v42 = vsel %vm4073_vm4, %v16479_v45, 0.0 }
 0x368   : > { %v4091_v30 = vpop.xlane.xlu1 %4090  ;;  %v4401_v37 = vsel %vm4285_vm7, %v3732_v4, 0  ;;  %v4135_v34 = vsub.f32 %v16292_v48, %v4115_v35  ;;  %v2936_v4 = vrot.slane %v16402_v1, 4  ;;  %v2911_v63 = vsel %vm2350_vm0, %v2910_v5, %v16398_v2 }
 0x369   : > { %v4127_v46 = vsub.f32 %v16296_v53, %v4091_v30  ;;  %4410 = vmatpush.bf16.msrb.mxu2 %v4401_v37  ;;  %v16486_v58 = vpop.eup %14217  ;;  %v2935_v30 = vsel %vm2350_vm0, %v2934_v50, %v16402_v1 }
 0x36a   : > { %v4164_v6 = vmul.f32 1.442695, %v4135_v34  ;;  %v4194_v19 = vsel %vm4073_vm4, %v16486_v58, 0.0  ;;  %v2917_v34 = vperm.slane %v2911_v63, %v15436_v10 }
 0x36b   : > { %v4148_v17 = vmul.f32 1.442695, %v4127_v46 }
 0x36c   : > { %4198 = vadd.xlane.f32.xlu1 %v4197_v42 }
 0x36d   : > { %14219 = vpow2.f32 %v4148_v17  ;;  %v2937_v17 = vsel %vm2350_vm0, %v16312_v8, %v2936_v4 }
 0x36e   : > { %14221 = vpow2.f32 %v4164_v6  ;;  %v2945_v7 = vperm.slane %v2937_v17, %v15436_v10 }
 0x370   : > { %v4121_v44 = vpop.xlane.xlu1 %4120 }
 0x371   : > { %v4137_v43 = vsub.f32 %v16304_v16, %v4121_v44  ;;  %v4134_v16 = vsub.f32 %v16280_v59, %v16458_v56  ;;  %v14171_v20 = vpop.permute.xlu0 %14170 }
 0x372   : > { %v14173_v35 = vunpack.i.h.bf16 %v14171_v20  ;;  %v14172_v37 = vunpack.i.l.bf16 %v14171_v20 }
 0x373   : > { %v16490_v53 = vpop.eup %14219  ;;  %v4168_v48 = vmul.f32 1.442695, %v4137_v43  ;;  %v4162_v23 = vmul.f32 1.442695, %v4134_v16 }
 0x374   : > { %4195 = vadd.xlane.f32.xlu1 %v4194_v19  ;;  %v4185_v31 = vsel %vm4073_vm4, %v16490_v53, 0.0  ;;  %v16497_v62 = vpop.eup %14221  ;;  %v2922_v6 = vrot.slane %v14173_v35, 4  ;;  %v2946_v3 = vrot.slane %v14172_v37, 4 }
 0x375   : > { %14223 = vpow2.f32 %v4168_v48  ;;  %4186 = vadd.xlane.f32.xlu0 %v4185_v31  ;;  %v4209_v39 = vsel %vm4073_vm4, %v16497_v62, 0.0 }
 0x376   : > { %14225 = vpow2.f32 %v4160_v9 }
 0x377   : > { %14227 = vpow2.f32 %v4166_v15  ;;  %v2960_v15 = vrot.slane %v2917_v34, 4 }
 0x378   : > { %14229 = vpow2.f32 %v4162_v23 }
 0x37b   : > { %v16501_v14 = vpop.eup %14223 }
 0x37c   : > { %v4215_v36 = vsel %vm4073_vm4, %v16501_v14, 0.0  ;;  %v16507_v41 = vpop.eup %14225 }
 0x37d   : > { %4216 = vadd.xlane.f32.xlu1 %v4215_v36  ;;  %4210 = vadd.xlane.f32.xlu0 %v4209_v39  ;;  %v16509_v60 = vpop.eup %14227  ;;  %v4203_v59 = vsel %vm4073_vm4, %v16507_v41, 0.0 }
 0x37e   : > { %v4212_v56 = vsel %vm4073_vm4, %v16509_v60, 0.0  ;;  %v16515_v13 = vpop.eup %14229 }
 0x37f   : > { %v4206_v21 = vsel %vm4073_vm4, %v16515_v13, 0.0 }
 0x384   : > { %4204 = vadd.xlane.f32.xlu2 %v4203_v59 }
 0x385   : > { %4213 = vadd.xlane.f32.xlu1 %v4212_v56  ;;  %v2996_v56 = vrot.slane %v2945_v7, 4 }
 0x38c   : > { %4207 = vadd.xlane.f32.xlu2 %v4206_v21 }
 0x3a5   : > { %v4175_v33 = vpop.xlane.xlu2 %4174 }
 0x3a6   : > { %14231 = vrcp.f32 %v4175_v33 }
 0x3a7   : > { %v4172_v61 = vpop.xlane.xlu1 %4171 }
 0x3a8   : > { %14233 = vrcp.f32 %v4172_v61 }
 0x3ac   : > { %v14232_v47 = vpop.eup %14231 }
 0x3ad   : > { %v4235_v24 = vmul.f32 %v14232_v47, %v16324_v11 }
 0x3ae   : > { %v14234_v55 = vpop.eup %14233  ;;  %v4178_v40 = vpop.xlane.xlu2 %4177 }
 0x3af   : > { %v4234_v25 = vmul.f32 %v14234_v55, %v16327_v18  ;;  %14235 = vrcp.f32 %v4178_v40  ;;  %4251 = vst.msk [vmem:[%s15003_s10 + $0x8] sm:$0xff] %vm4073_vm4, %v4235_v24  ;;  %v4267_v26 = vpack.c.bf16 %v4235_v24, %v4235_v24  ;;  %v2912_v18 = vrot.slane %v16398_v2, 4 }
 0x3b0   : > { %v2941_v2 = vperm.slane %v2935_v30, %v15436_v10 }
 0x3b1   : > { %4250 = vst.msk [vmem:[%s15003_s10] sm:$0xff] %vm4073_vm4, %v4234_v25  ;;  %v4266_v52 = vpack.c.bf16 %v4234_v25, %v4234_v25  ;;  %10875 = vmatmul.msk.bf16.vlgmr.msra.gmra.mxu1 %vm4073_vm4, %v4267_v26 }
 0x3b2   : > { %v2984_v39 = vrot.slane %v2941_v2, 4 }
 0x3b3   : > { %10874 = vmatmul.msk.bf16.vlgmr.msra.gmra.mxu0 %vm4073_vm4, %v4266_v52 }
 0x3b5   : > { %v14236_v49 = vpop.eup %14235 }
 0x3b6   : > { %v4236_v11 = vmul.f32 %v14236_v49, %v16344_v22  ;;  %v4181_v12 = vpop.xlane.xlu2 %4180  ;;  %v2913_v22 = vsel %vm2350_vm0, %v16308_v28, %v2912_v18 }
 0x3b7   : > { %14237 = vrcp.f32 %v4181_v12  ;;  %v2921_v42 = vperm.slane %v2913_v22, %v15436_v10 }
 0x3b8   : > { %4252 = vst.msk [vmem:[%s15003_s10 + $0x10] sm:$0xff] %vm4073_vm4, %v4236_v11  ;;  %v4268_v57 = vpack.c.bf16 %v4236_v11, %v4236_v11 }
 0x3b9   : > { %v2972_v36 = vrot.slane %v2921_v42, 4 }
 0x3ba   : > { %10876 = vmatmul.msk.bf16.vlgmr.msra.gmra.mxu2 %vm4073_vm4, %v4268_v57 }
 0x3bd   : > { %v14238_v46 = vpop.eup %14237  ;;  %v4184_v44 = vpop.xlane.xlu1 %4183 }
 0x3be   : > { %v4237_v51 = vmul.f32 %v14238_v46, %v16356_v27  ;;  %v14176_v28 = vpop.permute.xlu2 %14175  ;;  %14239 = vrcp.f32 %v4184_v44 }
 0x3bf   : > { %v14178_v1 = vunpack.i.h.bf16 %v14176_v28  ;;  %v14177_v43 = vunpack.i.l.bf16 %v14176_v28 }
 0x3c0   : > { %4253 = vst.msk [vmem:[%s15003_s10 + $0x18] sm:$0xff] %vm4073_vm4, %v4237_v51  ;;  %v4269_v48 = vpack.c.bf16 %v4237_v51, %v4237_v51 }
 0x3c1   : > { %v2923_v8 = vsel %vm2350_vm0, %v2922_v6, %v14178_v1  ;;  %v2924_v19 = vrot.slane %v14178_v1, 4  ;;  %v2947_v31 = vsel %vm2350_vm0, %v2946_v3, %v14177_v43  ;;  %v2948_v9 = vrot.slane %v14177_v43, 4 }
 0x3c2   : > { %v2929_v27 = vperm.slane %v2923_v8, %v15436_v10  ;;  %v2953_v16 = vperm.slane %v2947_v31, %v15436_v10  ;;  %10877 = vmatmul.msk.bf16.vlgmr.msra.gmra.mxu3 %vm4073_vm4, %v4269_v48 }
 0x3c3   : > { %v2925_v23 = vsel %vm2350_vm0, %v14173_v35, %v2924_v19  ;;  %v2949_v59 = vsel %vm2350_vm0, %v14172_v37, %v2948_v9 }
 0x3c4   : > { %v2933_v21 = vperm.slane %v2925_v23, %v15436_v10  ;;  %v2958_v33 = vrot.slane %v2929_v27, 4  ;;  %v2961_v61 = vsel %vm2350_vm0, %v2929_v27, %v2960_v15  ;;  %v14240_v47 = vpop.eup %14239  ;;  %v2957_v24 = vperm.slane %v2949_v59, %v15436_v10 }
 0x3c5   : > { %v2969_v55 = vperm.slane %v2961_v61, %v15514_v54  ;;  %v2982_v40 = vrot.slane %v2953_v16, 4  ;;  %v2985_v25 = vsel %vm2350_vm0, %v2953_v16, %v2984_v39  ;;  %v4238_v26 = vmul.f32 %v14240_v47, %v16373_v32  ;;  %v4190_v11 = vpop.xlane.xlu1 %4189 }
 0x3c6   : > { %v2959_v52 = vsel %vm2350_vm0, %v2958_v33, %v2917_v34  ;;  %v2970_v49 = vrot.slane %v2933_v21, 4  ;;  %v2973_v5 = vsel %vm2350_vm0, %v2933_v21, %v2972_v36  ;;  %v2993_v63 = vperm.slane %v2985_v25, %v15514_v54 }
 0x3c7   : > { %v2965_v12 = vperm.slane %v2959_v52, %v15514_v54  ;;  %v2981_v18 = vperm.slane %v2973_v5, %v15514_v54  ;;  %v3012_v50 = vrot.slane %v2969_v55, 4  ;;  %v2983_v20 = vsel %vm2350_vm0, %v2982_v40, %v2941_v2  ;;  %4254 = vst.msk [vmem:[%s15003_s10 + $0x20] sm:$0xff] %vm4073_vm4, %v4238_v26 }
 0x3c8   : > { %v4270_v57 = vpack.c.bf16 %v4238_v26, %v4238_v26  ;;  %v2971_v4 = vsel %vm2350_vm0, %v2970_v49, %v2921_v42  ;;  %v2989_v32 = vperm.slane %v2983_v20, %v15514_v54  ;;  %v2994_v37 = vrot.slane %v2957_v24, 4 }
 0x3c9   : > { %v2977_v35 = vperm.slane %v2971_v4, %v15514_v54  ;;  %v3008_v22 = vrot.slane %v2965_v12, 4  ;;  %v3020_v30 = vrot.slane %v2981_v18, 4  ;;  %v2997_v46 = vsel %vm2350_vm0, %v2957_v24, %v2996_v56 }
 0x3ca   : > { %v3006_v34 = vrot.slane %v2989_v32, 4  ;;  %v3010_v17 = vrot.slane %v2993_v63, 4  ;;  %v3013_v2 = vsel %vm2350_vm0, %v2993_v63, %v3012_v50  ;;  %10878 = vmatmul.msk.bf16.vlgmr.msrb.gmra.mxu0 %vm4073_vm4, %v4270_v57  ;;  %v2995_v42 = vsel %vm2350_vm0, %v2994_v37, %v2945_v7 }
 0x3cb   : > { %v3016_v6 = vrot.slane %v2977_v35, 4  ;;  %v3005_v51 = vperm.slane %v2997_v46, %v15514_v54  ;;  %v3009_v44 = vsel %vm2350_vm0, %v2989_v32, %v3008_v22  ;;  %v3001_v28 = vperm.slane %v2995_v42, %v15514_v54 }
 0x3cc   : > { %v3007_v3 = vsel %vm2350_vm0, %v3006_v34, %v2965_v12  ;;  %v3011_v1 = vsel %vm2350_vm0, %v3010_v17, %v2969_v55  ;;  %v3594_v43 = vrot.slane %v3013_v2, 4  ;;  %v3596_v15 = vrot.slane %v3009_v44, 4 }
 0x3cd   : > { %v3018_v48 = vrot.slane %v3005_v51, 4  ;;  %v3021_v8 = vsel %vm2350_vm0, %v3005_v51, %v3020_v30  ;;  %v3582_v19 = vrot.slane %v3011_v1, 4  ;;  %v3584_v31 = vrot.slane %v3007_v3, 4  ;;  %v4193_v7 = vpop.xlane.xlu1 %4192 }
 0x3ce   : > { %v3014_v9 = vrot.slane %v3001_v28, 4  ;;  %v3618_v27 = vrot.slane %v3021_v8, 4  ;;  %14241 = vrcp.f32 %v4190_v11  ;;  %v3017_v39 = vsel %vm2350_vm0, %v3001_v28, %v3016_v6 }
 0x3cf   : > { %v3019_v16 = vsel %vm2350_vm0, %v3018_v48, %v2981_v18  ;;  %v3585_v36 = vsel %vm2350_vm0, %v3011_v1, %v3584_v31  ;;  %14243 = vrcp.f32 %v4193_v7  ;;  %v3583_v56 = vsel %vm2350_vm0, %v3582_v19, %v3007_v3 }
 0x3d0   : > { %v3606_v23 = vrot.slane %v3019_v16, 4  ;;  %v3015_v59 = vsel %vm2350_vm0, %v3014_v9, %v2977_v35  ;;  %v3595_v21 = vsel %vm2350_vm0, %v3594_v43, %v3009_v44  ;;  %v3589_v33 = vperm.slane %v3583_v56, %v15436_v10 }
 0x3d1   : > { %v3601_v61 = vperm.slane %v3595_v21, %v15436_v10  ;;  %v3608_v47 = vrot.slane %v3015_v59, 4  ;;  %v3619_v55 = vsel %vm2350_vm0, %v3618_v27, %v3017_v39  ;;  %v16596_v25 = vperm.slane %v3585_v36, %v15436_v10 }
 0x3d2   : > { %v3607_v24 = vsel %vm2350_vm0, %v3606_v23, %v3015_v59  ;;  %v3625_v40 = vperm.slane %v3619_v55, %v15436_v10  ;;  %v3597_v26 = vsel %vm2350_vm0, %v3013_v2, %v3596_v15  ;;  %v3632_v5 = vrot.slane %v3589_v33, 4 }
 0x3d3   : > { %v3613_v52 = vperm.slane %v3607_v24, %v15436_v10  ;;  %v3630_v49 = vrot.slane %v3601_v61, 4  ;;  %v3605_v11 = vperm.slane %v3597_v26, %v15436_v10  ;;  %v3609_v50 = vsel %vm2350_vm0, %v3019_v16, %v3608_v47 }
 0x3d4   : > { %v14242_v12 = vpop.eup %14241  ;;  %v3654_v18 = vrot.slane %v3625_v40, 4  ;;  %v3620_v20 = vrot.slane %v3017_v39, 4  ;;  %v3644_v57 = vrot.slane %v16596_v25, 4  ;;  %v3633_v35 = vsel %vm2350_vm0, %v3601_v61, %v3632_v5 }
 0x3d5   : > { %v14244_v4 = vpop.eup %14243  ;;  %v4240_v32 = vmul.f32 %v14242_v12, %v16386_v0  ;;  %v3631_v63 = vsel %vm2350_vm0, %v3630_v49, %v3589_v33  ;;  %v3656_v22 = vrot.slane %v3613_v52, 4  ;;  %v3641_v34 = vperm.slane %v3633_v35, %v15514_v54 }
 0x3d6   : > { %v4241_v30 = vmul.f32 %v14244_v4, %v16394_v38  ;;  %v3637_v37 = vperm.slane %v3631_v63, %v15514_v54  ;;  %v3655_v46 = vsel %vm2350_vm0, %v3654_v18, %v3613_v52  ;;  %v3617_v6 = vperm.slane %v3609_v50, %v15436_v10 }
 0x3d7   : > { %4256 = vst.msk [vmem:[%s15003_s10 + $0x30] sm:$0xff] %vm4073_vm4, %v4240_v32  ;;  %v4272_v17 = vpack.c.bf16 %v4240_v32, %v4240_v32  ;;  %v3661_v2 = vperm.slane %v3655_v46, %v15514_v54  ;;  %v3657_v0 = vsel %vm2350_vm0, %v3625_v40, %v3656_v22  ;;  %v4202_v51 = vpop.xlane.xlu1 %4201  ;;  %v3684_v28 = vrot.slane %v3641_v34, 4 }
 0x3d8   : > { %4257 = vst.msk [vmem:[%s15003_s10 + $0x38] sm:$0xff] %vm4073_vm4, %v4241_v30  ;;  %v4273_v42 = vpack.c.bf16 %v4241_v30, %v4241_v30  ;;  %v3680_v38 = vrot.slane %v3637_v37, 4  ;;  %v3665_v44 = vperm.slane %v3657_v0, %v15514_v54  ;;  %14245 = vrcp.f32 %v4202_v51 }
 0x3d9   : > { %10880 = vmatmul.msk.bf16.vlgmr.msrb.gmra.mxu2 %vm4073_vm4, %v4272_v17  ;;  %v3678_v3 = vrot.slane %v3661_v2, 4  ;;  %v3621_v1 = vsel %vm2350_vm0, %v3021_v8, %v3620_v20  ;;  %v3645_v43 = vsel %vm2350_vm0, %v3605_v11, %v3644_v57  ;;  %v3668_v39 = vrot.slane %v3617_v6, 4 }
 0x3da   : > { %10881 = vmatmul.msk.bf16.vlgmr.msrb.gmra.mxu3 %vm4073_vm4, %v4273_v42  ;;  %v3681_v48 = vsel %vm2350_vm0, %v3661_v2, %v3680_v38  ;;  %v3685_v19 = vsel %vm2350_vm0, %v3665_v44, %v3684_v28  ;;  %v3682_v31 = vrot.slane %v3665_v44, 4  ;;  %v3629_v9 = vperm.slane %v3621_v1, %v15436_v10 }
 0x3db   : > { %v3735_v15 = vpack.c.bf16 %v3681_v48, %v3681_v48  ;;  %v3737_v27 = vpack.c.bf16 %v3685_v19, %v3685_v19  ;;  %v3679_v7 = vsel %vm2350_vm0, %v3678_v3, %v3637_v37  ;;  %v3653_v16 = vperm.slane %v3645_v43, %v15514_v54 }
 0x3dc   : > { %v3734_v36 = vpack.c.bf16 %v3679_v7, %v3679_v7  ;;  %v3683_v8 = vsel %vm2350_vm0, %v3682_v31, %v3641_v34  ;;  %v3642_v23 = vrot.slane %v3605_v11, 4  ;;  %v3669_v47 = vsel %vm2350_vm0, %v3629_v9, %v3668_v39 }
 0x3dd   : > { %v4458_v59 = vsel %vm4285_vm7, %v3735_v15, 0  ;;  %v4496_v56 = vsel %vm4285_vm7, %v3737_v27, 0  ;;  %v3736_v21 = vpack.c.bf16 %v3683_v8, %v3683_v8  ;;  %v3692_v33 = vrot.slane %v3653_v16, 4 }
 0x3de   : > { %4467 = vmatpush.bf16.msra.mxu1 %v4458_v59  ;;  %4505 = vmatpush.bf16.msra.mxu3 %v4496_v56  ;;  %v4439_v61 = vsel %vm4285_vm7, %v3734_v36, 0  ;;  %v3666_v55 = vrot.slane %v3629_v9, 4  ;;  %v14246_v24 = vpop.eup %14245  ;;  %v3677_v26 = vperm.slane %v3669_v47, %v15514_v54  ;;  %v3643_v49 = vsel %vm2350_vm0, %v3642_v23, %v16596_v25 }
 0x3df   : > { %4448 = vmatpush.bf16.msra.mxu0 %v4439_v61  ;;  %v4477_v40 = vsel %vm4285_vm7, %v3736_v21, 0  ;;  %v4244_v52 = vmul.f32 %v14246_v24, %v16463_v29  ;;  %v4199_v11 = vpop.xlane.xlu1 %4198  ;;  %v3649_v57 = vperm.slane %v3643_v49, %v15514_v54 }
 0x3e0   : > { %4486 = vmatpush.bf16.msra.mxu2 %v4477_v40  ;;  %v3667_v5 = vsel %vm2350_vm0, %v3666_v55, %v3617_v6  ;;  %v3693_v12 = vsel %vm2350_vm0, %v3677_v26, %v3692_v33  ;;  %v3690_v50 = vrot.slane %v3677_v26, 4  ;;  %14247 = vrcp.f32 %v4199_v11 }
 0x3e1   : > { %v3673_v18 = vperm.slane %v3667_v5, %v15514_v54  ;;  %4260 = vst.msk [vmem:[%s15003_s10 + $0x50] sm:$0xff] %vm4073_vm4, %v4244_v52  ;;  %v3741_v20 = vpack.c.bf16 %v3693_v12, %v3693_v12  ;;  %v4276_v63 = vpack.c.bf16 %v4244_v52, %v4244_v52  ;;  %v3688_v0 = vrot.slane %v3649_v57, 4 }
 0x3e2   : > { %v3691_v29 = vsel %vm2350_vm0, %v3690_v50, %v3653_v16 }
 0x3e3   : > { %v3686_v4 = vrot.slane %v3673_v18, 4  ;;  %v4572_v32 = vsel %vm4285_vm7, %v3741_v20, 0  ;;  %v3740_v25 = vpack.c.bf16 %v3691_v29, %v3691_v29  ;;  %v3689_v6 = vsel %vm2350_vm0, %v3673_v18, %v3688_v0 }
 0x3e4   : > { %4581 = vmatpush.bf16.msrb.mxu3 %v4572_v32  ;;  %v3739_v3 = vpack.c.bf16 %v3689_v6, %v3689_v6 }
 0x3e5   : > { %v3687_v35 = vsel %vm2350_vm0, %v3686_v4, %v3649_v57  ;;  %v4553_v30 = vsel %vm4285_vm7, %v3740_v25, 0 }
 0x3e6   : > { %v3738_v22 = vpack.c.bf16 %v3687_v35, %v3687_v35  ;;  %v14248_v37 = vpop.eup %14247  ;;  %4562 = vmatpush.bf16.msrb.mxu2 %v4553_v30 }
 0x3e7   : > { %v4243_v34 = vmul.f32 %v14248_v37, %v16479_v45  ;;  %v4196_v17 = vpop.xlane.xlu1 %4195 }
 0x3e8   : > { %v4515_v46 = vsel %vm4285_vm7, %v3738_v22, 0  ;;  %14249 = vrcp.f32 %v4196_v17  ;;  %v4187_v2 = vpop.xlane.xlu0 %4186 }
 0x3e9   : > { %4524 = vmatpush.bf16.msrb.mxu0 %v4515_v46  ;;  %10884 = vmatmul.msk.bf16.vlgmr.msra.gmra.mxu2 %vm4073_vm4, %v4276_v63  ;;  %4259 = vst.msk [vmem:[%s15003_s10 + $0x48] sm:$0xff] %vm4073_vm4, %v4243_v34  ;;  %14251 = vrcp.f32 %v4187_v2  ;;  %v4275_v39 = vpack.c.bf16 %v4243_v34, %v4243_v34 }
 0x3ee   : > { %v14250_v42 = vpop.eup %14249 }
 0x3ef   : > { %v14252_v51 = vpop.eup %14251  ;;  %v4242_v38 = vmul.f32 %v14250_v42, %v16486_v58  ;;  %v4534_v58 = vsel %vm4285_vm7, %v3739_v3, 0 }
 0x3f0   : > { %v4239_v45 = vmul.f32 %v14252_v51, %v16490_v53  ;;  %v4217_v44 = vpop.xlane.xlu1 %4216  ;;  %v4211_v28 = vpop.xlane.xlu0 %4210 }
 0x3f1   : > { %4258 = vst.msk [vmem:[%s15003_s10 + $0x40] sm:$0xff] %vm4073_vm4, %v4242_v38  ;;  %v4274_v1 = vpack.c.bf16 %v4242_v38, %v4242_v38  ;;  %14253 = vrcp.f32 %v4217_v44 }
 0x3f2   : > { %4255 = vst.msk [vmem:[%s15003_s10 + $0x28] sm:$0xff] %vm4073_vm4, %v4239_v45  ;;  %v4271_v43 = vpack.c.bf16 %v4239_v45, %v4239_v45  ;;  %14255 = vrcp.f32 %v4211_v28 }
 0x3f3   : > { %10882 = vmatmul.msk.bf16.vlgmr.msra.gmra.mxu0 %vm4073_vm4, %v4274_v1 }
 0x3f4   : > { %10879 = vmatmul.msk.bf16.vlgmr.msrb.gmra.mxu1 %vm4073_vm4, %v4271_v43 }
 0x3f5   : > { %4543 = vmatpush.bf16.msrb.mxu1 %v4534_v58 }
 0x3f7   : > { %v4205_v53 = vpop.xlane.xlu2 %4204  ;;  %v14254_v48 = vpop.eup %14253 }
 0x3f8   : > { %14257 = vrcp.f32 %v4205_v53  ;;  %v14256_v19 = vpop.eup %14255  ;;  %v4249_v31 = vmul.f32 %v14254_v48, %v16501_v14  ;;  %v4214_v9 = vpop.xlane.xlu1 %4213 }
 0x3f9   : > { %v4247_v15 = vmul.f32 %v14256_v19, %v16497_v62  ;;  %14259 = vrcp.f32 %v4214_v9 }
 0x3fa   : > { %4265 = vst.msk [vmem:[%s15003_s10 + $0x78] sm:$0xff] %vm4073_vm4, %v4249_v31  ;;  %v4281_v56 = vpack.c.bf16 %v4249_v31, %v4249_v31 }
 0x3fb   : > { %4263 = vst.msk [vmem:[%s15003_s10 + $0x68] sm:$0xff] %vm4073_vm4, %v4247_v15 }
 0x3fe   : > { %v14258_v27 = vpop.eup %14257 }
 0x3ff   : > { %v4245_v7 = vmul.f32 %v14258_v27, %v16507_v41  ;;  %v4208_v16 = vpop.xlane.xlu2 %4207  ;;  %v14260_v36 = vpop.eup %14259 }
 0x400   : > { %14261 = vrcp.f32 %v4208_v16  ;;  %v4248_v14 = vmul.f32 %v14260_v36, %v16509_v60  ;;  %v4279_v60 = vpack.c.bf16 %v4247_v15, %v4247_v15 }
 0x401   : > { %4261 = vst.msk [vmem:[%s15003_s10 + $0x58] sm:$0xff] %vm4073_vm4, %v4245_v7  ;;  %v4277_v8 = vpack.c.bf16 %v4245_v7, %v4245_v7 }
 0x402   : > { %4264 = vst.msk [vmem:[%s15003_s10 + $0x70] sm:$0xff] %vm4073_vm4, %v4248_v14  ;;  %v4280_v62 = vpack.c.bf16 %v4248_v14, %v4248_v14 }
 0x403   : > { %10885 = vmatmul.msk.bf16.vlgmr.msra.gmra.mxu3 %vm4073_vm4, %v4277_v8 }
 0x404   : > { %10883 = vmatmul.msk.bf16.vlgmr.msra.gmra.mxu1 %vm4073_vm4, %v4275_v39  ;;  %10888 = vmatmul.msk.bf16.vlgmr.msrb.gmra.mxu2 %vm4073_vm4, %v4280_v62 }
 0x406   : > { %v14262_v23 = vpop.eup %14261 }
 0x407   : > { %v4246_v41 = vmul.f32 %v14262_v23, %v16515_v13 }
 0x409   : > { %4262 = vst.msk [vmem:[%s15003_s10 + $0x60] sm:$0xff] %vm4073_vm4, %v4246_v41  ;;  %v4278_v59 = vpack.c.bf16 %v4246_v41, %v4246_v41 }
 0x40b   : > { %10886 = vmatmul.msk.bf16.vlgmr.msrb.gmra.mxu0 %vm4073_vm4, %v4278_v59 }
 0x413   : > { %10889 = vmatmul.msk.bf16.vlgmr.msrb.gmra.mxu3 %vm4073_vm4, %v4281_v56 }
 0x414   : > { %10887 = vmatmul.msk.bf16.vlgmr.msrb.gmra.mxu1 %vm4073_vm4, %v4279_v60 }
 0x42e   : > { %v4317_v21 = vpop.f32.mrf.mxu1 }
 0x42f   : > { %v4601_v49 = vrot.slane %v4317_v21, 4 }
 0x430   : > { %v4298_v33 = vpop.f32.mrf.mxu0 }
 0x431   : > { %v4589_v55 = vrot.slane %v4298_v33, 4 }
 0x436   : > { %v4319_v61 = vpop.f32.mrf.mxu1 }
 0x438   : > { %v4300_v47 = vpop.f32.mrf.mxu0 }
 0x43d   : > { %v4336_v24 = vpop.f32.mrf.mxu2 }
 0x43e   : > { %v4587_v40 = vrot.slane %v4336_v24, 4  ;;  %v4590_v13 = vsel %vm2350_vm0, %v4336_v24, %v4589_v55 }
 0x43f   : > { %v4598_v52 = vperm.slane %v4590_v13, %v15436_v10 }
 0x440   : > { %v4588_v26 = vsel %vm2350_vm0, %v4587_v40, %v4298_v33 }
 0x441   : > { %v4594_v5 = vperm.slane %v4588_v26, %v15436_v10  ;;  %v4649_v20 = vrot.slane %v4598_v52, 4 }
 0x443   : > { %v4637_v32 = vrot.slane %v4594_v5, 4 }
 0x445   : > { %v4338_v11 = vpop.f32.mrf.mxu2  ;;  %v4355_v12 = vpop.f32.mrf.mxu3 }
 0x446   : > { %v4599_v18 = vrot.slane %v4355_v12, 4  ;;  %v4602_v50 = vsel %vm2350_vm0, %v4355_v12, %v4601_v49 }
 0x447   : > { %v4374_v57 = vpop.f32.mrf.mxu0  ;;  %v4610_v4 = vperm.slane %v4602_v50, %v15436_v10 }
 0x448   : > { %v4600_v29 = vsel %vm2350_vm0, %v4599_v18, %v4317_v21  ;;  %v4613_v45 = vrot.slane %v4374_v57, 4 }
 0x449   : > { %v4606_v25 = vperm.slane %v4600_v29, %v15436_v10  ;;  %v4647_v63 = vrot.slane %v4610_v4, 4  ;;  %v4650_v35 = vsel %vm2350_vm0, %v4610_v4, %v4649_v20 }
 0x44a   : > { %v4658_v36 = vperm.slane %v4650_v35, %v15514_v54 }
 0x44b   : > { %v4635_v22 = vrot.slane %v4606_v25, 4  ;;  %v4638_v30 = vsel %vm2350_vm0, %v4606_v25, %v4637_v32  ;;  %v4648_v37 = vsel %vm2350_vm0, %v4647_v63, %v4598_v52 }
 0x44c   : > { %v4646_v48 = vperm.slane %v4638_v30, %v15514_v54  ;;  %v4654_v16 = vperm.slane %v4648_v37, %v15514_v54  ;;  %v4697_v26 = vrot.slane %v4658_v36, 4 }
 0x44d   : > { %v4636_v46 = vsel %vm2350_vm0, %v4635_v22, %v4594_v5  ;;  %v4357_v34 = vpop.f32.mrf.mxu3 }
 0x44e   : > { %v4642_v9 = vperm.slane %v4636_v46, %v15514_v54  ;;  %v4689_v41 = vrot.slane %v4646_v48, 4  ;;  %v4693_v13 = vrot.slane %v4654_v16, 4 }
 0x44f   : > { %v4376_v17 = vpop.f32.mrf.mxu0 }
 0x450   : > { %v4685_v56 = vrot.slane %v4642_v9, 4 }
 0x45c   : > { %v4412_v2 = vpop.f32.mrf.mxu2 }
 0x45d   : > { %v4431_v0 = vpop.f32.mrf.mxu3  ;;  %v4611_v51 = vrot.slane %v4412_v2, 4  ;;  %v4614_v28 = vsel %vm2350_vm0, %v4412_v2, %v4613_v45 }
 0x45e   : > { %v4623_v1 = vrot.slane %v4431_v0, 4  ;;  %v4622_v58 = vperm.slane %v4614_v28, %v15436_v10 }
 0x45f   : > { %v4612_v44 = vsel %vm2350_vm0, %v4611_v51, %v4374_v57 }
 0x460   : > { %v4618_v3 = vperm.slane %v4612_v44, %v15436_v10  ;;  %v4673_v14 = vrot.slane %v4622_v58, 4 }
 0x462   : > { %v4661_v15 = vrot.slane %v4618_v3, 4 }
 0x464   : > { %v4414_v6 = vpop.f32.mrf.mxu2 }
 0x465   : > { %v4433_v42 = vpop.f32.mrf.mxu3 }
 0x46c   : > { %v4488_v38 = vpop.f32.mrf.mxu2 }
 0x46d   : > { %v4699_v30 = vrot.slane %v4488_v38, 4 }
 0x470   : > { %v4450_v43 = vpop.f32.mrf.mxu0 }
 0x471   : > { %v4393_v53 = vpop.f32.mrf.mxu1  ;;  %v4701_v29 = vrot.slane %v4450_v43, 4  ;;  %v4700_v34 = vsel %vm2350_vm0, %v4699_v30, %v4450_v43 }
 0x472   : > { %v4624_v19 = vsel %vm2350_vm0, %v4623_v1, %v4393_v53  ;;  %v4625_v31 = vrot.slane %v4393_v53, 4  ;;  %v4706_v44 = vperm.slane %v4700_v34, %v15436_v10 }
 0x473   : > { %v4630_v7 = vperm.slane %v4624_v19, %v15436_v10  ;;  %v4702_v17 = vsel %vm2350_vm0, %v4488_v38, %v4701_v29 }
 0x474   : > { %v4490_v27 = vpop.f32.mrf.mxu2  ;;  %v4626_v8 = vsel %vm2350_vm0, %v4431_v0, %v4625_v31  ;;  %v4710_v28 = vperm.slane %v4702_v17, %v15436_v10 }
 0x475   : > { %v4634_v39 = vperm.slane %v4626_v8, %v15436_v10  ;;  %v4659_v62 = vrot.slane %v4630_v7, 4  ;;  %v4662_v23 = vsel %vm2350_vm0, %v4630_v7, %v4661_v15  ;;  %v4749_v15 = vrot.slane %v4706_v44, 4 }
 0x476   : > { %v4670_v59 = vperm.slane %v4662_v23, %v15514_v54  ;;  %v4761_v27 = vrot.slane %v4710_v28, 4 }
 0x477   : > { %v4660_v60 = vsel %vm2350_vm0, %v4659_v62, %v4618_v3  ;;  %v4671_v21 = vrot.slane %v4634_v39, 4  ;;  %v4674_v33 = vsel %vm2350_vm0, %v4634_v39, %v4673_v14 }
 0x478   : > { %v4666_v61 = vperm.slane %v4660_v60, %v15514_v54  ;;  %v4682_v47 = vperm.slane %v4674_v33, %v15514_v54  ;;  %v4687_v55 = vrot.slane %v4670_v59, 4  ;;  %v4690_v24 = vsel %vm2350_vm0, %v4670_v59, %v4689_v41  ;;  %v4452_v40 = vpop.f32.mrf.mxu0 }
 0x479   : > { %v4672_v52 = vsel %vm2350_vm0, %v4671_v21, %v4622_v58  ;;  %v4823_v49 = vrot.slane %v4690_v24, 4  ;;  %v4395_v5 = vpop.f32.mrf.mxu1 }
 0x47a   : > { %v4678_v11 = vperm.slane %v4672_v52, %v15514_v54  ;;  %v4683_v12 = vrot.slane %v4666_v61, 4  ;;  %v4686_v18 = vsel %vm2350_vm0, %v4666_v61, %v4685_v56  ;;  %v4688_v50 = vsel %vm2350_vm0, %v4687_v55, %v4646_v48 }
 0x47b   : > { %v4695_v20 = vrot.slane %v4682_v47, 4  ;;  %v16719_v57 = vsel %vm2350_vm0, %v4682_v47, %v4697_v26  ;;  %v4824_v4 = vsel %vm2350_vm0, %v4823_v49, %v4686_v18  ;;  %v4825_v63 = vrot.slane %v4686_v18, 4 }
 0x47c   : > { %v4684_v32 = vsel %vm2350_vm0, %v4683_v12, %v4642_v9  ;;  %v16724_v25 = vsel %vm2350_vm0, %v4678_v11, %v4693_v13  ;;  %v4691_v2 = vrot.slane %v4678_v11, 4  ;;  %v4811_v0 = vrot.slane %v4688_v50, 4 }
 0x47d   : > { %v4696_v35 = vsel %vm2350_vm0, %v4695_v20, %v4658_v36  ;;  %v4813_v22 = vrot.slane %v4684_v32, 4  ;;  %v4826_v37 = vsel %vm2350_vm0, %v4690_v24, %v4825_v63  ;;  %v16732_v6 = vperm.slane %v4824_v4, %v15436_v10 }
 0x47e   : > { %v4847_v42 = vrot.slane %v16719_v57, 4  ;;  %v4835_v45 = vrot.slane %v4696_v35, 4  ;;  %v4692_v58 = vsel %vm2350_vm0, %v4691_v2, %v4654_v16  ;;  %v4812_v43 = vsel %vm2350_vm0, %v4811_v0, %v4684_v32 }
 0x47f   : > { %v4814_v46 = vsel %vm2350_vm0, %v4688_v50, %v4813_v22  ;;  %v4859_v53 = vrot.slane %v16732_v6, 4  ;;  %v16744_v31 = vperm.slane %v4812_v43, %v15436_v10  ;;  %v4849_v55 = vrot.slane %v16724_v25, 4 }
 0x480   : > { %v4848_v38 = vsel %vm2350_vm0, %v4847_v42, %v16724_v25  ;;  %v4836_v9 = vsel %vm2350_vm0, %v4835_v45, %v4692_v58  ;;  %v4837_v13 = vrot.slane %v4692_v58, 4  ;;  %v4834_v26 = vperm.slane %v4826_v37, %v15436_v10 }
 0x481   : > { %v4469_v51 = vpop.f32.mrf.mxu1  ;;  %v16749_v8 = vperm.slane %v4848_v38, %v15436_v10  ;;  %v16753_v62 = vperm.slane %v4836_v9, %v15436_v10  ;;  %v4860_v23 = vsel %vm2350_vm0, %v4859_v53, %v16744_v31  ;;  %v4822_v63 = vperm.slane %v4814_v46, %v15436_v10 }
 0x482   : > { %v4713_v3 = vrot.slane %v4469_v51, 4  ;;  %v16760_v21 = vperm.slane %v4860_v23, %v15514_v54  ;;  %v4838_v22 = vsel %vm2350_vm0, %v4696_v35, %v4837_v13  ;;  %v4850_v30 = vsel %vm2350_vm0, %v16719_v57, %v4849_v55  ;;  %v11132_v55 = vld [vmem:[%s14993_s13 + $0x1e0] sm:$0xf] }
 0x483   : > { %v4883_v47 = vrot.slane %v16749_v8, 4  ;;  %v4846_v34 = vperm.slane %v4838_v22, %v15436_v10  ;;  %v4858_v17 = vperm.slane %v4850_v30, %v15436_v10  ;;  %v4871_v2 = vrot.slane %v4834_v26, 4 }
 0x484   : > { %v4909_v18 = vrot.slane %v16760_v21, 4  ;;  %v4861_v43 = vrot.slane %v16744_v31, 4 }
 0x485   : > { %v4884_v12 = vsel %vm2350_vm0, %v4883_v47, %v16753_v62  ;;  %v4872_v45 = vsel %vm2350_vm0, %v4871_v2, %v4822_v63  ;;  %v4897_v58 = vrot.slane %v4846_v34, 4  ;;  %v11124_v2 = vld [vmem:[%s14993_s13 + $0x1d0] sm:$0xf] }
 0x486   : > { %v4507_v1 = vpop.f32.mrf.mxu3  ;;  %v16783_v25 = vperm.slane %v4884_v12, %v15514_v54 }
 0x487   : > { %v4711_v48 = vrot.slane %v4507_v1, 4  ;;  %v4714_v19 = vsel %vm2350_vm0, %v4507_v1, %v4713_v3  ;;  %v4564_v36 = vpop.f32.mrf.mxu2  ;;  %v16807_v1 = vperm.slane %v4872_v45, %v15514_v54  ;;  %v4898_v31 = vsel %vm2350_vm0, %v4858_v17, %v4897_v58 }
 0x488   : > { %v4722_v7 = vperm.slane %v4714_v19, %v15436_v10  ;;  %v4526_v16 = vpop.f32.mrf.mxu0  ;;  %v4723_v39 = vrot.slane %v4564_v36, 4  ;;  %v16799_v35 = vsel %vm2350_vm0, %v16783_v25, %v4909_v18  ;;  %v4885_v19 = vrot.slane %v16753_v62, 4 }
 0x489   : > { %v4712_v14 = vsel %vm2350_vm0, %v4711_v48, %v4469_v51  ;;  %v4471_v60 = vpop.f32.mrf.mxu1  ;;  %v4725_v33 = vrot.slane %v4526_v16, 4 }
 0x48a   : > { %v4718_v41 = vperm.slane %v4712_v14, %v15436_v10  ;;  %v4759_v59 = vrot.slane %v4722_v7, 4  ;;  %v4762_v56 = vsel %vm2350_vm0, %v4722_v7, %v4761_v27  ;;  %v4724_v61 = vsel %vm2350_vm0, %v4723_v39, %v4526_v16  ;;  %v13459_v60 = vld [vmem:[%s14993_s13 + $0x1f4] sm:$0xf0] }
 0x48b   : > { %v16768_v52 = vperm.slane %v4762_v56, %v15514_v54  ;;  %v16772_v5 = vperm.slane %v4724_v61, %v15436_v10  ;;  %v4726_v4 = vsel %vm2350_vm0, %v4564_v36, %v4725_v33  ;;  %v4917_v27 = vrot.slane %v16807_v1, 4  ;;  %v11140_v56 = vld [vmem:[%s14993_s13 + $0x1f0] sm:$0xf] }
 0x48c   : > { %v4747_v24 = vrot.slane %v4718_v41, 4  ;;  %v4750_v40 = vsel %vm2350_vm0, %v4718_v41, %v4749_v15  ;;  %v4760_v49 = vsel %vm2350_vm0, %v4759_v59, %v4710_v28  ;;  %v4734_v42 = vperm.slane %v4726_v4, %v15436_v10 }
 0x48d   : > { %v16779_v20 = vperm.slane %v4750_v40, %v15514_v54  ;;  %v16790_v37 = vperm.slane %v4760_v49, %v15514_v54  ;;  %v4809_v0 = vrot.slane %v16768_v52, 4  ;;  %v4773_v51 = vrot.slane %v16772_v5, 4 }
 0x48e   : > { %v4509_v11 = vpop.f32.mrf.mxu3  ;;  %v4748_v50 = vsel %vm2350_vm0, %v4747_v24, %v4706_v44  ;;  %v4895_v44 = vrot.slane %v4858_v17, 4  ;;  %v4873_v28 = vrot.slane %v4822_v63, 4  ;;  %v16823_v14 = vperm.slane %v4898_v31, %v15514_v54  ;;  %v13457_v24 = vld [vmem:[%s14993_s13 + $0x1e4] sm:$0xf0] }
 0x48f   : > { %v4566_v32 = vpop.f32.mrf.mxu2  ;;  %v16802_v57 = vperm.slane %v4748_v50, %v15514_v54  ;;  %v4801_v3 = vrot.slane %v16779_v20, 4  ;;  %v4862_v39 = vsel %vm2350_vm0, %v16732_v6, %v4861_v43  ;;  %v4785_v62 = vrot.slane %v4734_v42, 4 }
 0x490   : > { %v4528_v29 = vpop.f32.mrf.mxu0  ;;  %v4896_v53 = vsel %vm2350_vm0, %v4895_v44, %v4846_v34  ;;  %v4874_v48 = vsel %vm2350_vm0, %v4834_v26, %v4873_v28  ;;  %v4805_v33 = vrot.slane %v16790_v37, 4  ;;  %v16838_v47 = vperm.slane %v4862_v39, %v15514_v54 }
 0x491   : > { %v4545_v46 = vpop.f32.mrf.mxu1  ;;  %v16814_v15 = vperm.slane %v4896_v53, %v15514_v54  ;;  %v16818_v7 = vperm.slane %v4874_v48, %v15514_v54  ;;  %v4886_v6 = vsel %vm2350_vm0, %v16749_v8, %v4885_v19  ;;  %v11141_v50 = vor.u32 %v13459_v60, %v11140_v56 }
 0x492   : > { %v4737_v38 = vrot.slane %v4545_v46, 4  ;;  %v16852_v18 = vperm.slane %v4886_v6, %v15514_v54  ;;  %v4913_v8 = vrot.slane %v16838_v47, 4  ;;  %v11133_v63 = vor.u32 %v13457_v24, %v11132_v55 }
 0x493   : > { %v16830_v41 = vsel %vm2350_vm0, %v16814_v15, %v4917_v27  ;;  %v4921_v59 = vrot.slane %v16818_v7, 4  ;;  %5505 = vmatpush.bf16.msra.mxu3 %v11141_v50  ;;  %v4797_v45 = vrot.slane %v16802_v57, 4 }
 0x495   : > { %v16848_v11 = vsel %vm2350_vm0, %v16823_v14, %v4921_v59 }
 0x496   : > { %v4583_v9 = vpop.f32.mrf.mxu3 }
 0x497   : > { %v4735_v16 = vrot.slane %v4583_v9, 4  ;;  %v4738_v36 = vsel %vm2350_vm0, %v4583_v9, %v4737_v38  ;;  %5506 = vmatpush.bf16.msra.mxu3 %v11133_v63 }
 0x498   : > { %v4746_v23 = vperm.slane %v4738_v36, %v15436_v10 }
 0x499   : > { %v4736_v61 = vsel %vm2350_vm0, %v4735_v16, %v4545_v46  ;;  %v4547_v49 = vpop.f32.mrf.mxu1  ;;  %v13455_v46 = vld [vmem:[%s14993_s13 + $0x1d4] sm:$0xf0] }
 0x49a   : > { %v4742_v40 = vperm.slane %v4736_v61, %v15436_v10  ;;  %v4783_v13 = vrot.slane %v4746_v23, 4  ;;  %v4786_v26 = vsel %vm2350_vm0, %v4746_v23, %v4785_v62  ;;  %v11125_v9 = vor.u32 %v13455_v46, %v11124_v2 }
 0x49b   : > { %v4794_v12 = vperm.slane %v4786_v26, %v15514_v54 }
 0x49c   : > { %v4771_v4 = vrot.slane %v4742_v40, 4  ;;  %v4774_v29 = vsel %vm2350_vm0, %v4742_v40, %v4773_v51  ;;  %v4784_v32 = vsel %vm2350_vm0, %v4783_v13, %v4734_v42  ;;  %v16867_v42 = vsel %vm2350_vm0, %v16852_v18, %v4913_v8  ;;  %5507 = vmatpush.bf16.msra.mxu3 %v11125_v9 }
 0x49d   : > { %v4782_v22 = vperm.slane %v4774_v29, %v15514_v54  ;;  %v4790_v30 = vperm.slane %v4784_v32, %v15514_v54  ;;  %v4807_v34 = vrot.slane %v4794_v12, 4  ;;  %v4810_v17 = vsel %vm2350_vm0, %v4794_v12, %v4809_v0 }
 0x49e   : > { %v4772_v44 = vsel %vm2350_vm0, %v4771_v4, %v16772_v5  ;;  %v4959_v28 = vrot.slane %v4810_v17, 4  ;;  %v4585_v51 = vpop.f32.mrf.mxu3 }
 0x49f   : > { %v4778_v58 = vperm.slane %v4772_v44, %v15514_v54  ;;  %v4799_v43 = vrot.slane %v4782_v22, 4  ;;  %v4802_v38 = vsel %vm2350_vm0, %v4782_v22, %v4801_v3  ;;  %v4803_v0 = vrot.slane %v4790_v30, 4 }
 0x4a0   : > { %v4806_v53 = vsel %vm2350_vm0, %v4790_v30, %v4805_v33  ;;  %v4808_v48 = vsel %vm2350_vm0, %v4807_v34, %v16768_v52  ;;  %v4935_v19 = vrot.slane %v4802_v38, 4 }
 0x4a1   : > { %v4795_v5 = vrot.slane %v4778_v58, 4  ;;  %v4798_v27 = vsel %vm2350_vm0, %v4778_v58, %v4797_v45  ;;  %v4800_v31 = vsel %vm2350_vm0, %v4799_v43, %v16779_v20  ;;  %v4804_v16 = vsel %vm2350_vm0, %v4803_v0, %v16790_v37  ;;  %v11116_v58 = vld [vmem:[%s14993_s13 + $0x1c0] sm:$0xf] }
 0x4a2   : > { %v4923_v36 = vrot.slane %v4800_v31, 4  ;;  %v4937_v3 = vrot.slane %v4798_v27, 4  ;;  %v4947_v39 = vrot.slane %v4808_v48, 4  ;;  %v4949_v62 = vrot.slane %v4804_v16, 4 }
 0x4a3   : > { %v4960_v23 = vsel %vm2350_vm0, %v4959_v28, %v4806_v53  ;;  %v4961_v59 = vrot.slane %v4806_v53, 4  ;;  %v4796_v52 = vsel %vm2350_vm0, %v4795_v5, %v16802_v57  ;;  %v4936_v56 = vsel %vm2350_vm0, %v4935_v19, %v4798_v27  ;;  %v13453_v53 = vld [vmem:[%s14993_s13 + $0x1c4] sm:$0xf0]  ;;  %v13451_v19 = vld [vmem:[%s14993_s13 + $0x1b4] sm:$0xf0] }
 0x4a4   : > { %v4938_v60 = vsel %vm2350_vm0, %v4802_v38, %v4937_v3  ;;  %v4924_v20 = vsel %vm2350_vm0, %v4923_v36, %v4796_v52  ;;  %v4925_v33 = vrot.slane %v4796_v52, 4  ;;  %v4942_v37 = vperm.slane %v4936_v56, %v15436_v10  ;;  %v13411_v36 = vld [vmem:[%s14993_s13 + $0x74] sm:$0xf0]  ;;  %v11076_v3 = vld [vmem:[%s14993_s13 + $0x170] sm:$0xf] }
 0x4a5   : > { %v4962_v61 = vsel %vm2350_vm0, %v4810_v17, %v4961_v59  ;;  %v4930_v6 = vperm.slane %v4924_v20, %v15436_v10  ;;  %v4948_v55 = vsel %vm2350_vm0, %v4947_v39, %v4804_v16  ;;  %v4966_v24 = vperm.slane %v4960_v23, %v15436_v10  ;;  %v10948_v16 = vld [vmem:[%s14993_s13 + $0x70] sm:$0xf]  ;;  %v13443_v52 = vld [vmem:[%s14993_s13 + $0x174] sm:$0xf0] }
 0x4a6   : > { %v4970_v57 = vperm.slane %v4962_v61, %v15436_v10  ;;  %v4954_v40 = vperm.slane %v4948_v55, %v15436_v10  ;;  %v4971_v13 = vrot.slane %v4942_v37, 4  ;;  %v4926_v26 = vsel %vm2350_vm0, %v4800_v31, %v4925_v33  ;;  %v10940_v33 = vld [vmem:[%s14993_s13 + $0x60] sm:$0xf]  ;;  %v11012_v55 = vld [vmem:[%s14993_s13 + $0xf0] sm:$0xf] }
 0x4a7   : > { %v4995_v49 = vrot.slane %v4966_v24, 4  ;;  %v4934_v12 = vperm.slane %v4926_v26, %v15436_v10  ;;  %v4946_v8 = vperm.slane %v4938_v60, %v15436_v10  ;;  %v4950_v50 = vsel %vm2350_vm0, %v4808_v48, %v4949_v62  ;;  %v11108_v48 = vld [vmem:[%s14993_s13 + $0x1b0] sm:$0xf] }
 0x4a8   : > { %v4972_v4 = vsel %vm2350_vm0, %v4971_v13, %v4930_v6  ;;  %v4958_v29 = vperm.slane %v4950_v50, %v15436_v10  ;;  %v5007_v32 = vrot.slane %v4970_v57, 4  ;;  %v4973_v63 = vrot.slane %v4930_v6, 4  ;;  %v13441_v50 = vld [vmem:[%s14993_s13 + $0x164] sm:$0xf0] }
 0x4a9   : > { %v16899_v22 = vperm.slane %v4972_v4, %v15514_v54  ;;  %v4996_v30 = vsel %vm2350_vm0, %v4995_v49, %v4954_v40  ;;  %v4983_v34 = vrot.slane %v4946_v8, 4  ;;  %v4985_v17 = vrot.slane %v4934_v12, 4 }
 0x4aa   : > { %v5008_v2 = vsel %vm2350_vm0, %v5007_v32, %v4958_v29  ;;  %v5009_v46 = vrot.slane %v4958_v29, 4  ;;  %v4974_v45 = vsel %vm2350_vm0, %v4942_v37, %v4973_v63  ;;  %v16905_v10 = vperm.slane %v4996_v30, %v15514_v54  ;;  %v13409_v37 = vld [vmem:[%s14993_s13 + $0x64] sm:$0xf0]  ;;  %v11004_v32 = vld [vmem:[%s14993_s13 + $0xe0] sm:$0xf] }
 0x4ab   : > { %v5021_v44 = vrot.slane %v16899_v22, 4  ;;  %v4984_v28 = vsel %vm2350_vm0, %v4983_v34, %v4934_v12  ;;  %v4986_v51 = vsel %vm2350_vm0, %v4946_v8, %v4985_v17  ;;  %v16924_v5 = vperm.slane %v5008_v2, %v15514_v54  ;;  %v11100_v12 = vld [vmem:[%s14993_s13 + $0x1a0] sm:$0xf]  ;;  %v13425_v63 = vld [vmem:[%s14993_s13 + $0xe4] sm:$0xf0] }
 0x4ac   : > { %v16912_v43 = vperm.slane %v4984_v28, %v15514_v54  ;;  %v16915_v38 = vperm.slane %v4986_v51, %v15514_v54  ;;  %v5010_v0 = vsel %vm2350_vm0, %v4970_v57, %v5009_v46  ;;  %v16930_v31 = vperm.slane %v4974_v45, %v15514_v54  ;;  %v13427_v57 = vld [vmem:[%s14993_s13 + $0xf4] sm:$0xf0]  ;;  %v11068_v8 = vld [vmem:[%s14993_s13 + $0x160] sm:$0xf]  ;;  %v10932_v30 = vld [vmem:[%s14993_s13 + $0x50] sm:$0xf] }
 0x4ad   : > { %v5022_v9 = vsel %vm2350_vm0, %v16905_v10, %v5021_v44  ;;  %v16927_v27 = vperm.slane %v5010_v0, %v15514_v54  ;;  %v4997_v59 = vrot.slane %v4954_v40, 4  ;;  %v4907_v56 = vrot.slane %v16783_v25, 4  ;;  %v13407_v34 = vld [vmem:[%s14993_s13 + $0x54] sm:$0xf0]  ;;  %v11060_v45 = vld [vmem:[%s14993_s13 + $0x150] sm:$0xf] }
 0x4ae   : > { %v14184_v39 = vpack.i.bf16 %v5022_v9, %v16799_v35  ;;  %v5029_v62 = vrot.slane %v16912_v43, 4  ;;  %v5033_v23 = vrot.slane %v16915_v38, 4  ;;  %v5025_v60 = vrot.slane %v16930_v31, 4  ;;  %v13439_v44 = vld [vmem:[%s14993_s13 + $0x154] sm:$0xf0] }
 0x4af   : > { %v11117_v20 = vor.u32 %v13453_v53, %v11116_v58  ;;  %v4998_v6 = vsel %vm2350_vm0, %v4966_v24, %v4997_v59  ;;  %v10949_v25 = vor.u32 %v13411_v36, %v10948_v16  ;;  %v11109_v49 = vor.u32 %v13451_v19, %v11108_v48  ;;  %v13449_v24 = vld [vmem:[%s14993_s13 + $0x1a4] sm:$0xf0]  ;;  %v13447_v58 = vld [vmem:[%s14993_s13 + $0x194] sm:$0xf0]  ;;  %v10996_v53 = vld [vmem:[%s14993_s13 + $0xd0] sm:$0xf] }
 0x4b0   : > { %14185 = vrot.lane.b32.xlu0 %v14184_v39, %s14710_s22  ;;  %v5030_v35 = vsel %vm2350_vm0, %v16924_v5, %v5029_v62  ;;  %v5034_v61 = vsel %vm2350_vm0, %v16927_v27, %v5033_v23  ;;  %v16954_v26 = vperm.slane %v4998_v6, %v15514_v54  ;;  %v11077_v4 = vor.u32 %v13443_v52, %v11076_v3  ;;  %v10924_v48 = vld [vmem:[%s14993_s13 + $0x40] sm:$0xf]  ;;  %v13405_v19 = vld [vmem:[%s14993_s13 + $0x44] sm:$0xf0]  ;;  %v13458_v59 = vld [vmem:[%s14993_s13 + $0x1f4] sm:$0xf] }
 0x4b1   : > { %v14179_v40 = vpack.i.bf16 %v5030_v35, %v16830_v41  ;;  %v14189_v13 = vpack.i.bf16 %v5034_v61, %v16848_v11  ;;  %5508 = vmatpush.bf16.msra.mxu3 %v11117_v20  ;;  %5463 = vmatpush.bf16.msra.mxu0 %v10949_v25  ;;  %v10941_v29 = vor.u32 %v13409_v37, %v10940_v33  ;;  %v4915_v41 = vrot.slane %v16814_v15, 4  ;;  %v13437_v39 = vld [vmem:[%s14993_s13 + $0x144] sm:$0xf0]  ;;  %v11084_v62 = vld [vmem:[%s14993_s13 + $0x180] sm:$0xf] }
 0x4b2   : > { %v4919_v54 = vrot.slane %v16823_v14, 4  ;;  %v5026_v11 = vsel %vm2350_vm0, %v16954_v26, %v5025_v60  ;;  %v11013_v17 = vor.u32 %v13427_v57, %v11012_v55  ;;  %v4911_v2 = vrot.slane %v16852_v18, 4  ;;  %5491 = vmatpush.bf16.msra.mxu2 %v11077_v4  ;;  %v11092_v14 = vld [vmem:[%s14993_s13 + $0x190] sm:$0xf]  ;;  %v13423_v18 = vld [vmem:[%s14993_s13 + $0xd4] sm:$0xf0] }
 0x4b3   : > { %14180 = vrot.lane.b32.xlu1 %v14179_v40, %s14710_s22  ;;  %14190 = vrot.lane.b32.xlu2 %v14189_v13, %s14710_s22  ;;  %v11069_v15 = vor.u32 %v13441_v50, %v11068_v8  ;;  %v11101_v46 = vor.u32 %v13449_v24, %v11100_v12  ;;  %v11005_v28 = vor.u32 %v13425_v63, %v11004_v32  ;;  %v13445_v23 = vld [vmem:[%s14993_s13 + $0x184] sm:$0xf0]  ;;  %v10916_v60 = vld [vmem:[%s14993_s13 + $0x30] sm:$0xf]  ;;  %v5019_v8 = vrot.slane %v16905_v10, 4 }
 0x4b4   : > { %5477 = vmatpush.bf16.msra.mxu1 %v11013_v17  ;;  %v14194_v51 = vpack.i.bf16 %v5026_v11, %v16867_v42  ;;  %v10933_v0 = vor.u32 %v13407_v34, %v10932_v30  ;;  %v16982_v9 = vsel %vm2350_vm0, %v4919_v54, %v16818_v7  ;;  %v16986_v16 = vsel %vm2350_vm0, %v4907_v56, %v16760_v21  ;;  %v11052_v21 = vld [vmem:[%s14993_s13 + $0x140] sm:$0xf]  ;;  %v11142_v56 = vld [vmem:[%s14993_s13 + $0x1f8] sm:$0xf0]  ;;  %v13403_v20 = vld [vmem:[%s14993_s13 + $0x34] sm:$0xf0] }
 0x4b5   : > { %5509 = vmatpush.bf16.msra.mxu3 %v11109_v49  ;;  %5464 = vmatpush.bf16.msra.mxu0 %v10941_v29  ;;  %v16990_v42 = vsel %vm2350_vm0, %v4915_v41, %v16807_v1  ;;  %v11061_v36 = vor.u32 %v13439_v44, %v11060_v45  ;;  %v16995_v7 = vsel %vm2350_vm0, %v4911_v2, %v16838_v47  ;;  %v11044_v37 = vld [vmem:[%s14993_s13 + $0x130] sm:$0xf]  ;;  %v13435_v35 = vld [vmem:[%s14993_s13 + $0x134] sm:$0xf0]  ;;  %v13456_v25 = vld [vmem:[%s14993_s13 + $0x1e4] sm:$0xf] }
 0x4b6   : > { %5492 = vmatpush.bf16.msra.mxu2 %v11069_v15  ;;  %v11093_v3 = vor.u32 %v13447_v58, %v11092_v14  ;;  %v10997_v1 = vor.u32 %v13423_v18, %v10996_v53  ;;  %v10925_v52 = vor.u32 %v13405_v19, %v10924_v48  ;;  %v11053_v47 = vor.u32 %v13437_v39, %v11052_v21  ;;  %v11134_v55 = vld [vmem:[%s14993_s13 + $0x1e8] sm:$0xf0]  ;;  %v13454_v13 = vld [vmem:[%s14993_s13 + $0x1d4] sm:$0xf]  ;;  %v11126_v49 = vld [vmem:[%s14993_s13 + $0x1d8] sm:$0xf0] }
 0x4b7   : > { %v11085_v33 = vor.u32 %v13445_v23, %v11084_v62  ;;  %v11145_v61 = vor.u32 %v13458_v59, %v11142_v56  ;;  %v10917_v6 = vor.u32 %v13403_v20, %v10916_v60  ;;  %v11045_v57 = vor.u32 %v13435_v35, %v11044_v37  ;;  %v10988_v63 = vld [vmem:[%s14993_s13 + $0xc0] sm:$0xf]  ;;  %v13421_v41 = vld [vmem:[%s14993_s13 + $0xc4] sm:$0xf0]  ;;  %v13452_v54 = vld [vmem:[%s14993_s13 + $0x1c4] sm:$0xf] }
 0x4b8   : > { %14195 = vrot.lane.b32.xlu0 %v14194_v51, %s14710_s22  ;;  %5478 = vmatpush.bf16.msra.mxu1 %v11005_v28  ;;  %v11137_v40 = vor.u32 %v13456_v25, %v11134_v55  ;;  %v11129_v12 = vor.u32 %v13454_v13, %v11126_v49  ;;  %v5027_v50 = vrot.slane %v16924_v5, 4  ;;  %v5023_v24 = vrot.slane %v16954_v26, 4  ;;  %v13401_v26 = vld [vmem:[%s14993_s13 + $0x24] sm:$0xf0]  ;;  %v11036_v30 = vld [vmem:[%s14993_s13 + $0x120] sm:$0xf] }
 0x4b9   : > { %5510 = vmatpush.bf16.msra.mxu3 %v11101_v46  ;;  %5465 = vmatpush.bf16.msra.mxu0 %v10933_v0  ;;  %v5031_v4 = vrot.slane %v16927_v27, 4  ;;  %v17017_v29 = vsel %vm2350_vm0, %v5019_v8, %v16899_v22  ;;  %v10908_v27 = vld [vmem:[%s14993_s13 + $0x20] sm:$0xf]  ;;  %v10989_v11 = vor.u32 %v13421_v41, %v10988_v63  ;;  %v13433_v34 = vld [vmem:[%s14993_s13 + $0x124] sm:$0xf0] }
 0x4ba   : > { %5493 = vmatpush.bf16.msra.mxu2 %v11061_v36  ;;  %v17021_v32 = vsel %vm2350_vm0, %v5027_v50, %v16912_v43  ;;  %v17025_v10 = vsel %vm2350_vm0, %v5023_v24, %v16930_v31  ;;  %v10909_v22 = vor.u32 %v13401_v26, %v10908_v27  ;;  %v11118_v43 = vld [vmem:[%s14993_s13 + $0x1c8] sm:$0xf0]  ;;  %v10900_v17 = vld [vmem:[%s14993_s13 + $0x10] sm:$0xf]  ;;  %v13399_v2 = vld [vmem:[%s14993_s13 + $0x14] sm:$0xf0] }
 0x4bb   : > { %v17029_v5 = vsel %vm2350_vm0, %v5031_v4, %v16915_v38  ;;  %v11121_v31 = vor.u32 %v13452_v54, %v11118_v43  ;;  %v11037_v38 = vor.u32 %v13433_v34, %v11036_v30  ;;  %v10980_v15 = vld [vmem:[%s14993_s13 + $0xb0] sm:$0xf]  ;;  %v13419_v46 = vld [vmem:[%s14993_s13 + $0xb4] sm:$0xf0]  ;;  %v10901_v14 = vor.u32 %v13399_v2, %v10900_v17  ;;  %v13450_v44 = vld [vmem:[%s14993_s13 + $0x1b4] sm:$0xf] }
 0x4bc   : > { %5479 = vmatpush.bf16.msra.mxu1 %v10997_v1  ;;  %v10981_v45 = vor.u32 %v13419_v46, %v10980_v15  ;;  %v11110_v28 = vld [vmem:[%s14993_s13 + $0x1b8] sm:$0xf0]  ;;  %v11028_v51 = vld [vmem:[%s14993_s13 + $0x110] sm:$0xf]  ;;  %v13431_v0 = vld [vmem:[%s14993_s13 + $0x114] sm:$0xf0] }
 0x4bd   : > { %5511 = vmatpush.bf16.msra.mxu3 %v11093_v3  ;;  %5466 = vmatpush.bf16.msra.mxu0 %v10925_v52  ;;  %v11113_v58 = vor.u32 %v13450_v44, %v11110_v28  ;;  %v10892_v53 = vld [vmem:[%s14993_s13] sm:$0xf]  ;;  %v13397_v18 = vld [vmem:[%s14993_s13 + $0x4] sm:$0xf0]  ;;  %v11029_v48 = vor.u32 %v13431_v0, %v11028_v51  ;;  %v13410_v3 = vld [vmem:[%s14993_s13 + $0x74] sm:$0xf] }
 0x4be   : > { %5494 = vmatpush.bf16.msra.mxu2 %v11053_v47  ;;  %v10972_v19 = vld [vmem:[%s14993_s13 + $0xa0] sm:$0xf]  ;;  %v13417_v36 = vld [vmem:[%s14993_s13 + $0xa4] sm:$0xf0]  ;;  %v10893_v21 = vor.u32 %v13397_v18, %v10892_v53  ;;  %v10950_v39 = vld [vmem:[%s14993_s13 + $0x78] sm:$0xf0] }
 0x4bf   : > { %v13448_v1 = vld [vmem:[%s14993_s13 + $0x1a4] sm:$0xf]  ;;  %v11102_v62 = vld [vmem:[%s14993_s13 + $0x1a8] sm:$0xf0]  ;;  %v10973_v23 = vor.u32 %v13417_v36, %v10972_v19  ;;  %v10953_v59 = vor.u32 %v13410_v3, %v10950_v39  ;;  %v11020_v52 = vld [vmem:[%s14993_s13 + $0x100] sm:$0xf] }
 0x4c0   : > { %5480 = vmatpush.bf16.msra.mxu1 %v10989_v11  ;;  %v13429_v56 = vld [vmem:[%s14993_s13 + $0x104] sm:$0xf0]  ;;  %v13442_v60 = vld [vmem:[%s14993_s13 + $0x174] sm:$0xf]  ;;  %v11105_v20 = vor.u32 %v13448_v1, %v11102_v62  ;;  %v10964_v37 = vld [vmem:[%s14993_s13 + $0x90] sm:$0xf] }
 0x4c1   : > { %5512 = vmatpush.bf16.msra.mxu3 %v11085_v33  ;;  %5467 = vmatpush.bf16.msra.mxu0 %v10917_v6  ;;  %v11021_v47 = vor.u32 %v13429_v56, %v11020_v52  ;;  %v11078_v33 = vld [vmem:[%s14993_s13 + $0x178] sm:$0xf0]  ;;  %v13415_v35 = vld [vmem:[%s14993_s13 + $0x94] sm:$0xf0]  ;;  %v13408_v6 = vld [vmem:[%s14993_s13 + $0x64] sm:$0xf] }
 0x4c2   : > { %5495 = vmatpush.bf16.msra.mxu2 %v11045_v57  ;;  %v10942_v25 = vld [vmem:[%s14993_s13 + $0x68] sm:$0xf0]  ;;  %v13446_v55 = vld [vmem:[%s14993_s13 + $0x194] sm:$0xf]  ;;  %v11094_v57 = vld [vmem:[%s14993_s13 + $0x198] sm:$0xf0]  ;;  %v10965_v49 = vor.u32 %v13415_v35, %v10964_v37 }
 0x4c3   : > { %v11070_v13 = vld [vmem:[%s14993_s13 + $0x168] sm:$0xf0]  ;;  %v10956_v8 = vld [vmem:[%s14993_s13 + $0x80] sm:$0xf]  ;;  %v13413_v50 = vld [vmem:[%s14993_s13 + $0x84] sm:$0xf0]  ;;  %v11097_v24 = vor.u32 %v13446_v55, %v11094_v57 }
 0x4c4   : > { %5481 = vmatpush.bf16.msra.mxu1 %v10981_v45  ;;  %v13406_v4 = vld [vmem:[%s14993_s13 + $0x54] sm:$0xf]  ;;  %v10934_v27 = vld [vmem:[%s14993_s13 + $0x58] sm:$0xf0]  ;;  %v13444_v41 = vld [vmem:[%s14993_s13 + $0x184] sm:$0xf]  ;;  %v10957_v43 = vor.u32 %v13413_v50, %v10956_v8 }
 0x4c5   : > { %5561 = vmatpush.bf16.msrb.mxu3 %v11145_v61  ;;  %5468 = vmatpush.bf16.msra.mxu0 %v10909_v22  ;;  %v11081_v61 = vor.u32 %v13442_v60, %v11078_v33  ;;  %v13426_v26 = vld [vmem:[%s14993_s13 + $0xf4] sm:$0xf]  ;;  %v11014_v22 = vld [vmem:[%s14993_s13 + $0xf8] sm:$0xf0]  ;;  %v11086_v54 = vld [vmem:[%s14993_s13 + $0x188] sm:$0xf0]  ;;  %v10937_v11 = vor.u32 %v13406_v4, %v10934_v27 }
 0x4c6   : > { %5496 = vmatpush.bf16.msra.mxu2 %v11037_v38  ;;  %v11089_v30 = vor.u32 %v13444_v41, %v11086_v54  ;;  %v13438_v34 = vld [vmem:[%s14993_s13 + $0x154] sm:$0xf]  ;;  %v11062_v17 = vld [vmem:[%s14993_s13 + $0x158] sm:$0xf0]  ;;  %v13404_v2 = vld [vmem:[%s14993_s13 + $0x44] sm:$0xf] }
 0x4c7   : > { %v11065_v38 = vor.u32 %v13438_v34, %v11062_v17  ;;  %v10926_v15 = vld [vmem:[%s14993_s13 + $0x48] sm:$0xf0]  ;;  %v13424_v46 = vld [vmem:[%s14993_s13 + $0xe4] sm:$0xf]  ;;  %v13402_v0 = vld [vmem:[%s14993_s13 + $0x34] sm:$0xf] }
 0x4c8   : > { %5482 = vmatpush.bf16.msra.mxu1 %v10973_v23  ;;  %v11006_v45 = vld [vmem:[%s14993_s13 + $0xe8] sm:$0xf0]  ;;  %v13436_v44 = vld [vmem:[%s14993_s13 + $0x144] sm:$0xf]  ;;  %v10918_v53 = vld [vmem:[%s14993_s13 + $0x38] sm:$0xf0] }
 0x4c9   : > { %5562 = vmatpush.bf16.msrb.mxu3 %v11137_v40  ;;  %5469 = vmatpush.bf16.msra.mxu0 %v10901_v14  ;;  %v13440_v40 = vld [vmem:[%s14993_s13 + $0x164] sm:$0xf]  ;;  %v10929_v14 = vor.u32 %v13404_v2, %v10926_v15  ;;  %v11054_v28 = vld [vmem:[%s14993_s13 + $0x148] sm:$0xf0]  ;;  %v11009_v51 = vor.u32 %v13424_v46, %v11006_v45  ;;  %v13422_v18 = vld [vmem:[%s14993_s13 + $0xd4] sm:$0xf] }
 0x4ca   : > { %5497 = vmatpush.bf16.msra.mxu2 %v11029_v48  ;;  %v11073_v63 = vor.u32 %v13440_v40, %v11070_v13  ;;  %v10921_v48 = vor.u32 %v13402_v0, %v10918_v53  ;;  %v10998_v19 = vld [vmem:[%s14993_s13 + $0xd8] sm:$0xf0]  ;;  %v13434_v1 = vld [vmem:[%s14993_s13 + $0x134] sm:$0xf]  ;;  %v13400_v23 = vld [vmem:[%s14993_s13 + $0x24] sm:$0xf] }
 0x4cb   : > { %v11001_v3 = vor.u32 %v13422_v18, %v10998_v19  ;;  %v11046_v62 = vld [vmem:[%s14993_s13 + $0x138] sm:$0xf0]  ;;  %v10910_v52 = vld [vmem:[%s14993_s13 + $0x28] sm:$0xf0]  ;;  %v13420_v56 = vld [vmem:[%s14993_s13 + $0xc4] sm:$0xf] }
 0x4cc   : > { %5483 = vmatpush.bf16.msra.mxu1 %v10965_v49  ;;  %v10990_v60 = vld [vmem:[%s14993_s13 + $0xc8] sm:$0xf0]  ;;  %v10913_v33 = vor.u32 %v13400_v23, %v10910_v52  ;;  %v13432_v37 = vld [vmem:[%s14993_s13 + $0x124] sm:$0xf]  ;;  %v13398_v55 = vld [vmem:[%s14993_s13 + $0x14] sm:$0xf] }
 0x4cd   : > { %5563 = vmatpush.bf16.msrb.mxu3 %v11129_v12  ;;  %5470 = vmatpush.bf16.msra.mxu0 %v10893_v21  ;;  %v10945_v12 = vor.u32 %v13408_v6, %v10942_v25  ;;  %v11038_v35 = vld [vmem:[%s14993_s13 + $0x128] sm:$0xf0]  ;;  %v10993_v6 = vor.u32 %v13420_v56, %v10990_v60  ;;  %v10902_v57 = vld [vmem:[%s14993_s13 + $0x18] sm:$0xf0]  ;;  %v13396_v50 = vld [vmem:[%s14993_s13 + $0x4] sm:$0xf] }
 0x4ce   : > { %5498 = vmatpush.bf16.msra.mxu2 %v11021_v47  ;;  %v11041_v25 = vor.u32 %v13432_v37, %v11038_v35  ;;  %v10982_v40 = vld [vmem:[%s14993_s13 + $0xb8] sm:$0xf0]  ;;  %v10905_v49 = vor.u32 %v13398_v55, %v10902_v57  ;;  %v13416_v4 = vld [vmem:[%s14993_s13 + $0xa4] sm:$0xf]  ;;  %v10974_v27 = vld [vmem:[%s14993_s13 + $0xa8] sm:$0xf0] }
 0x4cf   : > { %v11030_v13 = vld [vmem:[%s14993_s13 + $0x118] sm:$0xf0]  ;;  %v10977_v41 = vor.u32 %v13416_v4, %v10974_v27  ;;  %v10958_v34 = vld [vmem:[%s14993_s13 + $0x88] sm:$0xf0] }
 0x4d0   : > { %5484 = vmatpush.bf16.msra.mxu1 %v10957_v43  ;;  %v13414_v43 = vld [vmem:[%s14993_s13 + $0x94] sm:$0xf] }
 0x4d1   : > { %5564 = vmatpush.bf16.msrb.mxu3 %v11121_v31  ;;  %5519 = vmatpush.bf16.msrb.mxu0 %v10953_v59  ;;  %v11017_v31 = vor.u32 %v13426_v26, %v11014_v22  ;;  %v11049_v59 = vor.u32 %v13434_v1, %v11046_v62  ;;  %v13428_v26 = vld [vmem:[%s14993_s13 + $0x104] sm:$0xf]  ;;  %v756_v1 = vlaneseq }
 0x4d2   : > { %5547 = vmatpush.bf16.msrb.mxu2 %v11081_v61 }
 0x4d3   : > { %v757_v52 = vand.u32 127, %v756_v1  ;;  %v13548_v1 = vld [vmem:[%s14997_s29 + $0x2bc] sm:$0xf0] }
 0x4d4   : > { %5533 = vmatpush.bf16.msrb.mxu1 %v11017_v31 }
 0x4d5   : > { %5565 = vmatpush.bf16.msrb.mxu3 %v11113_v58  ;;  %5520 = vmatpush.bf16.msrb.mxu0 %v10945_v12  ;;  %v11057_v58 = vor.u32 %v13436_v44, %v11054_v28 }
 0x4d6   : > { %5548 = vmatpush.bf16.msrb.mxu2 %v11073_v63  ;;  %v11022_v63 = vld [vmem:[%s14993_s13 + $0x108] sm:$0xf0] }
 0x4d7   : > { %v11025_v54 = vor.u32 %v13428_v26, %v11022_v63 }
 0x4d8   : > { %5534 = vmatpush.bf16.msrb.mxu1 %v11009_v51 }
 0x4d9   : > { %5566 = vmatpush.bf16.msrb.mxu3 %v11105_v20  ;;  %5521 = vmatpush.bf16.msrb.mxu0 %v10937_v11  ;;  %v10966_v11 = vld [vmem:[%s14993_s13 + $0x98] sm:$0xf0] }
 0x4da   : > { %5549 = vmatpush.bf16.msrb.mxu2 %v11065_v38  ;;  %v10969_v31 = vor.u32 %v13414_v43, %v10966_v11 }
 0x4dc   : > { %5535 = vmatpush.bf16.msrb.mxu1 %v11001_v3 }
 0x4dd   : > { %5567 = vmatpush.bf16.msrb.mxu3 %v11097_v24  ;;  %5522 = vmatpush.bf16.msrb.mxu0 %v10929_v14  ;;  %v10894_v24 = vld [vmem:[%s14993_s13 + $0x8] sm:$0xf0] }
 0x4de   : > { %5550 = vmatpush.bf16.msrb.mxu2 %v11057_v58  ;;  %v10897_v22 = vor.u32 %v13396_v50, %v10894_v24  ;;  %v14274_v50 = vld [vmem:[#allocation15 + $0x18] sm:$0xff] }
 0x4e0   : > { %5536 = vmatpush.bf16.msrb.mxu1 %v10993_v6 }
 0x4e1   : > { %5568 = vmatpush.bf16.msrb.mxu3 %v11089_v30  ;;  %5523 = vmatpush.bf16.msrb.mxu0 %v10921_v48  ;;  %v13412_v30 = vld [vmem:[%s14993_s13 + $0x84] sm:$0xf] }
 0x4e2   : > { %5551 = vmatpush.bf16.msrb.mxu2 %v11049_v59  ;;  %v10961_v17 = vor.u32 %v13412_v30, %v10958_v34 }
 0x4e5   : > { %5524 = vmatpush.bf16.msrb.mxu0 %v10913_v33 }
 0x4e6   : > { %5552 = vmatpush.bf16.msrb.mxu2 %v11041_v25 }
 0x4e9   : > { %5525 = vmatpush.bf16.msrb.mxu0 %v10905_v49 }
 0x4ed   : > { %5526 = vmatpush.bf16.msrb.mxu0 %v10897_v22 }
 0x50d   : > { %v14191_v36 = vpop.permute.xlu2 %14190 }
 0x50e   : > { %v14193_v21 = vunpack.i.h.bf16 %v14191_v36  ;;  %v14192_v39 = vunpack.i.l.bf16 %v14191_v36 }
 0x510   : > { %v5073_v20 = vsel %vm3742_vm1, %v16982_v9, %v14192_v39  ;;  %v5074_v47 = vsel %vm3742_vm1, %v17029_v5, %v14193_v21  ;;  %v13418_v9 = vld [vmem:[%s14993_s13 + $0xb4] sm:$0xf] }
 0x511   : > { %v5078_v61 = vpack.c.bf16 %v5074_v47, %v5073_v20  ;;  %v13430_v5 = vld [vmem:[%s14993_s13 + $0x114] sm:$0xf]  ;;  %v10985_v12 = vor.u32 %v13418_v9, %v10982_v40  ;;  %v758_v20 = vadd.s32 128, %v757_v52  ;;  %v14272_v47 = vld [vmem:[#allocation15 + $0x8] sm:$0xff]  ;;  %v14714_v9 = vmov 0.0   ;;  %s14589_s13 = sshra.s32 %s9790_s17, 4  ;;  %s14590_s13 = int_to_ptr.hbm [resolvable:$true] %s14589_s13 }
 0x512   : > { %v11033_v8 = vor.u32 %v13430_v5, %v11030_v13  ;;  %v14273_v5 = vld [vmem:[#allocation15 + $0x10] sm:$0xff]  ;;  %v13540_v52 = vld [vmem:[%s14997_s29 + $0x284] sm:$0xf]  ;;  %p14596_p12 = scmp.lt.s32.totalorder %s14590_s13, %s18660_s16 }
 0x513   : > { %5513 = vmatmul.bf16.vlgmr.msra.gmra.mxu3 %v5078_v61  ;;  %5537 = vmatpush.bf16.msrb.mxu1 %v10985_v12  ;;  %vm760_vm8 = vcmp.lt.s32.totalorder %v758_v20, 192  ;;  %v11982_v20 = vld [vmem:[%s14997_s29 + $0x6c0] sm:$0xf0] }
 0x514   : > { %5553 = vmatpush.bf16.msrb.mxu2 %v11033_v8  ;;  %v17127_v40 = vsel %vm760_vm8, 1.0, %v14714_v9  ;;  %v11918_v9 = vld [vmem:[%s14997_s29 + $0x640] sm:$0xf0] }
 0x517   : > { %5538 = vmatpush.bf16.msrb.mxu1 %v10977_v41 }
 0x518   : > { %5554 = vmatpush.bf16.msrb.mxu2 %v11025_v54 }
 0x51b   : > { %5539 = vmatpush.bf16.msrb.mxu1 %v10969_v31 }
 0x51f   : > { %5540 = vmatpush.bf16.msrb.mxu1 %v10961_v17  ;;  %v11596_v17 = vld [vmem:[%s14997_s29 + $0x380] sm:$0xf] }
 0x522   : > { %v14186_v38 = vpop.permute.xlu0 %14185 }
 0x523   : > { %v14188_v2 = vunpack.i.h.bf16 %v14186_v38  ;;  %v14187_v15 = vunpack.i.l.bf16 %v14186_v38  ;;  %5569 = vmatmul.bf16.vlgmr.msrb.gmra.mxu3 %v5078_v61  ;;  %v13580_v38 = vld [vmem:[%s14997_s29 + $0x3bc] sm:$0xf0] }
 0x525   : > { %v5067_v46 = vsel %vm3742_vm1, %v16986_v16, %v14187_v15  ;;  %v5068_v14 = vsel %vm3742_vm1, %v17017_v29, %v14188_v2  ;;  %v14181_v45 = vpop.permute.xlu1 %14180  ;;  %v12108_v2 = vld [vmem:[%s14997_s29 + $0x780] sm:$0xf]  ;;  %v11597_v15 = vor.u32 %v13580_v38, %v11596_v17 }
 0x526   : > { %v5075_v44 = vpack.c.bf16 %v5068_v14, %v5067_v46  ;;  %v14183_v28 = vunpack.i.h.bf16 %v14181_v45  ;;  %v14182_v51 = vunpack.i.l.bf16 %v14181_v45  ;;  %v13708_v46 = vld [vmem:[%s14997_s29 + $0x7bc] sm:$0xf0]  ;;  %v13572_v14 = vld [vmem:[%s14997_s29 + $0x384] sm:$0xf] }
 0x527   : > { %v11598_v45 = vld [vmem:[%s14997_s29 + $0x3c0] sm:$0xf0] }
 0x528   : > { %v5071_v58 = vsel %vm3742_vm1, %v16990_v42, %v14182_v51  ;;  %v5072_v0 = vsel %vm3742_vm1, %v17021_v32, %v14183_v28  ;;  %5471 = vmatmul.bf16.vlgmr.msra.gmra.mxu0 %v5075_v44  ;;  %v11601_v28 = vor.u32 %v13572_v14, %v11598_v45  ;;  %v13700_v51 = vld [vmem:[%s14997_s29 + $0x784] sm:$0xf] }
 0x529   : > { %v5077_v53 = vpack.c.bf16 %v5072_v0, %v5071_v58  ;;  %v12110_v58 = vld [vmem:[%s14997_s29 + $0x7c0] sm:$0xf0]  ;;  %v11532_v0 = vld [vmem:[%s14997_s29 + $0x300] sm:$0xf]  ;;  %7191 = vmatpush.bf16.msra.mxu0 %v11597_v15 }
 0x52a   : > { %v14196_v18 = vpop.permute.xlu0 %14195 }
 0x52b   : > { %5499 = vmatmul.bf16.vlgmr.msra.gmra.mxu2 %v5077_v53  ;;  %v14198_v48 = vunpack.i.h.bf16 %v14196_v18  ;;  %v14197_v16 = vunpack.i.l.bf16 %v14196_v18  ;;  %v13564_v18 = vld [vmem:[%s14997_s29 + $0x33c] sm:$0xf0] }
 0x52c   : > { %7219 = vmatpush.bf16.msra.mxu2 %v11601_v28 }
 0x52d   : > { %v5070_v29 = vsel %vm3742_vm1, %v17025_v10, %v14198_v48  ;;  %v5069_v19 = vsel %vm3742_vm1, %v16995_v7, %v14197_v16  ;;  %v14271_v10 = vld [vmem:[#allocation15] sm:$0xff]  ;;  %v12044_v48 = vld [vmem:[%s14997_s29 + $0x700] sm:$0xf] }
 0x52e   : > { %v5076_v36 = vpack.c.bf16 %v5070_v29, %v5069_v19  ;;  %v13692_v16 = vld [vmem:[%s14997_s29 + $0x73c] sm:$0xf0]  ;;  %v11533_v29 = vor.u32 %v13564_v18, %v11532_v0 }
 0x52f   : > { %v12045_v19 = vor.u32 %v13692_v16, %v12044_v48  ;;  %v11788_v16 = vld [vmem:[%s14997_s29 + $0x500] sm:$0xf] }
 0x530   : > { %5485 = vmatmul.bf16.vlgmr.msra.gmra.mxu1 %v5076_v36  ;;  %7192 = vmatpush.bf16.msra.mxu0 %v11533_v29 }
 0x538   : > { %5527 = vmatmul.bf16.vlgmr.msrb.gmra.mxu0 %v5075_v44  ;;  %v12109_v44 = vor.u32 %v13708_v46, %v12108_v2 }
 0x53a   : > { %7205 = vmatpush.bf16.msra.mxu1 %v12109_v44 }
 0x53b   : > { %5555 = vmatmul.bf16.vlgmr.msrb.gmra.mxu2 %v5077_v53  ;;  %v12113_v53 = vor.u32 %v13700_v51, %v12110_v58 }
 0x53d   : > { %7233 = vmatpush.bf16.msra.mxu3 %v12113_v53 }
 0x53e   : > { %7206 = vmatpush.bf16.msra.mxu1 %v12045_v19  ;;  %v13628_v19 = vld [vmem:[%s14997_s29 + $0x53c] sm:$0xf0] }
 0x540   : > { %5541 = vmatmul.bf16.vlgmr.msrb.gmra.mxu1 %v5076_v36  ;;  %v13556_v36 = vld [vmem:[%s14997_s29 + $0x304] sm:$0xf] }
 0x596   : > { %v5514_v3 = vpop.f32.mrf.mxu3 }
 0x59e   : > { %v5516_v62 = vpop.f32.mrf.mxu3 }
 0x5a5   : > { %v5472_v42 = vpop.f32.mrf.mxu0 }
 0x5a6   : > { %v5473_v60 = vadd.f32 %v14271_v10, %v5472_v42  ;;  %v5570_v6 = vpop.f32.mrf.mxu3  ;;  %v11534_v42 = vld [vmem:[%s14997_s29 + $0x340] sm:$0xf0] }
 0x5a7   : > { %v11470_v10 = vld [vmem:[%s14997_s29 + $0x2c0] sm:$0xf0] }
 0x5ad   : > { %v5474_v32 = vpop.f32.mrf.mxu0  ;;  %v5486_v21 = vpop.f32.mrf.mxu1 }
 0x5ae   : > { %v5500_v39 = vpop.f32.mrf.mxu2  ;;  %v5487_v7 = vadd.f32 %v5486_v21, %v5473_v60  ;;  %v5475_v13 = vadd.f32 %v14273_v5, %v5474_v32  ;;  %v5572_v43 = vpop.f32.mrf.mxu3  ;;  %v11537_v32 = vor.u32 %v13556_v36, %v11534_v42  ;;  %v12046_v21 = vld [vmem:[%s14997_s29 + $0x740] sm:$0xf0] }
 0x5af   : > { %v13668_v60 = vld [vmem:[%s14997_s29 + $0x684] sm:$0xf] }
 0x5b0   : > { %v5501_v25 = vadd.f32 %v5500_v39, %v5487_v7  ;;  %v11468_v39 = vld [vmem:[%s14997_s29 + $0x280] sm:$0xf]  ;;  %7220 = vmatpush.bf16.msra.mxu2 %v11537_v32  ;;  %v13492_v36 = vld [vmem:[%s14997_s29 + $0x104] sm:$0xf] }
 0x5b1   : > { %v11278_v42 = vld [vmem:[%s14997_s29 + $0x140] sm:$0xf0] }
 0x5b2   : > { %v17129_v12 = vadd.f32 %v5514_v3, %v5501_v25  ;;  %v13684_v3 = vld [vmem:[%s14997_s29 + $0x704] sm:$0xf]  ;;  %v11281_v32 = vor.u32 %v13492_v36, %v11278_v42  ;;  %v13685_v42 = vld [vmem:[%s14997_s29 + $0x70c] sm:$0xf] }
 0x5b3   : > { %v13524_v25 = vld [vmem:[%s14997_s29 + $0x204] sm:$0xf] }
 0x5b5   : > { %v5488_v23 = vpop.f32.mrf.mxu1  ;;  %v5528_v56 = vpop.f32.mrf.mxu0 }
 0x5b6   : > { %v5502_v59 = vpop.f32.mrf.mxu2  ;;  %v5529_v33 = vadd.f32 %v14272_v47, %v5528_v56  ;;  %v5489_v8 = vadd.f32 %v5488_v23, %v5475_v13  ;;  %v11980_v23 = vld [vmem:[%s14997_s29 + $0x680] sm:$0xf]  ;;  %v11469_v56 = vor.u32 %v13548_v1, %v11468_v39  ;;  %v11473_v47 = vor.u32 %v13540_v52, %v11470_v10  ;;  %v11790_v39 = vld [vmem:[%s14997_s29 + $0x540] sm:$0xf0] }
 0x5b7   : > { %v11340_v13 = vld [vmem:[%s14997_s29 + $0x180] sm:$0xf] }
 0x5b8   : > { %v5503_v41 = vadd.f32 %v5502_v59, %v5489_v8  ;;  %v13676_v59 = vld [vmem:[%s14997_s29 + $0x6bc] sm:$0xf0]  ;;  %7193 = vmatpush.bf16.msra.mxu0 %v11469_v56  ;;  %7221 = vmatpush.bf16.msra.mxu2 %v11473_v47 }
 0x5b9   : > { %v11981_v7 = vor.u32 %v13676_v59, %v11980_v23  ;;  %v11212_v1 = vld [vmem:[%s14997_s29 + $0x80] sm:$0xf] }
 0x5ba   : > { %v17136_v31 = vadd.f32 %v5516_v62, %v5503_v41  ;;  %v12049_v62 = vor.u32 %v13684_v3, %v12046_v21  ;;  %v11342_v41 = vld [vmem:[%s14997_s29 + $0x1c0] sm:$0xf0]  ;;  %v11789_v3 = vor.u32 %v13628_v19, %v11788_v16  ;;  %v13484_v23 = vld [vmem:[%s14997_s29 + $0xbc] sm:$0xf0]  ;;  %v13557_v16 = vld [vmem:[%s14997_s29 + $0x30c] sm:$0xf] }
 0x5bb   : > { %7207 = vmatpush.bf16.msra.mxu1 %v11981_v7  ;;  %v13620_v21 = vld [vmem:[%s14997_s29 + $0x504] sm:$0xf]  ;;  %v11724_v59 = vld [vmem:[%s14997_s29 + $0x480] sm:$0xf]  ;;  %v11213_v56 = vor.u32 %v13484_v23, %v11212_v1  ;;  %v13549_v1 = vld [vmem:[%s14997_s29 + $0x2c4] sm:$0xf0] }
 0x5bc   : > { %7234 = vmatpush.bf16.msra.mxu3 %v12049_v62  ;;  %v11793_v62 = vor.u32 %v13620_v21, %v11790_v39  ;;  %v13612_v52 = vld [vmem:[%s14997_s29 + $0x4bc] sm:$0xf0]  ;;  %v13604_v7 = vld [vmem:[%s14997_s29 + $0x484] sm:$0xf]  ;;  %v11476_v39 = vld [vmem:[%s14997_s29 + $0x288] sm:$0xf] }
 0x5bd   : > { %v5542_v37 = vpop.f32.mrf.mxu1  ;;  %v5530_v57 = vpop.f32.mrf.mxu0  ;;  %v11725_v10 = vor.u32 %v13612_v52, %v11724_v59  ;;  %v11477_v23 = vor.u32 %v13549_v1, %v11476_v39  ;;  %v13677_v59 = vld [vmem:[%s14997_s29 + $0x6c4] sm:$0xf0]  ;;  %v13541_v52 = vld [vmem:[%s14997_s29 + $0x28c] sm:$0xf] }
 0x5be   : > { %v5543_v35 = vadd.f32 %v5542_v37, %v5529_v33  ;;  %v5556_v61 = vpop.f32.mrf.mxu2  ;;  %v5531_v24 = vadd.f32 %v14274_v50, %v5530_v57  ;;  %v11404_v33 = vld [vmem:[%s14997_s29 + $0x200] sm:$0xf]  ;;  %v13652_v57 = vld [vmem:[%s14997_s29 + $0x604] sm:$0xf]  ;;  %v11798_v39 = vld [vmem:[%s14997_s29 + $0x548] sm:$0xf0] }
 0x5bf   : > { %v13532_v37 = vld [vmem:[%s14997_s29 + $0x23c] sm:$0xf0] }
 0x5c0   : > { %v5557_v55 = vadd.f32 %v5556_v61, %v5543_v35  ;;  %v11916_v35 = vld [vmem:[%s14997_s29 + $0x600] sm:$0xf]  ;;  %v11985_v61 = vor.u32 %v13668_v60, %v11982_v20  ;;  %v11405_v5 = vor.u32 %v13532_v37, %v11404_v33  ;;  %v13476_v60 = vld [vmem:[%s14997_s29 + $0x84] sm:$0xf] }
 0x5c1   : > { %v13516_v50 = vld [vmem:[%s14997_s29 + $0x1bc] sm:$0xf0]  ;;  %v11214_v20 = vld [vmem:[%s14997_s29 + $0xc0] sm:$0xf0] }
 0x5c2   : > { %v5571_v49 = vadd.f32 %v5570_v6, %v5557_v55  ;;  %v13660_v6 = vld [vmem:[%s14997_s29 + $0x63c] sm:$0xf0]  ;;  %v11406_v55 = vld [vmem:[%s14997_s29 + $0x240] sm:$0xf0]  ;;  %7235 = vmatpush.bf16.msra.mxu3 %v11985_v61  ;;  %7194 = vmatpush.bf16.msra.mxu0 %v11405_v5  ;;  %v11217_v33 = vor.u32 %v13476_v60, %v11214_v20 }
 0x5c3   : > { %v11409_v8 = vor.u32 %v13524_v25, %v11406_v55  ;;  %v11726_v37 = vld [vmem:[%s14997_s29 + $0x4c0] sm:$0xf0]  ;;  %v11148_v25 = vld [vmem:[%s14997_s29] sm:$0xf] }
 0x5c4   : > { %v17132_v4 = vmul.f32 %v17127_v40, %v5571_v49  ;;  %v11917_v49 = vor.u32 %v13660_v6, %v11916_v35  ;;  %v11729_v61 = vor.u32 %v13604_v7, %v11726_v37  ;;  %v13468_v55 = vld [vmem:[%s14997_s29 + $0x3c] sm:$0xf0]  ;;  %v13669_v7 = vld [vmem:[%s14997_s29 + $0x68c] sm:$0xf]  ;;  %v11412_v37 = vld [vmem:[%s14997_s29 + $0x208] sm:$0xf] }
 0x5c5   : > { %v5544_v27 = vpop.f32.mrf.mxu1  ;;  %7222 = vmatpush.bf16.msra.mxu2 %v11409_v8  ;;  %v13596_v5 = vld [vmem:[%s14997_s29 + $0x43c] sm:$0xf0] }
 0x5c6   : > { %v5545_v26 = vadd.f32 %v5544_v27, %v5531_v24  ;;  %v5581_v63 = vadd.f32 %v17132_v4, %v17129_v12  ;;  %v5558_v22 = vpop.f32.mrf.mxu2  ;;  %v11852_v24 = vld [vmem:[%s14997_s29 + $0x580] sm:$0xf]  ;;  %7208 = vmatpush.bf16.msra.mxu1 %v11917_v49  ;;  %v11150_v49 = vld [vmem:[%s14997_s29 + $0x40] sm:$0xf0] }
 0x5c7   : > { %v13644_v27 = vld [vmem:[%s14997_s29 + $0x5bc] sm:$0xf0] }
 0x5c8   : > { %v5559_v54 = vadd.f32 %v5558_v22, %v5545_v26  ;;  %5582 = vadd.xlane.f32.xlu1 %v5581_v63  ;;  %v11921_v63 = vor.u32 %v13652_v57, %v11918_v9  ;;  %v13508_v22 = vld [vmem:[%s14997_s29 + $0x184] sm:$0xf]  ;;  %v11853_v17 = vor.u32 %v13644_v27, %v11852_v24  ;;  %v11660_v57 = vld [vmem:[%s14997_s29 + $0x400] sm:$0xf]  ;;  %v11149_v9 = vor.u32 %v13468_v55, %v11148_v25  ;;  %v13661_v55 = vld [vmem:[%s14997_s29 + $0x644] sm:$0xf0] }
 0x5c9   : > { %v11345_v15 = vor.u32 %v13508_v22, %v11342_v41  ;;  %v11661_v8 = vor.u32 %v13596_v5, %v11660_v57  ;;  %v13588_v24 = vld [vmem:[%s14997_s29 + $0x404] sm:$0xf]  ;;  %v13581_v41 = vld [vmem:[%s14997_s29 + $0x3c4] sm:$0xf0]  ;;  %v13525_v57 = vld [vmem:[%s14997_s29 + $0x20c] sm:$0xf] }
 0x5ca   : > { %v5573_v11 = vadd.f32 %v5572_v43, %v5559_v54  ;;  %v13636_v43 = vld [vmem:[%s14997_s29 + $0x584] sm:$0xf]  ;;  %7236 = vmatpush.bf16.msra.mxu3 %v11921_v63  ;;  %7209 = vmatpush.bf16.msra.mxu1 %v11853_v17 }
 0x5cb   : > { %7223 = vmatpush.bf16.msra.mxu2 %v11345_v15  ;;  %v11662_v27 = vld [vmem:[%s14997_s29 + $0x440] sm:$0xf0]  ;;  %v11606_v15 = vld [vmem:[%s14997_s29 + $0x3c8] sm:$0xf0] }
 0x5cc   : > { %v17139_v30 = vmul.f32 %v17127_v40, %v5573_v11  ;;  %v11854_v11 = vld [vmem:[%s14997_s29 + $0x5c0] sm:$0xf0]  ;;  %v11665_v22 = vor.u32 %v13588_v24, %v11662_v27  ;;  %v17277_v24 = vld [vmem:[%s608_s25] sm:$0x3]  ;;  %s14591_s25 = scalar_lea.hbm %s14590_s13, 128 }
 0x5cd   : > { %v11857_v46 = vor.u32 %v13636_v43, %v11854_v11  ;;  %v13709_v43 = vld [vmem:[%s14997_s29 + $0x7c4] sm:$0xf0]  ;;  %p14592_p7 = scmp.ne.s32.totalorder %s14590_s13, %s14591_s25 }
 0x5ce   : > { %v5584_v34 = vadd.f32 %v17139_v30, %v17136_v31  ;;  %7210 = vmatpush.bf16.msra.mxu1 %v11789_v3  ;;  %v12054_v3 = vld [vmem:[%s14997_s29 + $0x748] sm:$0xf0] }
 0x5cf   : > { %7237 = vmatpush.bf16.msra.mxu3 %v11857_v46  ;;  %7224 = vmatpush.bf16.msra.mxu2 %v11281_v32  ;;  %v12057_v21 = vor.u32 %v13685_v42, %v12054_v3  ;;  %p14593_p10 = pnand %p14592_p7, %p14834_p8 }
 0x5d0   : > { %5585 = vadd.xlane.f32.xlu0 %v5584_v34  ;;  %v11341_v34 = vor.u32 %v13516_v50, %v11340_v13  ;;  %v13460_v13 = vld [vmem:[%s14997_s29 + $0x4] sm:$0xf] }
 0x5d1   : > { %v11153_v50 = vor.u32 %v13460_v13, %v11150_v49  ;;  %v11414_v49 = vld [vmem:[%s14997_s29 + $0x248] sm:$0xf0]  ;;  %p14594_p11 = pneg %p14593_p10 }
 0x5d2   : > { %7195 = vmatpush.bf16.msra.mxu0 %v11341_v34  ;;  %7211 = vmatpush.bf16.msra.mxu1 %v11725_v10 }
 0x5d3   : > { %7238 = vmatpush.bf16.msra.mxu3 %v11793_v62  ;;  %7225 = vmatpush.bf16.msra.mxu2 %v11217_v33  ;;  %v11988_v62 = vld [vmem:[%s14997_s29 + $0x688] sm:$0xf] }
 0x5d4   : > { %v11989_v60 = vor.u32 %v13677_v59, %v11988_v62  ;;  %v13485_v59 = vld [vmem:[%s14997_s29 + $0xc4] sm:$0xf0] }
 0x5d6   : > { %7212 = vmatpush.bf16.msra.mxu1 %v11661_v8  ;;  %v13653_v8 = vld [vmem:[%s14997_s29 + $0x60c] sm:$0xf] }
 0x5d7   : > { %7239 = vmatpush.bf16.msra.mxu3 %v11729_v61  ;;  %7226 = vmatpush.bf16.msra.mxu2 %v11153_v50  ;;  %v11924_v61 = vld [vmem:[%s14997_s29 + $0x608] sm:$0xf]  ;;  %v11926_v50 = vld [vmem:[%s14997_s29 + $0x648] sm:$0xf0] }
 0x5d8   : > { %v11925_v13 = vor.u32 %v13661_v55, %v11924_v61  ;;  %v13605_v61 = vld [vmem:[%s14997_s29 + $0x48c] sm:$0xf] }
 0x5db   : > { %7240 = vmatpush.bf16.msra.mxu3 %v11665_v22  ;;  %v11348_v22 = vld [vmem:[%s14997_s29 + $0x188] sm:$0xf] }
 0x63b   : > { %v5583_v26 = vpop.xlane.xlu1 %5582 }
 0x63c   : > { %v5587_v54 = vmul.f32 0.0052083335, %v5583_v26  ;;  %v11604_v26 = vld [vmem:[%s14997_s29 + $0x388] sm:$0xf] }
 0x63d   : > { %v11605_v34 = vor.u32 %v13581_v41, %v11604_v26  ;;  %v13517_v41 = vld [vmem:[%s14997_s29 + $0x1c4] sm:$0xf0] }
 0x63e   : > { %v17184_v38 = vsub.f32 %v17129_v12, %v5587_v54  ;;  %v5590_v2 = vsub.f32 %v17132_v4, %v5587_v54  ;;  %v12116_v54 = vld [vmem:[%s14997_s29 + $0x788] sm:$0xf] }
 0x63f   : > { %v12117_v17 = vor.u32 %v13709_v43, %v12116_v54  ;;  %v11860_v54 = vld [vmem:[%s14997_s29 + $0x588] sm:$0xf]  ;;  %v11929_v43 = vor.u32 %v13653_v8, %v11926_v50 }
 0x640   : > { %v17188_v14 = vmul.f32 %v17127_v40, %v5590_v2  ;;  %v5597_v45 = vmul.f32 %v17184_v38, %v17184_v38  ;;  %v13573_v2 = vld [vmem:[%s14997_s29 + $0x38c] sm:$0xf]  ;;  %v11668_v50 = vld [vmem:[%s14997_s29 + $0x408] sm:$0xf] }
 0x641   : > { %v11609_v46 = vor.u32 %v13573_v2, %v11606_v15  ;;  %7261 = vmatpush.bf16.msrb.mxu1 %v12117_v17  ;;  %v11350_v17 = vld [vmem:[%s14997_s29 + $0x1c8] sm:$0xf0] }
 0x642   : > { %v5598_v44 = vmul.f32 %v17188_v14, %v17188_v14  ;;  %v13637_v2 = vld [vmem:[%s14997_s29 + $0x58c] sm:$0xf] }
 0x643   : > { %v5586_v12 = vpop.xlane.xlu0 %5585  ;;  %7275 = vmatpush.bf16.msrb.mxu2 %v11609_v46  ;;  %v11862_v15 = vld [vmem:[%s14997_s29 + $0x5c8] sm:$0xf0] }
 0x644   : > { %v5588_v4 = vmul.f32 0.0052083335, %v5586_v12  ;;  %v5601_v28 = vadd.f32 %v5598_v44, %v5597_v45  ;;  %v13701_v45 = vld [vmem:[%s14997_s29 + $0x78c] sm:$0xf]  ;;  %v11540_v12 = vld [vmem:[%s14997_s29 + $0x308] sm:$0xf] }
 0x645   : > { %v12118_v44 = vld [vmem:[%s14997_s29 + $0x7c8] sm:$0xf0] }
 0x646   : > { %v17195_v51 = vsub.f32 %v17136_v31, %v5588_v4  ;;  %v5592_v58 = vsub.f32 %v17139_v30, %v5588_v4  ;;  %5602 = vadd.xlane.f32.xlu2 %v5601_v28  ;;  %v11276_v31 = vld [vmem:[%s14997_s29 + $0x100] sm:$0xf] }
 0x647   : > { %v13500_v30 = vld [vmem:[%s14997_s29 + $0x13c] sm:$0xf0] }
 0x648   : > { %v17199_v0 = vmul.f32 %v17127_v40, %v5592_v58  ;;  %v5599_v53 = vmul.f32 %v17195_v51, %v17195_v51  ;;  %v11277_v29 = vor.u32 %v13500_v30, %v11276_v31  ;;  %v12121_v58 = vor.u32 %v13701_v45, %v12118_v44  ;;  %v13693_v30 = vld [vmem:[%s14997_s29 + $0x744] sm:$0xf0] }
 0x649   : > { %v11349_v45 = vor.u32 %v13517_v41, %v11348_v22 }
 0x64a   : > { %v5600_v18 = vmul.f32 %v17199_v0, %v17199_v0  ;;  %7196 = vmatpush.bf16.msra.mxu0 %v11277_v29  ;;  %v11542_v29 = vld [vmem:[%s14997_s29 + $0x348] sm:$0xf0]  ;;  %7289 = vmatpush.bf16.msrb.mxu3 %v12121_v58  ;;  %v13501_v58 = vld [vmem:[%s14997_s29 + $0x144] sm:$0xf0] }
 0x64b   : > { %v11545_v36 = vor.u32 %v13557_v16, %v11542_v29  ;;  %v5637_v16 = vperm.slane %v17277_v24, 1  ;;  %v11865_v29 = vor.u32 %v13637_v2, %v11862_v15  ;;  %v13582_v2 = vld [vmem:[%s14997_s29 + $0x3cc] sm:$0xf0] }
 0x64c   : > { %v5604_v48 = vadd.f32 %v5600_v18, %v5599_v53  ;;  %v13565_v53 = vld [vmem:[%s14997_s29 + $0x344] sm:$0xf0] }
 0x64d   : > { %v12052_v18 = vld [vmem:[%s14997_s29 + $0x708] sm:$0xf]  ;;  %v11541_v31 = vor.u32 %v13565_v53, %v11540_v12  ;;  %7276 = vmatpush.bf16.msrb.mxu2 %v11545_v36  ;;  %v17299_v53 = vld [vmem:[%s618_s3] sm:$0x3]  ;;  %v11286_v36 = vld [vmem:[%s14997_s29 + $0x148] sm:$0xf0] }
 0x64e   : > { %5605 = vadd.xlane.f32.xlu1 %v5604_v48  ;;  %7197 = vmatpush.bf16.msra.mxu0 %v11213_v56  ;;  %v12053_v19 = vor.u32 %v13693_v30, %v12052_v18  ;;  %v11478_v56 = vld [vmem:[%s14997_s29 + $0x2c8] sm:$0xf0]  ;;  %v11284_v12 = vld [vmem:[%s14997_s29 + $0x108] sm:$0xf] }
 0x64f   : > { %v11481_v20 = vor.u32 %v13541_v52, %v11478_v56  ;;  %7290 = vmatpush.bf16.msrb.mxu3 %v12057_v21  ;;  %v13629_v30 = vld [vmem:[%s14997_s29 + $0x544] sm:$0xf0]  ;;  %v13621_v21 = vld [vmem:[%s14997_s29 + $0x50c] sm:$0xf]  ;;  %v11285_v1 = vor.u32 %v13501_v58, %v11284_v12 }
 0x650   : > { %7262 = vmatpush.bf16.msrb.mxu1 %v12053_v19  ;;  %v13493_v19 = vld [vmem:[%s14997_s29 + $0x10c] sm:$0xf]  ;;  %v13613_v56 = vld [vmem:[%s14997_s29 + $0x4c4] sm:$0xf0] }
 0x651   : > { %7277 = vmatpush.bf16.msrb.mxu2 %v11481_v20  ;;  %v11801_v20 = vor.u32 %v13621_v21, %v11798_v39  ;;  %v11550_v21 = vld [vmem:[%s14997_s29 + $0x350] sm:$0xf0] }
 0x652   : > { %7198 = vmatpush.bf16.msra.mxu0 %v11149_v9  ;;  %v13686_v39 = vld [vmem:[%s14997_s29 + $0x714] sm:$0xf] }
 0x654   : > { %7263 = vmatpush.bf16.msrb.mxu1 %v11989_v60  ;;  %v5646_v60 = vperm.slane %v17299_v53, 1 }
 0x656   : > { %7247 = vmatpush.bf16.msrb.mxu0 %v11605_v34  ;;  %v13509_v34 = vld [vmem:[%s14997_s29 + $0x18c] sm:$0xf] }
 0x658   : > { %7264 = vmatpush.bf16.msrb.mxu1 %v11925_v13  ;;  %v11156_v13 = vld [vmem:[%s14997_s29 + $0x8] sm:$0xf] }
 0x65a   : > { %7248 = vmatpush.bf16.msrb.mxu0 %v11541_v31  ;;  %v11796_v31 = vld [vmem:[%s14997_s29 + $0x508] sm:$0xf] }
 0x65b   : > { %v11797_v62 = vor.u32 %v13629_v30, %v11796_v31  ;;  %v12126_v31 = vld [vmem:[%s14997_s29 + $0x7d0] sm:$0xf0] }
 0x65e   : > { %7249 = vmatpush.bf16.msrb.mxu0 %v11477_v23  ;;  %v11220_v23 = vld [vmem:[%s14997_s29 + $0x88] sm:$0xf] }
 0x6b9   : > { %v5603_v47 = vpop.xlane.xlu2 %5602 }
 0x6ba   : > { %v5607_v35 = vmul.f32 0.0052083335, %v5603_v47  ;;  %v11990_v47 = vld [vmem:[%s14997_s29 + $0x6c8] sm:$0xf0] }
 0x6bb   : > { %v11993_v33 = vor.u32 %v13669_v7, %v11990_v47  ;;  %v13477_v7 = vld [vmem:[%s14997_s29 + $0x8c] sm:$0xf] }
 0x6bc   : > { %v17221_v6 = vadd.f32 1e-05, %v5607_v35  ;;  %v13533_v35 = vld [vmem:[%s14997_s29 + $0x244] sm:$0xf0]  ;;  %v11222_v47 = vld [vmem:[%s14997_s29 + $0xc8] sm:$0xf0] }
 0x6bd   : > { %v11413_v5 = vor.u32 %v13533_v35, %v11412_v37  ;;  %7291 = vmatpush.bf16.msrb.mxu3 %v11993_v33  ;;  %v11221_v35 = vor.u32 %v13485_v59, %v11220_v23  ;;  %v11225_v8 = vor.u32 %v13477_v7, %v11222_v47  ;;  %v11484_v59 = vld [vmem:[%s14997_s29 + $0x290] sm:$0xf]  ;;  %v13670_v7 = vld [vmem:[%s14997_s29 + $0x694] sm:$0xf] }
 0x6be   : > { %14263 = vrsqrt.f32 %v17221_v6  ;;  %vm5617_vm10 = vweird.f32 %v17221_v6  ;;  %v11998_v47 = vld [vmem:[%s14997_s29 + $0x6d0] sm:$0xf0] }
 0x6bf   : > { %7250 = vmatpush.bf16.msrb.mxu0 %v11413_v5 }
 0x6c1   : > { %v5606_v63 = vpop.xlane.xlu1 %5605  ;;  %7292 = vmatpush.bf16.msrb.mxu3 %v11929_v43  ;;  %v11670_v43 = vld [vmem:[%s14997_s29 + $0x448] sm:$0xf0] }
 0x6c2   : > { %v5608_v11 = vmul.f32 0.0052083335, %v5606_v63  ;;  %v11417_v63 = vor.u32 %v13525_v57, %v11414_v49  ;;  %v13469_v49 = vld [vmem:[%s14997_s29 + $0x44] sm:$0xf0] }
 0x6c3   : > { %7251 = vmatpush.bf16.msrb.mxu0 %v11349_v45  ;;  %v11157_v41 = vor.u32 %v13469_v49, %v11156_v13  ;;  %v13710_v45 = vld [vmem:[%s14997_s29 + $0x7cc] sm:$0xf0]  ;;  %v11422_v13 = vld [vmem:[%s14997_s29 + $0x250] sm:$0xf0] }
 0x6c4   : > { %v17241_v4 = vpop.eup %14263  ;;  %v17243_v28 = vadd.f32 1e-05, %v5608_v11  ;;  %v13645_v11 = vld [vmem:[%s14997_s29 + $0x5c4] sm:$0xf0]  ;;  %7278 = vmatpush.bf16.msrb.mxu2 %v11417_v63  ;;  %v13654_v49 = vld [vmem:[%s14997_s29 + $0x614] sm:$0xf] }
 0x6c5   : > { %v5612_v48 = vmul.f32 %v17241_v4, %v17221_v6  ;;  %vm5618_vm9 = vweird.f32 %v17241_v4  ;;  %v11861_v44 = vor.u32 %v13645_v11, %v11860_v54  ;;  %7293 = vmatpush.bf16.msrb.mxu3 %v11865_v29  ;;  %v13589_v54 = vld [vmem:[%s14997_s29 + $0x40c] sm:$0xf]  ;;  %v13566_v29 = vld [vmem:[%s14997_s29 + $0x34c] sm:$0xf0] }
 0x6c6   : > { %14265 = vrsqrt.f32 %v17243_v28  ;;  %vm5619_vm11 = vmor %vm5617_vm10, %vm5618_vm9  ;;  %vm5627_vm13 = vweird.f32 %v17243_v28 }
 0x6c7   : > { %v5613_v32 = vmul.f32 %v17241_v4, %v5612_v48  ;;  %v11353_v48 = vor.u32 %v13509_v34, %v11350_v17  ;;  %7265 = vmatpush.bf16.msrb.mxu1 %v11861_v44  ;;  %7252 = vmatpush.bf16.msrb.mxu0 %v11285_v1  ;;  %v11612_v17 = vld [vmem:[%s14997_s29 + $0x390] sm:$0xf]  ;;  %v13574_v44 = vld [vmem:[%s14997_s29 + $0x394] sm:$0xf] }
 0x6c8   : > { %v11613_v30 = vor.u32 %v13582_v2, %v11612_v17  ;;  %v12062_v1 = vld [vmem:[%s14997_s29 + $0x750] sm:$0xf0] }
 0x6c9   : > { %v5614_v10 = vmul.f32 0.5, %v5613_v32  ;;  %7279 = vmatpush.bf16.msrb.mxu2 %v11353_v48  ;;  %7294 = vmatpush.bf16.msrb.mxu3 %v11801_v20  ;;  %v13702_v48 = vld [vmem:[%s14997_s29 + $0x794] sm:$0xf] }
 0x6ca   : > { %v11486_v20 = vld [vmem:[%s14997_s29 + $0x2d0] sm:$0xf0] }
 0x6cb   : > { %v5615_v25 = vsub.f32 1.5, %v5614_v10  ;;  %v5645_v10 = vperm.slane %v17299_v53, 0  ;;  %7266 = vmatpush.bf16.msrb.mxu1 %v11797_v62  ;;  %7253 = vmatpush.bf16.msrb.mxu0 %v11221_v35  ;;  %v11673_v53 = vor.u32 %v13589_v54, %v11670_v43  ;;  %v13534_v35 = vld [vmem:[%s14997_s29 + $0x24c] sm:$0xf0]  ;;  %v13510_v54 = vld [vmem:[%s14997_s29 + $0x194] sm:$0xf] }
 0x6cc   : > { %v17270_v9 = vpop.eup %14265  ;;  %v11358_v43 = vld [vmem:[%s14997_s29 + $0x1d0] sm:$0xf0] }
 0x6cd   : > { %v5616_v27 = vmul.f32 %v17241_v4, %v5615_v25  ;;  %v5622_v26 = vmul.f32 %v17270_v9, %v17243_v28  ;;  %vm5628_vm12 = vweird.f32 %v17270_v9  ;;  %v11734_v25 = vld [vmem:[%s14997_s29 + $0x4c8] sm:$0xf0]  ;;  %v11870_v17 = vld [vmem:[%s14997_s29 + $0x5d0] sm:$0xf0] }
 0x6ce   : > { %vm5629_vm14 = vmor %vm5627_vm13, %vm5628_vm12 }
 0x6cf   : > { %v5623_v6 = vmul.f32 %v17270_v9, %v5622_v26  ;;  %v5620_v46 = vsel %vm5619_vm11, %v17241_v4, %v5616_v27  ;;  %v5636_v4 = vperm.slane %v17277_v24, 0  ;;  %v13461_v26 = vld [vmem:[%s14997_s29 + $0xc] sm:$0xf]  ;;  %7254 = vmatpush.bf16.msrb.mxu0 %v11157_v41  ;;  %v13646_v41 = vld [vmem:[%s14997_s29 + $0x5cc] sm:$0xf0] }
 0x6d0   : > { %v5631_v42 = vmul.f32 %v5620_v46, %v17184_v38  ;;  %v5632_v3 = vmul.f32 %v5620_v46, %v17188_v14  ;;  %v11289_v38 = vor.u32 %v13493_v19, %v11286_v36  ;;  %v11732_v14 = vld [vmem:[%s14997_s29 + $0x488] sm:$0xf]  ;;  %v12124_v46 = vld [vmem:[%s14997_s29 + $0x790] sm:$0xf]  ;;  %v12129_v36 = vor.u32 %v13702_v48, %v12126_v31  ;;  %v13494_v31 = vld [vmem:[%s14997_s29 + $0x114] sm:$0xf] }
 0x6d1   : > { %v5624_v18 = vmul.f32 0.5, %v5623_v6  ;;  %v11733_v5 = vor.u32 %v13613_v56, %v11732_v14  ;;  %v12065_v14 = vor.u32 %v13686_v39, %v12062_v1  ;;  %v11996_v56 = vld [vmem:[%s14997_s29 + $0x690] sm:$0xf]  ;;  %v13478_v1 = vld [vmem:[%s14997_s29 + $0x94] sm:$0xf] }
 0x6d2   : > { %v5640_v28 = vmul.f32 %v5636_v4, %v5631_v42  ;;  %v5641_v33 = vmul.f32 %v5637_v16, %v5632_v3  ;;  %7280 = vmatpush.bf16.msrb.mxu2 %v11289_v38  ;;  %v12060_v42 = vld [vmem:[%s14997_s29 + $0x710] sm:$0xf] }
 0x6d3   : > { %v5625_v32 = vsub.f32 1.5, %v5624_v18  ;;  %7267 = vmatpush.bf16.msrb.mxu1 %v11733_v5  ;;  %v11614_v18 = vld [vmem:[%s14997_s29 + $0x3d0] sm:$0xf0]  ;;  %v13694_v3 = vld [vmem:[%s14997_s29 + $0x74c] sm:$0xf0] }
 0x6d4   : > { %v17335_v63 = vadd.f32 %v5645_v10, %v5640_v28  ;;  %v17337_v22 = vadd.f32 %v5646_v60, %v5641_v33  ;;  %v11617_v19 = vor.u32 %v13574_v44, %v11614_v18  ;;  %v12061_v23 = vor.u32 %v13694_v3, %v12060_v42  ;;  %v13526_v5 = vld [vmem:[%s14997_s29 + $0x214] sm:$0xf]  ;;  %v11804_v18 = vld [vmem:[%s14997_s29 + $0x510] sm:$0xf] }
 0x6d5   : > { %v5626_v52 = vmul.f32 %v17270_v9, %v5625_v32  ;;  %v13558_v32 = vld [vmem:[%s14997_s29 + $0x314] sm:$0xf]  ;;  %v11361_v44 = vor.u32 %v13510_v54, %v11358_v43  ;;  %v13630_v48 = vld [vmem:[%s14997_s29 + $0x54c] sm:$0xf0]  ;;  %v12068_v43 = vld [vmem:[%s14997_s29 + $0x718] sm:$0xf] }
 0x6d6   : > { %7281 = vmatpush.bf16.msrb.mxu2 %v11225_v8  ;;  %v11553_v38 = vor.u32 %v13558_v32, %v11550_v21  ;;  %v11934_v8 = vld [vmem:[%s14997_s29 + $0x650] sm:$0xf0]  ;;  %v13486_v42 = vld [vmem:[%s14997_s29 + $0xcc] sm:$0xf0] }
 0x6d7   : > { %v5630_v37 = vsel %vm5629_vm14, %v17270_v9, %v5626_v52  ;;  %v13597_v9 = vld [vmem:[%s14997_s29 + $0x444] sm:$0xf0]  ;;  %v13550_v52 = vld [vmem:[%s14997_s29 + $0x2cc] sm:$0xf0] }
 0x6d8   : > { %v5633_v55 = vmul.f32 %v5630_v37, %v17195_v51  ;;  %v5634_v57 = vmul.f32 %v5630_v37, %v17199_v0  ;;  %v11737_v51 = vor.u32 %v13605_v61, %v11734_v25  ;;  %v11158_v0 = vld [vmem:[%s14997_s29 + $0x48] sm:$0xf0]  ;;  %v11669_v6 = vor.u32 %v13597_v9, %v11668_v50  ;;  %v11420_v37 = vld [vmem:[%s14997_s29 + $0x210] sm:$0xf] }
 0x6d9   : > { %v11161_v15 = vor.u32 %v13461_v26, %v11158_v0  ;;  %v11485_v28 = vor.u32 %v13550_v52, %v11484_v59  ;;  %v12001_v25 = vor.u32 %v13670_v7, %v11998_v47  ;;  %v11421_v50 = vor.u32 %v13534_v35, %v11420_v37  ;;  %v11868_v0 = vld [vmem:[%s14997_s29 + $0x590] sm:$0xf]  ;;  %v11742_v59 = vld [vmem:[%s14997_s29 + $0x4d0] sm:$0xf0]  ;;  %v11620_v35 = vld [vmem:[%s14997_s29 + $0x398] sm:$0xf] }
 0x6da   : > { %v5642_v24 = vmul.f32 %v5636_v4, %v5633_v55  ;;  %v5643_v27 = vmul.f32 %v5637_v16, %v5634_v57  ;;  %7295 = vmatpush.bf16.msrb.mxu3 %v11737_v51  ;;  %7268 = vmatpush.bf16.msrb.mxu1 %v11669_v6  ;;  %v12125_v4 = vor.u32 %v13710_v45, %v12124_v46  ;;  %v11548_v16 = vld [vmem:[%s14997_s29 + $0x310] sm:$0xf]  ;;  %v13638_v6 = vld [vmem:[%s14997_s29 + $0x594] sm:$0xf] }
 0x6db   : > { %7282 = vmatpush.bf16.msrb.mxu2 %v11161_v15  ;;  %v11549_v62 = vor.u32 %v13566_v29, %v11548_v16  ;;  %v11932_v55 = vld [vmem:[%s14997_s29 + $0x610] sm:$0xf]  ;;  %v11425_v51 = vor.u32 %v13526_v5, %v11422_v13  ;;  %v11937_v26 = vor.u32 %v13654_v49, %v11934_v8  ;;  %v11869_v15 = vor.u32 %v13646_v41, %v11868_v0  ;;  %v11806_v16 = vld [vmem:[%s14997_s29 + $0x550] sm:$0xf0]  ;;  %v11622_v49 = vld [vmem:[%s14997_s29 + $0x3d8] sm:$0xf0] }
 0x6dc   : > { %v17341_v11 = vadd.f32 %v5645_v10, %v5642_v24  ;;  %v17343_v34 = vadd.f32 %v5646_v60, %v5643_v27  ;;  %v13678_v10 = vld [vmem:[%s14997_s29 + $0x6cc] sm:$0xf0]  ;;  %v13542_v60 = vld [vmem:[%s14997_s29 + $0x294] sm:$0xf]  ;;  %v13703_v8 = vld [vmem:[%s14997_s29 + $0x79c] sm:$0xf] }
 0x6dd   : > { %v11997_v33 = vor.u32 %v13678_v10, %v11996_v56  ;;  %v11489_v61 = vor.u32 %v13542_v60, %v11486_v20  ;;  %v13662_v57 = vld [vmem:[%s14997_s29 + $0x64c] sm:$0xf0]  ;;  %v13462_v47 = vld [vmem:[%s14997_s29 + $0x14] sm:$0xf]  ;;  %v13567_v0 = vld [vmem:[%s14997_s29 + $0x354] sm:$0xf0] }
 0x6de   : > { %v17352_v12 = vpack.c.bf16 %v17341_v11, %v17335_v63  ;;  %v17356_v58 = vpack.c.bf16 %v17343_v34, %v17337_v22  ;;  %7296 = vmatpush.bf16.msrb.mxu3 %v11673_v53  ;;  %v11933_v9 = vor.u32 %v13662_v57, %v11932_v55  ;;  %v11356_v24 = vld [vmem:[%s14997_s29 + $0x190] sm:$0xf]  ;;  %v11873_v53 = vor.u32 %v13638_v6, %v11870_v17  ;;  %v11678_v37 = vld [vmem:[%s14997_s29 + $0x450] sm:$0xf0]  ;;  %v13711_v55 = vld [vmem:[%s14997_s29 + $0x7d4] sm:$0xf0] }
 0x6df   : > { %v13518_v27 = vld [vmem:[%s14997_s29 + $0x1cc] sm:$0xf0]  ;;  %v13575_v57 = vld [vmem:[%s14997_s29 + $0x39c] sm:$0xf]  ;;  %v13695_v6 = vld [vmem:[%s14997_s29 + $0x754] sm:$0xf0] }
 0x6e0   : > { %7199 = vmatmul.bf16.vlgmr.msra.gmra.mxu0 %v17352_v12  ;;  %7213 = vmatmul.bf16.vlgmr.msra.gmra.mxu1 %v17356_v58  ;;  %v11357_v2 = vor.u32 %v13518_v27, %v11356_v24  ;;  %v11292_v46 = vld [vmem:[%s14997_s29 + $0x110] sm:$0xf]  ;;  %v11625_v41 = vor.u32 %v13575_v57, %v11622_v49  ;;  %v13559_v17 = vld [vmem:[%s14997_s29 + $0x31c] sm:$0xf] }
 0x6e1   : > { %7227 = vmatmul.bf16.vlgmr.msra.gmra.mxu2 %v17352_v12  ;;  %7241 = vmatmul.bf16.vlgmr.msra.gmra.mxu3 %v17356_v58  ;;  %v13502_v45 = vld [vmem:[%s14997_s29 + $0x14c] sm:$0xf0] }
 0x6e2   : > { %7303 = vmatpush.bf16.msra.mxu0 %v11613_v30  ;;  %7317 = vmatpush.bf16.msra.mxu1 %v12125_v4  ;;  %v11294_v30 = vld [vmem:[%s14997_s29 + $0x150] sm:$0xf0]  ;;  %v11293_v29 = vor.u32 %v13502_v45, %v11292_v46  ;;  %v11740_v21 = vld [vmem:[%s14997_s29 + $0x490] sm:$0xf]  ;;  %v12070_v46 = vld [vmem:[%s14997_s29 + $0x758] sm:$0xf0] }
 0x6e3   : > { %7331 = vmatpush.bf16.msra.mxu2 %v11617_v19  ;;  %7345 = vmatpush.bf16.msra.mxu3 %v12129_v36  ;;  %v13622_v4 = vld [vmem:[%s14997_s29 + $0x514] sm:$0xf]  ;;  %v11805_v19 = vor.u32 %v13630_v48, %v11804_v18  ;;  %v11228_v36 = vld [vmem:[%s14997_s29 + $0x90] sm:$0xf]  ;;  %v11297_v3 = vor.u32 %v13494_v31, %v11294_v30  ;;  %v13551_v18 = vld [vmem:[%s14997_s29 + $0x2d4] sm:$0xf0] }
 0x6e4   : > { %v11809_v32 = vor.u32 %v13622_v4, %v11806_v16  ;;  %v13614_v39 = vld [vmem:[%s14997_s29 + $0x4cc] sm:$0xf0]  ;;  %v12004_v30 = vld [vmem:[%s14997_s29 + $0x698] sm:$0xf]  ;;  %v13543_v16 = vld [vmem:[%s14997_s29 + $0x29c] sm:$0xf] }
 0x6e5   : > { %v11164_v52 = vld [vmem:[%s14997_s29 + $0x10] sm:$0xf]  ;;  %v13679_v4 = vld [vmem:[%s14997_s29 + $0x6d4] sm:$0xf0] }
 0x6e6   : > { %7304 = vmatpush.bf16.msra.mxu0 %v11549_v62  ;;  %7318 = vmatpush.bf16.msra.mxu1 %v12061_v23  ;;  %v11230_v62 = vld [vmem:[%s14997_s29 + $0xd0] sm:$0xf0]  ;;  %v13470_v56 = vld [vmem:[%s14997_s29 + $0x4c] sm:$0xf0] }
 0x6e7   : > { %7332 = vmatpush.bf16.msra.mxu2 %v11553_v38  ;;  %7346 = vmatpush.bf16.msra.mxu3 %v12065_v14  ;;  %v13606_v23 = vld [vmem:[%s14997_s29 + $0x494] sm:$0xf]  ;;  %v11229_v38 = vor.u32 %v13486_v42, %v11228_v36  ;;  %v11741_v14 = vor.u32 %v13614_v39, %v11740_v21  ;;  %v11676_v10 = vld [vmem:[%s14997_s29 + $0x410] sm:$0xf]  ;;  %v11233_v20 = vor.u32 %v13478_v1, %v11230_v62  ;;  %v12006_v36 = vld [vmem:[%s14997_s29 + $0x6d8] sm:$0xf0] }
 0x6e8   : > { %v13598_v60 = vld [vmem:[%s14997_s29 + $0x44c] sm:$0xf0]  ;;  %v11745_v7 = vor.u32 %v13606_v23, %v11742_v59  ;;  %v11165_v5 = vor.u32 %v13470_v56, %v11164_v52  ;;  %v13535_v21 = vld [vmem:[%s14997_s29 + $0x254] sm:$0xf0]  ;;  %v13527_v59 = vld [vmem:[%s14997_s29 + $0x21c] sm:$0xf] }
 0x6e9   : > { %v11677_v13 = vor.u32 %v13598_v60, %v11676_v10  ;;  %v11940_v62 = vld [vmem:[%s14997_s29 + $0x618] sm:$0xf]  ;;  %v11430_v52 = vld [vmem:[%s14997_s29 + $0x258] sm:$0xf0] }
 0x6ea   : > { %7305 = vmatpush.bf16.msra.mxu0 %v11485_v28  ;;  %7319 = vmatpush.bf16.msra.mxu1 %v11997_v33  ;;  %v11166_v28 = vld [vmem:[%s14997_s29 + $0x50] sm:$0xf0]  ;;  %v13663_v23 = vld [vmem:[%s14997_s29 + $0x654] sm:$0xf0] }
 0x6eb   : > { %7333 = vmatpush.bf16.msra.mxu2 %v11489_v61  ;;  %7347 = vmatpush.bf16.msra.mxu3 %v12001_v25  ;;  %v13590_v33 = vld [vmem:[%s14997_s29 + $0x414] sm:$0xf]  ;;  %v13583_v61 = vld [vmem:[%s14997_s29 + $0x3d4] sm:$0xf0]  ;;  %v11941_v10 = vor.u32 %v13663_v23, %v11940_v62  ;;  %v13712_v62 = vld [vmem:[%s14997_s29 + $0x7dc] sm:$0xf0] }
 0x6ec   : > { %v12132_v25 = vld [vmem:[%s14997_s29 + $0x798] sm:$0xf]  ;;  %v11681_v24 = vor.u32 %v13590_v33, %v11678_v37  ;;  %v11621_v27 = vor.u32 %v13583_v61, %v11620_v35  ;;  %v13511_v37 = vld [vmem:[%s14997_s29 + $0x19c] sm:$0xf]  ;;  %v13576_v23 = vld [vmem:[%s14997_s29 + $0x3a4] sm:$0xf] }
 0x6ed   : > { %v11364_v60 = vld [vmem:[%s14997_s29 + $0x198] sm:$0xf]  ;;  %v11366_v35 = vld [vmem:[%s14997_s29 + $0x1d8] sm:$0xf0] }
 0x6ee   : > { %7306 = vmatpush.bf16.msra.mxu0 %v11421_v50  ;;  %7320 = vmatpush.bf16.msra.mxu1 %v11933_v9  ;;  %v12134_v50 = vld [vmem:[%s14997_s29 + $0x7d8] sm:$0xf0]  ;;  %v11169_v9 = vor.u32 %v13462_v47, %v11166_v28  ;;  %v11876_v28 = vld [vmem:[%s14997_s29 + $0x598] sm:$0xf]  ;;  %v11369_v49 = vor.u32 %v13511_v37, %v11366_v35  ;;  %v12076_v35 = vld [vmem:[%s14997_s29 + $0x720] sm:$0xf] }
 0x6ef   : > { %7334 = vmatpush.bf16.msra.mxu2 %v11425_v51  ;;  %7348 = vmatpush.bf16.msra.mxu3 %v11937_v26  ;;  %v12133_v51 = vor.u32 %v13711_v55, %v12132_v25  ;;  %v11556_v26 = vld [vmem:[%s14997_s29 + $0x318] sm:$0xf]  ;;  %v12137_v54 = vor.u32 %v13703_v8, %v12134_v50  ;;  %v13639_v61 = vld [vmem:[%s14997_s29 + $0x59c] sm:$0xf] }
 0x6f0   : > { %7255 = vmatmul.bf16.vlgmr.msrb.gmra.mxu0 %v17352_v12  ;;  %7269 = vmatmul.bf16.vlgmr.msrb.gmra.mxu1 %v17356_v58  ;;  %v11557_v45 = vor.u32 %v13567_v0, %v11556_v26  ;;  %v13647_v33 = vld [vmem:[%s14997_s29 + $0x5d4] sm:$0xf0]  ;;  %v11878_v25 = vld [vmem:[%s14997_s29 + $0x5d8] sm:$0xf0] }
 0x6f1   : > { %7283 = vmatmul.bf16.vlgmr.msrb.gmra.mxu2 %v17352_v12  ;;  %7297 = vmatmul.bf16.vlgmr.msrb.gmra.mxu3 %v17356_v58  ;;  %v11877_v57 = vor.u32 %v13647_v33, %v11876_v28  ;;  %v11881_v8 = vor.u32 %v13639_v61, %v11878_v25  ;;  %v11812_v50 = vld [vmem:[%s14997_s29 + $0x518] sm:$0xf]  ;;  %v11814_v26 = vld [vmem:[%s14997_s29 + $0x558] sm:$0xf0]  ;;  %v13568_v28 = vld [vmem:[%s14997_s29 + $0x35c] sm:$0xf0] }
 0x6f2   : > { %7307 = vmatpush.bf16.msra.mxu0 %v11357_v2  ;;  %7321 = vmatpush.bf16.msra.mxu1 %v11869_v15  ;;  %v11558_v2 = vld [vmem:[%s14997_s29 + $0x358] sm:$0xf0]  ;;  %v13696_v61 = vld [vmem:[%s14997_s29 + $0x75c] sm:$0xf0]  ;;  %v13560_v25 = vld [vmem:[%s14997_s29 + $0x324] sm:$0xf] }
 0x6f3   : > { %7335 = vmatpush.bf16.msra.mxu2 %v11361_v44  ;;  %7349 = vmatpush.bf16.msra.mxu3 %v11873_v53  ;;  %v13687_v15 = vld [vmem:[%s14997_s29 + $0x71c] sm:$0xf]  ;;  %v12069_v44 = vor.u32 %v13695_v6, %v12068_v43  ;;  %v11492_v53 = vld [vmem:[%s14997_s29 + $0x298] sm:$0xf]  ;;  %v11561_v48 = vor.u32 %v13559_v17, %v11558_v2 }
 0x6f4   : > { %v12073_v31 = vor.u32 %v13687_v15, %v12070_v46  ;;  %v11493_v42 = vor.u32 %v13551_v18, %v11492_v53  ;;  %v13487_v43 = vld [vmem:[%s14997_s29 + $0xd4] sm:$0xf0]  ;;  %v13479_v46 = vld [vmem:[%s14997_s29 + $0x9c] sm:$0xf] }
 0x6f5   : > { %v11748_v2 = vld [vmem:[%s14997_s29 + $0x498] sm:$0xf]  ;;  %v11750_v53 = vld [vmem:[%s14997_s29 + $0x4d8] sm:$0xf0] }
 0x6f6   : > { %7308 = vmatpush.bf16.msra.mxu0 %v11293_v29  ;;  %7322 = vmatpush.bf16.msra.mxu1 %v11805_v19  ;;  %v11494_v29 = vld [vmem:[%s14997_s29 + $0x2d8] sm:$0xf0]  ;;  %v13615_v15 = vld [vmem:[%s14997_s29 + $0x4d4] sm:$0xf0] }
 0x6f7   : > { %7336 = vmatpush.bf16.msra.mxu2 %v11297_v3  ;;  %7350 = vmatpush.bf16.msra.mxu3 %v11809_v32  ;;  %v13671_v19 = vld [vmem:[%s14997_s29 + $0x69c] sm:$0xf]  ;;  %v12005_v3 = vor.u32 %v13679_v4, %v12004_v30  ;;  %v11428_v32 = vld [vmem:[%s14997_s29 + $0x218] sm:$0xf]  ;;  %v11497_v39 = vor.u32 %v13543_v16, %v11494_v29 }
 0x6f8   : > { %v12009_v1 = vor.u32 %v13671_v19, %v12006_v36  ;;  %v11429_v56 = vor.u32 %v13535_v21, %v11428_v32  ;;  %v11172_v18 = vld [vmem:[%s14997_s29 + $0x18] sm:$0xf]  ;;  %v13463_v36 = vld [vmem:[%s14997_s29 + $0x1c] sm:$0xf]  ;;  %v11628_v21 = vld [vmem:[%s14997_s29 + $0x3a0] sm:$0xf] }
 0x6f9   : > { %v13471_v30 = vld [vmem:[%s14997_s29 + $0x54] sm:$0xf0]  ;;  %v11686_v32 = vld [vmem:[%s14997_s29 + $0x458] sm:$0xf0] }
 0x6fa   : > { %7309 = vmatpush.bf16.msra.mxu0 %v11229_v38  ;;  %7323 = vmatpush.bf16.msra.mxu1 %v11741_v14  ;;  %v13655_v38 = vld [vmem:[%s14997_s29 + $0x61c] sm:$0xf]  ;;  %v11684_v4 = vld [vmem:[%s14997_s29 + $0x418] sm:$0xf] }
 0x6fb   : > { %7337 = vmatpush.bf16.msra.mxu2 %v11233_v20  ;;  %7351 = vmatpush.bf16.msra.mxu3 %v11745_v7  ;;  %v11942_v14 = vld [vmem:[%s14997_s29 + $0x658] sm:$0xf0]  ;;  %v13519_v20 = vld [vmem:[%s14997_s29 + $0x1d4] sm:$0xf0]  ;;  %v11433_v7 = vor.u32 %v13527_v59, %v11430_v52  ;;  %v11173_v59 = vor.u32 %v13471_v30, %v11172_v18  ;;  %v11438_v18 = vld [vmem:[%s14997_s29 + $0x260] sm:$0xf0] }
 0x6fc   : > { %v11945_v47 = vor.u32 %v13655_v38, %v11942_v14  ;;  %v11365_v55 = vor.u32 %v13519_v20, %v11364_v60  ;;  %v13599_v16 = vld [vmem:[%s14997_s29 + $0x454] sm:$0xf0]  ;;  %v11630_v38 = vld [vmem:[%s14997_s29 + $0x3e0] sm:$0xf0] }
 0x6fd   : > { %v11685_v52 = vor.u32 %v13599_v16, %v11684_v4  ;;  %v13704_v14 = vld [vmem:[%s14997_s29 + $0x7a4] sm:$0xf]  ;;  %v11633_v33 = vor.u32 %v13576_v23, %v11630_v38  ;;  %v11372_v16 = vld [vmem:[%s14997_s29 + $0x1a0] sm:$0xf] }
 0x6fe   : > { %7310 = vmatpush.bf16.msra.mxu0 %v11165_v5  ;;  %7324 = vmatpush.bf16.msra.mxu1 %v11677_v13  ;;  %v11300_v5 = vld [vmem:[%s14997_s29 + $0x118] sm:$0xf] }
 0x6ff   : > { %7338 = vmatpush.bf16.msra.mxu2 %v11169_v9  ;;  %7352 = vmatpush.bf16.msra.mxu3 %v11681_v24  ;;  %v13503_v13 = vld [vmem:[%s14997_s29 + $0x154] sm:$0xf0]  ;;  %v13495_v24 = vld [vmem:[%s14997_s29 + $0x11c] sm:$0xf] }
 0x700   : > { %v13631_v9 = vld [vmem:[%s14997_s29 + $0x554] sm:$0xf0]  ;;  %v11301_v0 = vor.u32 %v13503_v13, %v11300_v5  ;;  %v12078_v5 = vld [vmem:[%s14997_s29 + $0x760] sm:$0xf0] }
 0x701   : > { %7311 = vmatmul.bf16.vlgmr.msra.gmra.mxu0 %v17352_v12  ;;  %7325 = vmatmul.bf16.vlgmr.msra.gmra.mxu1 %v17356_v58 }
 0x702   : > { %7359 = vmatpush.bf16.msrb.mxu0 %v11621_v27  ;;  %7373 = vmatpush.bf16.msrb.mxu1 %v12133_v51  ;;  %v11302_v27 = vld [vmem:[%s14997_s29 + $0x158] sm:$0xf0] }
 0x703   : > { %7387 = vmatpush.bf16.msrb.mxu2 %v11625_v41  ;;  %7401 = vmatpush.bf16.msrb.mxu3 %v12137_v54  ;;  %v13623_v51 = vld [vmem:[%s14997_s29 + $0x51c] sm:$0xf]  ;;  %v11813_v41 = vor.u32 %v13631_v9, %v11812_v50  ;;  %v11236_v54 = vld [vmem:[%s14997_s29 + $0x98] sm:$0xf]  ;;  %v11305_v6 = vor.u32 %v13495_v24, %v11302_v27  ;;  %v13552_v50 = vld [vmem:[%s14997_s29 + $0x2dc] sm:$0xf0] }
 0x704   : > { %7339 = vmatmul.bf16.vlgmr.msra.gmra.mxu2 %v17352_v12  ;;  %7353 = vmatmul.bf16.vlgmr.msra.gmra.mxu3 %v17356_v58  ;;  %v11817_v17 = vor.u32 %v13623_v51, %v11814_v26  ;;  %v12012_v27 = vld [vmem:[%s14997_s29 + $0x6a0] sm:$0xf]  ;;  %v13544_v26 = vld [vmem:[%s14997_s29 + $0x2a4] sm:$0xf] }
 0x705   : > { %v13680_v51 = vld [vmem:[%s14997_s29 + $0x6dc] sm:$0xf0] }
 0x706   : > { %7360 = vmatpush.bf16.msrb.mxu0 %v11557_v45  ;;  %7374 = vmatpush.bf16.msrb.mxu1 %v12069_v44  ;;  %v11238_v45 = vld [vmem:[%s14997_s29 + $0xd8] sm:$0xf0] }
 0x707   : > { %7388 = vmatpush.bf16.msrb.mxu2 %v11561_v48  ;;  %7402 = vmatpush.bf16.msrb.mxu3 %v12073_v31  ;;  %v13607_v44 = vld [vmem:[%s14997_s29 + $0x49c] sm:$0xf]  ;;  %v11237_v48 = vor.u32 %v13487_v43, %v11236_v54  ;;  %v11749_v31 = vor.u32 %v13615_v15, %v11748_v2  ;;  %v11241_v29 = vor.u32 %v13479_v46, %v11238_v45  ;;  %v12014_v54 = vld [vmem:[%s14997_s29 + $0x6e0] sm:$0xf0]  ;;  %v13536_v2 = vld [vmem:[%s14997_s29 + $0x25c] sm:$0xf0] }
 0x708   : > { %v11753_v19 = vor.u32 %v13607_v44, %v11750_v53  ;;  %v11948_v45 = vld [vmem:[%s14997_s29 + $0x620] sm:$0xf]  ;;  %v13528_v53 = vld [vmem:[%s14997_s29 + $0x224] sm:$0xf] }
 0x709   : > { %v13664_v44 = vld [vmem:[%s14997_s29 + $0x65c] sm:$0xf0] }
 0x70a   : > { %7361 = vmatpush.bf16.msrb.mxu0 %v11493_v42  ;;  %7375 = vmatpush.bf16.msrb.mxu1 %v12005_v3  ;;  %v11174_v42 = vld [vmem:[%s14997_s29 + $0x58] sm:$0xf0]  ;;  %v11949_v4 = vor.u32 %v13664_v44, %v11948_v45  ;;  %v13713_v45 = vld [vmem:[%s14997_s29 + $0x7e4] sm:$0xf0]  ;;  %v13577_v44 = vld [vmem:[%s14997_s29 + $0x3ac] sm:$0xf] }
 0x70b   : > { %7389 = vmatpush.bf16.msrb.mxu2 %v11497_v39  ;;  %7403 = vmatpush.bf16.msrb.mxu3 %v12009_v1  ;;  %v13591_v3 = vld [vmem:[%s14997_s29 + $0x41c] sm:$0xf]  ;;  %v13584_v39 = vld [vmem:[%s14997_s29 + $0x3dc] sm:$0xf0] }
 0x70c   : > { %v12140_v1 = vld [vmem:[%s14997_s29 + $0x7a0] sm:$0xf]  ;;  %v11689_v60 = vor.u32 %v13591_v3, %v11686_v32  ;;  %v11629_v20 = vor.u32 %v13584_v39, %v11628_v21  ;;  %v13512_v32 = vld [vmem:[%s14997_s29 + $0x1a4] sm:$0xf] }
 0x70d   : > { %v13648_v3 = vld [vmem:[%s14997_s29 + $0x5dc] sm:$0xf0]  ;;  %v11374_v21 = vld [vmem:[%s14997_s29 + $0x1e0] sm:$0xf0] }
 0x70e   : > { %7362 = vmatpush.bf16.msrb.mxu0 %v11429_v56  ;;  %7376 = vmatpush.bf16.msrb.mxu1 %v11941_v10  ;;  %v12142_v56 = vld [vmem:[%s14997_s29 + $0x7e0] sm:$0xf0]  ;;  %v11177_v10 = vor.u32 %v13463_v36, %v11174_v42  ;;  %v11884_v42 = vld [vmem:[%s14997_s29 + $0x5a0] sm:$0xf]  ;;  %v11377_v38 = vor.u32 %v13512_v32, %v11374_v21  ;;  %v12084_v21 = vld [vmem:[%s14997_s29 + $0x728] sm:$0xf] }
 0x70f   : > { %7390 = vmatpush.bf16.msrb.mxu2 %v11433_v7  ;;  %7404 = vmatpush.bf16.msrb.mxu3 %v11945_v47  ;;  %v12141_v7 = vor.u32 %v13712_v62, %v12140_v1  ;;  %v11564_v47 = vld [vmem:[%s14997_s29 + $0x320] sm:$0xf]  ;;  %v12145_v37 = vor.u32 %v13704_v14, %v12142_v56  ;;  %v13640_v39 = vld [vmem:[%s14997_s29 + $0x5a4] sm:$0xf]  ;;  %v11885_v23 = vor.u32 %v13648_v3, %v11884_v42  ;;  %v13569_v42 = vld [vmem:[%s14997_s29 + $0x364] sm:$0xf0] }
 0x710   : > { %v11565_v13 = vor.u32 %v13568_v28, %v11564_v47  ;;  %v11886_v1 = vld [vmem:[%s14997_s29 + $0x5e0] sm:$0xf0]  ;;  %v11820_v56 = vld [vmem:[%s14997_s29 + $0x520] sm:$0xf] }
 0x711   : > { %v11889_v14 = vor.u32 %v13640_v39, %v11886_v1  ;;  %v11822_v47 = vld [vmem:[%s14997_s29 + $0x560] sm:$0xf0]  ;;  %v13697_v39 = vld [vmem:[%s14997_s29 + $0x764] sm:$0xf0]  ;;  %v13561_v1 = vld [vmem:[%s14997_s29 + $0x32c] sm:$0xf] }
 0x712   : > { %7363 = vmatpush.bf16.msrb.mxu0 %v11365_v55  ;;  %7377 = vmatpush.bf16.msrb.mxu1 %v11877_v57  ;;  %v11566_v55 = vld [vmem:[%s14997_s29 + $0x360] sm:$0xf0] }
 0x713   : > { %7391 = vmatpush.bf16.msrb.mxu2 %v11369_v49  ;;  %7405 = vmatpush.bf16.msrb.mxu3 %v11881_v8  ;;  %v13688_v57 = vld [vmem:[%s14997_s29 + $0x724] sm:$0xf]  ;;  %v12077_v49 = vor.u32 %v13696_v61, %v12076_v35  ;;  %v11500_v8 = vld [vmem:[%s14997_s29 + $0x2a0] sm:$0xf]  ;;  %v11569_v9 = vor.u32 %v13560_v25, %v11566_v55 }
 0x714   : > { %v12081_v24 = vor.u32 %v13688_v57, %v12078_v5  ;;  %v11501_v43 = vor.u32 %v13552_v50, %v11500_v8  ;;  %v13488_v35 = vld [vmem:[%s14997_s29 + $0xdc] sm:$0xf0]  ;;  %v13480_v5 = vld [vmem:[%s14997_s29 + $0xa4] sm:$0xf] }
 0x715   : > { %v11756_v55 = vld [vmem:[%s14997_s29 + $0x4a0] sm:$0xf]  ;;  %v11758_v8 = vld [vmem:[%s14997_s29 + $0x4e0] sm:$0xf0] }
 0x716   : > { %7364 = vmatpush.bf16.msrb.mxu0 %v11301_v0  ;;  %7378 = vmatpush.bf16.msrb.mxu1 %v11813_v41  ;;  %v11502_v0 = vld [vmem:[%s14997_s29 + $0x2e0] sm:$0xf0]  ;;  %v13616_v57 = vld [vmem:[%s14997_s29 + $0x4dc] sm:$0xf0] }
 0x717   : > { %7392 = vmatpush.bf16.msrb.mxu2 %v11305_v6  ;;  %7406 = vmatpush.bf16.msrb.mxu3 %v11817_v17  ;;  %v13672_v41 = vld [vmem:[%s14997_s29 + $0x6a4] sm:$0xf]  ;;  %v12013_v6 = vor.u32 %v13680_v51, %v12012_v27  ;;  %v11436_v17 = vld [vmem:[%s14997_s29 + $0x220] sm:$0xf]  ;;  %v11505_v15 = vor.u32 %v13544_v26, %v11502_v0 }
 0x718   : > { %v12017_v46 = vor.u32 %v13672_v41, %v12014_v54  ;;  %v11437_v30 = vor.u32 %v13536_v2, %v11436_v17  ;;  %v11180_v50 = vld [vmem:[%s14997_s29 + $0x20] sm:$0xf]  ;;  %v13464_v54 = vld [vmem:[%s14997_s29 + $0x24] sm:$0xf]  ;;  %v11636_v2 = vld [vmem:[%s14997_s29 + $0x3a8] sm:$0xf] }
 0x719   : > { %v13472_v27 = vld [vmem:[%s14997_s29 + $0x5c] sm:$0xf0]  ;;  %v11694_v17 = vld [vmem:[%s14997_s29 + $0x460] sm:$0xf0] }
 0x71a   : > { %7365 = vmatpush.bf16.msrb.mxu0 %v11237_v48  ;;  %7379 = vmatpush.bf16.msrb.mxu1 %v11749_v31  ;;  %v13656_v48 = vld [vmem:[%s14997_s29 + $0x624] sm:$0xf]  ;;  %v11692_v51 = vld [vmem:[%s14997_s29 + $0x420] sm:$0xf] }
 0x71b   : > { %7393 = vmatpush.bf16.msrb.mxu2 %v11241_v29  ;;  %7407 = vmatpush.bf16.msrb.mxu3 %v11753_v19  ;;  %v11950_v31 = vld [vmem:[%s14997_s29 + $0x660] sm:$0xf0]  ;;  %v13520_v29 = vld [vmem:[%s14997_s29 + $0x1dc] sm:$0xf0]  ;;  %v11441_v19 = vor.u32 %v13528_v53, %v11438_v18  ;;  %v11181_v53 = vor.u32 %v13472_v27, %v11180_v50  ;;  %v11446_v50 = vld [vmem:[%s14997_s29 + $0x268] sm:$0xf0] }
 0x71c   : > { %v11953_v36 = vor.u32 %v13656_v48, %v11950_v31  ;;  %v11373_v62 = vor.u32 %v13520_v29, %v11372_v16  ;;  %v13600_v26 = vld [vmem:[%s14997_s29 + $0x45c] sm:$0xf0]  ;;  %v11638_v48 = vld [vmem:[%s14997_s29 + $0x3e8] sm:$0xf0] }
 0x71d   : > { %v11693_v18 = vor.u32 %v13600_v26, %v11692_v51  ;;  %v13705_v31 = vld [vmem:[%s14997_s29 + $0x7ac] sm:$0xf]  ;;  %v11641_v3 = vor.u32 %v13577_v44, %v11638_v48  ;;  %v11380_v26 = vld [vmem:[%s14997_s29 + $0x1a8] sm:$0xf] }
 0x71e   : > { %7366 = vmatpush.bf16.msrb.mxu0 %v11173_v59  ;;  %7380 = vmatpush.bf16.msrb.mxu1 %v11685_v52  ;;  %v11308_v59 = vld [vmem:[%s14997_s29 + $0x120] sm:$0xf] }
 0x71f   : > { %7394 = vmatpush.bf16.msrb.mxu2 %v11177_v10  ;;  %7408 = vmatpush.bf16.msrb.mxu3 %v11689_v60  ;;  %v13504_v52 = vld [vmem:[%s14997_s29 + $0x15c] sm:$0xf0]  ;;  %v13496_v60 = vld [vmem:[%s14997_s29 + $0x124] sm:$0xf] }
 0x720   : > { %v13632_v10 = vld [vmem:[%s14997_s29 + $0x55c] sm:$0xf0]  ;;  %v11309_v28 = vor.u32 %v13504_v52, %v11308_v59  ;;  %v12086_v59 = vld [vmem:[%s14997_s29 + $0x768] sm:$0xf0] }
 0x721   : > { %7367 = vmatmul.bf16.vlgmr.msrb.gmra.mxu0 %v17352_v12  ;;  %7381 = vmatmul.bf16.vlgmr.msrb.gmra.mxu1 %v17356_v58 }
 0x722   : > { %7415 = vmatpush.bf16.msra.mxu0 %v11629_v20  ;;  %7429 = vmatpush.bf16.msra.mxu1 %v12141_v7  ;;  %v11310_v20 = vld [vmem:[%s14997_s29 + $0x160] sm:$0xf0] }
 0x723   : > { %7443 = vmatpush.bf16.msra.mxu2 %v11633_v33  ;;  %7457 = vmatpush.bf16.msra.mxu3 %v12145_v37  ;;  %v13624_v7 = vld [vmem:[%s14997_s29 + $0x524] sm:$0xf]  ;;  %v11821_v33 = vor.u32 %v13632_v10, %v11820_v56  ;;  %v11244_v37 = vld [vmem:[%s14997_s29 + $0xa0] sm:$0xf]  ;;  %v11313_v61 = vor.u32 %v13496_v60, %v11310_v20  ;;  %v13553_v56 = vld [vmem:[%s14997_s29 + $0x2e4] sm:$0xf0] }
 0x724   : > { %7395 = vmatmul.bf16.vlgmr.msrb.gmra.mxu2 %v17352_v12  ;;  %7409 = vmatmul.bf16.vlgmr.msrb.gmra.mxu3 %v17356_v58  ;;  %v11825_v25 = vor.u32 %v13624_v7, %v11822_v47  ;;  %v12020_v20 = vld [vmem:[%s14997_s29 + $0x6a8] sm:$0xf]  ;;  %v13545_v47 = vld [vmem:[%s14997_s29 + $0x2ac] sm:$0xf] }
 0x725   : > { %v13681_v7 = vld [vmem:[%s14997_s29 + $0x6e4] sm:$0xf0] }
 0x726   : > { %7416 = vmatpush.bf16.msra.mxu0 %v11565_v13  ;;  %7430 = vmatpush.bf16.msra.mxu1 %v12077_v49  ;;  %v11246_v13 = vld [vmem:[%s14997_s29 + $0xe0] sm:$0xf0] }
 0x727   : > { %7444 = vmatpush.bf16.msra.mxu2 %v11569_v9  ;;  %7458 = vmatpush.bf16.msra.mxu3 %v12081_v24  ;;  %v13608_v49 = vld [vmem:[%s14997_s29 + $0x4a4] sm:$0xf]  ;;  %v11245_v9 = vor.u32 %v13488_v35, %v11244_v37  ;;  %v11757_v24 = vor.u32 %v13616_v57, %v11756_v55  ;;  %v11249_v0 = vor.u32 %v13480_v5, %v11246_v13  ;;  %v12022_v37 = vld [vmem:[%s14997_s29 + $0x6e8] sm:$0xf0]  ;;  %v13537_v55 = vld [vmem:[%s14997_s29 + $0x264] sm:$0xf0] }
 0x728   : > { %v11761_v41 = vor.u32 %v13608_v49, %v11758_v8  ;;  %v11956_v13 = vld [vmem:[%s14997_s29 + $0x628] sm:$0xf]  ;;  %v13529_v8 = vld [vmem:[%s14997_s29 + $0x22c] sm:$0xf] }
 0x729   : > { %v13665_v49 = vld [vmem:[%s14997_s29 + $0x664] sm:$0xf0] }
 0x72a   : > { %7417 = vmatpush.bf16.msra.mxu0 %v11501_v43  ;;  %7431 = vmatpush.bf16.msra.mxu1 %v12013_v6  ;;  %v11182_v43 = vld [vmem:[%s14997_s29 + $0x60] sm:$0xf0]  ;;  %v11957_v51 = vor.u32 %v13665_v49, %v11956_v13  ;;  %v13714_v13 = vld [vmem:[%s14997_s29 + $0x7ec] sm:$0xf0]  ;;  %v13578_v49 = vld [vmem:[%s14997_s29 + $0x3b4] sm:$0xf] }
 0x72b   : > { %7445 = vmatpush.bf16.msra.mxu2 %v11505_v15  ;;  %7459 = vmatpush.bf16.msra.mxu3 %v12017_v46  ;;  %v13592_v6 = vld [vmem:[%s14997_s29 + $0x424] sm:$0xf]  ;;  %v13585_v15 = vld [vmem:[%s14997_s29 + $0x3e4] sm:$0xf0] }
 0x72c   : > { %v12148_v46 = vld [vmem:[%s14997_s29 + $0x7a8] sm:$0xf]  ;;  %v11697_v16 = vor.u32 %v13592_v6, %v11694_v17  ;;  %v11637_v29 = vor.u32 %v13585_v15, %v11636_v2  ;;  %v13513_v17 = vld [vmem:[%s14997_s29 + $0x1ac] sm:$0xf] }
 0x72d   : > { %v13649_v6 = vld [vmem:[%s14997_s29 + $0x5e4] sm:$0xf0]  ;;  %v11382_v2 = vld [vmem:[%s14997_s29 + $0x1e8] sm:$0xf0] }
 0x72e   : > { %7418 = vmatpush.bf16.msra.mxu0 %v11437_v30  ;;  %7432 = vmatpush.bf16.msra.mxu1 %v11949_v4  ;;  %v12150_v30 = vld [vmem:[%s14997_s29 + $0x7e8] sm:$0xf0]  ;;  %v11185_v4 = vor.u32 %v13464_v54, %v11182_v43  ;;  %v11892_v43 = vld [vmem:[%s14997_s29 + $0x5a8] sm:$0xf]  ;;  %v11385_v48 = vor.u32 %v13513_v17, %v11382_v2  ;;  %v12092_v2 = vld [vmem:[%s14997_s29 + $0x730] sm:$0xf] }
 0x72f   : > { %7446 = vmatpush.bf16.msra.mxu2 %v11441_v19  ;;  %7460 = vmatpush.bf16.msra.mxu3 %v11953_v36  ;;  %v12149_v19 = vor.u32 %v13713_v45, %v12148_v46  ;;  %v11572_v36 = vld [vmem:[%s14997_s29 + $0x328] sm:$0xf]  ;;  %v12153_v32 = vor.u32 %v13705_v31, %v12150_v30  ;;  %v13641_v15 = vld [vmem:[%s14997_s29 + $0x5ac] sm:$0xf]  ;;  %v11893_v44 = vor.u32 %v13649_v6, %v11892_v43  ;;  %v13570_v43 = vld [vmem:[%s14997_s29 + $0x36c] sm:$0xf0] }
 0x730   : > { %v11573_v52 = vor.u32 %v13569_v42, %v11572_v36  ;;  %v11894_v46 = vld [vmem:[%s14997_s29 + $0x5e8] sm:$0xf0]  ;;  %v11828_v30 = vld [vmem:[%s14997_s29 + $0x528] sm:$0xf] }
 0x731   : > { %v11897_v31 = vor.u32 %v13641_v15, %v11894_v46  ;;  %v11830_v36 = vld [vmem:[%s14997_s29 + $0x568] sm:$0xf0]  ;;  %v13698_v15 = vld [vmem:[%s14997_s29 + $0x76c] sm:$0xf0]  ;;  %v13562_v46 = vld [vmem:[%s14997_s29 + $0x334] sm:$0xf] }
 0x732   : > { %7419 = vmatpush.bf16.msra.mxu0 %v11373_v62  ;;  %7433 = vmatpush.bf16.msra.mxu1 %v11885_v23  ;;  %v11574_v62 = vld [vmem:[%s14997_s29 + $0x368] sm:$0xf0] }
 0x733   : > { %7447 = vmatpush.bf16.msra.mxu2 %v11377_v38  ;;  %7461 = vmatpush.bf16.msra.mxu3 %v11889_v14  ;;  %v13689_v23 = vld [vmem:[%s14997_s29 + $0x72c] sm:$0xf]  ;;  %v12085_v38 = vor.u32 %v13697_v39, %v12084_v21  ;;  %v11508_v14 = vld [vmem:[%s14997_s29 + $0x2a8] sm:$0xf]  ;;  %v11577_v10 = vor.u32 %v13561_v1, %v11574_v62 }
 0x734   : > { %v12089_v60 = vor.u32 %v13689_v23, %v12086_v59  ;;  %v11509_v35 = vor.u32 %v13553_v56, %v11508_v14  ;;  %v13489_v21 = vld [vmem:[%s14997_s29 + $0xe4] sm:$0xf0]  ;;  %v13481_v59 = vld [vmem:[%s14997_s29 + $0xac] sm:$0xf] }
 0x735   : > { %v11764_v62 = vld [vmem:[%s14997_s29 + $0x4a8] sm:$0xf]  ;;  %v11766_v14 = vld [vmem:[%s14997_s29 + $0x4e8] sm:$0xf0] }
 0x736   : > { %7420 = vmatpush.bf16.msra.mxu0 %v11309_v28  ;;  %7434 = vmatpush.bf16.msra.mxu1 %v11821_v33  ;;  %v11510_v28 = vld [vmem:[%s14997_s29 + $0x2e8] sm:$0xf0]  ;;  %v13617_v23 = vld [vmem:[%s14997_s29 + $0x4e4] sm:$0xf0] }
 0x737   : > { %7448 = vmatpush.bf16.msra.mxu2 %v11313_v61  ;;  %7462 = vmatpush.bf16.msra.mxu3 %v11825_v25  ;;  %v13673_v33 = vld [vmem:[%s14997_s29 + $0x6ac] sm:$0xf]  ;;  %v12021_v61 = vor.u32 %v13681_v7, %v12020_v20  ;;  %v11444_v25 = vld [vmem:[%s14997_s29 + $0x228] sm:$0xf]  ;;  %v11513_v57 = vor.u32 %v13545_v47, %v11510_v28 }
 0x738   : > { %v12025_v5 = vor.u32 %v13673_v33, %v12022_v37  ;;  %v11445_v27 = vor.u32 %v13537_v55, %v11444_v25  ;;  %v11188_v56 = vld [vmem:[%s14997_s29 + $0x28] sm:$0xf]  ;;  %v13465_v37 = vld [vmem:[%s14997_s29 + $0x2c] sm:$0xf]  ;;  %v11644_v55 = vld [vmem:[%s14997_s29 + $0x3b0] sm:$0xf] }
 0x739   : > { %v13473_v20 = vld [vmem:[%s14997_s29 + $0x64] sm:$0xf0]  ;;  %v11702_v25 = vld [vmem:[%s14997_s29 + $0x468] sm:$0xf0] }
 0x73a   : > { %7421 = vmatpush.bf16.msra.mxu0 %v11245_v9  ;;  %7435 = vmatpush.bf16.msra.mxu1 %v11757_v24  ;;  %v13657_v9 = vld [vmem:[%s14997_s29 + $0x62c] sm:$0xf]  ;;  %v11700_v7 = vld [vmem:[%s14997_s29 + $0x428] sm:$0xf] }
 0x73b   : > { %7449 = vmatpush.bf16.msra.mxu2 %v11249_v0  ;;  %7463 = vmatpush.bf16.msra.mxu3 %v11761_v41  ;;  %v11958_v24 = vld [vmem:[%s14997_s29 + $0x668] sm:$0xf0]  ;;  %v13521_v0 = vld [vmem:[%s14997_s29 + $0x1e4] sm:$0xf0]  ;;  %v11449_v41 = vor.u32 %v13529_v8, %v11446_v50  ;;  %v11189_v8 = vor.u32 %v13473_v20, %v11188_v56  ;;  %v11454_v56 = vld [vmem:[%s14997_s29 + $0x270] sm:$0xf0] }
 0x73c   : > { %v11961_v54 = vor.u32 %v13657_v9, %v11958_v24  ;;  %v11381_v45 = vor.u32 %v13521_v0, %v11380_v26  ;;  %v13601_v47 = vld [vmem:[%s14997_s29 + $0x464] sm:$0xf0]  ;;  %v11646_v9 = vld [vmem:[%s14997_s29 + $0x3f0] sm:$0xf0] }
 0x73d   : > { %v11701_v50 = vor.u32 %v13601_v47, %v11700_v7  ;;  %v13706_v24 = vld [vmem:[%s14997_s29 + $0x7b4] sm:$0xf]  ;;  %v11649_v6 = vor.u32 %v13578_v49, %v11646_v9  ;;  %v11388_v47 = vld [vmem:[%s14997_s29 + $0x1b0] sm:$0xf] }
 0x73e   : > { %7422 = vmatpush.bf16.msra.mxu0 %v11181_v53  ;;  %7436 = vmatpush.bf16.msra.mxu1 %v11693_v18  ;;  %v11316_v53 = vld [vmem:[%s14997_s29 + $0x128] sm:$0xf] }
 0x73f   : > { %7450 = vmatpush.bf16.msra.mxu2 %v11185_v4  ;;  %7464 = vmatpush.bf16.msra.mxu3 %v11697_v16  ;;  %v13505_v18 = vld [vmem:[%s14997_s29 + $0x164] sm:$0xf0]  ;;  %v13497_v16 = vld [vmem:[%s14997_s29 + $0x12c] sm:$0xf] }
 0x740   : > { %v13633_v4 = vld [vmem:[%s14997_s29 + $0x564] sm:$0xf0]  ;;  %v11317_v42 = vor.u32 %v13505_v18, %v11316_v53  ;;  %v12094_v53 = vld [vmem:[%s14997_s29 + $0x770] sm:$0xf0] }
 0x741   : > { %7423 = vmatmul.bf16.vlgmr.msra.gmra.mxu0 %v17352_v12  ;;  %7437 = vmatmul.bf16.vlgmr.msra.gmra.mxu1 %v17356_v58 }
 0x742   : > { %7471 = vmatpush.bf16.msrb.mxu0 %v11637_v29  ;;  %7485 = vmatpush.bf16.msrb.mxu1 %v12149_v19  ;;  %v11318_v29 = vld [vmem:[%s14997_s29 + $0x168] sm:$0xf0] }
 0x743   : > { %7499 = vmatpush.bf16.msrb.mxu2 %v11641_v3  ;;  %7513 = vmatpush.bf16.msrb.mxu3 %v12153_v32  ;;  %v13625_v19 = vld [vmem:[%s14997_s29 + $0x52c] sm:$0xf]  ;;  %v11829_v3 = vor.u32 %v13633_v4, %v11828_v30  ;;  %v11252_v32 = vld [vmem:[%s14997_s29 + $0xa8] sm:$0xf]  ;;  %v11321_v39 = vor.u32 %v13497_v16, %v11318_v29  ;;  %v13554_v30 = vld [vmem:[%s14997_s29 + $0x2ec] sm:$0xf0] }
 0x744   : > { %7451 = vmatmul.bf16.vlgmr.msra.gmra.mxu2 %v17352_v12  ;;  %7465 = vmatmul.bf16.vlgmr.msra.gmra.mxu3 %v17356_v58  ;;  %v11833_v1 = vor.u32 %v13625_v19, %v11830_v36  ;;  %v12028_v29 = vld [vmem:[%s14997_s29 + $0x6b0] sm:$0xf]  ;;  %v13546_v36 = vld [vmem:[%s14997_s29 + $0x2b4] sm:$0xf] }
 0x745   : > { %v13682_v19 = vld [vmem:[%s14997_s29 + $0x6ec] sm:$0xf0] }
 0x746   : > { %7472 = vmatpush.bf16.msrb.mxu0 %v11573_v52  ;;  %7486 = vmatpush.bf16.msrb.mxu1 %v12085_v38  ;;  %v11254_v52 = vld [vmem:[%s14997_s29 + $0xe8] sm:$0xf0] }
 0x747   : > { %7500 = vmatpush.bf16.msrb.mxu2 %v11577_v10  ;;  %7514 = vmatpush.bf16.msrb.mxu3 %v12089_v60  ;;  %v13609_v38 = vld [vmem:[%s14997_s29 + $0x4ac] sm:$0xf]  ;;  %v11253_v10 = vor.u32 %v13489_v21, %v11252_v32  ;;  %v11765_v60 = vor.u32 %v13617_v23, %v11764_v62  ;;  %v11257_v28 = vor.u32 %v13481_v59, %v11254_v52  ;;  %v12030_v32 = vld [vmem:[%s14997_s29 + $0x6f0] sm:$0xf0]  ;;  %v13538_v62 = vld [vmem:[%s14997_s29 + $0x26c] sm:$0xf0] }
 0x748   : > { %v11769_v33 = vor.u32 %v13609_v38, %v11766_v14  ;;  %v11964_v52 = vld [vmem:[%s14997_s29 + $0x630] sm:$0xf]  ;;  %v13530_v14 = vld [vmem:[%s14997_s29 + $0x234] sm:$0xf] }
 0x749   : > { %v13666_v38 = vld [vmem:[%s14997_s29 + $0x66c] sm:$0xf0] }
 0x74a   : > { %7473 = vmatpush.bf16.msrb.mxu0 %v11509_v35  ;;  %7487 = vmatpush.bf16.msrb.mxu1 %v12021_v61  ;;  %v11190_v35 = vld [vmem:[%s14997_s29 + $0x68] sm:$0xf0]  ;;  %v11965_v7 = vor.u32 %v13666_v38, %v11964_v52  ;;  %v13715_v52 = vld [vmem:[%s14997_s29 + $0x7f4] sm:$0xf0]  ;;  %v13579_v38 = vld [vmem:[%s14997_s29 + $0x3bc] sm:$0xf] }
 0x74b   : > { %7501 = vmatpush.bf16.msrb.mxu2 %v11513_v57  ;;  %7515 = vmatpush.bf16.msrb.mxu3 %v12025_v5  ;;  %v13593_v61 = vld [vmem:[%s14997_s29 + $0x42c] sm:$0xf]  ;;  %v13586_v57 = vld [vmem:[%s14997_s29 + $0x3ec] sm:$0xf0] }
 0x74c   : > { %v12156_v5 = vld [vmem:[%s14997_s29 + $0x7b0] sm:$0xf]  ;;  %v11705_v26 = vor.u32 %v13593_v61, %v11702_v25  ;;  %v11645_v0 = vor.u32 %v13586_v57, %v11644_v55  ;;  %v13514_v25 = vld [vmem:[%s14997_s29 + $0x1b4] sm:$0xf] }
 0x74d   : > { %v13650_v61 = vld [vmem:[%s14997_s29 + $0x5ec] sm:$0xf0]  ;;  %v11390_v55 = vld [vmem:[%s14997_s29 + $0x1f0] sm:$0xf0] }
 0x74e   : > { %7474 = vmatpush.bf16.msrb.mxu0 %v11445_v27  ;;  %7488 = vmatpush.bf16.msrb.mxu1 %v11957_v51  ;;  %v12158_v27 = vld [vmem:[%s14997_s29 + $0x7f0] sm:$0xf0]  ;;  %v11193_v51 = vor.u32 %v13465_v37, %v11190_v35  ;;  %v11900_v35 = vld [vmem:[%s14997_s29 + $0x5b0] sm:$0xf]  ;;  %v11393_v9 = vor.u32 %v13514_v25, %v11390_v55  ;;  %v12100_v55 = vld [vmem:[%s14997_s29 + $0x738] sm:$0xf] }
 0x74f   : > { %7502 = vmatpush.bf16.msrb.mxu2 %v11449_v41  ;;  %7516 = vmatpush.bf16.msrb.mxu3 %v11961_v54  ;;  %v12157_v41 = vor.u32 %v13714_v13, %v12156_v5  ;;  %v11580_v54 = vld [vmem:[%s14997_s29 + $0x330] sm:$0xf]  ;;  %v12161_v17 = vor.u32 %v13706_v24, %v12158_v27  ;;  %v13642_v57 = vld [vmem:[%s14997_s29 + $0x5b4] sm:$0xf]  ;;  %v11901_v49 = vor.u32 %v13650_v61, %v11900_v35  ;;  %v13571_v35 = vld [vmem:[%s14997_s29 + $0x374] sm:$0xf0] }
 0x750   : > { %v11581_v18 = vor.u32 %v13570_v43, %v11580_v54  ;;  %v11902_v5 = vld [vmem:[%s14997_s29 + $0x5f0] sm:$0xf0]  ;;  %v11836_v27 = vld [vmem:[%s14997_s29 + $0x530] sm:$0xf] }
 0x751   : > { %v11905_v24 = vor.u32 %v13642_v57, %v11902_v5  ;;  %v11838_v54 = vld [vmem:[%s14997_s29 + $0x570] sm:$0xf0]  ;;  %v13699_v57 = vld [vmem:[%s14997_s29 + $0x774] sm:$0xf0]  ;;  %v13563_v5 = vld [vmem:[%s14997_s29 + $0x33c] sm:$0xf] }
 0x752   : > { %7475 = vmatpush.bf16.msrb.mxu0 %v11381_v45  ;;  %7489 = vmatpush.bf16.msrb.mxu1 %v11893_v44  ;;  %v11582_v45 = vld [vmem:[%s14997_s29 + $0x370] sm:$0xf0] }
 0x753   : > { %7503 = vmatpush.bf16.msrb.mxu2 %v11385_v48  ;;  %7517 = vmatpush.bf16.msrb.mxu3 %v11897_v31  ;;  %v13690_v44 = vld [vmem:[%s14997_s29 + $0x734] sm:$0xf]  ;;  %v12093_v48 = vor.u32 %v13698_v15, %v12092_v2  ;;  %v11516_v31 = vld [vmem:[%s14997_s29 + $0x2b0] sm:$0xf]  ;;  %v11585_v4 = vor.u32 %v13562_v46, %v11582_v45 }
 0x754   : > { %v12097_v16 = vor.u32 %v13690_v44, %v12094_v53  ;;  %v11517_v21 = vor.u32 %v13554_v30, %v11516_v31  ;;  %v13490_v2 = vld [vmem:[%s14997_s29 + $0xec] sm:$0xf0]  ;;  %v13482_v53 = vld [vmem:[%s14997_s29 + $0xb4] sm:$0xf] }
 0x755   : > { %v11772_v45 = vld [vmem:[%s14997_s29 + $0x4b0] sm:$0xf]  ;;  %v11774_v31 = vld [vmem:[%s14997_s29 + $0x4f0] sm:$0xf0] }
 0x756   : > { %7476 = vmatpush.bf16.msrb.mxu0 %v11317_v42  ;;  %7490 = vmatpush.bf16.msrb.mxu1 %v11829_v3  ;;  %v11518_v42 = vld [vmem:[%s14997_s29 + $0x2f0] sm:$0xf0]  ;;  %v13618_v44 = vld [vmem:[%s14997_s29 + $0x4ec] sm:$0xf0] }
 0x757   : > { %7504 = vmatpush.bf16.msrb.mxu2 %v11321_v39  ;;  %7518 = vmatpush.bf16.msrb.mxu3 %v11833_v1  ;;  %v13674_v3 = vld [vmem:[%s14997_s29 + $0x6b4] sm:$0xf]  ;;  %v12029_v39 = vor.u32 %v13682_v19, %v12028_v29  ;;  %v11452_v1 = vld [vmem:[%s14997_s29 + $0x230] sm:$0xf]  ;;  %v11521_v23 = vor.u32 %v13546_v36, %v11518_v42 }
 0x758   : > { %v12033_v59 = vor.u32 %v13674_v3, %v12030_v32  ;;  %v11453_v20 = vor.u32 %v13538_v62, %v11452_v1  ;;  %v11196_v30 = vld [vmem:[%s14997_s29 + $0x30] sm:$0xf]  ;;  %v13466_v32 = vld [vmem:[%s14997_s29 + $0x34] sm:$0xf]  ;;  %v11652_v62 = vld [vmem:[%s14997_s29 + $0x3b8] sm:$0xf] }
 0x759   : > { %v13474_v29 = vld [vmem:[%s14997_s29 + $0x6c] sm:$0xf0]  ;;  %v11710_v1 = vld [vmem:[%s14997_s29 + $0x470] sm:$0xf0] }
 0x75a   : > { %7477 = vmatpush.bf16.msrb.mxu0 %v11253_v10  ;;  %7491 = vmatpush.bf16.msrb.mxu1 %v11765_v60  ;;  %v13658_v10 = vld [vmem:[%s14997_s29 + $0x634] sm:$0xf]  ;;  %v11708_v19 = vld [vmem:[%s14997_s29 + $0x430] sm:$0xf] }
 0x75b   : > { %7505 = vmatpush.bf16.msrb.mxu2 %v11257_v28  ;;  %7519 = vmatpush.bf16.msrb.mxu3 %v11769_v33  ;;  %v11966_v60 = vld [vmem:[%s14997_s29 + $0x670] sm:$0xf0]  ;;  %v13522_v28 = vld [vmem:[%s14997_s29 + $0x1ec] sm:$0xf0]  ;;  %v11457_v33 = vor.u32 %v13530_v14, %v11454_v56  ;;  %v11197_v14 = vor.u32 %v13474_v29, %v11196_v30  ;;  %v13667_v30 = vld [vmem:[%s14997_s29 + $0x674] sm:$0xf0] }
 0x75c   : > { %v11969_v37 = vor.u32 %v13658_v10, %v11966_v60  ;;  %v11389_v13 = vor.u32 %v13522_v28, %v11388_v47  ;;  %v13602_v36 = vld [vmem:[%s14997_s29 + $0x46c] sm:$0xf0]  ;;  %v11654_v10 = vld [vmem:[%s14997_s29 + $0x3f8] sm:$0xf0] }
 0x75d   : > { %v11709_v56 = vor.u32 %v13602_v36, %v11708_v19  ;;  %v13707_v60 = vld [vmem:[%s14997_s29 + $0x7bc] sm:$0xf]  ;;  %v11657_v61 = vor.u32 %v13579_v38, %v11654_v10 }
 0x75e   : > { %7478 = vmatpush.bf16.msrb.mxu0 %v11189_v8  ;;  %7492 = vmatpush.bf16.msrb.mxu1 %v11701_v50  ;;  %v11324_v8 = vld [vmem:[%s14997_s29 + $0x130] sm:$0xf]  ;;  %v13659_v29 = vld [vmem:[%s14997_s29 + $0x63c] sm:$0xf] }
 0x75f   : > { %7506 = vmatpush.bf16.msrb.mxu2 %v11193_v51  ;;  %7520 = vmatpush.bf16.msrb.mxu3 %v11705_v26  ;;  %v13506_v50 = vld [vmem:[%s14997_s29 + $0x16c] sm:$0xf0]  ;;  %v13498_v26 = vld [vmem:[%s14997_s29 + $0x134] sm:$0xf]  ;;  %v11974_v19 = vld [vmem:[%s14997_s29 + $0x678] sm:$0xf0] }
 0x760   : > { %v13634_v51 = vld [vmem:[%s14997_s29 + $0x56c] sm:$0xf0]  ;;  %v11325_v43 = vor.u32 %v13506_v50, %v11324_v8  ;;  %v12102_v8 = vld [vmem:[%s14997_s29 + $0x778] sm:$0xf0] }
 0x761   : > { %7479 = vmatmul.bf16.vlgmr.msrb.gmra.mxu0 %v17352_v12  ;;  %7493 = vmatmul.bf16.vlgmr.msrb.gmra.mxu1 %v17356_v58  ;;  %v11398_v38 = vld [vmem:[%s14997_s29 + $0x1f8] sm:$0xf0] }
 0x762   : > { %7527 = vmatpush.bf16.msra.mxu0 %v11645_v0  ;;  %7541 = vmatpush.bf16.msra.mxu1 %v12157_v41  ;;  %v11326_v0 = vld [vmem:[%s14997_s29 + $0x170] sm:$0xf0] }
 0x763   : > { %7555 = vmatpush.bf16.msra.mxu2 %v11649_v6  ;;  %7569 = vmatpush.bf16.msra.mxu3 %v12161_v17  ;;  %v13626_v41 = vld [vmem:[%s14997_s29 + $0x534] sm:$0xf]  ;;  %v11837_v6 = vor.u32 %v13634_v51, %v11836_v27  ;;  %v11260_v17 = vld [vmem:[%s14997_s29 + $0xb0] sm:$0xf]  ;;  %v11329_v15 = vor.u32 %v13498_v26, %v11326_v0  ;;  %v13555_v27 = vld [vmem:[%s14997_s29 + $0x2f4] sm:$0xf0] }
 0x764   : > { %7507 = vmatmul.bf16.vlgmr.msrb.gmra.mxu2 %v17352_v12  ;;  %7521 = vmatmul.bf16.vlgmr.msrb.gmra.mxu3 %v17356_v58  ;;  %v11841_v46 = vor.u32 %v13626_v41, %v11838_v54  ;;  %v12036_v0 = vld [vmem:[%s14997_s29 + $0x6b8] sm:$0xf]  ;;  %v13547_v54 = vld [vmem:[%s14997_s29 + $0x2bc] sm:$0xf] }
 0x765   : > { %v13683_v41 = vld [vmem:[%s14997_s29 + $0x6f4] sm:$0xf0] }
 0x766   : > { %7528 = vmatpush.bf16.msra.mxu0 %v11581_v18  ;;  %7542 = vmatpush.bf16.msra.mxu1 %v12093_v48  ;;  %v11262_v18 = vld [vmem:[%s14997_s29 + $0xf0] sm:$0xf0] }
 0x767   : > { %7556 = vmatpush.bf16.msra.mxu2 %v11585_v4  ;;  %7570 = vmatpush.bf16.msra.mxu3 %v12097_v16  ;;  %v13610_v48 = vld [vmem:[%s14997_s29 + $0x4b4] sm:$0xf]  ;;  %v11261_v4 = vor.u32 %v13490_v2, %v11260_v17  ;;  %v11773_v16 = vor.u32 %v13618_v44, %v11772_v45  ;;  %v11265_v42 = vor.u32 %v13482_v53, %v11262_v18  ;;  %v12038_v17 = vld [vmem:[%s14997_s29 + $0x6f8] sm:$0xf0]  ;;  %v13539_v45 = vld [vmem:[%s14997_s29 + $0x274] sm:$0xf0]  ;;  %v17727_v44 = vpop.f32.mrf.mxu0  ;;  %v17729_v53 = vpop.f32.mrf.mxu1 }
 0x768   : > { %v11777_v3 = vor.u32 %v13610_v48, %v11774_v31  ;;  %v11972_v31 = vld [vmem:[%s14997_s29 + $0x638] sm:$0xf] }
 0x76a   : > { %7529 = vmatpush.bf16.msra.mxu0 %v11517_v21  ;;  %7543 = vmatpush.bf16.msra.mxu1 %v12029_v39  ;;  %v11198_v21 = vld [vmem:[%s14997_s29 + $0x70] sm:$0xf0] }
 0x76b   : > { %7557 = vmatpush.bf16.msra.mxu2 %v11521_v23  ;;  %7571 = vmatpush.bf16.msra.mxu3 %v12033_v59  ;;  %v13594_v39 = vld [vmem:[%s14997_s29 + $0x434] sm:$0xf]  ;;  %v13587_v23 = vld [vmem:[%s14997_s29 + $0x3f4] sm:$0xf0] }
 0x76c   : > { %v12164_v59 = vld [vmem:[%s14997_s29 + $0x7b8] sm:$0xf]  ;;  %v11713_v47 = vor.u32 %v13594_v39, %v11710_v1  ;;  %v11653_v28 = vor.u32 %v13587_v23, %v11652_v62  ;;  %v11977_v39 = vor.u32 %v13659_v29, %v11974_v19  ;;  %v13515_v23 = vld [vmem:[%s14997_s29 + $0x1bc] sm:$0xf]  ;;  %v12228_v19 = vld [vmem:[%s14999_s4 + $0x70] sm:$0xf] }
 0x76d   : > { %v11908_v1 = vld [vmem:[%s14997_s29 + $0x5b8] sm:$0xf]  ;;  %v11718_v29 = vld [vmem:[%s14997_s29 + $0x478] sm:$0xf0] }
 0x76e   : > { %7530 = vmatpush.bf16.msra.mxu0 %v11453_v20  ;;  %7544 = vmatpush.bf16.msra.mxu1 %v11965_v7  ;;  %v12166_v20 = vld [vmem:[%s14997_s29 + $0x7f8] sm:$0xf0]  ;;  %v11201_v7 = vor.u32 %v13466_v32, %v11198_v21  ;;  %v13523_v32 = vld [vmem:[%s14997_s29 + $0x1f4] sm:$0xf0] }
 0x76f   : > { %7558 = vmatpush.bf16.msra.mxu2 %v11457_v33  ;;  %7572 = vmatpush.bf16.msra.mxu3 %v11969_v37  ;;  %v12165_v33 = vor.u32 %v13715_v52, %v12164_v59  ;;  %v11588_v37 = vld [vmem:[%s14997_s29 + $0x338] sm:$0xf]  ;;  %v12169_v25 = vor.u32 %v13707_v60, %v12166_v20  ;;  %v17742_v59 = vpop.f32.mrf.mxu2  ;;  %v17744_v52 = vpop.f32.mrf.mxu3 }
 0x770   : > { %v11589_v50 = vor.u32 %v13571_v35, %v11588_v37  ;;  %v13651_v62 = vld [vmem:[%s14997_s29 + $0x5f4] sm:$0xf0]  ;;  %v13499_v35 = vld [vmem:[%s14997_s29 + $0x13c] sm:$0xf] }
 0x771   : > { %v11909_v60 = vor.u32 %v13651_v62, %v11908_v1  ;;  %v11332_v20 = vld [vmem:[%s14997_s29 + $0x138] sm:$0xf]  ;;  %v12420_v62 = vld [vmem:[%s14999_s4 + $0x1f0] sm:$0xf] }
 0x772   : > { %7531 = vmatpush.bf16.msra.mxu0 %v11389_v13  ;;  %7545 = vmatpush.bf16.msra.mxu1 %v11901_v49  ;;  %v11590_v13 = vld [vmem:[%s14997_s29 + $0x378] sm:$0xf0]  ;;  %v13635_v37 = vld [vmem:[%s14997_s29 + $0x574] sm:$0xf0] }
 0x773   : > { %7559 = vmatpush.bf16.msra.mxu2 %v11393_v9  ;;  %7573 = vmatpush.bf16.msra.mxu3 %v11905_v24  ;;  %v13691_v49 = vld [vmem:[%s14997_s29 + $0x73c] sm:$0xf]  ;;  %v12101_v9 = vor.u32 %v13699_v57, %v12100_v55  ;;  %v11524_v24 = vld [vmem:[%s14997_s29 + $0x2b8] sm:$0xf]  ;;  %v11593_v51 = vor.u32 %v13563_v5, %v11590_v13  ;;  %v17757_v57 = vpop.f32.mrf.mxu0  ;;  %v17759_v5 = vpop.f32.mrf.mxu1 }
 0x774   : > { %v12105_v26 = vor.u32 %v13691_v49, %v12102_v8  ;;  %v11525_v2 = vor.u32 %v13555_v27, %v11524_v24  ;;  %v11846_v55 = vld [vmem:[%s14997_s29 + $0x578] sm:$0xf0]  ;;  %v11268_v8 = vld [vmem:[%s14997_s29 + $0xb8] sm:$0xf] }
 0x775   : > { %v11780_v27 = vld [vmem:[%s14997_s29 + $0x4b8] sm:$0xf] }
 0x776   : > { %7532 = vmatpush.bf16.msra.mxu0 %v11325_v43  ;;  %7546 = vmatpush.bf16.msra.mxu1 %v11837_v6  ;;  %v11526_v43 = vld [vmem:[%s14997_s29 + $0x2f8] sm:$0xf0]  ;;  %v13763_v1 = vld [vmem:[%s14999_s4 + $0x174] sm:$0xf0] }
 0x777   : > { %7560 = vmatpush.bf16.msra.mxu2 %v11329_v15  ;;  %7574 = vmatpush.bf16.msra.mxu3 %v11841_v46  ;;  %v13675_v6 = vld [vmem:[%s14997_s29 + $0x6bc] sm:$0xf]  ;;  %v12037_v15 = vor.u32 %v13683_v41, %v12036_v0  ;;  %v11460_v46 = vld [vmem:[%s14997_s29 + $0x238] sm:$0xf]  ;;  %v11529_v18 = vor.u32 %v13547_v54, %v11526_v43 }
 0x778   : > { %v12041_v48 = vor.u32 %v13675_v6, %v12038_v17  ;;  %v11461_v36 = vor.u32 %v13539_v45, %v11460_v46  ;;  %v11270_v0 = vld [vmem:[%s14997_s29 + $0xf8] sm:$0xf0]  ;;  %v11204_v43 = vld [vmem:[%s14997_s29 + $0x38] sm:$0xf]  ;;  %v17770_v6 = vpop.f32.mrf.mxu2  ;;  %v17772_v17 = vpop.f32.mrf.mxu3 }
 0x779   : > { %v13611_v41 = vld [vmem:[%s14997_s29 + $0x4bc] sm:$0xf]  ;;  %v13475_v46 = vld [vmem:[%s14997_s29 + $0x74] sm:$0xf0] }
 0x77a   : > { %7533 = vmatpush.bf16.msra.mxu0 %v11261_v4  ;;  %7547 = vmatpush.bf16.msra.mxu1 %v11773_v16  ;;  %v13531_v4 = vld [vmem:[%s14997_s29 + $0x23c] sm:$0xf]  ;;  %v11716_v45 = vld [vmem:[%s14997_s29 + $0x438] sm:$0xf] }
 0x77b   : > { %7561 = vmatpush.bf16.msra.mxu2 %v11265_v42  ;;  %7575 = vmatpush.bf16.msra.mxu3 %v11777_v3  ;;  %v11462_v16 = vld [vmem:[%s14997_s29 + $0x278] sm:$0xf0]  ;;  %v11973_v42 = vor.u32 %v13667_v30, %v11972_v31  ;;  %v11396_v3 = vld [vmem:[%s14997_s29 + $0x1b8] sm:$0xf] }
 0x77c   : > { %v11465_v21 = vor.u32 %v13531_v4, %v11462_v16  ;;  %v11397_v10 = vor.u32 %v13523_v32, %v11396_v3  ;;  %v11782_v54 = vld [vmem:[%s14997_s29 + $0x4f8] sm:$0xf0]  ;;  %v13747_v3 = vld [vmem:[%s14999_s4 + $0xf4] sm:$0xf0]  ;;  %v12356_v32 = vld [vmem:[%s14999_s4 + $0x170] sm:$0xf] }
 0x77d   : > { %v11785_v31 = vor.u32 %v13611_v41, %v11782_v54  ;;  %v13467_v30 = vld [vmem:[%s14997_s29 + $0x3c] sm:$0xf]  ;;  %v13743_v41 = vld [vmem:[%s14999_s4 + $0xd4] sm:$0xf0]  ;;  %v12340_v54 = vld [vmem:[%s14999_s4 + $0x150] sm:$0xf] }
 0x77e   : > { %7534 = vmatpush.bf16.msra.mxu0 %v11197_v14  ;;  %7548 = vmatpush.bf16.msra.mxu1 %v11709_v56  ;;  %v13643_v14 = vld [vmem:[%s14997_s29 + $0x5bc] sm:$0xf] }
 0x77f   : > { %7562 = vmatpush.bf16.msra.mxu2 %v11201_v7  ;;  %7576 = vmatpush.bf16.msra.mxu3 %v11713_v47  ;;  %v11910_v56 = vld [vmem:[%s14997_s29 + $0x5f8] sm:$0xf0]  ;;  %v13507_v7 = vld [vmem:[%s14997_s29 + $0x174] sm:$0xf0]  ;;  %v11401_v47 = vor.u32 %v13515_v23, %v11398_v38  ;;  %v17789_v38 = vpop.f32.mrf.mxu0 }
 0x780   : > { %v11333_v13 = vor.u32 %v13507_v7, %v11332_v20  ;;  %v11206_v4 = vld [vmem:[%s14997_s29 + $0x78] sm:$0xf0]  ;;  %v13779_v23 = vld [vmem:[%s14999_s4 + $0x1f4] sm:$0xf0]  ;;  %v12220_v7 = vld [vmem:[%s14999_s4 + $0x60] sm:$0xf] }
 0x781   : > { %7535 = vmatmul.bf16.vlgmr.msra.gmra.mxu0 %v17352_v12  ;;  %7549 = vmatmul.bf16.vlgmr.msra.gmra.mxu1 %v17356_v58  ;;  %v13595_v16 = vld [vmem:[%s14997_s29 + $0x43c] sm:$0xf] }
 0x782   : > { %7583 = vmatpush.bf16.msrb.mxu0 %v11653_v28  ;;  %7597 = vmatpush.bf16.msrb.mxu1 %v12165_v33  ;;  %v11913_v28 = vor.u32 %v13643_v14, %v11910_v56  ;;  %v11844_v33 = vld [vmem:[%s14997_s29 + $0x538] sm:$0xf]  ;;  %v17791_v14 = vpop.f32.mrf.mxu1  ;;  %v11209_v56 = vor.u32 %v13467_v30, %v11206_v4 }
 0x783   : > { %7611 = vmatpush.bf16.msrb.mxu2 %v11657_v61  ;;  %7625 = vmatpush.bf16.msrb.mxu3 %v12169_v25  ;;  %v11334_v61 = vld [vmem:[%s14997_s29 + $0x178] sm:$0xf0]  ;;  %v11845_v49 = vor.u32 %v13635_v37, %v11844_v33  ;;  %v12421_v33 = vor.u32 %v13779_v23, %v12420_v62  ;;  %v12284_v37 = vld [vmem:[%s14999_s4 + $0xe0] sm:$0xf]  ;;  %v12260_v23 = vld [vmem:[%s14999_s4 + $0xb0] sm:$0xf] }
 0x784   : > { %7563 = vmatmul.bf16.vlgmr.msra.gmra.mxu2 %v17352_v12  ;;  %7577 = vmatmul.bf16.vlgmr.msra.gmra.mxu3 %v17356_v58  ;;  %v13627_v25 = vld [vmem:[%s14997_s29 + $0x53c] sm:$0xf] }
 0x785   : > { %v11849_v24 = vor.u32 %v13627_v25, %v11846_v55  ;;  %v13761_v25 = vld [vmem:[%s14999_s4 + $0x164] sm:$0xf0]  ;;  %v12412_v55 = vld [vmem:[%s14999_s4 + $0x1e0] sm:$0xf] }
 0x786   : > { %7584 = vmatpush.bf16.msrb.mxu0 %v11589_v50  ;;  %7598 = vmatpush.bf16.msrb.mxu1 %v12101_v9  ;;  %v13491_v50 = vld [vmem:[%s14997_s29 + $0xf4] sm:$0xf0]  ;;  %v11337_v9 = vor.u32 %v13499_v35, %v11334_v61  ;;  %v13745_v35 = vld [vmem:[%s14999_s4 + $0xe4] sm:$0xf0]  ;;  %v12348_v61 = vld [vmem:[%s14999_s4 + $0x160] sm:$0xf] }
 0x787   : > { %7612 = vmatpush.bf16.msrb.mxu2 %v11593_v51  ;;  %7626 = vmatpush.bf16.msrb.mxu3 %v12105_v26  ;;  %v13619_v51 = vld [vmem:[%s14997_s29 + $0x4f4] sm:$0xf0]  ;;  %v13483_v26 = vld [vmem:[%s14997_s29 + $0xbc] sm:$0xf] }
 0x78a   : > { %7585 = vmatpush.bf16.msrb.mxu0 %v11525_v2  ;;  %7599 = vmatpush.bf16.msrb.mxu1 %v12037_v15  ;;  %v11269_v2 = vor.u32 %v13491_v50, %v11268_v8  ;;  %v11781_v15 = vor.u32 %v13619_v51, %v11780_v27  ;;  %v17803_v8 = vpop.f32.mrf.mxu3  ;;  %v13727_v27 = vld [vmem:[%s14999_s4 + $0x54] sm:$0xf0]  ;;  %v12349_v51 = vor.u32 %v13761_v25, %v12348_v61  ;;  %v17821_v30 = vpop.f32.mrf.mxu1  ;;  %v13721_v61 = vld [vmem:[%s14999_s4 + $0x24] sm:$0xf0] }
 0x78b   : > { %7613 = vmatpush.bf16.msrb.mxu2 %v11529_v18  ;;  %7627 = vmatpush.bf16.msrb.mxu3 %v12041_v48  ;;  %v13603_v18 = vld [vmem:[%s14997_s29 + $0x474] sm:$0xf0]  ;;  %v11273_v48 = vor.u32 %v13483_v26, %v11270_v0  ;;  %v12276_v0 = vld [vmem:[%s14999_s4 + $0xd0] sm:$0xf] }
 0x78e   : > { %7586 = vmatpush.bf16.msrb.mxu0 %v11461_v36  ;;  %7600 = vmatpush.bf16.msrb.mxu1 %v11973_v42  ;;  %v13731_v36 = vld [vmem:[%s14999_s4 + $0x74] sm:$0xf0]  ;;  %v12292_v42 = vld [vmem:[%s14999_s4 + $0xf0] sm:$0xf] }
 0x78f   : > { %7614 = vmatpush.bf16.msrb.mxu2 %v11465_v21  ;;  %7628 = vmatpush.bf16.msrb.mxu3 %v11977_v39  ;;  %v11205_v21 = vor.u32 %v13475_v46, %v11204_v43  ;;  %v11717_v39 = vor.u32 %v13603_v18, %v11716_v45  ;;  %v12293_v20 = vor.u32 %v13747_v3, %v12292_v42  ;;  %v13759_v43 = vld [vmem:[%s14999_s4 + $0x154] sm:$0xf0]  ;;  %v12204_v18 = vld [vmem:[%s14999_s4 + $0x40] sm:$0xf]  ;;  %v13773_v42 = vld [vmem:[%s14999_s4 + $0x1c4] sm:$0xf0] }
 0x790   : > { %v12277_v45 = vor.u32 %v13743_v41, %v12276_v0  ;;  %v17855_v0 = vadd.f32 %v17744_v52, %v17742_v59  ;;  %v17859_v41 = vadd.f32 %v17759_v5, %v17757_v57  ;;  %v12180_v52 = vld [vmem:[%s14999_s4 + $0x10] sm:$0xf]  ;;  %v13719_v57 = vld [vmem:[%s14999_s4 + $0x14] sm:$0xf0] }
 0x792   : > { %7587 = vmatpush.bf16.msrb.mxu0 %v11397_v10  ;;  %7601 = vmatpush.bf16.msrb.mxu1 %v11909_v60  ;;  %v11721_v10 = vor.u32 %v13595_v16, %v11718_v29  ;;  %v12229_v60 = vor.u32 %v13731_v36, %v12228_v19  ;;  %v13741_v16 = vld [vmem:[%s14999_s4 + $0xc4] sm:$0xf0]  ;;  %v12332_v29 = vld [vmem:[%s14999_s4 + $0x140] sm:$0xf] }
 0x793   : > { %7615 = vmatpush.bf16.msrb.mxu2 %v11401_v47  ;;  %7629 = vmatpush.bf16.msrb.mxu3 %v11913_v28  ;;  %v13729_v47 = vld [vmem:[%s14999_s4 + $0x64] sm:$0xf0]  ;;  %v12357_v28 = vor.u32 %v13763_v1, %v12356_v32  ;;  %v12396_v36 = vld [vmem:[%s14999_s4 + $0x1c0] sm:$0xf] }
 0x794   : > { %v12221_v50 = vor.u32 %v13729_v47, %v12220_v7  ;;  %v13757_v19 = vld [vmem:[%s14999_s4 + $0x144] sm:$0xf0]  ;;  %v12397_v62 = vor.u32 %v13773_v42, %v12396_v36  ;;  %v13755_v7 = vld [vmem:[%s14999_s4 + $0x134] sm:$0xf0]  ;;  %v12388_v47 = vld [vmem:[%s14999_s4 + $0x1b0] sm:$0xf]  ;;  %v12181_v36 = vor.u32 %v13719_v57, %v12180_v52 }
 0x795   : > { %v12333_v1 = vor.u32 %v13757_v19, %v12332_v29  ;;  %v12604_v52 = vld [vmem:[%s14999_s4 + $0x360] sm:$0xf]  ;;  %v13825_v57 = vld [vmem:[%s14999_s4 + $0x364] sm:$0xf0] }
 0x796   : > { %7588 = vmatpush.bf16.msrb.mxu0 %v11333_v13  ;;  %7602 = vmatpush.bf16.msrb.mxu1 %v11845_v49  ;;  %v13777_v13 = vld [vmem:[%s14999_s4 + $0x1e4] sm:$0xf0]  ;;  %v17801_v49 = vpop.f32.mrf.mxu2 }
 0x797   : > { %7616 = vmatpush.bf16.msrb.mxu2 %v11337_v9  ;;  %7630 = vmatpush.bf16.msrb.mxu3 %v11849_v24  ;;  %v12285_v9 = vor.u32 %v13745_v35, %v12284_v37  ;;  %v12212_v24 = vld [vmem:[%s14999_s4 + $0x50] sm:$0xf]  ;;  %v12413_v26 = vor.u32 %v13777_v13, %v12412_v55  ;;  %v12188_v35 = vld [vmem:[%s14999_s4 + $0x20] sm:$0xf] }
 0x798   : > { %v12213_v46 = vor.u32 %v13727_v27, %v12212_v24  ;;  %v12252_v13 = vld [vmem:[%s14999_s4 + $0xa0] sm:$0xf]  ;;  %v13753_v24 = vld [vmem:[%s14999_s4 + $0x124] sm:$0xf0] }
 0x799   : > { %v12380_v27 = vld [vmem:[%s14999_s4 + $0x1a0] sm:$0xf] }
 0x79a   : > { %7589 = vmatpush.bf16.msrb.mxu0 %v11269_v2  ;;  %7603 = vmatpush.bf16.msrb.mxu1 %v11781_v15  ;;  %v12404_v2 = vld [vmem:[%s14999_s4 + $0x1d0] sm:$0xf]  ;;  %v13775_v15 = vld [vmem:[%s14999_s4 + $0x1d4] sm:$0xf0] }
 0x79b   : > { %7617 = vmatpush.bf16.msrb.mxu2 %v11273_v48  ;;  %7631 = vmatpush.bf16.msrb.mxu3 %v11785_v31  ;;  %v13725_v48 = vld [vmem:[%s14999_s4 + $0x44] sm:$0xf0]  ;;  %v17819_v31 = vpop.f32.mrf.mxu0  ;;  %v12405_v4 = vor.u32 %v13775_v15, %v12404_v2  ;;  %v12308_v15 = vld [vmem:[%s14999_s4 + $0x110] sm:$0xf] }
 0x79c   : > { %v12205_v3 = vor.u32 %v13725_v48, %v12204_v18  ;;  %v13767_v18 = vld [vmem:[%s14999_s4 + $0x194] sm:$0xf0] }
 0x79e   : > { %7590 = vmatpush.bf16.msrb.mxu0 %v11205_v21  ;;  %7604 = vmatpush.bf16.msrb.mxu1 %v11717_v39  ;;  %v12196_v21 = vld [vmem:[%s14999_s4 + $0x30] sm:$0xf]  ;;  %v13723_v39 = vld [vmem:[%s14999_s4 + $0x34] sm:$0xf0] }
 0x79f   : > { %7618 = vmatpush.bf16.msrb.mxu2 %v11209_v56  ;;  %7632 = vmatpush.bf16.msrb.mxu3 %v11721_v10  ;;  %v13739_v56 = vld [vmem:[%s14999_s4 + $0xb4] sm:$0xf0]  ;;  %v12324_v10 = vld [vmem:[%s14999_s4 + $0x130] sm:$0xf] }
 0x7a0   : > { %v12261_v37 = vor.u32 %v13739_v56, %v12260_v23  ;;  %v12325_v25 = vor.u32 %v13755_v7, %v12324_v10  ;;  %v12300_v23 = vld [vmem:[%s14999_s4 + $0x100] sm:$0xf]  ;;  %v13749_v56 = vld [vmem:[%s14999_s4 + $0x104] sm:$0xf0]  ;;  %v7273_v7 = vadd.f32 %v17821_v30, %v17819_v31  ;;  %v7299_v31 = vadd.f32 %v17803_v8, %v17801_v49 }
 0x7a1   : > { %7591 = vmatmul.bf16.vlgmr.msrb.gmra.mxu0 %v17352_v12  ;;  %7605 = vmatmul.bf16.vlgmr.msrb.gmra.mxu1 %v17356_v58  ;;  %v12364_v10 = vld [vmem:[%s14999_s4 + $0x180] sm:$0xf] }
 0x7a2   : > { %9223 = vmatpush.bf16.msra.mxu0 %v12229_v60  ;;  %9237 = vmatpush.bf16.msra.mxu1 %v12293_v20  ;;  %v17834_v60 = vpop.f32.mrf.mxu2  ;;  %v17836_v20 = vpop.f32.mrf.mxu3 }
 0x7a3   : > { %9251 = vmatpush.bf16.msra.mxu2 %v12357_v28  ;;  %9265 = vmatpush.bf16.msra.mxu3 %v12421_v33  ;;  %v13771_v28 = vld [vmem:[%s14999_s4 + $0x1b4] sm:$0xf0]  ;;  %v12197_v33 = vor.u32 %v13723_v39, %v12196_v21  ;;  %v13733_v21 = vld [vmem:[%s14999_s4 + $0x84] sm:$0xf0]  ;;  %v7271_v39 = vadd.f32 %v17791_v14, %v17789_v38  ;;  %v12548_v38 = vld [vmem:[%s14999_s4 + $0x2f0] sm:$0xf] }
 0x7a4   : > { %7619 = vmatmul.bf16.vlgmr.msrb.gmra.mxu2 %v17352_v12  ;;  %7633 = vmatmul.bf16.vlgmr.msrb.gmra.mxu3 %v17356_v58  ;;  %v12341_v12 = vor.u32 %v13759_v43, %v12340_v54  ;;  %v12268_v58 = vld [vmem:[%s14999_s4 + $0xc0] sm:$0xf]  ;;  %v12389_v55 = vor.u32 %v13771_v28, %v12388_v47  ;;  %v17863_v54 = vadd.f32 %v17772_v17, %v17770_v6  ;;  %v17865_v43 = vpop.f32.mrf.mxu0  ;;  %v12244_v6 = vld [vmem:[%s14999_s4 + $0x90] sm:$0xf]  ;;  %v13735_v17 = vld [vmem:[%s14999_s4 + $0x94] sm:$0xf0] }
 0x7a5   : > { %v12269_v32 = vor.u32 %v13741_v16, %v12268_v58  ;;  %v12172_v16 = vld [vmem:[%s14999_s4] sm:$0xf]  ;;  %v12245_v42 = vor.u32 %v13735_v17, %v12244_v6  ;;  %v7301_v47 = vadd.f32 %v17836_v20, %v17834_v60  ;;  %v13765_v28 = vld [vmem:[%s14999_s4 + $0x184] sm:$0xf0]  ;;  %v13811_v14 = vld [vmem:[%s14999_s4 + $0x2f4] sm:$0xf0]  ;;  %v12301_v20 = vor.u32 %v13749_v56, %v12300_v23 }
 0x7a6   : > { %9224 = vmatpush.bf16.msra.mxu0 %v12221_v50  ;;  %9238 = vmatpush.bf16.msra.mxu1 %v12285_v9  ;;  %v13737_v50 = vld [vmem:[%s14999_s4 + $0xa4] sm:$0xf0]  ;;  %v12316_v9 = vld [vmem:[%s14999_s4 + $0x120] sm:$0xf]  ;;  %v7656_v58 = vmax.f32 %v17863_v54, 0.0 }
 0x7a7   : > { %9252 = vmatpush.bf16.msra.mxu2 %v12349_v51  ;;  %9266 = vmatpush.bf16.msra.mxu3 %v12413_v26  ;;  %v13769_v51 = vld [vmem:[%s14999_s4 + $0x1a4] sm:$0xf0]  ;;  %v17851_v26 = vadd.f32 %v17729_v53, %v17727_v44  ;;  %v17867_v44 = vpop.f32.mrf.mxu1  ;;  %v12189_v53 = vor.u32 %v13721_v61, %v12188_v35  ;;  %v12253_v59 = vor.u32 %v13737_v50, %v12252_v13  ;;  %v12612_v35 = vld [vmem:[%s14999_s4 + $0x370] sm:$0xf]  ;;  %v13843_v50 = vld [vmem:[%s14999_s4 + $0x3f4] sm:$0xf0] }
 0x7a8   : > { %v12317_v5 = vor.u32 %v13753_v24, %v12316_v9  ;;  %v12381_v2 = vor.u32 %v13769_v51, %v12380_v27  ;;  %v12676_v13 = vld [vmem:[%s14999_s4 + $0x3f0] sm:$0xf]  ;;  %v7641_v9 = vmax.f32 %v7271_v39, 0.0  ;;  %v12365_v24 = vor.u32 %v13765_v28, %v12364_v10  ;;  %v13793_v54 = vld [vmem:[%s14999_s4 + $0x264] sm:$0xf0] }
 0x7a9   : > { %v7639_v48 = vmax.f32 %v17851_v26, 0.0  ;;  %v7657_v27 = vmax.f32 %v7273_v7, 0.0  ;;  %v7658_v51 = vmax.f32 %v7301_v47, 0.0  ;;  %v12677_v8 = vor.u32 %v13843_v50, %v12676_v13  ;;  %v13823_v39 = vld [vmem:[%s14999_s4 + $0x354] sm:$0xf0] }
 0x7aa   : > { %9225 = vmatpush.bf16.msra.mxu0 %v12213_v46  ;;  %9239 = vmatpush.bf16.msra.mxu1 %v12277_v45  ;;  %v13751_v46 = vld [vmem:[%s14999_s4 + $0x114] sm:$0xf0]  ;;  %v12372_v45 = vld [vmem:[%s14999_s4 + $0x190] sm:$0xf]  ;;  %v17882_v29 = vpop.f32.mrf.mxu2  ;;  %v17884_v19 = vpop.f32.mrf.mxu3  ;;  %v12460_v47 = vld [vmem:[%s14999_s4 + $0x240] sm:$0xf] }
 0x7ab   : > { %9253 = vmatpush.bf16.msra.mxu2 %v12341_v12  ;;  %9267 = vmatpush.bf16.msra.mxu3 %v12405_v4  ;;  %v7640_v12 = vmax.f32 %v17855_v0, 0.0  ;;  %v7655_v4 = vmax.f32 %v17859_v41, 0.0  ;;  %v12549_v0 = vor.u32 %v13811_v14, %v12548_v38  ;;  %v12476_v41 = vld [vmem:[%s14999_s4 + $0x260] sm:$0xf]  ;;  %v13789_v28 = vld [vmem:[%s14999_s4 + $0x244] sm:$0xf0] }
 0x7ac   : > { %v17909_v30 = vpop.f32.mrf.mxu0  ;;  %v12524_v38 = vld [vmem:[%s14999_s4 + $0x2c0] sm:$0xf]  ;;  %v13805_v14 = vld [vmem:[%s14999_s4 + $0x2c4] sm:$0xf0] }
 0x7ad   : > { %v17921_v6 = vpack.c.bf16 %v7655_v4, %v7639_v48  ;;  %v17923_v17 = vpack.c.bf16 %v7656_v58, %v7640_v12  ;;  %v12477_v48 = vor.u32 %v13793_v54, %v12476_v41  ;;  %v12468_v4 = vld [vmem:[%s14999_s4 + $0x250] sm:$0xf]  ;;  %v13791_v58 = vld [vmem:[%s14999_s4 + $0x254] sm:$0xf0] }
 0x7ae   : > { %9226 = vmatpush.bf16.msra.mxu0 %v12205_v3  ;;  %9240 = vmatpush.bf16.msra.mxu1 %v12269_v32  ;;  %v13717_v3 = vld [vmem:[%s14999_s4 + $0x4] sm:$0xf0]  ;;  %v12236_v32 = vld [vmem:[%s14999_s4 + $0x80] sm:$0xf]  ;;  %v12469_v10 = vor.u32 %v13791_v58, %v12468_v4  ;;  %v12580_v41 = vld [vmem:[%s14999_s4 + $0x330] sm:$0xf] }
 0x7af   : > { %9254 = vmatpush.bf16.msra.mxu2 %v12333_v1  ;;  %9268 = vmatpush.bf16.msra.mxu3 %v12397_v62  ;;  %v12309_v1 = vor.u32 %v13751_v46, %v12308_v15  ;;  %v12373_v62 = vor.u32 %v13767_v18, %v12372_v45  ;;  %v12173_v61 = vor.u32 %v13717_v3, %v12172_v16  ;;  %v17911_v60 = vpop.f32.mrf.mxu1  ;;  %v7642_v15 = vmax.f32 %v7299_v31, 0.0  ;;  %v12532_v3 = vld [vmem:[%s14999_s4 + $0x2d0] sm:$0xf]  ;;  %v13819_v54 = vld [vmem:[%s14999_s4 + $0x334] sm:$0xf0] }
 0x7b0   : > { %v17925_v46 = vpack.c.bf16 %v7657_v27, %v7641_v9  ;;  %v12461_v9 = vor.u32 %v13789_v28, %v12460_v47  ;;  %v12525_v31 = vor.u32 %v13805_v14, %v12524_v38  ;;  %v13801_v4 = vld [vmem:[%s14999_s4 + $0x2a4] sm:$0xf0]  ;;  %v12572_v58 = vld [vmem:[%s14999_s4 + $0x320] sm:$0xf]  ;;  %v13815_v47 = vld [vmem:[%s14999_s4 + $0x314] sm:$0xf0] }
 0x7b1   : > { %v17933_v16 = vpack.c.bf16 %v7658_v51, %v7642_v15  ;;  %v12581_v15 = vor.u32 %v13819_v54, %v12580_v41  ;;  %v12628_v28 = vld [vmem:[%s14999_s4 + $0x390] sm:$0xf]  ;;  %v12556_v41 = vld [vmem:[%s14999_s4 + $0x300] sm:$0xf]  ;;  %v13813_v54 = vld [vmem:[%s14999_s4 + $0x304] sm:$0xf0] }
 0x7b2   : > { %9227 = vmatpush.bf16.msra.mxu0 %v12197_v33  ;;  %9241 = vmatpush.bf16.msra.mxu1 %v12261_v37  ;;  %v12484_v33 = vld [vmem:[%s14999_s4 + $0x270] sm:$0xf]  ;;  %v13795_v37 = vld [vmem:[%s14999_s4 + $0x274] sm:$0xf0]  ;;  %v17927_v45 = vpop.f32.mrf.mxu2  ;;  %v17929_v18 = vpop.f32.mrf.mxu3 }
 0x7b3   : > { %9255 = vmatpush.bf16.msra.mxu2 %v12325_v25  ;;  %9269 = vmatpush.bf16.msra.mxu3 %v12389_v55  ;;  %v12237_v25 = vor.u32 %v13733_v21, %v12236_v32  ;;  %v13827_v55 = vld [vmem:[%s14999_s4 + $0x374] sm:$0xf0]  ;;  %v12485_v26 = vor.u32 %v13795_v37, %v12484_v33  ;;  %v12596_v21 = vld [vmem:[%s14999_s4 + $0x350] sm:$0xf] }
 0x7b4   : > { %v12613_v49 = vor.u32 %v13827_v55, %v12612_v35  ;;  %v13807_v32 = vld [vmem:[%s14999_s4 + $0x2d4] sm:$0xf0]  ;;  %v17943_v23 = vpop.f32.mrf.mxu0  ;;  %v12597_v33 = vor.u32 %v13823_v39, %v12596_v21  ;;  %v12588_v35 = vld [vmem:[%s14999_s4 + $0x340] sm:$0xf]  ;;  %v13837_v55 = vld [vmem:[%s14999_s4 + $0x3c4] sm:$0xf0]  ;;  %v17983_v21 = vadd.f32 %v17884_v19, %v17882_v29  ;;  %v17987_v39 = vadd.f32 %v17911_v60, %v17909_v30 }
 0x7b5   : > { %v12533_v7 = vor.u32 %v13807_v32, %v12532_v3  ;;  %v13833_v3 = vld [vmem:[%s14999_s4 + $0x3a4] sm:$0xf0]  ;;  %v17979_v32 = vadd.f32 %v17867_v44, %v17865_v43  ;;  %v12500_v30 = vld [vmem:[%s14999_s4 + $0x290] sm:$0xf]  ;;  %v13799_v60 = vld [vmem:[%s14999_s4 + $0x294] sm:$0xf0] }
 0x7b6   : > { %9228 = vmatpush.bf16.msra.mxu0 %v12189_v53  ;;  %9242 = vmatpush.bf16.msra.mxu1 %v12253_v59  ;;  %v12540_v53 = vld [vmem:[%s14999_s4 + $0x2e0] sm:$0xf]  ;;  %v13809_v59 = vld [vmem:[%s14999_s4 + $0x2e4] sm:$0xf0]  ;;  %v7644_v38 = vmax.f32 %v17983_v21, 0.0  ;;  %v7659_v14 = vmax.f32 %v17987_v39, 0.0 }
 0x7b7   : > { %9256 = vmatpush.bf16.msra.mxu2 %v12317_v5  ;;  %9270 = vmatpush.bf16.msra.mxu3 %v12381_v2  ;;  %v12668_v5 = vld [vmem:[%s14999_s4 + $0x3e0] sm:$0xf]  ;;  %v13841_v2 = vld [vmem:[%s14999_s4 + $0x3e4] sm:$0xf0]  ;;  %v12541_v12 = vor.u32 %v13809_v59, %v12540_v53  ;;  %v17945_v56 = vpop.f32.mrf.mxu1 }
 0x7ba   : > { %9229 = vmatpush.bf16.msra.mxu0 %v12181_v36  ;;  %9243 = vmatpush.bf16.msra.mxu1 %v12245_v42  ;;  %v12605_v36 = vor.u32 %v13825_v57, %v12604_v52  ;;  %v12669_v42 = vor.u32 %v13841_v2, %v12668_v5  ;;  %v17957_v13 = vpop.f32.mrf.mxu2  ;;  %v17959_v50 = vpop.f32.mrf.mxu3  ;;  %v12444_v52 = vld [vmem:[%s14999_s4 + $0x220] sm:$0xf]  ;;  %v13785_v57 = vld [vmem:[%s14999_s4 + $0x224] sm:$0xf0] }
 0x7bb   : > { %9257 = vmatpush.bf16.msra.mxu2 %v12309_v1  ;;  %9271 = vmatpush.bf16.msra.mxu3 %v12373_v62  ;;  %v12660_v1 = vld [vmem:[%s14999_s4 + $0x3d0] sm:$0xf]  ;;  %v13839_v62 = vld [vmem:[%s14999_s4 + $0x3d4] sm:$0xf0]  ;;  %v12445_v43 = vor.u32 %v13785_v57, %v12444_v52 }
 0x7bc   : > { %v12661_v37 = vor.u32 %v13839_v62, %v12660_v1  ;;  %v7370_v5 = vpop.f32.mrf.mxu0  ;;  %v17991_v1 = vadd.f32 %v17929_v18, %v17927_v45  ;;  %v12436_v62 = vld [vmem:[%s14999_s4 + $0x210] sm:$0xf]  ;;  %v13875_v57 = vld [vmem:[%s14999_s4 + $0x4f4] sm:$0xf0] }
 0x7bd   : > { %v12804_v52 = vld [vmem:[%s14999_s4 + $0x4f0] sm:$0xf] }
 0x7be   : > { %9230 = vmatpush.bf16.msra.mxu0 %v12173_v61  ;;  %9244 = vmatpush.bf16.msra.mxu1 %v12237_v25  ;;  %v13821_v61 = vld [vmem:[%s14999_s4 + $0x344] sm:$0xf0]  ;;  %v12652_v25 = vld [vmem:[%s14999_s4 + $0x3c0] sm:$0xf] }
 0x7bf   : > { %9258 = vmatpush.bf16.msra.mxu2 %v12301_v20  ;;  %9272 = vmatpush.bf16.msra.mxu3 %v12365_v24  ;;  %v12452_v20 = vld [vmem:[%s14999_s4 + $0x230] sm:$0xf]  ;;  %v13787_v24 = vld [vmem:[%s14999_s4 + $0x234] sm:$0xf0]  ;;  %v12589_v27 = vor.u32 %v13821_v61, %v12588_v35  ;;  %v12653_v51 = vor.u32 %v13837_v55, %v12652_v25  ;;  %v7384_v2 = vpop.f32.mrf.mxu1  ;;  %v7660_v35 = vmax.f32 %v17991_v1, 0.0  ;;  %v12501_v55 = vor.u32 %v13799_v60, %v12500_v30 }
 0x7c0   : > { %v12453_v53 = vor.u32 %v13787_v24, %v12452_v20  ;;  %v12428_v61 = vld [vmem:[%s14999_s4 + $0x200] sm:$0xf]  ;;  %v13797_v20 = vld [vmem:[%s14999_s4 + $0x284] sm:$0xf0]  ;;  %v7383_v24 = vadd.f32 %v17945_v56, %v17943_v23  ;;  %v12740_v23 = vld [vmem:[%s14999_s4 + $0x470] sm:$0xf] }
 0x7c1   : > { %9231 = vmatmul.bf16.vlgmr.msra.gmra.mxu0 %v17921_v6  ;;  %9245 = vmatmul.bf16.vlgmr.msra.gmra.mxu1 %v17923_v17  ;;  %v13859_v56 = vld [vmem:[%s14999_s4 + $0x474] sm:$0xf0]  ;;  %v12860_v30 = vld [vmem:[%s14999_s4 + $0x560] sm:$0xf]  ;;  %v13889_v60 = vld [vmem:[%s14999_s4 + $0x564] sm:$0xf0] }
 0x7c2   : > { %9279 = vmatpush.bf16.msrb.mxu0 %v12485_v26  ;;  %9293 = vmatpush.bf16.msrb.mxu1 %v12549_v0  ;;  %v12516_v26 = vld [vmem:[%s14999_s4 + $0x2b0] sm:$0xf]  ;;  %v13803_v0 = vld [vmem:[%s14999_s4 + $0x2b4] sm:$0xf0]  ;;  %v7398_v45 = vpop.f32.mrf.mxu2  ;;  %v7412_v18 = vpop.f32.mrf.mxu3 }
 0x7c3   : > { %9307 = vmatpush.bf16.msrb.mxu2 %v12613_v49  ;;  %9321 = vmatpush.bf16.msrb.mxu3 %v12677_v8  ;;  %v12644_v49 = vld [vmem:[%s14999_s4 + $0x3b0] sm:$0xf]  ;;  %v13835_v8 = vld [vmem:[%s14999_s4 + $0x3b4] sm:$0xf0]  ;;  %v12517_v59 = vor.u32 %v13803_v0, %v12516_v26 }
 0x7c4   : > { %9259 = vmatmul.bf16.vlgmr.msra.gmra.mxu2 %v17925_v46  ;;  %9273 = vmatmul.bf16.vlgmr.msra.gmra.mxu3 %v17933_v16 }
 0x7c6   : > { %9280 = vmatpush.bf16.msrb.mxu0 %v12477_v48  ;;  %9294 = vmatpush.bf16.msrb.mxu1 %v12541_v12  ;;  %v12645_v48 = vor.u32 %v13835_v8, %v12644_v49  ;;  %v12508_v12 = vld [vmem:[%s14999_s4 + $0x2a0] sm:$0xf]  ;;  %v7385_v8 = vadd.f32 %v7384_v2, %v7370_v5  ;;  %v7411_v5 = vadd.f32 %v17959_v50, %v17957_v13 }
 0x7c7   : > { %9308 = vmatpush.bf16.msrb.mxu2 %v12605_v36  ;;  %9322 = vmatpush.bf16.msrb.mxu3 %v12669_v42  ;;  %v13817_v36 = vld [vmem:[%s14999_s4 + $0x324] sm:$0xf0]  ;;  %v12636_v42 = vld [vmem:[%s14999_s4 + $0x3a0] sm:$0xf]  ;;  %v12509_v44 = vor.u32 %v13801_v4, %v12508_v12  ;;  %v13891_v4 = vld [vmem:[%s14999_s4 + $0x574] sm:$0xf0]  ;;  %v12557_v2 = vor.u32 %v13813_v54, %v12556_v41 }
 0x7c8   : > { %v12573_v29 = vor.u32 %v13817_v36, %v12572_v58  ;;  %v12637_v19 = vor.u32 %v13833_v3, %v12636_v42  ;;  %v12620_v49 = vld [vmem:[%s14999_s4 + $0x380] sm:$0xf]  ;;  %v12932_v58 = vld [vmem:[%s14999_s4 + $0x5f0] sm:$0xf]  ;;  %v13907_v36 = vld [vmem:[%s14999_s4 + $0x5f4] sm:$0xf0] }
 0x7c9   : > { %v7645_v42 = vmax.f32 %v7383_v24, 0.0  ;;  %v12933_v50 = vor.u32 %v13907_v36, %v12932_v58  ;;  %v13871_v24 = vld [vmem:[%s14999_s4 + $0x4d4] sm:$0xf0]  ;;  %v12916_v41 = vld [vmem:[%s14999_s4 + $0x5d0] sm:$0xf] }
 0x7ca   : > { %9281 = vmatpush.bf16.msrb.mxu0 %v12469_v10  ;;  %9295 = vmatpush.bf16.msrb.mxu1 %v12533_v7  ;;  %v13783_v10 = vld [vmem:[%s14999_s4 + $0x214] sm:$0xf0]  ;;  %v12564_v7 = vld [vmem:[%s14999_s4 + $0x310] sm:$0xf]  ;;  %v18029_v39 = vpop.f32.mrf.mxu2  ;;  %v18031_v1 = vpop.f32.mrf.mxu3  ;;  %v12908_v58 = vld [vmem:[%s14999_s4 + $0x5c0] sm:$0xf] }
 0x7cb   : > { %9309 = vmatpush.bf16.msrb.mxu2 %v12597_v33  ;;  %9323 = vmatpush.bf16.msrb.mxu3 %v12661_v37  ;;  %v13831_v33 = vld [vmem:[%s14999_s4 + $0x394] sm:$0xf0]  ;;  %v7643_v37 = vmax.f32 %v17979_v32, 0.0  ;;  %v12437_v25 = vor.u32 %v13783_v10, %v12436_v62  ;;  %v12565_v26 = vor.u32 %v13815_v47, %v12564_v7  ;;  %v7661_v32 = vmax.f32 %v7385_v8, 0.0  ;;  %v12732_v62 = vld [vmem:[%s14999_s4 + $0x460] sm:$0xf] }
 0x7cc   : > { %v12629_v0 = vor.u32 %v13831_v33, %v12628_v28  ;;  %v13857_v10 = vld [vmem:[%s14999_s4 + $0x464] sm:$0xf0]  ;;  %v12924_v7 = vld [vmem:[%s14999_s4 + $0x5e0] sm:$0xf]  ;;  %v18043_v47 = vpack.c.bf16 %v7660_v35, %v7644_v38  ;;  %v7646_v28 = vmax.f32 %v7411_v5, 0.0 }
 0x7cd   : > { %v18045_v33 = vpack.c.bf16 %v7661_v32, %v7645_v42  ;;  %v13903_v54 = vld [vmem:[%s14999_s4 + $0x5d4] sm:$0xf0]  ;;  %v13901_v36 = vld [vmem:[%s14999_s4 + $0x5c4] sm:$0xf0] }
 0x7ce   : > { %9282 = vmatpush.bf16.msrb.mxu0 %v12461_v9  ;;  %9296 = vmatpush.bf16.msrb.mxu1 %v12525_v31  ;;  %v13781_v9 = vld [vmem:[%s14999_s4 + $0x204] sm:$0xf0]  ;;  %v12492_v31 = vld [vmem:[%s14999_s4 + $0x280] sm:$0xf] }
 0x7cf   : > { %9310 = vmatpush.bf16.msrb.mxu2 %v12589_v27  ;;  %9324 = vmatpush.bf16.msrb.mxu3 %v12653_v51  ;;  %v18011_v27 = vpop.f32.mrf.mxu0  ;;  %v18013_v51 = vpop.f32.mrf.mxu1  ;;  %v12493_v12 = vor.u32 %v13797_v20, %v12492_v31  ;;  %v12788_v20 = vld [vmem:[%s14999_s4 + $0x4d0] sm:$0xf] }
 0x7d0   : > { %v12789_v8 = vor.u32 %v13871_v24, %v12788_v20  ;;  %v13881_v20 = vld [vmem:[%s14999_s4 + $0x524] sm:$0xf0]  ;;  %v12892_v24 = vld [vmem:[%s14999_s4 + $0x5a0] sm:$0xf] }
 0x7d2   : > { %9283 = vmatpush.bf16.msrb.mxu0 %v12453_v53  ;;  %9297 = vmatpush.bf16.msrb.mxu1 %v12517_v59  ;;  %v7413_v53 = vadd.f32 %v7412_v18, %v7398_v45  ;;  %v13829_v59 = vld [vmem:[%s14999_s4 + $0x384] sm:$0xf0]  ;;  %v18041_v18 = vpack.c.bf16 %v7659_v14, %v7643_v37  ;;  %v13855_v37 = vld [vmem:[%s14999_s4 + $0x454] sm:$0xf0] }
 0x7d3   : > { %9311 = vmatpush.bf16.msrb.mxu2 %v12581_v15  ;;  %9325 = vmatpush.bf16.msrb.mxu3 %v12645_v48  ;;  %v12868_v15 = vld [vmem:[%s14999_s4 + $0x570] sm:$0xf]  ;;  %v12429_v48 = vor.u32 %v13781_v9, %v12428_v61  ;;  %v12621_v3 = vor.u32 %v13829_v59, %v12620_v49  ;;  %v13905_v45 = vld [vmem:[%s14999_s4 + $0x5e4] sm:$0xf0]  ;;  %v12733_v61 = vor.u32 %v13857_v10, %v12732_v62  ;;  %v13867_v10 = vld [vmem:[%s14999_s4 + $0x4b4] sm:$0xf0] }
 0x7d4   : > { %v7662_v21 = vmax.f32 %v7413_v53, 0.0  ;;  %v12869_v13 = vor.u32 %v13891_v4, %v12868_v15  ;;  %v12861_v9 = vor.u32 %v13889_v60, %v12860_v30  ;;  %v12925_v31 = vor.u32 %v13905_v45, %v12924_v7  ;;  %v12716_v53 = vld [vmem:[%s14999_s4 + $0x440] sm:$0xf]  ;;  %v13853_v59 = vld [vmem:[%s14999_s4 + $0x444] sm:$0xf0] }
 0x7d5   : > { %v12844_v15 = vld [vmem:[%s14999_s4 + $0x540] sm:$0xf]  ;;  %v13885_v4 = vld [vmem:[%s14999_s4 + $0x544] sm:$0xf0]  ;;  %v12717_v42 = vor.u32 %v13853_v59, %v12716_v53  ;;  %v12772_v62 = vld [vmem:[%s14999_s4 + $0x4b0] sm:$0xf] }
 0x7d6   : > { %9284 = vmatpush.bf16.msrb.mxu0 %v12445_v43  ;;  %9298 = vmatpush.bf16.msrb.mxu1 %v12509_v44  ;;  %v12741_v43 = vor.u32 %v13859_v56, %v12740_v23  ;;  %v12805_v44 = vor.u32 %v13875_v57, %v12804_v52  ;;  %v18049_v14 = vpack.c.bf16 %v7662_v21, %v7646_v28  ;;  %v12780_v52 = vld [vmem:[%s14999_s4 + $0x4c0] sm:$0xf]  ;;  %v13869_v57 = vld [vmem:[%s14999_s4 + $0x4c4] sm:$0xf0]  ;;  %v12756_v59 = vld [vmem:[%s14999_s4 + $0x490] sm:$0xf] }
 0x7d7   : > { %9312 = vmatpush.bf16.msrb.mxu2 %v12573_v29  ;;  %9326 = vmatpush.bf16.msrb.mxu3 %v12637_v19  ;;  %v12796_v29 = vld [vmem:[%s14999_s4 + $0x4e0] sm:$0xf]  ;;  %v13873_v19 = vld [vmem:[%s14999_s4 + $0x4e4] sm:$0xf0]  ;;  %v18051_v38 = vpop.f32.mrf.mxu0  ;;  %v18053_v35 = vpop.f32.mrf.mxu1  ;;  %v12917_v56 = vor.u32 %v13903_v54, %v12916_v41  ;;  %v12781_v5 = vor.u32 %v13869_v57, %v12780_v52  ;;  %v12773_v60 = vor.u32 %v13867_v10, %v12772_v62  ;;  %v12692_v54 = vld [vmem:[%s14999_s4 + $0x410] sm:$0xf] }
 0x7d8   : > { %v12700_v7 = vld [vmem:[%s14999_s4 + $0x420] sm:$0xf]  ;;  %v13849_v45 = vld [vmem:[%s14999_s4 + $0x424] sm:$0xf0]  ;;  %v13879_v52 = vld [vmem:[%s14999_s4 + $0x514] sm:$0xf0] }
 0x7d9   : > { %v12884_v57 = vld [vmem:[%s14999_s4 + $0x590] sm:$0xf] }
 0x7da   : > { %9285 = vmatpush.bf16.msrb.mxu0 %v12437_v25  ;;  %9299 = vmatpush.bf16.msrb.mxu1 %v12501_v55  ;;  %v12797_v25 = vor.u32 %v13873_v19, %v12796_v29  ;;  %v12724_v55 = vld [vmem:[%s14999_s4 + $0x450] sm:$0xf]  ;;  %v13899_v19 = vld [vmem:[%s14999_s4 + $0x5b4] sm:$0xf0] }
 0x7db   : > { %9313 = vmatpush.bf16.msrb.mxu2 %v12565_v26  ;;  %9327 = vmatpush.bf16.msrb.mxu3 %v12629_v0  ;;  %v12852_v26 = vld [vmem:[%s14999_s4 + $0x550] sm:$0xf]  ;;  %v13887_v0 = vld [vmem:[%s14999_s4 + $0x554] sm:$0xf0]  ;;  %v12725_v49 = vor.u32 %v13855_v37, %v12724_v55  ;;  %v13865_v55 = vld [vmem:[%s14999_s4 + $0x4a4] sm:$0xf0] }
 0x7dc   : > { %v12853_v23 = vor.u32 %v13887_v0, %v12852_v26  ;;  %v12900_v29 = vld [vmem:[%s14999_s4 + $0x5b0] sm:$0xf]  ;;  %v12828_v37 = vld [vmem:[%s14999_s4 + $0x520] sm:$0xf]  ;;  %v13897_v26 = vld [vmem:[%s14999_s4 + $0x5a4] sm:$0xf0]  ;;  %v12701_v0 = vor.u32 %v13849_v45, %v12700_v7  ;;  %v7467_v7 = vadd.f32 %v18031_v1, %v18029_v39 }
 0x7dd   : > { %v12893_v53 = vor.u32 %v13897_v26, %v12892_v24  ;;  %v13124_v24 = vld [vmem:[%s14999_s4 + $0x770] sm:$0xf]  ;;  %v13955_v26 = vld [vmem:[%s14999_s4 + $0x774] sm:$0xf0] }
 0x7de   : > { %9286 = vmatpush.bf16.msrb.mxu0 %v12429_v48  ;;  %9300 = vmatpush.bf16.msrb.mxu1 %v12493_v12  ;;  %v18070_v48 = vpop.f32.mrf.mxu2  ;;  %v18072_v12 = vpop.f32.mrf.mxu3 }
 0x7df   : > { %9314 = vmatpush.bf16.msrb.mxu2 %v12557_v2  ;;  %9328 = vmatpush.bf16.msrb.mxu3 %v12621_v3  ;;  %v12708_v2 = vld [vmem:[%s14999_s4 + $0x430] sm:$0xf]  ;;  %v13851_v3 = vld [vmem:[%s14999_s4 + $0x434] sm:$0xf0]  ;;  %v18079_v32 = vpop.f32.mrf.mxu0  ;;  %v18081_v21 = vpop.f32.mrf.mxu1 }
 0x7e0   : > { %v12709_v30 = vor.u32 %v13851_v3, %v12708_v2  ;;  %v12684_v2 = vld [vmem:[%s14999_s4 + $0x400] sm:$0xf]  ;;  %v13845_v3 = vld [vmem:[%s14999_s4 + $0x404] sm:$0xf0] }
 0x7e1   : > { %9287 = vmatmul.bf16.vlgmr.msrb.gmra.mxu0 %v18041_v18  ;;  %9301 = vmatmul.bf16.vlgmr.msrb.gmra.mxu1 %v18043_v47 }
 0x7e2   : > { %9335 = vmatpush.bf16.msra.mxu0 %v12741_v43  ;;  %9349 = vmatpush.bf16.msra.mxu1 %v12805_v44  ;;  %v12845_v43 = vor.u32 %v13885_v4, %v12844_v15  ;;  %v12909_v44 = vor.u32 %v13901_v36, %v12908_v58  ;;  %v13895_v15 = vld [vmem:[%s14999_s4 + $0x594] sm:$0xf0]  ;;  %v7441_v36 = vadd.f32 %v18053_v35, %v18051_v38  ;;  %v13861_v38 = vld [vmem:[%s14999_s4 + $0x484] sm:$0xf0]  ;;  %v12812_v35 = vld [vmem:[%s14999_s4 + $0x500] sm:$0xf] }
 0x7e3   : > { %9363 = vmatpush.bf16.msra.mxu2 %v12869_v13  ;;  %9377 = vmatpush.bf16.msra.mxu3 %v12933_v50  ;;  %v12836_v13 = vld [vmem:[%s14999_s4 + $0x530] sm:$0xf]  ;;  %v13883_v50 = vld [vmem:[%s14999_s4 + $0x534] sm:$0xf0]  ;;  %v12885_v10 = vor.u32 %v13895_v15, %v12884_v57  ;;  %v13937_v57 = vld [vmem:[%s14999_s4 + $0x6e4] sm:$0xf0] }
 0x7e4   : > { %9315 = vmatmul.bf16.vlgmr.msrb.gmra.mxu2 %v18045_v33  ;;  %9329 = vmatmul.bf16.vlgmr.msrb.gmra.mxu3 %v18049_v14  ;;  %v12837_v28 = vor.u32 %v13883_v50, %v12836_v13  ;;  %v13877_v13 = vld [vmem:[%s14999_s4 + $0x504] sm:$0xf0]  ;;  %v7439_v50 = vadd.f32 %v18013_v51, %v18011_v27  ;;  %v7495_v27 = vadd.f32 %v18081_v21, %v18079_v32 }
 0x7e5   : > { %v12685_v51 = vor.u32 %v13845_v3, %v12684_v2 }
 0x7e6   : > { %9336 = vmatpush.bf16.msra.mxu0 %v12733_v61  ;;  %9350 = vmatpush.bf16.msra.mxu1 %v12797_v25  ;;  %v12901_v61 = vor.u32 %v13899_v19, %v12900_v29  ;;  %v12764_v25 = vld [vmem:[%s14999_s4 + $0x4a0] sm:$0xf]  ;;  %v7647_v32 = vmax.f32 %v7439_v50, 0.0  ;;  %v7649_v15 = vmax.f32 %v7495_v27, 0.0  ;;  %v13044_v50 = vld [vmem:[%s14999_s4 + $0x6d0] sm:$0xf] }
 0x7e7   : > { %9364 = vmatpush.bf16.msra.mxu2 %v12861_v9  ;;  %9378 = vmatpush.bf16.msra.mxu3 %v12925_v31  ;;  %v7508_v9 = vpop.f32.mrf.mxu2  ;;  %v7522_v31 = vpop.f32.mrf.mxu3  ;;  %v12765_v41 = vor.u32 %v13865_v55, %v12764_v25  ;;  %v13060_v25 = vld [vmem:[%s14999_s4 + $0x6f0] sm:$0xf]  ;;  %v13939_v55 = vld [vmem:[%s14999_s4 + $0x6f4] sm:$0xf0]  ;;  %v13100_v27 = vld [vmem:[%s14999_s4 + $0x740] sm:$0xf] }
 0x7e8   : > { %v7482_v4 = vpop.f32.mrf.mxu0  ;;  %v7496_v58 = vpop.f32.mrf.mxu1  ;;  %v7523_v45 = vadd.f32 %v7522_v31, %v7508_v9  ;;  %v12813_v9 = vor.u32 %v13877_v13, %v12812_v35  ;;  %v12980_v35 = vld [vmem:[%s14999_s4 + $0x650] sm:$0xf]  ;;  %v13919_v13 = vld [vmem:[%s14999_s4 + $0x654] sm:$0xf0] }
 0x7e9   : > { %v7497_v29 = vadd.f32 %v7496_v58, %v7482_v4  ;;  %v13116_v4 = vld [vmem:[%s14999_s4 + $0x760] sm:$0xf]  ;;  %v13953_v58 = vld [vmem:[%s14999_s4 + $0x764] sm:$0xf0] }
 0x7ea   : > { %9337 = vmatpush.bf16.msra.mxu0 %v12725_v49  ;;  %9351 = vmatpush.bf16.msra.mxu1 %v12789_v8  ;;  %v13847_v49 = vld [vmem:[%s14999_s4 + $0x414] sm:$0xf0]  ;;  %v12829_v8 = vor.u32 %v13881_v20, %v12828_v37  ;;  %v7663_v37 = vmax.f32 %v7441_v36, 0.0 }
 0x7eb   : > { %9365 = vmatpush.bf16.msra.mxu2 %v12853_v23  ;;  %9379 = vmatpush.bf16.msra.mxu3 %v12917_v56  ;;  %v13863_v23 = vld [vmem:[%s14999_s4 + $0x494] sm:$0xf0]  ;;  %v12820_v56 = vld [vmem:[%s14999_s4 + $0x510] sm:$0xf]  ;;  %v7665_v21 = vmax.f32 %v7497_v29, 0.0 }
 0x7ec   : > { %v12821_v62 = vor.u32 %v13879_v52, %v12820_v56  ;;  %v13125_v56 = vor.u32 %v13955_v26, %v13124_v24  ;;  %v13052_v52 = vld [vmem:[%s14999_s4 + $0x6e0] sm:$0xf]  ;;  %v18137_v36 = vpack.c.bf16 %v7663_v37, %v7647_v32  ;;  %v13935_v29 = vld [vmem:[%s14999_s4 + $0x6d4] sm:$0xf0]  ;;  %v13933_v37 = vld [vmem:[%s14999_s4 + $0x6c4] sm:$0xf0] }
 0x7ed   : > { %v18143_v2 = vpack.c.bf16 %v7665_v21, %v7649_v15  ;;  %v13915_v32 = vld [vmem:[%s14999_s4 + $0x634] sm:$0xf0]  ;;  %v13028_v21 = vld [vmem:[%s14999_s4 + $0x6b0] sm:$0xf]  ;;  %v12956_v15 = vld [vmem:[%s14999_s4 + $0x620] sm:$0xf] }
 0x7ee   : > { %9338 = vmatpush.bf16.msra.mxu0 %v12717_v42  ;;  %9352 = vmatpush.bf16.msra.mxu1 %v12781_v5  ;;  %v12693_v42 = vor.u32 %v13847_v49, %v12692_v54  ;;  %v12757_v5 = vor.u32 %v13863_v23, %v12756_v59  ;;  %v13061_v49 = vor.u32 %v13939_v55, %v13060_v25  ;;  %v7648_v59 = vmax.f32 %v7467_v7, 0.0  ;;  %v13967_v7 = vld [vmem:[%s14999_s4 + $0x7d4] sm:$0xf0]  ;;  %v13917_v25 = vld [vmem:[%s14999_s4 + $0x644] sm:$0xf0] }
 0x7ef   : > { %9366 = vmatpush.bf16.msra.mxu2 %v12845_v43  ;;  %9380 = vmatpush.bf16.msra.mxu3 %v12909_v44  ;;  %v12748_v43 = vld [vmem:[%s14999_s4 + $0x480] sm:$0xf]  ;;  %v7469_v44 = vadd.f32 %v18072_v12, %v18070_v48  ;;  %v7510_v19 = vpop.f32.mrf.mxu2  ;;  %v13893_v48 = vld [vmem:[%s14999_s4 + $0x584] sm:$0xf0]  ;;  %v12996_v12 = vld [vmem:[%s14999_s4 + $0x670] sm:$0xf] }
 0x7f0   : > { %v12749_v20 = vor.u32 %v13861_v38, %v12748_v43  ;;  %v7650_v23 = vmax.f32 %v7523_v45, 0.0  ;;  %v13117_v38 = vor.u32 %v13953_v58, %v13116_v4  ;;  %v13045_v45 = vor.u32 %v13935_v29, %v13044_v50  ;;  %v13036_v55 = vld [vmem:[%s14999_s4 + $0x6c0] sm:$0xf]  ;;  %v13913_v4 = vld [vmem:[%s14999_s4 + $0x624] sm:$0xf0] }
 0x7f1   : > { %v7664_v39 = vmax.f32 %v7469_v44, 0.0  ;;  %v13180_v44 = vld [vmem:[%s14999_s4 + $0x7e0] sm:$0xf]  ;;  %v13961_v50 = vld [vmem:[%s14999_s4 + $0x7a4] sm:$0xf0] }
 0x7f2   : > { %9339 = vmatpush.bf16.msra.mxu0 %v12709_v30  ;;  %9353 = vmatpush.bf16.msra.mxu1 %v12773_v60  ;;  %v7524_v30 = vpop.f32.mrf.mxu3  ;;  %v12876_v60 = vld [vmem:[%s14999_s4 + $0x580] sm:$0xf] }
 0x7f3   : > { %9367 = vmatpush.bf16.msra.mxu2 %v12837_v28  ;;  %9381 = vmatpush.bf16.msra.mxu3 %v12901_v61  ;;  %v7525_v28 = vadd.f32 %v7524_v30, %v7510_v19  ;;  %v13923_v61 = vld [vmem:[%s14999_s4 + $0x674] sm:$0xf0]  ;;  %v12877_v31 = vor.u32 %v13893_v48, %v12876_v60  ;;  %v13108_v19 = vld [vmem:[%s14999_s4 + $0x750] sm:$0xf]  ;;  %v12981_v48 = vor.u32 %v13919_v13, %v12980_v35  ;;  %v13020_v58 = vld [vmem:[%s14999_s4 + $0x6a0] sm:$0xf] }
 0x7f4   : > { %v12997_v54 = vor.u32 %v13923_v61, %v12996_v12  ;;  %v13951_v30 = vld [vmem:[%s14999_s4 + $0x754] sm:$0xf0]  ;;  %v13172_v12 = vld [vmem:[%s14999_s4 + $0x7d0] sm:$0xf]  ;;  %v12972_v61 = vld [vmem:[%s14999_s4 + $0x640] sm:$0xf]  ;;  %v12957_v35 = vor.u32 %v13913_v4, %v12956_v15 }
 0x7f5   : > { %v7666_v1 = vmax.f32 %v7525_v28, 0.0  ;;  %v13109_v28 = vor.u32 %v13951_v30, %v13108_v19  ;;  %v13173_v26 = vor.u32 %v13967_v7, %v13172_v12  ;;  %v13148_v13 = vld [vmem:[%s14999_s4 + $0x7a0] sm:$0xf]  ;;  %v12948_v30 = vld [vmem:[%s14999_s4 + $0x610] sm:$0xf] }
 0x7f6   : > { %9340 = vmatpush.bf16.msra.mxu0 %v12701_v0  ;;  %9354 = vmatpush.bf16.msra.mxu1 %v12765_v41  ;;  %v13188_v0 = vld [vmem:[%s14999_s4 + $0x7f0] sm:$0xf]  ;;  %v13971_v41 = vld [vmem:[%s14999_s4 + $0x7f4] sm:$0xf0] }
 0x7f7   : > { %9368 = vmatpush.bf16.msra.mxu2 %v12829_v8  ;;  %9382 = vmatpush.bf16.msra.mxu3 %v12893_v53  ;;  %v12988_v8 = vld [vmem:[%s14999_s4 + $0x660] sm:$0xf]  ;;  %v13921_v53 = vld [vmem:[%s14999_s4 + $0x664] sm:$0xf0]  ;;  %v13189_v3 = vor.u32 %v13971_v41, %v13188_v0  ;;  %v12964_v41 = vld [vmem:[%s14999_s4 + $0x630] sm:$0xf] }
 0x7f8   : > { %v12989_v43 = vor.u32 %v13921_v53, %v12988_v8  ;;  %v13947_v8 = vld [vmem:[%s14999_s4 + $0x734] sm:$0xf0] }
 0x7fa   : > { %9341 = vmatpush.bf16.msra.mxu0 %v12693_v42  ;;  %9355 = vmatpush.bf16.msra.mxu1 %v12757_v5  ;;  %v18139_v42 = vpack.c.bf16 %v7664_v39, %v7648_v59  ;;  %v18141_v5 = vpack.c.bf16 %v7666_v1, %v7650_v23  ;;  %v12973_v39 = vor.u32 %v13917_v25, %v12972_v61  ;;  %v13164_v1 = vld [vmem:[%s14999_s4 + $0x7c0] sm:$0xf]  ;;  %v13156_v23 = vld [vmem:[%s14999_s4 + $0x7b0] sm:$0xf]  ;;  %v13943_v61 = vld [vmem:[%s14999_s4 + $0x714] sm:$0xf0] }
 0x7fb   : > { %9369 = vmatpush.bf16.msra.mxu2 %v12821_v62  ;;  %9383 = vmatpush.bf16.msra.mxu3 %v12885_v10  ;;  %v13969_v62 = vld [vmem:[%s14999_s4 + $0x7e4] sm:$0xf0]  ;;  %v13053_v10 = vor.u32 %v13937_v57, %v13052_v52  ;;  %v12965_v59 = vor.u32 %v13915_v32, %v12964_v41  ;;  %v13140_v25 = vld [vmem:[%s14999_s4 + $0x790] sm:$0xf]  ;;  %v13068_v41 = vld [vmem:[%s14999_s4 + $0x700] sm:$0xf] }
 0x7fc   : > { %v13181_v60 = vor.u32 %v13969_v62, %v13180_v44  ;;  %v13929_v44 = vld [vmem:[%s14999_s4 + $0x6a4] sm:$0xf0]  ;;  %v13084_v62 = vld [vmem:[%s14999_s4 + $0x720] sm:$0xf] }
 0x7fd   : > { %v13021_v29 = vor.u32 %v13929_v44, %v13020_v58  ;;  %v12358_v58 = vld [vmem:[%s14999_s4 + $0x178] sm:$0xf0] }
 0x7fe   : > { %9342 = vmatpush.bf16.msra.mxu0 %v12685_v51  ;;  %9356 = vmatpush.bf16.msra.mxu1 %v12749_v20  ;;  %v13949_v51 = vld [vmem:[%s14999_s4 + $0x744] sm:$0xf0]  ;;  %v18165_v20 = vpop.f32.mrf.mxu0  ;;  %v18167_v24 = vpop.f32.mrf.mxu1 }
 0x7ff   : > { %9370 = vmatpush.bf16.msra.mxu2 %v12813_v9  ;;  %9384 = vmatpush.bf16.msra.mxu3 %v12877_v31  ;;  %v13965_v9 = vld [vmem:[%s14999_s4 + $0x7c4] sm:$0xf0]  ;;  %v13037_v31 = vor.u32 %v13933_v37, %v13036_v55  ;;  %v13101_v0 = vor.u32 %v13949_v51, %v13100_v27  ;;  %v13149_v55 = vor.u32 %v13961_v50, %v13148_v13  ;;  %v13959_v27 = vld [vmem:[%s14999_s4 + $0x794] sm:$0xf0]  ;;  %v12940_v51 = vld [vmem:[%s14999_s4 + $0x600] sm:$0xf] }
 0x800   : > { %v13165_v53 = vor.u32 %v13965_v9, %v13164_v1  ;;  %v13141_v15 = vor.u32 %v13959_v27, %v13140_v25 }
 0x801   : > { %9343 = vmatmul.bf16.vlgmr.msra.gmra.mxu0 %v18137_v36  ;;  %9357 = vmatmul.bf16.vlgmr.msra.gmra.mxu1 %v18139_v42 }
 0x802   : > { %9391 = vmatpush.bf16.msrb.mxu0 %v12997_v54  ;;  %9405 = vmatpush.bf16.msrb.mxu1 %v13061_v49  ;;  %v13931_v54 = vld [vmem:[%s14999_s4 + $0x6b4] sm:$0xf0]  ;;  %v13092_v49 = vld [vmem:[%s14999_s4 + $0x730] sm:$0xf] }
 0x803   : > { %9419 = vmatpush.bf16.msrb.mxu2 %v13125_v56  ;;  %9385 = vmatmul.bf16.vlgmr.msra.gmra.mxu3 %v18141_v5  ;;  %v13963_v56 = vld [vmem:[%s14999_s4 + $0x7b4] sm:$0xf0]  ;;  %v13029_v52 = vor.u32 %v13931_v54, %v13028_v21  ;;  %v13093_v57 = vor.u32 %v13947_v8, %v13092_v49  ;;  %v13941_v49 = vld [vmem:[%s14999_s4 + $0x704] sm:$0xf0]  ;;  %v13730_v8 = vld [vmem:[%s14999_s4 + $0x74] sm:$0xf] }
 0x804   : > { %9371 = vmatmul.bf16.vlgmr.msra.gmra.mxu2 %v18143_v2  ;;  %9433 = vmatpush.bf16.msrb.mxu3 %v13189_v3 }
 0x806   : > { %9392 = vmatpush.bf16.msrb.mxu0 %v12989_v43  ;;  %9406 = vmatpush.bf16.msrb.mxu1 %v13053_v10  ;;  %v13945_v10 = vld [vmem:[%s14999_s4 + $0x724] sm:$0xf0]  ;;  %v7538_v12 = vpop.f32.mrf.mxu0  ;;  %v7552_v7 = vpop.f32.mrf.mxu1 }
 0x807   : > { %9420 = vmatpush.bf16.msrb.mxu2 %v13117_v38  ;;  %v7564_v3 = vpop.f32.mrf.mxu2  ;;  %v7578_v43 = vpop.f32.mrf.mxu3  ;;  %v13157_v38 = vor.u32 %v13963_v56, %v13156_v23  ;;  %v13085_v19 = vor.u32 %v13945_v10, %v13084_v62  ;;  %v13746_v56 = vld [vmem:[%s14999_s4 + $0xf4] sm:$0xf]  ;;  %v13069_v62 = vor.u32 %v13941_v49, %v13068_v41 }
 0x808   : > { %9434 = vmatpush.bf16.msrb.mxu3 %v13181_v60  ;;  %v13911_v60 = vld [vmem:[%s14999_s4 + $0x614] sm:$0xf0]  ;;  %v7579_v32 = vadd.f32 %v7578_v43, %v7564_v3  ;;  %v13132_v3 = vld [vmem:[%s14999_s4 + $0x780] sm:$0xf]  ;;  %v13957_v43 = vld [vmem:[%s14999_s4 + $0x784] sm:$0xf0] }
 0x809   : > { %v12949_v37 = vor.u32 %v13911_v60, %v12948_v30  ;;  %v13778_v10 = vld [vmem:[%s14999_s4 + $0x1f4] sm:$0xf] }
 0x80a   : > { %9393 = vmatpush.bf16.msrb.mxu0 %v12981_v48  ;;  %9407 = vmatpush.bf16.msrb.mxu1 %v13045_v45  ;;  %v13012_v48 = vld [vmem:[%s14999_s4 + $0x690] sm:$0xf]  ;;  %v13927_v45 = vld [vmem:[%s14999_s4 + $0x694] sm:$0xf0]  ;;  %v13758_v41 = vld [vmem:[%s14999_s4 + $0x154] sm:$0xf] }
 0x80b   : > { %9421 = vmatpush.bf16.msrb.mxu2 %v13109_v28  ;;  %v13076_v28 = vld [vmem:[%s14999_s4 + $0x710] sm:$0xf]  ;;  %v13013_v1 = vor.u32 %v13927_v45, %v13012_v48  ;;  %v13744_v48 = vld [vmem:[%s14999_s4 + $0xe4] sm:$0xf]  ;;  %v13133_v45 = vor.u32 %v13957_v43, %v13132_v3 }
 0x80c   : > { %9435 = vmatpush.bf16.msrb.mxu3 %v13173_v26  ;;  %v13909_v26 = vld [vmem:[%s14999_s4 + $0x604] sm:$0xf0]  ;;  %v13077_v9 = vor.u32 %v13943_v61, %v13076_v28  ;;  %v13760_v28 = vld [vmem:[%s14999_s4 + $0x164] sm:$0xf]  ;;  %v12350_v61 = vld [vmem:[%s14999_s4 + $0x168] sm:$0xf0] }
 0x80d   : > { %v12941_v4 = vor.u32 %v13909_v26, %v12940_v51  ;;  %v13776_v51 = vld [vmem:[%s14999_s4 + $0x1e4] sm:$0xf]  ;;  %v12414_v26 = vld [vmem:[%s14999_s4 + $0x1e8] sm:$0xf0] }
 0x80e   : > { %9394 = vmatpush.bf16.msrb.mxu0 %v12973_v39  ;;  %9408 = vmatpush.bf16.msrb.mxu1 %v13037_v31  ;;  %v7553_v39 = vadd.f32 %v7552_v7, %v7538_v12  ;;  %v13004_v31 = vld [vmem:[%s14999_s4 + $0x680] sm:$0xf]  ;;  %v12286_v12 = vld [vmem:[%s14999_s4 + $0xe8] sm:$0xf0] }
 0x80f   : > { %9422 = vmatpush.bf16.msrb.mxu2 %v13101_v0  ;;  %v13925_v0 = vld [vmem:[%s14999_s4 + $0x684] sm:$0xf0]  ;;  %v7566_v21 = vpop.f32.mrf.mxu2  ;;  %v7580_v54 = vpop.f32.mrf.mxu3  ;;  %v12289_v27 = vor.u32 %v13744_v48, %v12286_v12  ;;  %v13770_v12 = vld [vmem:[%s14999_s4 + $0x1b4] sm:$0xf] }
 0x810   : > { %9436 = vmatpush.bf16.msrb.mxu3 %v13165_v53  ;;  %v12230_v53 = vld [vmem:[%s14999_s4 + $0x78] sm:$0xf0]  ;;  %v7581_v23 = vadd.f32 %v7580_v54, %v7566_v21  ;;  %v7667_v44 = vmax.f32 %v7553_v39, 0.0  ;;  %v13726_v39 = vld [vmem:[%s14999_s4 + $0x54] sm:$0xf]  ;;  %v12417_v21 = vor.u32 %v13776_v51, %v12414_v26 }
 0x811   : > { %v12233_v13 = vor.u32 %v13730_v8, %v12230_v53  ;;  %v13774_v8 = vld [vmem:[%s14999_s4 + $0x1d4] sm:$0xf]  ;;  %v12406_v53 = vld [vmem:[%s14999_s4 + $0x1d8] sm:$0xf0] }
 0x812   : > { %9395 = vmatpush.bf16.msrb.mxu0 %v12965_v59  ;;  %9409 = vmatpush.bf16.msrb.mxu1 %v13029_v52  ;;  %v7551_v59 = vadd.f32 %v18167_v24, %v18165_v20  ;;  %v12294_v52 = vld [vmem:[%s14999_s4 + $0xf8] sm:$0xf0]  ;;  %v7668_v20 = vmax.f32 %v7581_v23, 0.0  ;;  %v13005_v24 = vor.u32 %v13925_v0, %v13004_v31  ;;  %v13742_v31 = vld [vmem:[%s14999_s4 + $0xd4] sm:$0xf]  ;;  %v12409_v43 = vor.u32 %v13774_v8, %v12406_v53 }
 0x813   : > { %9423 = vmatpush.bf16.msrb.mxu2 %v13093_v57  ;;  %v13762_v57 = vld [vmem:[%s14999_s4 + $0x174] sm:$0xf]  ;;  %v12297_v50 = vor.u32 %v13746_v56, %v12294_v52  ;;  %v12278_v0 = vld [vmem:[%s14999_s4 + $0xd8] sm:$0xf0]  ;;  %v12206_v56 = vld [vmem:[%s14999_s4 + $0x48] sm:$0xf0] }
 0x814   : > { %9437 = vmatpush.bf16.msrb.mxu3 %v13157_v38  ;;  %v12422_v38 = vld [vmem:[%s14999_s4 + $0x1f8] sm:$0xf0]  ;;  %v7651_v30 = vmax.f32 %v7551_v59, 0.0  ;;  %v12361_v60 = vor.u32 %v13762_v57, %v12358_v58  ;;  %v12281_v49 = vor.u32 %v13742_v31, %v12278_v0  ;;  %v13724_v59 = vld [vmem:[%s14999_s4 + $0x44] sm:$0xf] }
 0x815   : > { %v13740_v52 = vld [vmem:[%s14999_s4 + $0xc4] sm:$0xf]  ;;  %v12270_v57 = vld [vmem:[%s14999_s4 + $0xc8] sm:$0xf0]  ;;  %v13718_v53 = vld [vmem:[%s14999_s4 + $0x14] sm:$0xf] }
 0x816   : > { %9396 = vmatpush.bf16.msrb.mxu0 %v12957_v35  ;;  %9410 = vmatpush.bf16.msrb.mxu1 %v13021_v29  ;;  %v7652_v35 = vmax.f32 %v7579_v32, 0.0  ;;  %v13728_v29 = vld [vmem:[%s14999_s4 + $0x64] sm:$0xf]  ;;  %v18221_v25 = vpack.c.bf16 %v7667_v44, %v7651_v30  ;;  %v12342_v32 = vld [vmem:[%s14999_s4 + $0x158] sm:$0xf0]  ;;  %v12209_v44 = vor.u32 %v13724_v59, %v12206_v56 }
 0x817   : > { %9424 = vmatpush.bf16.msrb.mxu2 %v13085_v19  ;;  %v12222_v19 = vld [vmem:[%s14999_s4 + $0x68] sm:$0xf0]  ;;  %v12345_v23 = vor.u32 %v13758_v41, %v12342_v32  ;;  %v13734_v56 = vld [vmem:[%s14999_s4 + $0x94] sm:$0xf] }
 0x818   : > { %9438 = vmatpush.bf16.msrb.mxu3 %v13149_v55  ;;  %v18217_v7 = vpack.c.bf16 %v7668_v20, %v7652_v35  ;;  %v12425_v55 = vor.u32 %v13778_v10, %v12422_v38  ;;  %v12273_v20 = vor.u32 %v13740_v52, %v12270_v57  ;;  %v13722_v10 = vld [vmem:[%s14999_s4 + $0x34] sm:$0xf]  ;;  %v12198_v35 = vld [vmem:[%s14999_s4 + $0x38] sm:$0xf0]  ;;  %v12382_v8 = vld [vmem:[%s14999_s4 + $0x1a8] sm:$0xf0] }
 0x819   : > { %v12246_v52 = vld [vmem:[%s14999_s4 + $0x98] sm:$0xf0] }
 0x81a   : > { %9397 = vmatpush.bf16.msrb.mxu0 %v12949_v37  ;;  %9411 = vmatpush.bf16.msrb.mxu1 %v13013_v1  ;;  %v12225_v37 = vor.u32 %v13728_v29, %v12222_v19  ;;  %v12353_v1 = vor.u32 %v13760_v28, %v12350_v61  ;;  %v13754_v29 = vld [vmem:[%s14999_s4 + $0x134] sm:$0xf]  ;;  %v12326_v19 = vld [vmem:[%s14999_s4 + $0x138] sm:$0xf0]  ;;  %v13720_v28 = vld [vmem:[%s14999_s4 + $0x24] sm:$0xf] }
 0x81b   : > { %9425 = vmatpush.bf16.msrb.mxu2 %v13077_v9  ;;  %v12214_v9 = vld [vmem:[%s14999_s4 + $0x58] sm:$0xf0]  ;;  %v12329_v61 = vor.u32 %v13754_v29, %v12326_v19  ;;  %v13748_v29 = vld [vmem:[%s14999_s4 + $0x104] sm:$0xf]  ;;  %v12302_v19 = vld [vmem:[%s14999_s4 + $0x108] sm:$0xf0] }
 0x81c   : > { %9439 = vmatpush.bf16.msrb.mxu3 %v13141_v15  ;;  %v12217_v54 = vor.u32 %v13726_v39, %v12214_v9  ;;  %v13756_v15 = vld [vmem:[%s14999_s4 + $0x144] sm:$0xf]  ;;  %v12318_v9 = vld [vmem:[%s14999_s4 + $0x128] sm:$0xf0] }
 0x81e   : > { %9398 = vmatpush.bf16.msrb.mxu0 %v12941_v4  ;;  %9412 = vmatpush.bf16.msrb.mxu1 %v13005_v24  ;;  %v12334_v4 = vld [vmem:[%s14999_s4 + $0x148] sm:$0xf0]  ;;  %v7592_v58 = vpop.f32.mrf.mxu0  ;;  %v7606_v3 = vpop.f32.mrf.mxu1  ;;  %v13772_v24 = vld [vmem:[%s14999_s4 + $0x1c4] sm:$0xf] }
 0x81f   : > { %9426 = vmatpush.bf16.msrb.mxu2 %v13069_v62  ;;  %v12398_v62 = vld [vmem:[%s14999_s4 + $0x1c8] sm:$0xf0]  ;;  %v12337_v38 = vor.u32 %v13756_v15, %v12334_v4  ;;  %v7607_v51 = vadd.f32 %v7606_v3, %v7592_v58  ;;  %v13750_v4 = vld [vmem:[%s14999_s4 + $0x114] sm:$0xf]  ;;  %v12310_v58 = vld [vmem:[%s14999_s4 + $0x118] sm:$0xf0] }
 0x820   : > { %9440 = vmatpush.bf16.msrb.mxu3 %v13133_v45  ;;  %v12401_v30 = vor.u32 %v13772_v24, %v12398_v62  ;;  %v12390_v45 = vld [vmem:[%s14999_s4 + $0x1b8] sm:$0xf0]  ;;  %v12249_v62 = vor.u32 %v13734_v56, %v12246_v52  ;;  %v12542_v56 = vld [vmem:[%s14999_s4 + $0x2e8] sm:$0xf0] }
 0x821   : > { %9399 = vmatmul.bf16.vlgmr.msrb.gmra.mxu0 %v18221_v25  ;;  %9413 = vmatmul.bf16.vlgmr.msrb.gmra.mxu1 %v18217_v7  ;;  %v12393_v41 = vor.u32 %v13770_v12, %v12390_v45  ;;  %v7653_v57 = vmax.f32 %v7607_v51, 0.0  ;;  %v12486_v12 = vld [vmem:[%s14999_s4 + $0x278] sm:$0xf0]  ;;  %v13810_v45 = vld [vmem:[%s14999_s4 + $0x2f4] sm:$0xf] }
 0x822   : > { %9447 = vmatpush.bf16.msra.mxu0 %v12233_v13  ;;  %9461 = vmatpush.bf16.msra.mxu1 %v12297_v50  ;;  %v13738_v13 = vld [vmem:[%s14999_s4 + $0xb4] sm:$0xf]  ;;  %v12262_v50 = vld [vmem:[%s14999_s4 + $0xb8] sm:$0xf0] }
 0x823   : > { %9475 = vmatpush.bf16.msra.mxu2 %v12361_v60  ;;  %v12201_v60 = vor.u32 %v13722_v10, %v12198_v35  ;;  %v12265_v48 = vor.u32 %v13738_v13, %v12262_v50  ;;  %v13716_v10 = vld [vmem:[%s14999_s4 + $0x4] sm:$0xf]  ;;  %v12313_v13 = vor.u32 %v13750_v4, %v12310_v58  ;;  %v12238_v50 = vld [vmem:[%s14999_s4 + $0x88] sm:$0xf0]  ;;  %v12614_v51 = vld [vmem:[%s14999_s4 + $0x378] sm:$0xf0] }
 0x824   : > { %9489 = vmatpush.bf16.msra.mxu3 %v12425_v55  ;;  %v12190_v55 = vld [vmem:[%s14999_s4 + $0x28] sm:$0xf0]  ;;  %v13732_v35 = vld [vmem:[%s14999_s4 + $0x84] sm:$0xf] }
 0x826   : > { %9448 = vmatpush.bf16.msra.mxu0 %v12225_v37  ;;  %9462 = vmatpush.bf16.msra.mxu1 %v12289_v27  ;;  %v13736_v37 = vld [vmem:[%s14999_s4 + $0xa4] sm:$0xf]  ;;  %v12254_v27 = vld [vmem:[%s14999_s4 + $0xa8] sm:$0xf0]  ;;  %v7594_v31 = vpop.f32.mrf.mxu0  ;;  %v7608_v0 = vpop.f32.mrf.mxu1 }
 0x827   : > { %9476 = vmatpush.bf16.msra.mxu2 %v12353_v1  ;;  %v7620_v26 = vpop.f32.mrf.mxu2  ;;  %v7634_v39 = vpop.f32.mrf.mxu3  ;;  %v13752_v1 = vld [vmem:[%s14999_s4 + $0x124] sm:$0xf]  ;;  %v7609_v32 = vadd.f32 %v7608_v0, %v7594_v31 }
 0x828   : > { %9490 = vmatpush.bf16.msra.mxu3 %v12417_v21  ;;  %v12193_v21 = vor.u32 %v13720_v28, %v12190_v55  ;;  %v12321_v59 = vor.u32 %v13752_v1, %v12318_v9  ;;  %v7635_v28 = vadd.f32 %v7634_v39, %v7620_v26  ;;  %v12241_v9 = vor.u32 %v13732_v35, %v12238_v50  ;;  %v13764_v31 = vld [vmem:[%s14999_s4 + $0x184] sm:$0xf]  ;;  %v13806_v35 = vld [vmem:[%s14999_s4 + $0x2d4] sm:$0xf] }
 0x829   : > { %v7669_v15 = vmax.f32 %v7609_v32, 0.0  ;;  %v12305_v39 = vor.u32 %v13748_v29, %v12302_v19  ;;  %v13842_v32 = vld [vmem:[%s14999_s4 + $0x3f4] sm:$0xf]  ;;  %v12598_v29 = vld [vmem:[%s14999_s4 + $0x358] sm:$0xf0] }
 0x82a   : > { %9449 = vmatpush.bf16.msra.mxu0 %v12217_v54  ;;  %9463 = vmatpush.bf16.msra.mxu1 %v12281_v49  ;;  %v12257_v54 = vor.u32 %v13736_v37, %v12254_v27  ;;  %v13768_v49 = vld [vmem:[%s14999_s4 + $0x1a4] sm:$0xf]  ;;  %v12550_v37 = vld [vmem:[%s14999_s4 + $0x2f8] sm:$0xf0]  ;;  %v13826_v27 = vld [vmem:[%s14999_s4 + $0x374] sm:$0xf] }
 0x82b   : > { %9477 = vmatpush.bf16.msra.mxu2 %v12345_v23  ;;  %v12182_v23 = vld [vmem:[%s14999_s4 + $0x18] sm:$0xf0]  ;;  %v12385_v3 = vor.u32 %v13768_v49, %v12382_v8  ;;  %v13792_v8 = vld [vmem:[%s14999_s4 + $0x264] sm:$0xf]  ;;  %v13822_v50 = vld [vmem:[%s14999_s4 + $0x354] sm:$0xf] }
 0x82c   : > { %9491 = vmatpush.bf16.msra.mxu3 %v12409_v43  ;;  %v13766_v43 = vld [vmem:[%s14999_s4 + $0x194] sm:$0xf]  ;;  %v12185_v24 = vor.u32 %v13718_v53, %v12182_v23  ;;  %v12678_v49 = vld [vmem:[%s14999_s4 + $0x3f8] sm:$0xf0]  ;;  %v12478_v53 = vld [vmem:[%s14999_s4 + $0x268] sm:$0xf0] }
 0x82d   : > { %v13808_v23 = vld [vmem:[%s14999_s4 + $0x2e4] sm:$0xf]  ;;  %v12481_v58 = vor.u32 %v13792_v8, %v12478_v53  ;;  %v12582_v53 = vld [vmem:[%s14999_s4 + $0x338] sm:$0xf0] }
 0x82e   : > { %9450 = vmatpush.bf16.msra.mxu0 %v12209_v44  ;;  %9464 = vmatpush.bf16.msra.mxu1 %v12273_v20  ;;  %v12374_v44 = vld [vmem:[%s14999_s4 + $0x198] sm:$0xf0]  ;;  %v18267_v20 = vpack.c.bf16 %v7669_v15, %v7653_v57  ;;  %v13824_v57 = vld [vmem:[%s14999_s4 + $0x364] sm:$0xf]  ;;  %v12606_v15 = vld [vmem:[%s14999_s4 + $0x368] sm:$0xf0] }
 0x82f   : > { %9478 = vmatpush.bf16.msra.mxu2 %v12337_v38  ;;  %v12174_v38 = vld [vmem:[%s14999_s4 + $0x8] sm:$0xf0]  ;;  %v12377_v55 = vor.u32 %v13766_v43, %v12374_v44  ;;  %v12545_v43 = vor.u32 %v13808_v23, %v12542_v56  ;;  %v13840_v44 = vld [vmem:[%s14999_s4 + $0x3e4] sm:$0xf] }
 0x830   : > { %9492 = vmatpush.bf16.msra.mxu3 %v12401_v30  ;;  %v7622_v30 = vpop.f32.mrf.mxu2  ;;  %9427 = vmatmul.bf16.vlgmr.msrb.gmra.mxu2 %v18267_v20  ;;  %v12177_v1 = vor.u32 %v13716_v10, %v12174_v38  ;;  %v12609_v10 = vor.u32 %v13824_v57, %v12606_v15  ;;  %v12670_v38 = vld [vmem:[%s14999_s4 + $0x3e8] sm:$0xf0]  ;;  %v13784_v57 = vld [vmem:[%s14999_s4 + $0x224] sm:$0xf] }
 0x831   : > { %v12446_v15 = vld [vmem:[%s14999_s4 + $0x228] sm:$0xf0] }
 0x832   : > { %9451 = vmatpush.bf16.msra.mxu0 %v12201_v60  ;;  %9465 = vmatpush.bf16.msra.mxu1 %v12265_v48  ;;  %v7636_v60 = vpop.f32.mrf.mxu3  ;;  %v13794_v48 = vld [vmem:[%s14999_s4 + $0x274] sm:$0xf] }
 0x833   : > { %9479 = vmatpush.bf16.msra.mxu2 %v12329_v61  ;;  %v7637_v61 = vadd.f32 %v7636_v60, %v7622_v30  ;;  %v12489_v0 = vor.u32 %v13794_v48, %v12486_v12  ;;  %v13838_v30 = vld [vmem:[%s14999_s4 + $0x3d4] sm:$0xf]  ;;  %v13788_v60 = vld [vmem:[%s14999_s4 + $0x244] sm:$0xf]  ;;  %v12462_v48 = vld [vmem:[%s14999_s4 + $0x248] sm:$0xf0]  ;;  %v12601_v12 = vor.u32 %v13822_v50, %v12598_v29 }
 0x834   : > { %9493 = vmatpush.bf16.msra.mxu3 %v12393_v41  ;;  %v12366_v41 = vld [vmem:[%s14999_s4 + $0x188] sm:$0xf0] }
 0x835   : > { %v7670_v26 = vmax.f32 %v7637_v61, 0.0  ;;  %v12369_v52 = vor.u32 %v13764_v31, %v12366_v41  ;;  %v12526_v61 = vld [vmem:[%s14999_s4 + $0x2c8] sm:$0xf0]  ;;  %v12454_v41 = vld [vmem:[%s14999_s4 + $0x238] sm:$0xf0] }
 0x836   : > { %9452 = vmatpush.bf16.msra.mxu0 %v12193_v21  ;;  %9466 = vmatpush.bf16.msra.mxu1 %v12257_v54  ;;  %v12553_v21 = vor.u32 %v13810_v45, %v12550_v37  ;;  %v12617_v54 = vor.u32 %v13826_v27, %v12614_v51  ;;  %v12662_v45 = vld [vmem:[%s14999_s4 + $0x3d8] sm:$0xf0]  ;;  %v12590_v37 = vld [vmem:[%s14999_s4 + $0x348] sm:$0xf0] }
 0x837   : > { %9480 = vmatpush.bf16.msra.mxu2 %v12321_v59  ;;  %v7654_v59 = vmax.f32 %v7635_v28, 0.0  ;;  %v13804_v28 = vld [vmem:[%s14999_s4 + $0x2c4] sm:$0xf]  ;;  %v12665_v31 = vor.u32 %v13838_v30, %v12662_v45  ;;  %v12438_v30 = vld [vmem:[%s14999_s4 + $0x218] sm:$0xf0] }
 0x838   : > { %9494 = vmatpush.bf16.msra.mxu3 %v12385_v3  ;;  %v12681_v3 = vor.u32 %v13842_v32, %v12678_v49  ;;  %v12518_v49 = vld [vmem:[%s14999_s4 + $0x2b8] sm:$0xf0]  ;;  %v12638_v45 = vld [vmem:[%s14999_s4 + $0x3a8] sm:$0xf0] }
 0x839   : > { %v18292_v4 = vpack.c.bf16 %v7670_v26, %v7654_v59  ;;  %v12529_v26 = vor.u32 %v13804_v28, %v12526_v61  ;;  %v13798_v28 = vld [vmem:[%s14999_s4 + $0x294] sm:$0xf]  ;;  %v12502_v61 = vld [vmem:[%s14999_s4 + $0x298] sm:$0xf0] }
 0x83a   : > { %9453 = vmatpush.bf16.msra.mxu0 %v12185_v24  ;;  %9467 = vmatpush.bf16.msra.mxu1 %v12249_v62  ;;  %v13790_v24 = vld [vmem:[%s14999_s4 + $0x254] sm:$0xf]  ;;  %v12470_v62 = vld [vmem:[%s14999_s4 + $0x258] sm:$0xf0] }
 0x83b   : > { %9481 = vmatpush.bf16.msra.mxu2 %v12313_v13  ;;  %v12534_v13 = vld [vmem:[%s14999_s4 + $0x2d8] sm:$0xf0]  ;;  %9441 = vmatmul.bf16.vlgmr.msrb.gmra.mxu3 %v18292_v4 }
 0x83c   : > { %9495 = vmatpush.bf16.msra.mxu3 %v12377_v55  ;;  %v12537_v19 = vor.u32 %v13806_v35, %v12534_v13  ;;  %v13820_v55 = vld [vmem:[%s14999_s4 + $0x344] sm:$0xf]  ;;  %v12449_v13 = vor.u32 %v13784_v57, %v12446_v15 }
 0x83d   : > { %v12593_v32 = vor.u32 %v13820_v55, %v12590_v37  ;;  %v12566_v37 = vld [vmem:[%s14999_s4 + $0x318] sm:$0xf0] }
 0x83e   : > { %9454 = vmatpush.bf16.msra.mxu0 %v12177_v1  ;;  %9468 = vmatpush.bf16.msra.mxu1 %v12241_v9  ;;  %v9232_v27 = vpop.f32.mrf.mxu0  ;;  %v9246_v51 = vpop.f32.mrf.mxu1  ;;  %v12465_v1 = vor.u32 %v13788_v60, %v12462_v48 }
 0x83f   : > { %9482 = vmatpush.bf16.msra.mxu2 %v12305_v39  ;;  %v9233_v9 = vadd.f32 %v9232_v27, %v17335_v63  ;;  %v13836_v39 = vld [vmem:[%s14999_s4 + $0x3c4] sm:$0xf]  ;;  %v13818_v63 = vld [vmem:[%s14999_s4 + $0x334] sm:$0xf] }
 0x840   : > { %9496 = vmatpush.bf16.msra.mxu3 %v12369_v52  ;;  %v13834_v52 = vld [vmem:[%s14999_s4 + $0x3b4] sm:$0xf] }
 0x841   : > { %9455 = vmatmul.bf16.vlgmr.msra.gmra.mxu0 %v17921_v6  ;;  %9469 = vmatmul.bf16.vlgmr.msra.gmra.mxu1 %v17923_v17  ;;  %v12473_v6 = vor.u32 %v13790_v24, %v12470_v62  ;;  %v12673_v17 = vor.u32 %v13840_v44, %v12670_v38  ;;  %v9247_v8 = vadd.f32 %v9246_v51, %v9233_v9  ;;  %v13816_v62 = vld [vmem:[%s14999_s4 + $0x324] sm:$0xf]  ;;  %v13830_v51 = vld [vmem:[%s14999_s4 + $0x394] sm:$0xf] }
 0x842   : > { %9503 = vmatpush.bf16.msrb.mxu0 %v12489_v0  ;;  %9517 = vmatpush.bf16.msrb.mxu1 %v12553_v21  ;;  %v13786_v0 = vld [vmem:[%s14999_s4 + $0x234] sm:$0xf]  ;;  %v12654_v21 = vld [vmem:[%s14999_s4 + $0x3c8] sm:$0xf0] }
 0x843   : > { %9531 = vmatpush.bf16.msrb.mxu2 %v12617_v54  ;;  %v13802_v54 = vld [vmem:[%s14999_s4 + $0x2b4] sm:$0xf]  ;;  %v12457_v59 = vor.u32 %v13786_v0, %v12454_v41  ;;  %v12657_v23 = vor.u32 %v13836_v39, %v12654_v21  ;;  %v12430_v39 = vld [vmem:[%s14999_s4 + $0x208] sm:$0xf0]  ;;  %v13796_v0 = vld [vmem:[%s14999_s4 + $0x284] sm:$0xf] }
 0x844   : > { %9545 = vmatpush.bf16.msrb.mxu3 %v12681_v3  ;;  %9483 = vmatmul.bf16.vlgmr.msra.gmra.mxu2 %v17925_v46  ;;  %v12521_v56 = vor.u32 %v13802_v54, %v12518_v49  ;;  %v12646_v3 = vld [vmem:[%s14999_s4 + $0x3b8] sm:$0xf0]  ;;  %v12510_v46 = vld [vmem:[%s14999_s4 + $0x2a8] sm:$0xf0]  ;;  %v13858_v49 = vld [vmem:[%s14999_s4 + $0x474] sm:$0xf] }
 0x845   : > { %v12649_v29 = vor.u32 %v13834_v52, %v12646_v3  ;;  %v12494_v41 = vld [vmem:[%s14999_s4 + $0x288] sm:$0xf0]  ;;  %v12870_v52 = vld [vmem:[%s14999_s4 + $0x578] sm:$0xf0]  ;;  %v13828_v3 = vld [vmem:[%s14999_s4 + $0x384] sm:$0xf] }
 0x846   : > { %9504 = vmatpush.bf16.msrb.mxu0 %v12481_v58  ;;  %9518 = vmatpush.bf16.msrb.mxu1 %v12545_v43  ;;  %v12585_v58 = vor.u32 %v13818_v63, %v12582_v53  ;;  %v13800_v43 = vld [vmem:[%s14999_s4 + $0x2a4] sm:$0xf]  ;;  %v9234_v35 = vpop.f32.mrf.mxu0  ;;  %v9248_v48 = vpop.f32.mrf.mxu1  ;;  %v12558_v21 = vld [vmem:[%s14999_s4 + $0x308] sm:$0xf0]  ;;  %v13874_v63 = vld [vmem:[%s14999_s4 + $0x4f4] sm:$0xf] }
 0x847   : > { %9532 = vmatpush.bf16.msrb.mxu2 %v12609_v10  ;;  %v9260_v44 = vpop.f32.mrf.mxu2  ;;  %v9274_v24 = vpop.f32.mrf.mxu3  ;;  %v12574_v10 = vld [vmem:[%s14999_s4 + $0x328] sm:$0xf0]  ;;  %v9235_v50 = vadd.f32 %v9234_v35, %v17341_v11  ;;  %v13814_v11 = vld [vmem:[%s14999_s4 + $0x314] sm:$0xf] }
 0x848   : > { %9546 = vmatpush.bf16.msrb.mxu3 %v12673_v17  ;;  %v9261_v38 = vadd.f32 %v9260_v44, %v9247_v8  ;;  %v13832_v17 = vld [vmem:[%s14999_s4 + $0x3a4] sm:$0xf]  ;;  %v12742_v8 = vld [vmem:[%s14999_s4 + $0x478] sm:$0xf0] }
 0x849   : > { %v9249_v55 = vadd.f32 %v9248_v48, %v9235_v50  ;;  %v12641_v9 = vor.u32 %v13832_v17, %v12638_v45  ;;  %v12745_v44 = vor.u32 %v13858_v49, %v12742_v8  ;;  %v12734_v50 = vld [vmem:[%s14999_s4 + $0x468] sm:$0xf0]  ;;  %v13888_v17 = vld [vmem:[%s14999_s4 + $0x564] sm:$0xf] }
 0x84a   : > { %9505 = vmatpush.bf16.msrb.mxu0 %v12473_v6  ;;  %9519 = vmatpush.bf16.msrb.mxu1 %v12537_v19  ;;  %v12513_v6 = vor.u32 %v13800_v43, %v12510_v46  ;;  %v13782_v19 = vld [vmem:[%s14999_s4 + $0x214] sm:$0xf]  ;;  %v18335_v60 = vadd.f32 %v9274_v24, %v9261_v38  ;;  %v12622_v24 = vld [vmem:[%s14999_s4 + $0x388] sm:$0xf0]  ;;  %v13904_v45 = vld [vmem:[%s14999_s4 + $0x5e4] sm:$0xf] }
 0x84b   : > { %9533 = vmatpush.bf16.msrb.mxu2 %v12601_v12  ;;  %v12577_v12 = vor.u32 %v13816_v62, %v12574_v10  ;;  %9497 = vmatmul.bf16.vlgmr.msra.gmra.mxu3 %v17933_v16  ;;  %v12441_v27 = vor.u32 %v13782_v19, %v12438_v30  ;;  %v12569_v16 = vor.u32 %v13814_v11, %v12566_v37  ;;  %v13906_v62 = vld [vmem:[%s14999_s4 + $0x5f4] sm:$0xf]  ;;  %v12934_v10 = vld [vmem:[%s14999_s4 + $0x5f8] sm:$0xf0]  ;;  %v12862_v19 = vld [vmem:[%s14999_s4 + $0x568] sm:$0xf0] }
 0x84c   : > { %9547 = vmatpush.bf16.msrb.mxu3 %v12665_v31  ;;  %v12505_v31 = vor.u32 %v13798_v28, %v12502_v61  ;;  %v12625_v30 = vor.u32 %v13828_v3, %v12622_v24  ;;  %v12937_v48 = vor.u32 %v13906_v62, %v12934_v10  ;;  %v12926_v28 = vld [vmem:[%s14999_s4 + $0x5e8] sm:$0xf0]  ;;  %v13854_v11 = vld [vmem:[%s14999_s4 + $0x454] sm:$0xf]  ;;  %v12726_v37 = vld [vmem:[%s14999_s4 + $0x458] sm:$0xf0] }
 0x84d   : > { %v12774_v3 = vld [vmem:[%s14999_s4 + $0x4b8] sm:$0xf0] }
 0x84e   : > { %9506 = vmatpush.bf16.msrb.mxu0 %v12465_v1  ;;  %9520 = vmatpush.bf16.msrb.mxu1 %v12529_v26  ;;  %v12630_v1 = vld [vmem:[%s14999_s4 + $0x398] sm:$0xf0]  ;;  %v13780_v26 = vld [vmem:[%s14999_s4 + $0x204] sm:$0xf] }
 0x84f   : > { %9534 = vmatpush.bf16.msrb.mxu2 %v12593_v32  ;;  %v13812_v32 = vld [vmem:[%s14999_s4 + $0x304] sm:$0xf]  ;;  %v9262_v54 = vpop.f32.mrf.mxu2  ;;  %v9276_v57 = vpop.f32.mrf.mxu3  ;;  %v12633_v15 = vor.u32 %v13830_v51, %v12630_v1  ;;  %v12790_v51 = vld [vmem:[%s14999_s4 + $0x4d8] sm:$0xf0]  ;;  %v13886_v1 = vld [vmem:[%s14999_s4 + $0x554] sm:$0xf] }
 0x850   : > { %9548 = vmatpush.bf16.msrb.mxu3 %v12657_v23  ;;  %v9263_v53 = vadd.f32 %v9262_v54, %v9249_v55  ;;  %v12806_v23 = vld [vmem:[%s14999_s4 + $0x4f8] sm:$0xf0]  ;;  %v12561_v46 = vor.u32 %v13812_v32, %v12558_v21  ;;  %v12865_v55 = vor.u32 %v13888_v17, %v12862_v19  ;;  %v13868_v32 = vld [vmem:[%s14999_s4 + $0x4c4] sm:$0xf]  ;;  %v12846_v54 = vld [vmem:[%s14999_s4 + $0x548] sm:$0xf0] }
 0x851   : > { %v12809_v38 = vor.u32 %v13874_v63, %v12806_v23  ;;  %v13884_v21 = vld [vmem:[%s14999_s4 + $0x544] sm:$0xf]  ;;  %v12910_v23 = vld [vmem:[%s14999_s4 + $0x5c8] sm:$0xf0] }
 0x852   : > { %9507 = vmatpush.bf16.msrb.mxu0 %v12457_v59  ;;  %9521 = vmatpush.bf16.msrb.mxu1 %v12521_v56  ;;  %v12433_v59 = vor.u32 %v13780_v26, %v12430_v39  ;;  %v13890_v56 = vld [vmem:[%s14999_s4 + $0x574] sm:$0xf]  ;;  %v18358_v43 = vadd.f32 %v9276_v57, %v9263_v53  ;;  %v12729_v26 = vor.u32 %v13854_v11, %v12726_v37  ;;  %v12766_v17 = vld [vmem:[%s14999_s4 + $0x4a8] sm:$0xf0]  ;;  %v13880_v19 = vld [vmem:[%s14999_s4 + $0x524] sm:$0xf] }
 0x853   : > { %9535 = vmatpush.bf16.msrb.mxu2 %v12585_v58  ;;  %v12497_v58 = vor.u32 %v13796_v0, %v12494_v41  ;;  %v12873_v35 = vor.u32 %v13890_v56, %v12870_v52  ;;  %v13902_v39 = vld [vmem:[%s14999_s4 + $0x5d4] sm:$0xf]  ;;  %v12718_v41 = vld [vmem:[%s14999_s4 + $0x448] sm:$0xf0]  ;;  %v12849_v52 = vor.u32 %v13884_v21, %v12846_v54  ;;  %v13896_v11 = vld [vmem:[%s14999_s4 + $0x5a4] sm:$0xf] }
 0x854   : > { %9549 = vmatpush.bf16.msrb.mxu3 %v12649_v29  ;;  %v13872_v29 = vld [vmem:[%s14999_s4 + $0x4e4] sm:$0xf]  ;;  %v13850_v57 = vld [vmem:[%s14999_s4 + $0x434] sm:$0xf]  ;;  %v12894_v37 = vld [vmem:[%s14999_s4 + $0x5a8] sm:$0xf0] }
 0x855   : > { %v12886_v21 = vld [vmem:[%s14999_s4 + $0x598] sm:$0xf0]  ;;  %v13844_v54 = vld [vmem:[%s14999_s4 + $0x404] sm:$0xf] }
 0x856   : > { %9508 = vmatpush.bf16.msrb.mxu0 %v12449_v13  ;;  %9522 = vmatpush.bf16.msrb.mxu1 %v12513_v6  ;;  %v13856_v13 = vld [vmem:[%s14999_s4 + $0x464] sm:$0xf]  ;;  %v12798_v6 = vld [vmem:[%s14999_s4 + $0x4e8] sm:$0xf0] }
 0x857   : > { %9536 = vmatpush.bf16.msrb.mxu2 %v12577_v12  ;;  %v12737_v12 = vor.u32 %v13856_v13, %v12734_v50  ;;  %v12801_v61 = vor.u32 %v13872_v29, %v12798_v6  ;;  %v13848_v50 = vld [vmem:[%s14999_s4 + $0x424] sm:$0xf]  ;;  %v12702_v29 = vld [vmem:[%s14999_s4 + $0x428] sm:$0xf0] }
 0x858   : > { %9550 = vmatpush.bf16.msrb.mxu3 %v12641_v9  ;;  %v12854_v9 = vld [vmem:[%s14999_s4 + $0x558] sm:$0xf0]  ;;  %v13864_v6 = vld [vmem:[%s14999_s4 + $0x4a4] sm:$0xf] }
 0x859   : > { %v12857_v0 = vor.u32 %v13886_v1, %v12854_v9  ;;  %v13846_v9 = vld [vmem:[%s14999_s4 + $0x414] sm:$0xf] }
 0x85a   : > { %9509 = vmatpush.bf16.msrb.mxu0 %v12441_v27  ;;  %9523 = vmatpush.bf16.msrb.mxu1 %v12505_v31  ;;  %v13870_v27 = vld [vmem:[%s14999_s4 + $0x4d4] sm:$0xf]  ;;  %v12929_v31 = vor.u32 %v13904_v45, %v12926_v28 }
 0x85b   : > { %9537 = vmatpush.bf16.msrb.mxu2 %v12569_v16  ;;  %v13852_v16 = vld [vmem:[%s14999_s4 + $0x444] sm:$0xf] }
 0x85c   : > { %9551 = vmatpush.bf16.msrb.mxu3 %v12633_v15  ;;  %v12721_v53 = vor.u32 %v13852_v16, %v12718_v41  ;;  %v12710_v15 = vld [vmem:[%s14999_s4 + $0x438] sm:$0xf0] }
 0x85d   : > { %v12713_v10 = vor.u32 %v13850_v57, %v12710_v15  ;;  %v12822_v16 = vld [vmem:[%s14999_s4 + $0x518] sm:$0xf0]  ;;  %v13938_v15 = vld [vmem:[%s14999_s4 + $0x6f4] sm:$0xf] }
 0x85e   : > { %9510 = vmatpush.bf16.msrb.mxu0 %v12433_v59  ;;  %9524 = vmatpush.bf16.msrb.mxu1 %v12497_v58  ;;  %v9288_v49 = vpop.f32.mrf.mxu0  ;;  %v9302_v8 = vpop.f32.mrf.mxu1  ;;  %v13900_v59 = vld [vmem:[%s14999_s4 + $0x5c4] sm:$0xf]  ;;  %v13866_v58 = vld [vmem:[%s14999_s4 + $0x4b4] sm:$0xf]  ;;  %v12998_v57 = vld [vmem:[%s14999_s4 + $0x678] sm:$0xf0] }
 0x85f   : > { %9538 = vmatpush.bf16.msrb.mxu2 %v12561_v46  ;;  %v13882_v46 = vld [vmem:[%s14999_s4 + $0x534] sm:$0xf]  ;;  %v12913_v62 = vor.u32 %v13900_v59, %v12910_v23  ;;  %v12750_v59 = vld [vmem:[%s14999_s4 + $0x488] sm:$0xf0]  ;;  %v13876_v23 = vld [vmem:[%s14999_s4 + $0x504] sm:$0xf] }
 0x860   : > { %9552 = vmatpush.bf16.msrb.mxu3 %v12625_v30  ;;  %v12830_v30 = vld [vmem:[%s14999_s4 + $0x528] sm:$0xf0] }
 0x861   : > { %9511 = vmatmul.bf16.vlgmr.msrb.gmra.mxu0 %v18041_v18  ;;  %9525 = vmatmul.bf16.vlgmr.msrb.gmra.mxu1 %v18043_v47  ;;  %v12918_v18 = vld [vmem:[%s14999_s4 + $0x5d8] sm:$0xf0]  ;;  %v12793_v47 = vor.u32 %v13870_v27, %v12790_v51  ;;  %v12769_v51 = vor.u32 %v13864_v6, %v12766_v17  ;;  %v12833_v1 = vor.u32 %v13880_v19, %v12830_v30  ;;  %v12878_v6 = vld [vmem:[%s14999_s4 + $0x588] sm:$0xf0]  ;;  %v13970_v17 = vld [vmem:[%s14999_s4 + $0x7f4] sm:$0xf] }
 0x862   : > { %9559 = vmatpush.bf16.msra.mxu0 %v12745_v44  ;;  %9573 = vmatpush.bf16.msra.mxu1 %v12809_v38  ;;  %v12921_v63 = vor.u32 %v13902_v39, %v12918_v18  ;;  %v12838_v44 = vld [vmem:[%s14999_s4 + $0x538] sm:$0xf0] }
 0x863   : > { %9587 = vmatpush.bf16.msra.mxu2 %v12873_v35  ;;  %9553 = vmatmul.bf16.vlgmr.msrb.gmra.mxu3 %v18049_v14  ;;  %v9289_v14 = vadd.f32 %v9288_v49, %v18335_v60  ;;  %v13898_v60 = vld [vmem:[%s14999_s4 + $0x5b4] sm:$0xf]  ;;  %v12902_v38 = vld [vmem:[%s14999_s4 + $0x5b8] sm:$0xf0]  ;;  %v12777_v35 = vor.u32 %v13866_v58, %v12774_v3  ;;  %v12841_v13 = vor.u32 %v13882_v46, %v12838_v44 }
 0x864   : > { %9539 = vmatmul.bf16.vlgmr.msrb.gmra.mxu2 %v18045_v33  ;;  %9601 = vmatpush.bf16.msra.mxu3 %v12937_v48  ;;  %v12782_v33 = vld [vmem:[%s14999_s4 + $0x4c8] sm:$0xf0]  ;;  %v13062_v58 = vld [vmem:[%s14999_s4 + $0x6f8] sm:$0xf0] }
 0x865   : > { %v12785_v56 = vor.u32 %v13868_v32, %v12782_v33  ;;  %v9303_v24 = vadd.f32 %v9302_v8, %v9289_v14  ;;  %v13894_v33 = vld [vmem:[%s14999_s4 + $0x594] sm:$0xf]  ;;  %v12814_v14 = vld [vmem:[%s14999_s4 + $0x508] sm:$0xf0]  ;;  %v13190_v19 = vld [vmem:[%s14999_s4 + $0x7f8] sm:$0xf0] }
 0x866   : > { %9560 = vmatpush.bf16.msra.mxu0 %v12737_v12  ;;  %9574 = vmatpush.bf16.msra.mxu1 %v12801_v61  ;;  %v9290_v28 = vpop.f32.mrf.mxu0  ;;  %v12905_v61 = vor.u32 %v13898_v60, %v12902_v38  ;;  %v9304_v18 = vpop.f32.mrf.mxu1  ;;  %v12889_v46 = vor.u32 %v13894_v33, %v12886_v21  ;;  %v12817_v38 = vor.u32 %v13876_v23, %v12814_v14  ;;  %v13174_v33 = vld [vmem:[%s14999_s4 + $0x7d8] sm:$0xf0]  ;;  %v13916_v21 = vld [vmem:[%s14999_s4 + $0x644] sm:$0xf] }
 0x867   : > { %9588 = vmatpush.bf16.msra.mxu2 %v12865_v55  ;;  %v9316_v48 = vpop.f32.mrf.mxu2  ;;  %v9330_v12 = vpop.f32.mrf.mxu3  ;;  %v12705_v55 = vor.u32 %v13848_v50, %v12702_v29  ;;  %v9291_v27 = vadd.f32 %v9290_v28, %v18358_v43  ;;  %v12897_v43 = vor.u32 %v13896_v11, %v12894_v37  ;;  %v13065_v29 = vor.u32 %v13938_v15, %v13062_v58  ;;  %v13054_v28 = vld [vmem:[%s14999_s4 + $0x6e8] sm:$0xf0] }
 0x868   : > { %9602 = vmatpush.bf16.msra.mxu3 %v12929_v31  ;;  %v9317_v45 = vadd.f32 %v9316_v48, %v9303_v24  ;;  %v12694_v31 = vld [vmem:[%s14999_s4 + $0x418] sm:$0xf0]  ;;  %v13954_v24 = vld [vmem:[%s14999_s4 + $0x774] sm:$0xf]  ;;  %v13920_v48 = vld [vmem:[%s14999_s4 + $0x664] sm:$0xf]  ;;  %v13193_v37 = vor.u32 %v13970_v17, %v13190_v19 }
 0x869   : > { %v9305_v41 = vadd.f32 %v9304_v18, %v9291_v27  ;;  %v12697_v32 = vor.u32 %v13846_v9, %v12694_v31  ;;  %v12982_v18 = vld [vmem:[%s14999_s4 + $0x658] sm:$0xf0]  ;;  %v13166_v15 = vld [vmem:[%s14999_s4 + $0x7c8] sm:$0xf0]  ;;  %v13912_v17 = vld [vmem:[%s14999_s4 + $0x624] sm:$0xf] }
 0x86a   : > { %9561 = vmatpush.bf16.msra.mxu0 %v12729_v26  ;;  %9575 = vmatpush.bf16.msra.mxu1 %v12793_v47  ;;  %v13862_v26 = vld [vmem:[%s14999_s4 + $0x494] sm:$0xf]  ;;  %v18412_v39 = vadd.f32 %v9330_v12, %v9317_v45  ;;  %v12758_v47 = vld [vmem:[%s14999_s4 + $0x498] sm:$0xf0]  ;;  %v12990_v12 = vld [vmem:[%s14999_s4 + $0x668] sm:$0xf0] }
 0x86b   : > { %9589 = vmatpush.bf16.msra.mxu2 %v12857_v0  ;;  %v13878_v0 = vld [vmem:[%s14999_s4 + $0x514] sm:$0xf]  ;;  %v12761_v49 = vor.u32 %v13862_v26, %v12758_v47  ;;  %v13936_v45 = vld [vmem:[%s14999_s4 + $0x6e4] sm:$0xf]  ;;  %v12993_v27 = vor.u32 %v13920_v48, %v12990_v12  ;;  %v12958_v19 = vld [vmem:[%s14999_s4 + $0x628] sm:$0xf0] }
 0x86c   : > { %9603 = vmatpush.bf16.msra.mxu3 %v12921_v63  ;;  %v12825_v8 = vor.u32 %v13878_v0, %v12822_v16  ;;  %v12686_v63 = vld [vmem:[%s14999_s4 + $0x408] sm:$0xf0]  ;;  %v13057_v9 = vor.u32 %v13936_v45, %v13054_v28  ;;  %v13918_v26 = vld [vmem:[%s14999_s4 + $0x654] sm:$0xf]  ;;  %v13046_v0 = vld [vmem:[%s14999_s4 + $0x6d8] sm:$0xf0] }
 0x86d   : > { %v12689_v44 = vor.u32 %v13844_v54, %v12686_v63  ;;  %v13934_v47 = vld [vmem:[%s14999_s4 + $0x6d4] sm:$0xf]  ;;  %v12974_v54 = vld [vmem:[%s14999_s4 + $0x648] sm:$0xf0]  ;;  %v13948_v63 = vld [vmem:[%s14999_s4 + $0x744] sm:$0xf] }
 0x86e   : > { %9562 = vmatpush.bf16.msra.mxu0 %v12721_v53  ;;  %9576 = vmatpush.bf16.msra.mxu1 %v12785_v56  ;;  %v13860_v53 = vld [vmem:[%s14999_s4 + $0x484] sm:$0xf]  ;;  %v13922_v56 = vld [vmem:[%s14999_s4 + $0x674] sm:$0xf]  ;;  %v13022_v12 = vld [vmem:[%s14999_s4 + $0x6a8] sm:$0xf0] }
 0x86f   : > { %9590 = vmatpush.bf16.msra.mxu2 %v12849_v52  ;;  %v9318_v52 = vpop.f32.mrf.mxu2  ;;  %v12753_v60 = vor.u32 %v13860_v53, %v12750_v59  ;;  %v13001_v50 = vor.u32 %v13922_v56, %v12998_v57  ;;  %v13950_v16 = vld [vmem:[%s14999_s4 + $0x754] sm:$0xf]  ;;  %v13102_v53 = vld [vmem:[%s14999_s4 + $0x748] sm:$0xf0]  ;;  %v13964_v57 = vld [vmem:[%s14999_s4 + $0x7c4] sm:$0xf] }
 0x870   : > { %9604 = vmatpush.bf16.msra.mxu3 %v12913_v62  ;;  %v9319_v3 = vadd.f32 %v9318_v52, %v9305_v41  ;;  %v13126_v62 = vld [vmem:[%s14999_s4 + $0x778] sm:$0xf0]  ;;  %v12977_v52 = vor.u32 %v13916_v21, %v12974_v54  ;;  %v13105_v58 = vor.u32 %v13948_v63, %v13102_v53  ;;  %v13944_v45 = vld [vmem:[%s14999_s4 + $0x724] sm:$0xf]  ;;  %v13086_v28 = vld [vmem:[%s14999_s4 + $0x728] sm:$0xf0] }
 0x871   : > { %v13129_v30 = vor.u32 %v13954_v24, %v13126_v62  ;;  %v13110_v41 = vld [vmem:[%s14999_s4 + $0x758] sm:$0xf0]  ;;  %v13946_v62 = vld [vmem:[%s14999_s4 + $0x734] sm:$0xf]  ;;  %v12942_v63 = vld [vmem:[%s14999_s4 + $0x608] sm:$0xf0] }
 0x872   : > { %9563 = vmatpush.bf16.msra.mxu0 %v12713_v10  ;;  %9577 = vmatpush.bf16.msra.mxu1 %v12777_v35  ;;  %v9332_v10 = vpop.f32.mrf.mxu3  ;;  %v13892_v35 = vld [vmem:[%s14999_s4 + $0x584] sm:$0xf]  ;;  %v13142_v21 = vld [vmem:[%s14999_s4 + $0x798] sm:$0xf0] }
 0x873   : > { %9591 = vmatpush.bf16.msra.mxu2 %v12841_v13  ;;  %v18432_v13 = vadd.f32 %v9332_v10, %v9319_v3  ;;  %v12881_v11 = vor.u32 %v13892_v35, %v12878_v6  ;;  %v13914_v3 = vld [vmem:[%s14999_s4 + $0x634] sm:$0xf]  ;;  %v13094_v10 = vld [vmem:[%s14999_s4 + $0x738] sm:$0xf0]  ;;  %v13924_v53 = vld [vmem:[%s14999_s4 + $0x684] sm:$0xf] }
 0x874   : > { %9605 = vmatpush.bf16.msra.mxu3 %v12905_v61  ;;  %v13952_v61 = vld [vmem:[%s14999_s4 + $0x764] sm:$0xf]  ;;  %v13962_v35 = vld [vmem:[%s14999_s4 + $0x7b4] sm:$0xf]  ;;  %v13097_v6 = vor.u32 %v13946_v62, %v13094_v10 }
 0x876   : > { %9564 = vmatpush.bf16.msra.mxu0 %v12705_v55  ;;  %9578 = vmatpush.bf16.msra.mxu1 %v12769_v51  ;;  %v13118_v55 = vld [vmem:[%s14999_s4 + $0x768] sm:$0xf0]  ;;  %v13968_v51 = vld [vmem:[%s14999_s4 + $0x7e4] sm:$0xf] }
 0x877   : > { %9592 = vmatpush.bf16.msra.mxu2 %v12833_v1  ;;  %v13182_v1 = vld [vmem:[%s14999_s4 + $0x7e8] sm:$0xf0]  ;;  %v13121_v31 = vor.u32 %v13952_v61, %v13118_v55 }
 0x878   : > { %9606 = vmatpush.bf16.msra.mxu3 %v12897_v43  ;;  %v12985_v43 = vor.u32 %v13918_v26, %v12982_v18 }
 0x87a   : > { %9565 = vmatpush.bf16.msra.mxu0 %v12697_v32  ;;  %9579 = vmatpush.bf16.msra.mxu1 %v12761_v49  ;;  %v13966_v32 = vld [vmem:[%s14999_s4 + $0x7d4] sm:$0xf]  ;;  %v13932_v49 = vld [vmem:[%s14999_s4 + $0x6c4] sm:$0xf] }
 0x87b   : > { %9593 = vmatpush.bf16.msra.mxu2 %v12825_v8  ;;  %v13038_v8 = vld [vmem:[%s14999_s4 + $0x6c8] sm:$0xf0]  ;;  %v13177_v56 = vor.u32 %v13966_v32, %v13174_v33  ;;  %v13078_v32 = vld [vmem:[%s14999_s4 + $0x718] sm:$0xf0] }
 0x87c   : > { %9607 = vmatpush.bf16.msra.mxu3 %v12889_v46  ;;  %v12966_v46 = vld [vmem:[%s14999_s4 + $0x638] sm:$0xf0] }
 0x87e   : > { %9566 = vmatpush.bf16.msra.mxu0 %v12689_v44  ;;  %9580 = vmatpush.bf16.msra.mxu1 %v12753_v60  ;;  %v9344_v59 = vpop.f32.mrf.mxu0  ;;  %v9358_v14 = vpop.f32.mrf.mxu1  ;;  %v13930_v44 = vld [vmem:[%s14999_s4 + $0x6b4] sm:$0xf]  ;;  %v13169_v60 = vor.u32 %v13964_v57, %v13166_v15 }
 0x87f   : > { %9594 = vmatpush.bf16.msra.mxu2 %v12817_v38  ;;  %v9345_v23 = vadd.f32 %v9344_v59, %v18412_v39  ;;  %v13030_v39 = vld [vmem:[%s14999_s4 + $0x6b8] sm:$0xf0]  ;;  %v12969_v38 = vor.u32 %v13914_v3, %v12966_v46 }
 0x880   : > { %9608 = vmatpush.bf16.msra.mxu3 %v12881_v11 }
 0x881   : > { %9567 = vmatmul.bf16.vlgmr.msra.gmra.mxu0 %v18137_v36  ;;  %9581 = vmatmul.bf16.vlgmr.msra.gmra.mxu1 %v18139_v42  ;;  %v13185_v36 = vor.u32 %v13968_v51, %v13182_v1  ;;  %v13049_v42 = vor.u32 %v13934_v47, %v13046_v0  ;;  %v9359_v24 = vadd.f32 %v9358_v14, %v9345_v23  ;;  %v13960_v1 = vld [vmem:[%s14999_s4 + $0x7a4] sm:$0xf]  ;;  %v13910_v0 = vld [vmem:[%s14999_s4 + $0x614] sm:$0xf]  ;;  %v13006_v23 = vld [vmem:[%s14999_s4 + $0x688] sm:$0xf0] }
 0x882   : > { %9615 = vmatpush.bf16.msrb.mxu0 %v13001_v50  ;;  %9629 = vmatpush.bf16.msrb.mxu1 %v13065_v29  ;;  %v13158_v50 = vld [vmem:[%s14999_s4 + $0x7b8] sm:$0xf0]  ;;  %v13033_v29 = vor.u32 %v13930_v44, %v13030_v39  ;;  %v12961_v51 = vor.u32 %v13912_v17, %v12958_v19  ;;  %v13089_v47 = vor.u32 %v13944_v45, %v13086_v28  ;;  %v13940_v14 = vld [vmem:[%s14999_s4 + $0x704] sm:$0xf] }
 0x883   : > { %9643 = vmatpush.bf16.msrb.mxu2 %v13129_v30  ;;  %9609 = vmatmul.bf16.vlgmr.msra.gmra.mxu3 %v18141_v5  ;;  %v13041_v5 = vor.u32 %v13932_v49, %v13038_v8  ;;  %v13928_v30 = vld [vmem:[%s14999_s4 + $0x6a4] sm:$0xf]  ;;  %v13009_v3 = vor.u32 %v13924_v53, %v13006_v23 }
 0x884   : > { %9595 = vmatmul.bf16.vlgmr.msra.gmra.mxu2 %v18143_v2  ;;  %9657 = vmatpush.bf16.msrb.mxu3 %v13193_v37  ;;  %v13113_v2 = vor.u32 %v13950_v16, %v13110_v41  ;;  %v13025_v18 = vor.u32 %v13928_v30, %v13022_v12  ;;  %v12950_v16 = vld [vmem:[%s14999_s4 + $0x618] sm:$0xf0]  ;;  %v13926_v41 = vld [vmem:[%s14999_s4 + $0x694] sm:$0xf]  ;;  %v13908_v8 = vld [vmem:[%s14999_s4 + $0x604] sm:$0xf] }
 0x885   : > { %v13956_v44 = vld [vmem:[%s14999_s4 + $0x784] sm:$0xf] }
 0x886   : > { %9616 = vmatpush.bf16.msrb.mxu0 %v12993_v27  ;;  %9630 = vmatpush.bf16.msrb.mxu1 %v13057_v9  ;;  %v9386_v55 = vpop.f32.mrf.mxu3  ;;  %v9346_v11 = vpop.f32.mrf.mxu0  ;;  %v13161_v27 = vor.u32 %v13962_v35, %v13158_v50  ;;  %v13150_v9 = vld [vmem:[%s14999_s4 + $0x7a8] sm:$0xf0] }
 0x887   : > { %9644 = vmatpush.bf16.msrb.mxu2 %v13121_v31  ;;  %v9372_v48 = vpop.f32.mrf.mxu2  ;;  %v9347_v37 = vadd.f32 %v9346_v11, %v18432_v13  ;;  %v9360_v26 = vpop.f32.mrf.mxu1  ;;  %v13153_v33 = vor.u32 %v13960_v1, %v13150_v9 }
 0x888   : > { %9658 = vmatpush.bf16.msrb.mxu3 %v13185_v36  ;;  %v9373_v61 = vadd.f32 %v9372_v48, %v9359_v24  ;;  %v13014_v36 = vld [vmem:[%s14999_s4 + $0x698] sm:$0xf0]  ;;  %v13134_v24 = vld [vmem:[%s14999_s4 + $0x788] sm:$0xf0] }
 0x889   : > { %v9361_v13 = vadd.f32 %v9360_v26, %v9347_v37  ;;  %v13017_v54 = vor.u32 %v13926_v41, %v13014_v36  ;;  %v13137_v39 = vor.u32 %v13956_v44, %v13134_v24 }
 0x88a   : > { %9617 = vmatpush.bf16.msrb.mxu0 %v12985_v43  ;;  %9631 = vmatpush.bf16.msrb.mxu1 %v13049_v42  ;;  %v9387_v31 = vadd.f32 %v9386_v55, %v9373_v61  ;;  %v13942_v43 = vld [vmem:[%s14999_s4 + $0x714] sm:$0xf]  ;;  %v12953_v42 = vor.u32 %v13910_v0, %v12950_v16 }
 0x88b   : > { %9645 = vmatpush.bf16.msrb.mxu2 %v13113_v2  ;;  %v13958_v2 = vld [vmem:[%s14999_s4 + $0x794] sm:$0xf]  ;;  %v13081_v49 = vor.u32 %v13942_v43, %v13078_v32 }
 0x88c   : > { %9659 = vmatpush.bf16.msrb.mxu3 %v13177_v56  ;;  %v13070_v56 = vld [vmem:[%s14999_s4 + $0x708] sm:$0xf0]  ;;  %v13145_v15 = vor.u32 %v13958_v2, %v13142_v21  ;;  %s14595_s4 = scalar_lea.hbm %s18660_s16, 768 }
 0x88d   : > { %v13073_v46 = vor.u32 %v13940_v14, %v13070_v56  ;;  %p14597_p13 = scmp.lt.s32.totalorder %s14595_s4, %s14591_s25 }
 0x88e   : > { %9618 = vmatpush.bf16.msrb.mxu0 %v12977_v52  ;;  %9632 = vmatpush.bf16.msrb.mxu1 %v13041_v5  ;;  %v9388_v57 = vpop.f32.mrf.mxu3  ;;  %v12945_v5 = vor.u32 %v13908_v8, %v12942_v63 }
 0x88f   : > { %9646 = vmatpush.bf16.msrb.mxu2 %v13105_v58  ;;  %v9374_v59 = vpop.f32.mrf.mxu2  ;;  %p14598_p0 = por %p14597_p13, %p14596_p12 }
 0x890   : > { %9660 = vmatpush.bf16.msrb.mxu3 %v13169_v60  ;;  %v9375_v52 = vadd.f32 %v9374_v59, %v9361_v13 }
 0x891   : > { %p14599_p1 = pnand %p14598_p0, %p14594_p11 }
 0x892   : > { %9619 = vmatpush.bf16.msrb.mxu0 %v12969_v38  ;;  %9633 = vmatpush.bf16.msrb.mxu1 %v13033_v29  ;;  %v9389_v58 = vadd.f32 %v9388_v57, %v9375_v52 }
 0x893   : > { %9647 = vmatpush.bf16.msrb.mxu2 %v13097_v6 }
 0x894   : > { %9661 = vmatpush.bf16.msrb.mxu3 %v13161_v27 }
 0x896   : > { %9620 = vmatpush.bf16.msrb.mxu0 %v12961_v51  ;;  %9634 = vmatpush.bf16.msrb.mxu1 %v13025_v18 }
 0x897   : > { %9648 = vmatpush.bf16.msrb.mxu2 %v13089_v47 }
 0x898   : > { %9662 = vmatpush.bf16.msrb.mxu3 %v13153_v33 }
 0x89a   : > { %9621 = vmatpush.bf16.msrb.mxu0 %v12953_v42  ;;  %9635 = vmatpush.bf16.msrb.mxu1 %v13017_v54 }
 0x89b   : > { %9649 = vmatpush.bf16.msrb.mxu2 %v13081_v49 }
 0x89c   : > { %9663 = vmatpush.bf16.msrb.mxu3 %v13145_v15 }
 0x89e   : > { %9622 = vmatpush.bf16.msrb.mxu0 %v12945_v5  ;;  %9636 = vmatpush.bf16.msrb.mxu1 %v13009_v3  ;;  %v9400_v62 = vpop.f32.mrf.mxu0  ;;  %v9414_v60 = vpop.f32.mrf.mxu1 }
 0x89f   : > { %9650 = vmatpush.bf16.msrb.mxu2 %v13073_v46  ;;  %v9401_v10 = vadd.f32 %v9400_v62, %v9387_v31 }
 0x8a0   : > { %9664 = vmatpush.bf16.msrb.mxu3 %v13137_v39 }
 0x8a1   : > { %9623 = vmatmul.bf16.vlgmr.msrb.gmra.mxu0 %v18221_v25  ;;  %9637 = vmatmul.bf16.vlgmr.msrb.gmra.mxu1 %v18217_v7  ;;  %v9415_v38 = vadd.f32 %v9414_v60, %v9401_v10 }
 0x8a2   : > { %9651 = vmatmul.bf16.vlgmr.msrb.gmra.mxu2 %v18267_v20 }
 0x8a3   : > { %9665 = vmatmul.bf16.vlgmr.msrb.gmra.mxu3 %v18292_v4 }
 0x8a6   : > { %v9402_v35 = vpop.f32.mrf.mxu0  ;;  %v9416_v29 = vpop.f32.mrf.mxu1 }
 0x8a7   : > { %v9403_v50 = vadd.f32 %v9402_v35, %v9389_v58 }
 0x8a9   : > { %v9417_v6 = vadd.f32 %v9416_v29, %v9403_v50 }
 0x8b3   : > { %v9428_v17 = vpop.f32.mrf.mxu2 }
 0x8b4   : > { %v9429_v19 = vadd.f32 %v9428_v17, %v9415_v38 }
 0x8bb   : > { %v9430_v30 = vpop.f32.mrf.mxu2 }
 0x8bc   : > { %v9431_v48 = vadd.f32 %v9430_v30, %v9417_v6 }
 0x8be   : > { %v9442_v25 = vpop.f32.mrf.mxu3  ;;  %v9456_v45 = vpop.f32.mrf.mxu0 }
 0x8bf   : > { %v18503_v12 = vadd.f32 %v9442_v25, %v9429_v19  ;;  %v9470_v4 = vpop.f32.mrf.mxu1  ;;  %v9457_v9 = vadd.f32 %v9456_v45, %v17337_v22 }
 0x8c1   : > { %v9471_v26 = vadd.f32 %v9470_v4, %v9457_v9 }
 0x8c6   : > { %v9444_v7 = vpop.f32.mrf.mxu3  ;;  %v9458_v55 = vpop.f32.mrf.mxu0 }
 0x8c7   : > { %v18505_v20 = vadd.f32 %v9444_v7, %v9431_v48  ;;  %v9484_v28 = vpop.f32.mrf.mxu2  ;;  %v9472_v11 = vpop.f32.mrf.mxu1  ;;  %v9459_v41 = vadd.f32 %v9458_v55, %v17343_v34 }
 0x8c8   : > { %v9485_v0 = vadd.f32 %v9484_v28, %v9471_v26 }
 0x8c9   : > { %v9473_v32 = vadd.f32 %v9472_v11, %v9459_v41 }
 0x8ce   : > { %v9498_v61 = vpop.f32.mrf.mxu3 }
 0x8cf   : > { %v9486_v37 = vpop.f32.mrf.mxu2  ;;  %v9499_v13 = vadd.f32 %v9498_v61, %v9485_v0 }
 0x8d0   : > { %v9487_v42 = vadd.f32 %v9486_v37, %v9473_v32 }
 0x8d6   : > { %v9500_v51 = vpop.f32.mrf.mxu3 }
 0x8d7   : > { %v9501_v49 = vadd.f32 %v9500_v51, %v9487_v42 }
 0x8de   : > { %v9512_v27 = vpop.f32.mrf.mxu0  ;;  %v9526_v1 = vpop.f32.mrf.mxu1 }
 0x8df   : > { %v9513_v36 = vadd.f32 %v9512_v27, %v9499_v13 }
 0x8e1   : > { %v9527_v2 = vadd.f32 %v9526_v1, %v9513_v36 }
 0x8e6   : > { %v9514_v18 = vpop.f32.mrf.mxu0  ;;  %v9554_v47 = vpop.f32.mrf.mxu3 }
 0x8e7   : > { %v9540_v31 = vpop.f32.mrf.mxu2  ;;  %v9528_v16 = vpop.f32.mrf.mxu1  ;;  %v9515_v22 = vadd.f32 %v9514_v18, %v9501_v49 }
 0x8e8   : > { %v9541_v8 = vadd.f32 %v9540_v31, %v9527_v2 }
 0x8e9   : > { %v9529_v23 = vadd.f32 %v9528_v16, %v9515_v22 }
 0x8ea   : > { %v9555_v63 = vadd.f32 %v9554_v47, %v9541_v8 }
 0x8ee   : > { %v9556_v21 = vpop.f32.mrf.mxu3 }
 0x8ef   : > { %v9542_v43 = vpop.f32.mrf.mxu2 }
 0x8f0   : > { %v9543_v52 = vadd.f32 %v9542_v43, %v9529_v23 }
 0x8f2   : > { %v9557_v15 = vadd.f32 %v9556_v21, %v9543_v52 }
 0x8fe   : > { %v9568_v33 = vpop.f32.mrf.mxu0  ;;  %v9582_v54 = vpop.f32.mrf.mxu1 }
 0x8ff   : > { %v9569_v59 = vadd.f32 %v9568_v33, %v9555_v63 }
 0x901   : > { %v9583_v34 = vadd.f32 %v9582_v54, %v9569_v59 }
 0x906   : > { %v9570_v14 = vpop.f32.mrf.mxu0  ;;  %v9610_v56 = vpop.f32.mrf.mxu3 }
 0x907   : > { %v9596_v53 = vpop.f32.mrf.mxu2  ;;  %v9584_v57 = vpop.f32.mrf.mxu1  ;;  %v9571_v58 = vadd.f32 %v9570_v14, %v9557_v15 }
 0x908   : > { %v9597_v5 = vadd.f32 %v9596_v53, %v9583_v34 }
 0x909   : > { %v9585_v24 = vadd.f32 %v9584_v57, %v9571_v58 }
 0x90a   : > { %v9611_v46 = vadd.f32 %v9610_v56, %v9597_v5 }
 0x90e   : > { %v9612_v62 = vpop.f32.mrf.mxu3 }
 0x90f   : > { %v9598_v3 = vpop.f32.mrf.mxu2 }
 0x910   : > { %v9599_v60 = vadd.f32 %v9598_v3, %v9585_v24 }
 0x912   : > { %v9613_v50 = vadd.f32 %v9612_v62, %v9599_v60 }
 0x91e   : > { %v9624_v44 = vpop.f32.mrf.mxu0  ;;  %v9638_v10 = vpop.f32.mrf.mxu1 }
 0x91f   : > { %v9625_v39 = vadd.f32 %v9624_v44, %v9611_v46 }
 0x921   : > { %v9639_v38 = vadd.f32 %v9638_v10, %v9625_v39 }
 0x925   : > { %v9652_v35 = vpop.f32.mrf.mxu2 }
 0x926   : > { %v9653_v29 = vadd.f32 %v9652_v35, %v9639_v38  ;;  %v9626_v6 = vpop.f32.mrf.mxu0  ;;  %v9666_v19 = vpop.f32.mrf.mxu3 }
 0x927   : > { %v9627_v17 = vadd.f32 %v9626_v6, %v9613_v50  ;;  %v9640_v48 = vpop.f32.mrf.mxu1 }
 0x928   : > { %v9667_v30 = vadd.f32 %v9666_v19, %v9653_v29 }
 0x929   : > { %v9641_v25 = vadd.f32 %v9640_v48, %v9627_v17 }
 0x92a   : > { %v9674_v7 = vmul.f32 %v17127_v40, %v9667_v30 }
 0x92c   : > { %v9677_v28 = vadd.f32 %v9674_v7, %v18503_v12 }
 0x92d   : > { %v9654_v45 = vpop.f32.mrf.mxu2 }
 0x92e   : > { %v9655_v4 = vadd.f32 %v9654_v45, %v9641_v25  ;;  %9678 = vadd.xlane.f32.xlu2 %v9677_v28  ;;  %v9668_v61 = vpop.f32.mrf.mxu3 }
 0x930   : > { %v9669_v55 = vadd.f32 %v9668_v61, %v9655_v4 }
 0x932   : > { %v9676_v11 = vmul.f32 %v17127_v40, %v9669_v55 }
 0x934   : > { %v9680_v37 = vadd.f32 %v9676_v11, %v18505_v20 }
 0x936   : > { %9681 = vadd.xlane.f32.xlu0 %v9680_v37 }
 0x9a1   : > { %v9679_v27 = vpop.xlane.xlu2 %9678 }
 0x9a2   : > { %v9683_v51 = vmul.f32 0.0052083335, %v9679_v27 }
 0x9a4   : > { %v18514_v1 = vsub.f32 %v18503_v12, %v9683_v51  ;;  %v9686_v9 = vsub.f32 %v9674_v7, %v9683_v51 }
 0x9a6   : > { %v18517_v31 = vmul.f32 %v17127_v40, %v9686_v9  ;;  %v9693_v26 = vmul.f32 %v18514_v1, %v18514_v1 }
 0x9a8   : > { %v9694_v18 = vmul.f32 %v18517_v31, %v18517_v31 }
 0x9a9   : > { %v9682_v47 = vpop.xlane.xlu0 %9681 }
 0x9aa   : > { %v9684_v0 = vmul.f32 0.0052083335, %v9682_v47  ;;  %v9697_v16 = vadd.f32 %v9694_v18, %v9693_v26 }
 0x9ac   : > { %v18524_v41 = vsub.f32 %v18505_v20, %v9684_v0  ;;  %v9688_v12 = vsub.f32 %v9676_v11, %v9684_v0  ;;  %9698 = vadd.xlane.f32.xlu1 %v9697_v16 }
 0x9ae   : > { %v18527_v13 = vmul.f32 %v17127_v40, %v9688_v12  ;;  %v9695_v36 = vmul.f32 %v18524_v41, %v18524_v41 }
 0x9b0   : > { %v9696_v43 = vmul.f32 %v18527_v13, %v18527_v13 }
 0x9b2   : > { %v9700_v32 = vadd.f32 %v9696_v43, %v9695_v36 }
 0x9b4   : > { %9701 = vadd.xlane.f32.xlu2 %v9700_v32 }
 0x9b5   : > { %14602 = shalt.err (!%p14599_p1)
}
 0x9b6   : > { %s14715_s27 = smov 128   ;;  %s14716_s22 = smov 8   ;;  %v9671_v63 = vld [vmem:[%s648_s5] sm:$0x3]  ;;  %v9672_v23 = vld [vmem:[%s658_s15] sm:$0x3] }
 0x9b7   : > { %14002 = dma.vmem_to_hbm [thread:$0]  (%p14834_p8), %s9788_s12, 2048, %s9790_s17, %s9754_s2, %s14715_s27, %s14715_s27, %s14716_s22   ;;  %v9732_v52 = vperm.slane %v9671_v63, 0  ;;  %v9733_v34 = vperm.slane %v9671_v63, 1  ;;  %v9741_v5 = vperm.slane %v9672_v23, 0  ;;  %v9742_v58 = vperm.slane %v9672_v23, 1 }
 0x9b8   : > { %s14717_s30 = smov [#allocation15]   ;;  %s18661_s28 = sld [smem:[#allocation36_spill]] }
 0x9b9   : > { %s9767_s5 = sshll.u32 %s14717_s30, 4  ;;  %s14718_s12 = smov 256   ;;  %s9768_s5 = int_to_ptr.vmem [resolvable:$true] %s9767_s5 }
 0x9ba   : > { %s14719_s14 = smov 16  }
 0x9be   : > { %s9769_s24 = sshll.u32 %s18661_s28, 4  ;;  %s9770_s24 = int_to_ptr.hbm [resolvable:$true] %s9769_s24 }
 0xa1f   : > { %v9699_v40 = vpop.xlane.xlu1 %9698 }
 0xa20   : > { %v9703_v20 = vmul.f32 0.0052083335, %v9699_v40 }
 0xa22   : > { %v9705_v33 = vadd.f32 1e-05, %v9703_v20 }
 0xa24   : > { %14267 = vrsqrt.f32 %v9705_v33  ;;  %vm9713_vm0 = vweird.f32 %v9705_v33 }
 0xa27   : > { %v9702_v42 = vpop.xlane.xlu2 %9701 }
 0xa28   : > { %v9704_v2 = vmul.f32 0.0052083335, %v9702_v42 }
 0xa2a   : > { %v14268_v21 = vpop.eup %14267  ;;  %v9706_v54 = vadd.f32 1e-05, %v9704_v2 }
 0xa2b   : > { %v9708_v49 = vmul.f32 %v14268_v21, %v9705_v33  ;;  %vm9714_vm15 = vweird.f32 %v14268_v21 }
 0xa2c   : > { %14269 = vrsqrt.f32 %v9706_v54  ;;  %vm9715_vm1 = vmor %vm9713_vm0, %vm9714_vm15  ;;  %vm9723_vm3 = vweird.f32 %v9706_v54 }
 0xa2d   : > { %v9709_v8 = vmul.f32 %v14268_v21, %v9708_v49 }
 0xa2f   : > { %v9710_v22 = vmul.f32 0.5, %v9709_v8 }
 0xa31   : > { %v9711_v53 = vsub.f32 1.5, %v9710_v22 }
 0xa32   : > { %v14270_v59 = vpop.eup %14269 }
 0xa33   : > { %v9712_v14 = vmul.f32 %v14268_v21, %v9711_v53  ;;  %v9718_v56 = vmul.f32 %v14270_v59, %v9706_v54  ;;  %vm9724_vm2 = vweird.f32 %v14270_v59 }
 0xa34   : > { %vm9725_vm4 = vmor %vm9723_vm3, %vm9724_vm2 }
 0xa35   : > { %v9716_v57 = vsel %vm9715_vm1, %v14268_v21, %v9712_v14  ;;  %v9719_v15 = vmul.f32 %v14270_v59, %v9718_v56 }
 0xa36   : > { %v9727_v3 = vmul.f32 %v9716_v57, %v18514_v1  ;;  %v9728_v46 = vmul.f32 %v9716_v57, %v18517_v31 }
 0xa37   : > { %v9720_v44 = vmul.f32 0.5, %v9719_v15 }
 0xa38   : > { %v9736_v24 = vmul.f32 %v9732_v52, %v9727_v3  ;;  %v9737_v39 = vmul.f32 %v9733_v34, %v9728_v46 }
 0xa39   : > { %v9721_v62 = vsub.f32 1.5, %v9720_v44 }
 0xa3a   : > { %v9745_v10 = vadd.f32 %v9741_v5, %v9736_v24  ;;  %v9746_v60 = vadd.f32 %v9742_v58, %v9737_v39 }
 0xa3b   : > { %v9722_v38 = vmul.f32 %v14270_v59, %v9721_v62 }
 0xa3c   : > { %9749 = vst [vmem:[#allocation15] sm:$0xff] %v9745_v10 }
 0xa3d   : > { %9750 = vst [vmem:[#allocation15 + $0x8] sm:$0xff] %v9746_v60  ;;  %v9726_v35 = vsel %vm9725_vm4, %v14270_v59, %v9722_v38 }
 0xa3e   : > { %v9729_v50 = vmul.f32 %v9726_v35, %v18524_v41  ;;  %v9730_v29 = vmul.f32 %v9726_v35, %v18527_v13 }
 0xa40   : > { %v9738_v6 = vmul.f32 %v9732_v52, %v9729_v50  ;;  %v9739_v17 = vmul.f32 %v9733_v34, %v9730_v29 }
 0xa42   : > { %v9747_v19 = vadd.f32 %v9741_v5, %v9738_v6  ;;  %v9748_v30 = vadd.f32 %v9742_v58, %v9739_v17 }
 0xa44   : > { %9751 = vst [vmem:[#allocation15 + $0x10] sm:$0xff] %v9747_v19 }
 0xa45   : > { %9752 = vst [vmem:[#allocation15 + $0x18] sm:$0xff] %v9748_v30 }
 0xa46   : > { %14001 = dma.vmem_to_hbm [thread:$0]  (%p346_p4), %s9768_s5, 512, %s9770_s24, [#allocation4], %s14718_s12, %s14718_s12, %s14719_s14  }
 0xa47   : > { %14668 = dma.done.wait (%p346_p4), [#allocation4], 512  }
 0xa48   : > { %14670 = vsyncadd (%p346_p4), [#allocation4], 4294966784 }
 0xa49 PF: > { %s18662_s11 = sld [smem:[#allocation25_spill]] }
 0xa4a   : > { %s18663_s26 = sld [smem:[#allocation23_spill]] }
 0xa4f   : > { %p14049_p8 = scmp.ge.s32.totalorder %s18662_s11, 2 }
 0xa50   : > { %s9809_s2 = sand.u32 1, %s18663_s26  }
 0xa51   : > { %p14039_p2 = pnand %p14049_p8, %p14838_p9  ;;  %s9810_s13 = scalar_lea.sflag [#allocation17], %s9809_s2 }
 0xa53   : > { %p14040_p6 = pneg %p14039_p2 }
 0xa55   : > { %14672 = dma.done.wait (%p14040_p6), %s9810_s13, 2048  }
 0xa56   : > { %14674 = vsyncadd (%p14040_p6), %s9810_s13, 4294965248  ;;  %s28_s22 = sadd.s32 1, %s18662_s11   ;;  %s18665_s25 = sld [smem:[#allocation30_spill]] }
 0xa57   : > { %p25_p5 = scmp.ge.s32.totalorder %s28_s22, 8   ;;  %s18666_s23 = sld [smem:[#allocation29_spill]] }
 0xa58   : > { %s18667_s17 = smov %s14681_s18  ;;  %s18668_s18 = smov %s14685_s19 }
 0xa59   : > { %s18670_s20 = smov %s14693_s21  ;;  %27 = sbr.rel (!%p25_p5) target bundleno = 15 (0xf), region = 205 }
 0xa5c   : > { %s18669_s19 = smov %s18665_s25 }
 0xa5d   : > { %s18671_s21 = smov %s18666_s23 }
 0xa5e   :  { %9816 = vsyncpa [#allocation3], 1 }
 0xa5f   :  { %9818 = vsyncpa [#allocation3 + $0x1], 1 }
 0xa60   :  { %9819 = vsyncpa [#allocation6], 1 }
 0xa61   :  { %9820 = vsyncpa [#allocation4], 1 }
 0xa62   :  { %9822 = vsyncpa [#allocation4 + $0x1], 1 }
 0xa63   :  { %9823 = vsyncpa [#allocation17], 1 }
 0xa64   :  { %9825 = vsyncpa [#allocation17 + $0x1], 1 }

</bundles_post_ra>
